<compile_context>
chip_gen: v5e
topology: v5e:2x2
jax: 0.10.0
libtpu: 0.0.40
codegen_flags: <defaults>
</compile_context>

<pallas_src>
import functools

import numpy as np
import jax
import jax.numpy as jnp
from jax import lax
from jax.experimental import pallas as pl
from jax.experimental.pallas import tpu as pltpu

EPS = 1e-5
LANE = 128


def _round_up(x, m):
    return (x + m - 1) // m * m


# ---------------------------------------------------------------------------
# One-time hardware probes (run eagerly, outside jit).
# ---------------------------------------------------------------------------
_PROBE_CACHE = {}


def _roll_mode():
    """Returns ('roll', matches_np_convention) if pltpu.roll works on the
    sublane axis of a 3-D tile, else ('slice', True) for a slice fallback."""
    if "roll" in _PROBE_CACHE:
        return _PROBE_CACHE["roll"]

    def kern(x_ref, o_ref):
        o_ref[...] = pltpu.roll(x_ref[...], 1, 1)

    x_np = np.arange(8 * 16 * 128, dtype=np.float32).reshape(8, 16, 128)
    try:
        y = pl.pallas_call(
            kern, out_shape=jax.ShapeDtypeStruct((8, 16, 128), jnp.float32)
        )(jnp.asarray(x_np))
        y = np.asarray(jax.device_get(y))
        if np.array_equal(y[:, 1, :], x_np[:, 0, :]):
            mode = ("roll", True)      # out[c] = in[c - shift]  (np.roll style)
        elif np.array_equal(y[:, 0, :], x_np[:, 1, :]):
            mode = ("roll", False)     # opposite convention
        else:
            mode = ("slice", True)
    except Exception:
        mode = ("slice", True)
    _PROBE_CACHE["roll"] = mode
    return mode


def _vmem_capacity():
    if "vmem" in _PROBE_CACHE:
        return _PROBE_CACHE["vmem"]
    try:
        cap = int(pltpu.get_tpu_info().vmem_capacity_bytes)
    except Exception:
        cap = 64 * 1024 * 1024          # conservative: v7x per-core VMEM
    _PROBE_CACHE["vmem"] = cap
    return cap


# ---------------------------------------------------------------------------
# In-kernel helpers.
# ---------------------------------------------------------------------------
def _shift_cols(x, delta, mode):
    """out[:, c, :] = x[:, c + delta, :] for delta in {-1, +1}.  Wrapped /
    edge columns pull from the zero halo columns, so they stay zero."""
    kind, np_conv = mode
    wp = x.shape[1]
    if kind == "roll":
        shift = (-delta) % wp if np_conv else delta % wp
        return pltpu.roll(x, shift, 1)
    # Fallback: unaligned slice + concat (correct, costs a relayout copy).
    if delta == 1:
        return jnp.concatenate([x[:, 1:, :], jnp.zeros_like(x[:, :1, :])], axis=1)
    return jnp.concatenate([jnp.zeros_like(x[:, :1, :]), x[:, :-1, :]], axis=1)


def _conv3x3(src_ref, w_ref, *, th, wp, mode):
    """3x3 conv over an assembled (th+2, wp, c_in) bf16 strip whose halo
    columns are zero.  w_ref: (3, 3*c_in, c_out).  Returns (th*wp, c_out) f32.
    K is widened to 3*c_in (one MXU dot per kernel row)."""
    c_in = src_ref.shape[-1]
    acc = None
    for ky in range(3):
        mid = src_ref[ky:ky + th]            # aligned slice along the outer axis
        left = _shift_cols(mid, -1, mode)    # kx = 0 tap (col - 1)
        right = _shift_cols(mid, +1, mode)   # kx = 2 tap (col + 1)
        op = jnp.concatenate([left, mid, right], axis=-1)     # (th, wp, 3*c_in)
        op = op.reshape(th * wp, 3 * c_in)   # wp % 8 == 0 -> layout-preserving
        p = jnp.dot(op, w_ref[ky], preferred_element_type=jnp.float32)
        acc = p if acc is None else acc + p
    return acc


def _finalize(acc, y_ref, st_ref, *, th, wp, w_real):
    """Mask dead columns, store bf16 tile and per-tile (sum, sumsq) stats."""
    cp = y_ref.shape[-1]
    acc = acc.reshape(th, wp, cp)
    col = lax.broadcasted_iota(jnp.int32, (1, wp, 1), 1)
    colmask = ((col >= 1) & (col <= w_real)).astype(jnp.float32)
    acc = acc * colmask
    y_ref[...] = acc.reshape(1, th, wp, cp).astype(y_ref.dtype)
    su = jnp.sum(acc, axis=(0, 1)).reshape(1, cp)
    sq = jnp.sum(acc * acc, axis=(0, 1)).reshape(1, cp)
    st_ref[...] = jnp.concatenate([su, sq], axis=0).reshape(1, 1, 2, cp)


# ---------------------------------------------------------------------------
# Pass 1: conv1 (3x3, pad=1) + per-tile BN1 partial stats.
# ---------------------------------------------------------------------------
def _conv1_kernel(xm_ref, xa_ref, xb_ref, w_ref, y_ref, st_ref, x_scr,
                  *, th, wp, w_real, mode):
    # Assemble the (th+2, wp, cin) strip: main rows + 2 trailing halo rows.
    # TODO(synk): the main-row copy is one bf16 VMEM round trip per step; the
    # halo-spill alternative needs per-tap f32 accumulator RMW in VMEM which
    # costs more, so the single assembly copy is kept deliberately.
    x_scr[0:th] = xm_ref[0]
    x_scr[th:th + 1] = xa_ref[0]
    x_scr[th + 1:th + 2] = xb_ref[0]
    acc = _conv3x3(x_scr, w_ref, th=th, wp=wp, mode=mode)
    _finalize(acc, y_ref, st_ref, th=th, wp=wp, w_real=w_real)


# ---------------------------------------------------------------------------
# Pass 2: BN1 affine + ReLU, conv2 (3x3, pad=1), per-tile BN2 partial stats.
# ---------------------------------------------------------------------------
def _conv2_kernel(ym_ref, yt_ref, yb_ref, sc_ref, sh_ref, w_ref,
                  y_ref, st_ref, a_scr, *, th, wp, w_real, mode):
    j = pl.program_id(1)
    ns = pl.num_programs(1)
    cp = a_scr.shape[-1]

    sc = sc_ref[...].reshape(1, 1, cp)
    sh = sh_ref[...].reshape(1, 1, cp)
    col = lax.broadcasted_iota(jnp.int32, (1, wp, 1), 1)
    colmask = ((col >= 1) & (col <= w_real)).astype(jnp.float32)

    def act(v):   # BN1 affine + ReLU (f32 math); dead/halo columns back to 0.
        z = jnp.maximum(v.astype(jnp.float32) * sc + sh, 0.0) * colmask
        return z.astype(jnp.bfloat16)

    a_scr[1:th + 1] = act(ym_ref[0])

    @pl.when(j == 0)
    def _():
        a_scr[0:1] = jnp.zeros((1, wp, cp), jnp.bfloat16)

    @pl.when(j > 0)
    def _():
        a_scr[0:1] = act(yt_ref[0])

    @pl.when(j == ns - 1)
    def _():
        a_scr[th + 1:th + 2] = jnp.zeros((1, wp, cp), jnp.bfloat16)

    @pl.when(j < ns - 1)
    def _():
        a_scr[th + 1:th + 2] = act(yb_ref[0])

    acc = _conv3x3(a_scr, w_ref, th=th, wp=wp, mode=mode)
    _finalize(acc, y_ref, st_ref, th=th, wp=wp, w_real=w_real)


# ---------------------------------------------------------------------------
# Pass 3: BN2 affine + ReLU (lane-dense elementwise).
# ---------------------------------------------------------------------------
def _bn_relu_kernel(y_ref, sc_ref, sh_ref, o_ref):
    cp = o_ref.shape[-1]
    sc = sc_ref[...].reshape(1, 1, 1, cp)
    sh = sh_ref[...].reshape(1, 1, 1, cp)
    o_ref[...] = jnp.maximum(y_ref[...].astype(jnp.float32) * sc + sh, 0.0)


# ---------------------------------------------------------------------------
# Tiling / wrapper.
# ---------------------------------------------------------------------------
def _pick_th(h, w, wp, cin_p, cout_p, budget):
    """Largest divisor of H whose per-step VMEM footprint fits the budget,
    preferring M = TH*W <= 2048."""
    cmax = max(cin_p, cout_p)

    def step_bytes(th):
        tile_in = th * wp * cin_p * 2
        tile_out = th * wp * cout_p * 2
        halo = 4 * wp * cmax * 2
        scratch = (th + 2) * wp * cmax * 2
        temps = 5 * th * wp * cmax * 2 + 2 * th * wp * cout_p * 4
        weights = 2 * 3 * 3 * cmax * cout_p * 2
        return 2 * (tile_in + tile_out + halo) + scratch + temps + weights

    # TODO(synk): no ragged-strip masking path; TH must divide H exactly.
    divs = [d for d in range(1, h + 1) if h % d == 0]
    fit = [d for d in divs if step_bytes(d) <= budget]
    if not fit:
        return 1
    good = [d for d in fit if d * w <= 2048]
    return max(good) if good else min(fit)


def _bn_scale_shift(stats, gamma_p, beta_p, count):
    """Fold per-tile (sum, sumsq) into per-channel BN scale/shift (training).
    TODO(synk): E[x^2]-E[x]^2 in f32 can cancel for large-mean activations."""
    tot = jnp.sum(stats, axis=(0, 1))                  # (2, Cp)
    mean = tot[0] / count
    var = jnp.maximum(tot[1] / count - mean * mean, 0.0)
    scale = gamma_p * jax.lax.rsqrt(var + EPS)
    shift = beta_p - mean * scale
    return scale.reshape(1, -1), shift.reshape(1, -1)


@functools.partial(jax.jit, static_argnums=(2, 3))
def _double_conv_impl(x_nchw, params, mode, vmem_cap):
    w1, b1, g1, be1, w2, b2, g2, be2 = params
    del b1, b2   # conv bias cancels exactly under training-mode BatchNorm

    n, cin, h, w = x_nchw.shape
    cout = w1.shape[0]
    cinp = _round_up(cin, LANE)
    cp = _round_up(cout, LANE)
    wp = _round_up(w + 2, 8)        # 1 zero halo column each side + alignment

    budget = int(vmem_cap * 0.5)
    th = _pick_th(h, w, wp, cinp, cp, budget)
    ns = h // th
    cnt = float(n * h * w)

    # ---- layout glue (HBM): NCHW -> NHWC, halo/channel pad, bf16 cast ------
    # TODO(synk): fold this pad/cast and the final unpad/transpose into
    # pass 1 / pass 3 once a layout-aware NCHW BlockSpec path is in place
    # (only worthwhile when W/Cout are lane-dense multiples of 128).
    x = jnp.transpose(x_nchw, (0, 2, 3, 1))
    xpad = jnp.pad(
        x, ((0, 0), (1, 1), (1, wp - w - 1), (0, cinp - cin))
    ).astype(jnp.bfloat16)

    def prep_w(wt, ci, ci_p):
        wt = jnp.transpose(wt, (2, 3, 1, 0))            # (3, 3, ci, cout)
        wt = jnp.pad(wt, ((0, 0), (0, 0), (0, ci_p - ci), (0, cp - cout)))
        return wt.astype(jnp.bfloat16).reshape(3, 3 * ci_p, cp)

    w1k = prep_w(w1, cin, cinp)
    w2k = prep_w(w2, cout, cp)
    g1p = jnp.pad(g1.astype(jnp.float32), (0, cp - cout))
    be1p = jnp.pad(be1.astype(jnp.float32), (0, cp - cout))
    g2p = jnp.pad(g2.astype(jnp.float32), (0, cp - cout))
    be2p = jnp.pad(be2.astype(jnp.float32), (0, cp - cout))

    cparams = pltpu.CompilerParams(
        dimension_semantics=("parallel", "parallel"),
        vmem_limit_bytes=min(int(vmem_cap * 0.85), 112 * 1024 * 1024))

    def full(shape):
        return pl.BlockSpec(shape, lambda i, j: (0,) * len(shape))

    # ---- Pass 1: conv1 + BN1 partial statistics -----------------------------
    # TODO(synk): if xprof still shows exposed DMA at large TH, bump the main
    # input spec to pipeline_mode=pl.Buffered(3).
    k1 = functools.partial(_conv1_kernel, th=th, wp=wp, w_real=w, mode=mode)
    y1, st1 = pl.pallas_call(
        k1,
        grid=(n, ns),
        in_specs=[
            pl.BlockSpec((1, th, wp, cinp), lambda i, j: (i, j, 0, 0)),
            pl.BlockSpec((1, 1, wp, cinp), lambda i, j: (i, (j + 1) * th, 0, 0)),
            pl.BlockSpec((1, 1, wp, cinp),
                         lambda i, j: (i, (j + 1) * th + 1, 0, 0)),
            full((3, 3 * cinp, cp)),
        ],
        out_specs=[
            pl.BlockSpec((1, th, wp, cp), lambda i, j: (i, j, 0, 0)),
            pl.BlockSpec((1, 1, 2, cp), lambda i, j: (i, j, 0, 0)),
        ],
        out_shape=[
            jax.ShapeDtypeStruct((n, h, wp, cp), jnp.bfloat16),
            jax.ShapeDtypeStruct((n, ns, 2, cp), jnp.float32),
        ],
        scratch_shapes=[pltpu.VMEM((th + 2, wp, cinp), jnp.bfloat16)],
        compiler_params=cparams,
    )(xpad, xpad, xpad, w1k)

    sc1, sh1 = _bn_scale_shift(st1, g1p, be1p, cnt)

    # ---- Pass 2: BN1 + ReLU -> conv2 + BN2 partial statistics ---------------
    k2 = functools.partial(_conv2_kernel, th=th, wp=wp, w_real=w, mode=mode)
    y2, st2 = pl.pallas_call(
        k2,
        grid=(n, ns),
        in_specs=[
            pl.BlockSpec((1, th, wp, cp), lambda i, j: (i, j, 0, 0)),
            pl.BlockSpec((1, 1, wp, cp),
                         lambda i, j: (i, jnp.maximum(j * th - 1, 0), 0, 0)),
            pl.BlockSpec((1, 1, wp, cp),
                         lambda i, j: (i, jnp.minimum((j + 1) * th, h - 1), 0, 0)),
            full((1, cp)),
            full((1, cp)),
            full((3, 3 * cp, cp)),
        ],
        out_specs=[
            pl.BlockSpec((1, th, wp, cp), lambda i, j: (i, j, 0, 0)),
            pl.BlockSpec((1, 1, 2, cp), lambda i, j: (i, j, 0, 0)),
        ],
        out_shape=[
            jax.ShapeDtypeStruct((n, h, wp, cp), jnp.bfloat16),
            jax.ShapeDtypeStruct((n, ns, 2, cp), jnp.float32),
        ],
        scratch_shapes=[pltpu.VMEM((th + 2, wp, cp), jnp.bfloat16)],
        compiler_params=cparams,
    )(y1, y1, y1, sc1, sh1, w2k)

    sc2, sh2 = _bn_scale_shift(st2, g2p, be2p, cnt)

    # ---- Pass 3: BN2 + ReLU --------------------------------------------------
    out = pl.pallas_call(
        _bn_relu_kernel,
        grid=(n, ns),
        in_specs=[
            pl.BlockSpec((1, th, wp, cp), lambda i, j: (i, j, 0, 0)),
            full((1, cp)),
            full((1, cp)),
        ],
        out_specs=pl.BlockSpec((1, th, wp, cp), lambda i, j: (i, j, 0, 0)),
        out_shape=jax.ShapeDtypeStruct((n, h, wp, cp), jnp.float32),
        compiler_params=cparams,
    )(y2, sc2, sh2)

    # Drop halo/pad columns and channel padding, back to NCHW (wrapper glue).
    return jnp.transpose(out[:, :, 1:w + 1, :cout], (0, 3, 1, 2))


def double_conv(x_nchw, params):
    """DoubleConv forward. x_nchw: (N, Cin, H, W) f32 -> (N, Cout, H, W) f32."""
    return _double_conv_impl(x_nchw, params, _roll_mode(), _vmem_capacity())


# ---------------------------------------------------------------------------
# Plain-JAX reference (PyTorch training-mode forward) + test harness.
# ---------------------------------------------------------------------------
def ref_double_conv(x, params):
    w1, b1, g1, be1, w2, b2, g2, be2 = params

    def conv(x, w, b):
        y = jax.lax.conv_general_dilated(
            x, w, window_strides=(1, 1), padding=((1, 1), (1, 1)),
            dimension_numbers=("NCHW", "OIHW", "NCHW"))
        return y + b[None, :, None, None]

    def bn_relu(y, g, be):
        mean = y.mean(axis=(0, 2, 3), keepdims=True)
        var = ((y - mean) ** 2).mean(axis=(0, 2, 3), keepdims=True)
        z = (y - mean) * jax.lax.rsqrt(var + EPS)
        z = z * g[None, :, None, None] + be[None, :, None, None]
        return jnp.maximum(z, 0.0)

    y = bn_relu(conv(x, w1, b1), g1, be1)
    return bn_relu(conv(y, w2, b2), g2, be2)


def init_params(key, in_ch, out_ch):
    k1, k2, k3, k4 = jax.random.split(key, 4)
    w1 = 0.1 * jax.random.normal(k1, (out_ch, in_ch, 3, 3), jnp.float32)
    b1 = 0.1 * jax.random.normal(k2, (out_ch,), jnp.float32)
    w2 = 0.1 * jax.random.normal(k3, (out_ch, out_ch, 3, 3), jnp.float32)
    b2 = 0.1 * jax.random.normal(k4, (out_ch,), jnp.float32)
    g1 = jnp.ones((out_ch,), jnp.float32)
    be1 = jnp.zeros((out_ch,), jnp.float32)
    g2 = jnp.ones((out_ch,), jnp.float32)
    be2 = jnp.zeros((out_ch,), jnp.float32)
    return (w1, b1, g1, be1, w2, b2, g2, be2)


if __name__ == "__main__":
    key = jax.random.PRNGKey(0)
    kx, kp = jax.random.split(key)

    N, in_ch, out_ch, H, W = 2, 4, 8, 16, 16
    x = jax.random.normal(kx, (N, in_ch, H, W), jnp.float32)
    params = init_params(kp, in_ch, out_ch)

    out = jax.block_until_ready(double_conv(x, params))
    ref = jax.block_until_ready(ref_double_conv(x, params))

    assert out.shape == (N, out_ch, H, W)
    err = float(jnp.max(jnp.abs(out - ref)))
    # bf16 MXU operands + bf16 intermediates (f32 accumulation / BN math).
    assert jnp.allclose(out, ref, atol=4e-2, rtol=4e-2), err

    print("KERNEL_OK")
</pallas_src>

<mosaic_0001>
module attributes {stable_mosaic.version = 11 : i64} {
  func.func @kern(%arg0: memref<8x16x128xf32, #tpu.memory_space<vmem>>, %arg1: memref<8x16x128xf32, #tpu.memory_space<vmem>>) attributes {dimension_semantics = [], scalar_prefetch = 0 : i64, scratch_operands = 0 : i64, tpu.core_type = #tpu.core_type<tc>} {
    %c0 = arith.constant 0 : index
    %c0_0 = arith.constant 0 : index
    %c0_1 = arith.constant 0 : index
    %0 = vector.load %arg0[%c0, %c0_0, %c0_1] : memref<8x16x128xf32, #tpu.memory_space<vmem>>, vector<8x16x128xf32>
    %c1_i32 = arith.constant 1 : i32
    %1 = tpu.dynamic_rotate %0 by %c1_i32 dim 1 : vector<8x16x128xf32>, i32 -> vector<8x16x128xf32>
    %c0_2 = arith.constant 0 : index
    %c0_3 = arith.constant 0 : index
    %c0_4 = arith.constant 0 : index
    %2 = vector.load %arg1[%c0_2, %c0_3, %c0_4] : memref<8x16x128xf32, #tpu.memory_space<vmem>>, vector<8x16x128xf32>
    tpu.vector_store %arg1[%c0_2, %c0_3, %c0_4], %1 {strides = array<i32>} : memref<8x16x128xf32, #tpu.memory_space<vmem>>, vector<8x16x128xf32>,
    return
  }
}

module attributes {stable_mosaic.version = 11 : i64} {
  func.func @_conv1_kernel(%arg0: i32, %arg1: i32, %arg2: memref<1x16x24x128xbf16, #tpu.memory_space<vmem>>, %arg3: memref<1x1x24x128xbf16, #tpu.memory_space<vmem>>, %arg4: memref<1x1x24x128xbf16, #tpu.memory_space<vmem>>, %arg5: memref<3x384x128xbf16, #tpu.memory_space<vmem>>, %arg6: memref<1x16x24x128xbf16, #tpu.memory_space<vmem>>, %arg7: memref<1x1x2x128xf32, #tpu.memory_space<vmem>>, %arg8: memref<18x24x128xbf16, #tpu.memory_space<vmem>>) attributes {dimension_semantics = [#tpu.dimension_semantics<parallel>, #tpu.dimension_semantics<parallel>], iteration_bounds = array<i64: 2, 1>, scalar_prefetch = 0 : i64, scratch_operands = 1 : i64, tpu.core_type = #tpu.core_type<tc>, window_params = [{transform_indices = @transform_0, window_bounds = array<i64: 1, 16, 24, 128>}, {transform_indices = @transform_1, window_bounds = array<i64: 1, 1, 24, 128>}, {transform_indices = @transform_2, window_bounds = array<i64: 1, 1, 24, 128>}, {pipeline_mode = #tpu.pipeline_mode<synchronous>, transform_indices = @transform_3, window_bounds = array<i64: 3, 384, 128>}, {transform_indices = @transform_4, window_bounds = array<i64: 1, 16, 24, 128>}, {transform_indices = @transform_5, window_bounds = array<i64: 1, 1, 2, 128>}]} {
    %c0 = arith.constant 0 : index
    %c0_0 = arith.constant 0 : index
    %c0_1 = arith.constant 0 : index
    %c0_2 = arith.constant 0 : index
    %0 = vector.load %arg2[%c0, %c0_0, %c0_1, %c0_2] : memref<1x16x24x128xbf16, #tpu.memory_space<vmem>>, vector<1x16x24x128xbf16>
    %1 = vector.shape_cast %0 : vector<1x16x24x128xbf16> to vector<16x24x128xbf16>
    %c0_3 = arith.constant 0 : index
    %c0_4 = arith.constant 0 : index
    %c0_5 = arith.constant 0 : index
    %2 = vector.load %arg8[%c0_3, %c0_4, %c0_5] : memref<18x24x128xbf16, #tpu.memory_space<vmem>>, vector<16x24x128xbf16>
    tpu.vector_store %arg8[%c0_3, %c0_4, %c0_5], %1 {strides = array<i32>} : memref<18x24x128xbf16, #tpu.memory_space<vmem>>, vector<16x24x128xbf16>,
    %c0_6 = arith.constant 0 : index
    %c0_7 = arith.constant 0 : index
    %c0_8 = arith.constant 0 : index
    %c0_9 = arith.constant 0 : index
    %3 = vector.load %arg3[%c0_6, %c0_7, %c0_8, %c0_9] : memref<1x1x24x128xbf16, #tpu.memory_space<vmem>>, vector<1x1x24x128xbf16>
    %4 = vector.shape_cast %3 : vector<1x1x24x128xbf16> to vector<1x24x128xbf16>
    %c16 = arith.constant 16 : index
    %c0_10 = arith.constant 0 : index
    %c0_11 = arith.constant 0 : index
    %5 = vector.load %arg8[%c16, %c0_10, %c0_11] : memref<18x24x128xbf16, #tpu.memory_space<vmem>>, vector<1x24x128xbf16>
    tpu.vector_store %arg8[%c16, %c0_10, %c0_11], %4 {strides = array<i32>} : memref<18x24x128xbf16, #tpu.memory_space<vmem>>, vector<1x24x128xbf16>,
    %c0_12 = arith.constant 0 : index
    %c0_13 = arith.constant 0 : index
    %c0_14 = arith.constant 0 : index
    %c0_15 = arith.constant 0 : index
    %6 = vector.load %arg4[%c0_12, %c0_13, %c0_14, %c0_15] : memref<1x1x24x128xbf16, #tpu.memory_space<vmem>>, vector<1x1x24x128xbf16>
    %7 = vector.shape_cast %6 : vector<1x1x24x128xbf16> to vector<1x24x128xbf16>
    %c17 = arith.constant 17 : index
    %c0_16 = arith.constant 0 : index
    %c0_17 = arith.constant 0 : index
    %8 = vector.load %arg8[%c17, %c0_16, %c0_17] : memref<18x24x128xbf16, #tpu.memory_space<vmem>>, vector<1x24x128xbf16>
    tpu.vector_store %arg8[%c17, %c0_16, %c0_17], %7 {strides = array<i32>} : memref<18x24x128xbf16, #tpu.memory_space<vmem>>, vector<1x24x128xbf16>,
    %c0_18 = arith.constant 0 : index
    %c0_19 = arith.constant 0 : index
    %c0_20 = arith.constant 0 : index
    %9 = vector.load %arg8[%c0_18, %c0_19, %c0_20] : memref<18x24x128xbf16, #tpu.memory_space<vmem>>, vector<16x24x128xbf16>
    %cst = arith.constant 0.000000e+00 : bf16
    %10 = vector.broadcast %cst : bf16 to vector<16x1x128xbf16>
    %11 = vector.extract_strided_slice %9 {offsets = [0, 0, 0], sizes = [16, 23, 128], strides = [1, 1, 1]} : vector<16x24x128xbf16> to vector<16x23x128xbf16>
    %12 = tpu.concatenate %10, %11 in 1 : vector<16x1x128xbf16>, vector<16x23x128xbf16> -> vector<16x24x128xbf16>
    %13 = vector.extract_strided_slice %9 {offsets = [0, 1, 0], sizes = [16, 23, 128], strides = [1, 1, 1]} : vector<16x24x128xbf16> to vector<16x23x128xbf16>
    %cst_21 = arith.constant 0.000000e+00 : bf16
    %14 = vector.broadcast %cst_21 : bf16 to vector<16x1x128xbf16>
    %15 = tpu.concatenate %13, %14 in 1 : vector<16x23x128xbf16>, vector<16x1x128xbf16> -> vector<16x24x128xbf16>
    %16 = tpu.concatenate %12, %9, %15 in 2 : vector<16x24x128xbf16>, vector<16x24x128xbf16>, vector<16x24x128xbf16> -> vector<16x24x384xbf16>
    %17 = vector.shape_cast %16 : vector<16x24x384xbf16> to vector<384x384xbf16>
    %c0_22 = arith.constant 0 : index
    %c0_23 = arith.constant 0 : index
    %c0_24 = arith.constant 0 : index
    %18 = vector.load %arg5[%c0_22, %c0_23, %c0_24] : memref<3x384x128xbf16, #tpu.memory_space<vmem>>, vector<1x384x128xbf16>
    %19 = vector.shape_cast %18 : vector<1x384x128xbf16> to vector<384x128xbf16>
    %cst_25 = arith.constant dense<0.000000e+00> : vector<384x128xf32>
    %20 = tpu.matmul %17, %19, %cst_25 {dimension_numbers = #tpu.dot_dimension_numbers<[1], [0], [0], [1], [0, 0, 1, 1], [], []>} : vector<384x384xbf16>, vector<384x128xbf16>, vector<384x128xf32> -> vector<384x128xf32>
    %c1 = arith.constant 1 : index
    %c0_26 = arith.constant 0 : index
    %c0_27 = arith.constant 0 : index
    %21 = vector.load %arg8[%c1, %c0_26, %c0_27] : memref<18x24x128xbf16, #tpu.memory_space<vmem>>, vector<16x24x128xbf16>
    %cst_28 = arith.constant 0.000000e+00 : bf16
    %22 = vector.broadcast %cst_28 : bf16 to vector<16x1x128xbf16>
    %23 = vector.extract_strided_slice %21 {offsets = [0, 0, 0], sizes = [16, 23, 128], strides = [1, 1, 1]} : vector<16x24x128xbf16> to vector<16x23x128xbf16>
    %24 = tpu.concatenate %22, %23 in 1 : vector<16x1x128xbf16>, vector<16x23x128xbf16> -> vector<16x24x128xbf16>
    %25 = vector.extract_strided_slice %21 {offsets = [0, 1, 0], sizes = [16, 23, 128], strides = [1, 1, 1]} : vector<16x24x128xbf16> to vector<16x23x128xbf16>
    %cst_29 = arith.constant 0.000000e+00 : bf16
    %26 = vector.broadcast %cst_29 : bf16 to vector<16x1x128xbf16>
    %27 = tpu.concatenate %25, %26 in 1 : vector<16x23x128xbf16>, vector<16x1x128xbf16> -> vector<16x24x128xbf16>
    %28 = tpu.concatenate %24, %21, %27 in 2 : vector<16x24x128xbf16>, vector<16x24x128xbf16>, vector<16x24x128xbf16> -> vector<16x24x384xbf16>
    %29 = vector.shape_cast %28 : vector<16x24x384xbf16> to vector<384x384xbf16>
    %c1_30 = arith.constant 1 : index
    %c0_31 = arith.constant 0 : index
    %c0_32 = arith.constant 0 : index
    %30 = vector.load %arg5[%c1_30, %c0_31, %c0_32] : memref<3x384x128xbf16, #tpu.memory_space<vmem>>, vector<1x384x128xbf16>
    %31 = vector.shape_cast %30 : vector<1x384x128xbf16> to vector<384x128xbf16>
    %cst_33 = arith.constant dense<0.000000e+00> : vector<384x128xf32>
    %32 = tpu.matmul %29, %31, %cst_33 {dimension_numbers = #tpu.dot_dimension_numbers<[1], [0], [0], [1], [0, 0, 1, 1], [], []>} : vector<384x384xbf16>, vector<384x128xbf16>, vector<384x128xf32> -> vector<384x128xf32>
    %33 = arith.addf %20, %32 : vector<384x128xf32>
    %c2 = arith.constant 2 : index
    %c0_34 = arith.constant 0 : index
    %c0_35 = arith.constant 0 : index
    %34 = vector.load %arg8[%c2, %c0_34, %c0_35] : memref<18x24x128xbf16, #tpu.memory_space<vmem>>, vector<16x24x128xbf16>
    %cst_36 = arith.constant 0.000000e+00 : bf16
    %35 = vector.broadcast %cst_36 : bf16 to vector<16x1x128xbf16>
    %36 = vector.extract_strided_slice %34 {offsets = [0, 0, 0], sizes = [16, 23, 128], strides = [1, 1, 1]} : vector<16x24x128xbf16> to vector<16x23x128xbf16>
    %37 = tpu.concatenate %35, %36 in 1 : vector<16x1x128xbf16>, vector<16x23x128xbf16> -> vector<16x24x128xbf16>
    %38 = vector.extract_strided_slice %34 {offsets = [0, 1, 0], sizes = [16, 23, 128], strides = [1, 1, 1]} : vector<16x24x128xbf16> to vector<16x23x128xbf16>
    %cst_37 = arith.constant 0.000000e+00 : bf16
    %39 = vector.broadcast %cst_37 : bf16 to vector<16x1x128xbf16>
    %40 = tpu.concatenate %38, %39 in 1 : vector<16x23x128xbf16>, vector<16x1x128xbf16> -> vector<16x24x128xbf16>
    %41 = tpu.concatenate %37, %34, %40 in 2 : vector<16x24x128xbf16>, vector<16x24x128xbf16>, vector<16x24x128xbf16> -> vector<16x24x384xbf16>
    %42 = vector.shape_cast %41 : vector<16x24x384xbf16> to vector<384x384xbf16>
    %c2_38 = arith.constant 2 : index
    %c0_39 = arith.constant 0 : index
    %c0_40 = arith.constant 0 : index
    %43 = vector.load %arg5[%c2_38, %c0_39, %c0_40] : memref<3x384x128xbf16, #tpu.memory_space<vmem>>, vector<1x384x128xbf16>
    %44 = vector.shape_cast %43 : vector<1x384x128xbf16> to vector<384x128xbf16>
    %cst_41 = arith.constant dense<0.000000e+00> : vector<384x128xf32>
    %45 = tpu.matmul %42, %44, %cst_41 {dimension_numbers = #tpu.dot_dimension_numbers<[1], [0], [0], [1], [0, 0, 1, 1], [], []>} : vector<384x384xbf16>, vector<384x128xbf16>, vector<384x128xf32> -> vector<384x128xf32>
    %46 = arith.addf %33, %45 : vector<384x128xf32>
    %47 = vector.shape_cast %46 : vector<384x128xf32> to vector<16x24x128xf32>
    %48 = tpu.iota {dimensions = array<i32: 1>} : vector<1x24x1xi32>
    %c1_i32 = arith.constant 1 : i32
    %49 = vector.broadcast %c1_i32 : i32 to vector<1x24x1xi32>
    %50 = arith.cmpi sge, %48, %49 : vector<1x24x1xi32>
    %c16_i32 = arith.constant 16 : i32
    %51 = vector.broadcast %c16_i32 : i32 to vector<1x24x1xi32>
    %52 = arith.cmpi sle, %48, %51 : vector<1x24x1xi32>
    %53 = arith.andi %50, %52 : vector<1x24x1xi1>
    %54 = arith.extui %53 : vector<1x24x1xi1> to vector<1x24x1xi32>
    %55 = arith.sitofp %54 : vector<1x24x1xi32> to vector<1x24x1xf32>
    %56 = vector.broadcast %55 : vector<1x24x1xf32> to vector<16x24x128xf32>
    %57 = arith.mulf %47, %56 : vector<16x24x128xf32>
    %58 = vector.shape_cast %57 : vector<16x24x128xf32> to vector<1x16x24x128xf32>
    %59 = arith.truncf %58 : vector<1x16x24x128xf32> to vector<1x16x24x128xbf16>
    %c0_42 = arith.constant 0 : index
    %c0_43 = arith.constant 0 : index
    %c0_44 = arith.constant 0 : index
    %c0_45 = arith.constant 0 : index
    %60 = vector.load %arg6[%c0_42, %c0_43, %c0_44, %c0_45] : memref<1x16x24x128xbf16, #tpu.memory_space<vmem>>, vector<1x16x24x128xbf16>
    tpu.vector_store %arg6[%c0_42, %c0_43, %c0_44, %c0_45], %59 {strides = array<i32>} : memref<1x16x24x128xbf16, #tpu.memory_space<vmem>>, vector<1x16x24x128xbf16>,
    %cst_46 = arith.constant dense<0.000000e+00> : vector<128xf32>
    %61 = vector.multi_reduction <add>, %57, %cst_46 [0, 1] : vector<16x24x128xf32> to vector<128xf32>
    %62 = vector.shape_cast %61 : vector<128xf32> to vector<1x128xf32>
    %63 = arith.mulf %57, %57 : vector<16x24x128xf32>
    %cst_47 = arith.constant dense<0.000000e+00> : vector<128xf32>
    %64 = vector.multi_reduction <add>, %63, %cst_47 [0, 1] : vector<16x24x128xf32> to vector<128xf32>
    %65 = vector.shape_cast %64 : vector<128xf32> to vector<1x128xf32>
    %66 = tpu.concatenate %62, %65 in 0 : vector<1x128xf32>, vector<1x128xf32> -> vector<2x128xf32>
    %67 = vector.shape_cast %66 : vector<2x128xf32> to vector<1x1x2x128xf32>
    %c0_48 = arith.constant 0 : index
    %c0_49 = arith.constant 0 : index
    %c0_50 = arith.constant 0 : index
    %c0_51 = arith.constant 0 : index
    %68 = vector.load %arg7[%c0_48, %c0_49, %c0_50, %c0_51] : memref<1x1x2x128xf32, #tpu.memory_space<vmem>>, vector<1x1x2x128xf32>
    tpu.vector_store %arg7[%c0_48, %c0_49, %c0_50, %c0_51], %67 {strides = array<i32>} : memref<1x1x2x128xf32, #tpu.memory_space<vmem>>, vector<1x1x2x128xf32>,
    return
  }
  func.func @transform_0(%arg0: i32, %arg1: i32) -> (i32, i32, i32, i32) {
    %c0_i32 = arith.constant 0 : i32
    %c0_i32_0 = arith.constant 0 : i32
    %c0_i32_1 = arith.constant 0 : i32
    return %arg0, %arg1, %c0_i32, %c0_i32_0 : i32, i32, i32, i32
  }
  func.func @transform_1(%arg0: i32, %arg1: i32) -> (i32, i32, i32, i32) {
    %c1_i32 = arith.constant 1 : i32
    %0 = arith.addi %arg1, %c1_i32 : i32
    %c16_i32 = arith.constant 16 : i32
    %1 = arith.muli %0, %c16_i32 : i32
    %c0_i32 = arith.constant 0 : i32
    %c0_i32_0 = arith.constant 0 : i32
    %c0_i32_1 = arith.constant 0 : i32
    return %arg0, %1, %c0_i32, %c0_i32_0 : i32, i32, i32, i32
  }
  func.func @transform_2(%arg0: i32, %arg1: i32) -> (i32, i32, i32, i32) {
    %c1_i32 = arith.constant 1 : i32
    %0 = arith.addi %arg1, %c1_i32 : i32
    %c16_i32 = arith.constant 16 : i32
    %1 = arith.muli %0, %c16_i32 : i32
    %c1_i32_0 = arith.constant 1 : i32
    %2 = arith.addi %1, %c1_i32_0 : i32
    %c0_i32 = arith.constant 0 : i32
    %c0_i32_1 = arith.constant 0 : i32
    %c0_i32_2 = arith.constant 0 : i32
    return %arg0, %2, %c0_i32, %c0_i32_1 : i32, i32, i32, i32
  }
  func.func @transform_3(%arg0: i32, %arg1: i32) -> (i32, i32, i32) {
    %c0_i32 = arith.constant 0 : i32
    %c0_i32_0 = arith.constant 0 : i32
    %c0_i32_1 = arith.constant 0 : i32
    %c0_i32_2 = arith.constant 0 : i32
    return %c0_i32, %c0_i32_0, %c0_i32_1 : i32, i32, i32
  }
  func.func @transform_4(%arg0: i32, %arg1: i32) -> (i32, i32, i32, i32) {
    %c0_i32 = arith.constant 0 : i32
    %c0_i32_0 = arith.constant 0 : i32
    %c0_i32_1 = arith.constant 0 : i32
    return %arg0, %arg1, %c0_i32, %c0_i32_0 : i32, i32, i32, i32
  }
  func.func @transform_5(%arg0: i32, %arg1: i32) -> (i32, i32, i32, i32) {
    %c0_i32 = arith.constant 0 : i32
    %c0_i32_0 = arith.constant 0 : i32
    %c0_i32_1 = arith.constant 0 : i32
    return %arg0, %arg1, %c0_i32, %c0_i32_0 : i32, i32, i32, i32
  }
}

module attributes {stable_mosaic.version = 11 : i64} {
  func.func @_conv2_kernel(%arg0: i32, %arg1: i32, %arg2: memref<1x16x24x128xbf16, #tpu.memory_space<vmem>>, %arg3: memref<1x1x24x128xbf16, #tpu.memory_space<vmem>>, %arg4: memref<1x1x24x128xbf16, #tpu.memory_space<vmem>>, %arg5: memref<1x128xf32, #tpu.memory_space<vmem>>, %arg6: memref<1x128xf32, #tpu.memory_space<vmem>>, %arg7: memref<3x384x128xbf16, #tpu.memory_space<vmem>>, %arg8: memref<1x16x24x128xbf16, #tpu.memory_space<vmem>>, %arg9: memref<1x1x2x128xf32, #tpu.memory_space<vmem>>, %arg10: memref<18x24x128xbf16, #tpu.memory_space<vmem>>) attributes {dimension_semantics = [#tpu.dimension_semantics<parallel>, #tpu.dimension_semantics<parallel>], iteration_bounds = array<i64: 2, 1>, scalar_prefetch = 0 : i64, scratch_operands = 1 : i64, tpu.core_type = #tpu.core_type<tc>, window_params = [{transform_indices = @transform_0, window_bounds = array<i64: 1, 16, 24, 128>}, {transform_indices = @transform_1, window_bounds = array<i64: 1, 1, 24, 128>}, {transform_indices = @transform_2, window_bounds = array<i64: 1, 1, 24, 128>}, {pipeline_mode = #tpu.pipeline_mode<synchronous>, transform_indices = @transform_3, window_bounds = array<i64: 1, 128>}, {pipeline_mode = #tpu.pipeline_mode<synchronous>, transform_indices = @transform_4, window_bounds = array<i64: 1, 128>}, {pipeline_mode = #tpu.pipeline_mode<synchronous>, transform_indices = @transform_5, window_bounds = array<i64: 3, 384, 128>}, {transform_indices = @transform_6, window_bounds = array<i64: 1, 16, 24, 128>}, {transform_indices = @transform_7, window_bounds = array<i64: 1, 1, 2, 128>}]} {
    %c0 = arith.constant 0 : index
    %c0_0 = arith.constant 0 : index
    %0 = vector.load %arg5[%c0, %c0_0] : memref<1x128xf32, #tpu.memory_space<vmem>>, vector<1x128xf32>
    %1 = vector.shape_cast %0 : vector<1x128xf32> to vector<1x1x128xf32>
    %c0_1 = arith.constant 0 : index
    %c0_2 = arith.constant 0 : index
    %2 = vector.load %arg6[%c0_1, %c0_2] : memref<1x128xf32, #tpu.memory_space<vmem>>, vector<1x128xf32>
    %3 = vector.shape_cast %2 : vector<1x128xf32> to vector<1x1x128xf32>
    %4 = tpu.iota {dimensions = array<i32: 1>} : vector<1x24x1xi32>
    %c1_i32 = arith.constant 1 : i32
    %5 = vector.broadcast %c1_i32 : i32 to vector<1x24x1xi32>
    %6 = arith.cmpi sge, %4, %5 : vector<1x24x1xi32>
    %c16_i32 = arith.constant 16 : i32
    %7 = vector.broadcast %c16_i32 : i32 to vector<1x24x1xi32>
    %8 = arith.cmpi sle, %4, %7 : vector<1x24x1xi32>
    %9 = arith.andi %6, %8 : vector<1x24x1xi1>
    %10 = arith.extui %9 : vector<1x24x1xi1> to vector<1x24x1xi32>
    %11 = arith.sitofp %10 : vector<1x24x1xi32> to vector<1x24x1xf32>
    %c0_3 = arith.constant 0 : index
    %c0_4 = arith.constant 0 : index
    %c0_5 = arith.constant 0 : index
    %c0_6 = arith.constant 0 : index
    %12 = vector.load %arg2[%c0_3, %c0_4, %c0_5, %c0_6] : memref<1x16x24x128xbf16, #tpu.memory_space<vmem>>, vector<1x16x24x128xbf16>
    %13 = vector.shape_cast %12 : vector<1x16x24x128xbf16> to vector<16x24x128xbf16>
    %14 = arith.extf %13 : vector<16x24x128xbf16> to vector<16x24x128xf32>
    %15 = vector.broadcast %1 : vector<1x1x128xf32> to vector<16x24x128xf32>
    %16 = arith.mulf %14, %15 : vector<16x24x128xf32>
    %17 = vector.broadcast %3 : vector<1x1x128xf32> to vector<16x24x128xf32>
    %18 = arith.addf %16, %17 : vector<16x24x128xf32>
    %cst = arith.constant 0.000000e+00 : f32
    %19 = vector.broadcast %cst : f32 to vector<16x24x128xf32>
    %20 = arith.maximumf %18, %19 : vector<16x24x128xf32>
    %21 = vector.broadcast %11 : vector<1x24x1xf32> to vector<16x24x128xf32>
    %22 = arith.mulf %20, %21 : vector<16x24x128xf32>
    %23 = arith.truncf %22 : vector<16x24x128xf32> to vector<16x24x128xbf16>
    %c1 = arith.constant 1 : index
    %c0_7 = arith.constant 0 : index
    %c0_8 = arith.constant 0 : index
    %24 = vector.load %arg10[%c1, %c0_7, %c0_8] : memref<18x24x128xbf16, #tpu.memory_space<vmem>>, vector<16x24x128xbf16>
    tpu.vector_store %arg10[%c1, %c0_7, %c0_8], %23 {strides = array<i32>} : memref<18x24x128xbf16, #tpu.memory_space<vmem>>, vector<16x24x128xbf16>,
    %c0_i32 = arith.constant 0 : i32
    %25 = arith.cmpi eq, %arg1, %c0_i32 : i32
    %26 = arith.extui %25 : i1 to i32
    %c0_i32_9 = arith.constant 0 : i32
    %27 = arith.cmpi ne, %26, %c0_i32_9 : i32
    scf.if %27 {
      %cst_54 = arith.constant 0.000000e+00 : bf16
      %97 = vector.broadcast %cst_54 : bf16 to vector<1x24x128xbf16>
      %c0_55 = arith.constant 0 : index
      %c0_56 = arith.constant 0 : index
      %c0_57 = arith.constant 0 : index
      %98 = vector.load %arg10[%c0_55, %c0_56, %c0_57] : memref<18x24x128xbf16, #tpu.memory_space<vmem>>, vector<1x24x128xbf16>
      tpu.vector_store %arg10[%c0_55, %c0_56, %c0_57], %97 {strides = array<i32>} : memref<18x24x128xbf16, #tpu.memory_space<vmem>>, vector<1x24x128xbf16>,
    } else {
    }
    %c0_i32_10 = arith.constant 0 : i32
    %28 = arith.cmpi sgt, %arg1, %c0_i32_10 : i32
    %29 = arith.extui %28 : i1 to i32
    %c0_i32_11 = arith.constant 0 : i32
    %30 = arith.cmpi ne, %29, %c0_i32_11 : i32
    scf.if %30 {
      %c0_54 = arith.constant 0 : index
      %c0_55 = arith.constant 0 : index
      %c0_56 = arith.constant 0 : index
      %c0_57 = arith.constant 0 : index
      %97 = vector.load %arg3[%c0_54, %c0_55, %c0_56, %c0_57] : memref<1x1x24x128xbf16, #tpu.memory_space<vmem>>, vector<1x1x24x128xbf16>
      %98 = vector.shape_cast %97 : vector<1x1x24x128xbf16> to vector<1x24x128xbf16>
      %99 = arith.extf %98 : vector<1x24x128xbf16> to vector<1x24x128xf32>
      %100 = vector.broadcast %1 : vector<1x1x128xf32> to vector<1x24x128xf32>
      %101 = arith.mulf %99, %100 : vector<1x24x128xf32>
      %102 = vector.broadcast %3 : vector<1x1x128xf32> to vector<1x24x128xf32>
      %103 = arith.addf %101, %102 : vector<1x24x128xf32>
      %cst_58 = arith.constant 0.000000e+00 : f32
      %104 = vector.broadcast %cst_58 : f32 to vector<1x24x128xf32>
      %105 = arith.maximumf %103, %104 : vector<1x24x128xf32>
      %106 = vector.broadcast %11 : vector<1x24x1xf32> to vector<1x24x128xf32>
      %107 = arith.mulf %105, %106 : vector<1x24x128xf32>
      %108 = arith.truncf %107 : vector<1x24x128xf32> to vector<1x24x128xbf16>
      %c0_59 = arith.constant 0 : index
      %c0_60 = arith.constant 0 : index
      %c0_61 = arith.constant 0 : index
      %109 = vector.load %arg10[%c0_59, %c0_60, %c0_61] : memref<18x24x128xbf16, #tpu.memory_space<vmem>>, vector<1x24x128xbf16>
      tpu.vector_store %arg10[%c0_59, %c0_60, %c0_61], %108 {strides = array<i32>} : memref<18x24x128xbf16, #tpu.memory_space<vmem>>, vector<1x24x128xbf16>,
    } else {
    }
    %c0_i32_12 = arith.constant 0 : i32
    %31 = arith.cmpi eq, %arg1, %c0_i32_12 : i32
    %32 = arith.extui %31 : i1 to i32
    %c0_i32_13 = arith.constant 0 : i32
    %33 = arith.cmpi ne, %32, %c0_i32_13 : i32
    scf.if %33 {
      %cst_54 = arith.constant 0.000000e+00 : bf16
      %97 = vector.broadcast %cst_54 : bf16 to vector<1x24x128xbf16>
      %c17 = arith.constant 17 : index
      %c0_55 = arith.constant 0 : index
      %c0_56 = arith.constant 0 : index
      %98 = vector.load %arg10[%c17, %c0_55, %c0_56] : memref<18x24x128xbf16, #tpu.memory_space<vmem>>, vector<1x24x128xbf16>
      tpu.vector_store %arg10[%c17, %c0_55, %c0_56], %97 {strides = array<i32>} : memref<18x24x128xbf16, #tpu.memory_space<vmem>>, vector<1x24x128xbf16>,
    } else {
    }
    %c0_i32_14 = arith.constant 0 : i32
    %34 = arith.cmpi slt, %arg1, %c0_i32_14 : i32
    %35 = arith.extui %34 : i1 to i32
    %c0_i32_15 = arith.constant 0 : i32
    %36 = arith.cmpi ne, %35, %c0_i32_15 : i32
    scf.if %36 {
      %c0_54 = arith.constant 0 : index
      %c0_55 = arith.constant 0 : index
      %c0_56 = arith.constant 0 : index
      %c0_57 = arith.constant 0 : index
      %97 = vector.load %arg4[%c0_54, %c0_55, %c0_56, %c0_57] : memref<1x1x24x128xbf16, #tpu.memory_space<vmem>>, vector<1x1x24x128xbf16>
      %98 = vector.shape_cast %97 : vector<1x1x24x128xbf16> to vector<1x24x128xbf16>
      %99 = arith.extf %98 : vector<1x24x128xbf16> to vector<1x24x128xf32>
      %100 = vector.broadcast %1 : vector<1x1x128xf32> to vector<1x24x128xf32>
      %101 = arith.mulf %99, %100 : vector<1x24x128xf32>
      %102 = vector.broadcast %3 : vector<1x1x128xf32> to vector<1x24x128xf32>
      %103 = arith.addf %101, %102 : vector<1x24x128xf32>
      %cst_58 = arith.constant 0.000000e+00 : f32
      %104 = vector.broadcast %cst_58 : f32 to vector<1x24x128xf32>
      %105 = arith.maximumf %103, %104 : vector<1x24x128xf32>
      %106 = vector.broadcast %11 : vector<1x24x1xf32> to vector<1x24x128xf32>
      %107 = arith.mulf %105, %106 : vector<1x24x128xf32>
      %108 = arith.truncf %107 : vector<1x24x128xf32> to vector<1x24x128xbf16>
      %c17 = arith.constant 17 : index
      %c0_59 = arith.constant 0 : index
      %c0_60 = arith.constant 0 : index
      %109 = vector.load %arg10[%c17, %c0_59, %c0_60] : memref<18x24x128xbf16, #tpu.memory_space<vmem>>, vector<1x24x128xbf16>
      tpu.vector_store %arg10[%c17, %c0_59, %c0_60], %108 {strides = array<i32>} : memref<18x24x128xbf16, #tpu.memory_space<vmem>>, vector<1x24x128xbf16>,
    } else {
    }
    %c0_16 = arith.constant 0 : index
    %c0_17 = arith.constant 0 : index
    %c0_18 = arith.constant 0 : index
    %37 = vector.load %arg10[%c0_16, %c0_17, %c0_18] : memref<18x24x128xbf16, #tpu.memory_space<vmem>>, vector<16x24x128xbf16>
    %cst_19 = arith.constant 0.000000e+00 : bf16
    %38 = vector.broadcast %cst_19 : bf16 to vector<16x1x128xbf16>
    %39 = vector.extract_strided_slice %37 {offsets = [0, 0, 0], sizes = [16, 23, 128], strides = [1, 1, 1]} : vector<16x24x128xbf16> to vector<16x23x128xbf16>
    %40 = tpu.concatenate %38, %39 in 1 : vector<16x1x128xbf16>, vector<16x23x128xbf16> -> vector<16x24x128xbf16>
    %41 = vector.extract_strided_slice %37 {offsets = [0, 1, 0], sizes = [16, 23, 128], strides = [1, 1, 1]} : vector<16x24x128xbf16> to vector<16x23x128xbf16>
    %cst_20 = arith.constant 0.000000e+00 : bf16
    %42 = vector.broadcast %cst_20 : bf16 to vector<16x1x128xbf16>
    %43 = tpu.concatenate %41, %42 in 1 : vector<16x23x128xbf16>, vector<16x1x128xbf16> -> vector<16x24x128xbf16>
    %44 = tpu.concatenate %40, %37, %43 in 2 : vector<16x24x128xbf16>, vector<16x24x128xbf16>, vector<16x24x128xbf16> -> vector<16x24x384xbf16>
    %45 = vector.shape_cast %44 : vector<16x24x384xbf16> to vector<384x384xbf16>
    %c0_21 = arith.constant 0 : index
    %c0_22 = arith.constant 0 : index
    %c0_23 = arith.constant 0 : index
    %46 = vector.load %arg7[%c0_21, %c0_22, %c0_23] : memref<3x384x128xbf16, #tpu.memory_space<vmem>>, vector<1x384x128xbf16>
    %47 = vector.shape_cast %46 : vector<1x384x128xbf16> to vector<384x128xbf16>
    %cst_24 = arith.constant dense<0.000000e+00> : vector<384x128xf32>
    %48 = tpu.matmul %45, %47, %cst_24 {dimension_numbers = #tpu.dot_dimension_numbers<[1], [0], [0], [1], [0, 0, 1, 1], [], []>} : vector<384x384xbf16>, vector<384x128xbf16>, vector<384x128xf32> -> vector<384x128xf32>
    %c1_25 = arith.constant 1 : index
    %c0_26 = arith.constant 0 : index
    %c0_27 = arith.constant 0 : index
    %49 = vector.load %arg10[%c1_25, %c0_26, %c0_27] : memref<18x24x128xbf16, #tpu.memory_space<vmem>>, vector<16x24x128xbf16>
    %cst_28 = arith.constant 0.000000e+00 : bf16
    %50 = vector.broadcast %cst_28 : bf16 to vector<16x1x128xbf16>
    %51 = vector.extract_strided_slice %49 {offsets = [0, 0, 0], sizes = [16, 23, 128], strides = [1, 1, 1]} : vector<16x24x128xbf16> to vector<16x23x128xbf16>
    %52 = tpu.concatenate %50, %51 in 1 : vector<16x1x128xbf16>, vector<16x23x128xbf16> -> vector<16x24x128xbf16>
    %53 = vector.extract_strided_slice %49 {offsets = [0, 1, 0], sizes = [16, 23, 128], strides = [1, 1, 1]} : vector<16x24x128xbf16> to vector<16x23x128xbf16>
    %cst_29 = arith.constant 0.000000e+00 : bf16
    %54 = vector.broadcast %cst_29 : bf16 to vector<16x1x128xbf16>
    %55 = tpu.concatenate %53, %54 in 1 : vector<16x23x128xbf16>, vector<16x1x128xbf16> -> vector<16x24x128xbf16>
    %56 = tpu.concatenate %52, %49, %55 in 2 : vector<16x24x128xbf16>, vector<16x24x128xbf16>, vector<16x24x128xbf16> -> vector<16x24x384xbf16>
    %57 = vector.shape_cast %56 : vector<16x24x384xbf16> to vector<384x384xbf16>
    %c1_30 = arith.constant 1 : index
    %c0_31 = arith.constant 0 : index
    %c0_32 = arith.constant 0 : index
    %58 = vector.load %arg7[%c1_30, %c0_31, %c0_32] : memref<3x384x128xbf16, #tpu.memory_space<vmem>>, vector<1x384x128xbf16>
    %59 = vector.shape_cast %58 : vector<1x384x128xbf16> to vector<384x128xbf16>
    %cst_33 = arith.constant dense<0.000000e+00> : vector<384x128xf32>
    %60 = tpu.matmul %57, %59, %cst_33 {dimension_numbers = #tpu.dot_dimension_numbers<[1], [0], [0], [1], [0, 0, 1, 1], [], []>} : vector<384x384xbf16>, vector<384x128xbf16>, vector<384x128xf32> -> vector<384x128xf32>
    %61 = arith.addf %48, %60 : vector<384x128xf32>
    %c2 = arith.constant 2 : index
    %c0_34 = arith.constant 0 : index
    %c0_35 = arith.constant 0 : index
    %62 = vector.load %arg10[%c2, %c0_34, %c0_35] : memref<18x24x128xbf16, #tpu.memory_space<vmem>>, vector<16x24x128xbf16>
    %cst_36 = arith.constant 0.000000e+00 : bf16
    %63 = vector.broadcast %cst_36 : bf16 to vector<16x1x128xbf16>
    %64 = vector.extract_strided_slice %62 {offsets = [0, 0, 0], sizes = [16, 23, 128], strides = [1, 1, 1]} : vector<16x24x128xbf16> to vector<16x23x128xbf16>
    %65 = tpu.concatenate %63, %64 in 1 : vector<16x1x128xbf16>, vector<16x23x128xbf16> -> vector<16x24x128xbf16>
    %66 = vector.extract_strided_slice %62 {offsets = [0, 1, 0], sizes = [16, 23, 128], strides = [1, 1, 1]} : vector<16x24x128xbf16> to vector<16x23x128xbf16>
    %cst_37 = arith.constant 0.000000e+00 : bf16
    %67 = vector.broadcast %cst_37 : bf16 to vector<16x1x128xbf16>
    %68 = tpu.concatenate %66, %67 in 1 : vector<16x23x128xbf16>, vector<16x1x128xbf16> -> vector<16x24x128xbf16>
    %69 = tpu.concatenate %65, %62, %68 in 2 : vector<16x24x128xbf16>, vector<16x24x128xbf16>, vector<16x24x128xbf16> -> vector<16x24x384xbf16>
    %70 = vector.shape_cast %69 : vector<16x24x384xbf16> to vector<384x384xbf16>
    %c2_38 = arith.constant 2 : index
    %c0_39 = arith.constant 0 : index
    %c0_40 = arith.constant 0 : index
    %71 = vector.load %arg7[%c2_38, %c0_39, %c0_40] : memref<3x384x128xbf16, #tpu.memory_space<vmem>>, vector<1x384x128xbf16>
    %72 = vector.shape_cast %71 : vector<1x384x128xbf16> to vector<384x128xbf16>
    %cst_41 = arith.constant dense<0.000000e+00> : vector<384x128xf32>
    %73 = tpu.matmul %70, %72, %cst_41 {dimension_numbers = #tpu.dot_dimension_numbers<[1], [0], [0], [1], [0, 0, 1, 1], [], []>} : vector<384x384xbf16>, vector<384x128xbf16>, vector<384x128xf32> -> vector<384x128xf32>
    %74 = arith.addf %61, %73 : vector<384x128xf32>
    %75 = vector.shape_cast %74 : vector<384x128xf32> to vector<16x24x128xf32>
    %76 = tpu.iota {dimensions = array<i32: 1>} : vector<1x24x1xi32>
    %c1_i32_42 = arith.constant 1 : i32
    %77 = vector.broadcast %c1_i32_42 : i32 to vector<1x24x1xi32>
    %78 = arith.cmpi sge, %76, %77 : vector<1x24x1xi32>
    %c16_i32_43 = arith.constant 16 : i32
    %79 = vector.broadcast %c16_i32_43 : i32 to vector<1x24x1xi32>
    %80 = arith.cmpi sle, %76, %79 : vector<1x24x1xi32>
    %81 = arith.andi %78, %80 : vector<1x24x1xi1>
    %82 = arith.extui %81 : vector<1x24x1xi1> to vector<1x24x1xi32>
    %83 = arith.sitofp %82 : vector<1x24x1xi32> to vector<1x24x1xf32>
    %84 = vector.broadcast %83 : vector<1x24x1xf32> to vector<16x24x128xf32>
    %85 = arith.mulf %75, %84 : vector<16x24x128xf32>
    %86 = vector.shape_cast %85 : vector<16x24x128xf32> to vector<1x16x24x128xf32>
    %87 = arith.truncf %86 : vector<1x16x24x128xf32> to vector<1x16x24x128xbf16>
    %c0_44 = arith.constant 0 : index
    %c0_45 = arith.constant 0 : index
    %c0_46 = arith.constant 0 : index
    %c0_47 = arith.constant 0 : index
    %88 = vector.load %arg8[%c0_44, %c0_45, %c0_46, %c0_47] : memref<1x16x24x128xbf16, #tpu.memory_space<vmem>>, vector<1x16x24x128xbf16>
    tpu.vector_store %arg8[%c0_44, %c0_45, %c0_46, %c0_47], %87 {strides = array<i32>} : memref<1x16x24x128xbf16, #tpu.memory_space<vmem>>, vector<1x16x24x128xbf16>,
    %cst_48 = arith.constant dense<0.000000e+00> : vector<128xf32>
    %89 = vector.multi_reduction <add>, %85, %cst_48 [0, 1] : vector<16x24x128xf32> to vector<128xf32>
    %90 = vector.shape_cast %89 : vector<128xf32> to vector<1x128xf32>
    %91 = arith.mulf %85, %85 : vector<16x24x128xf32>
    %cst_49 = arith.constant dense<0.000000e+00> : vector<128xf32>
    %92 = vector.multi_reduction <add>, %91, %cst_49 [0, 1] : vector<16x24x128xf32> to vector<128xf32>
    %93 = vector.shape_cast %92 : vector<128xf32> to vector<1x128xf32>
    %94 = tpu.concatenate %90, %93 in 0 : vector<1x128xf32>, vector<1x128xf32> -> vector<2x128xf32>
    %95 = vector.shape_cast %94 : vector<2x128xf32> to vector<1x1x2x128xf32>
    %c0_50 = arith.constant 0 : index
    %c0_51 = arith.constant 0 : index
    %c0_52 = arith.constant 0 : index
    %c0_53 = arith.constant 0 : index
    %96 = vector.load %arg9[%c0_50, %c0_51, %c0_52, %c0_53] : memref<1x1x2x128xf32, #tpu.memory_space<vmem>>, vector<1x1x2x128xf32>
    tpu.vector_store %arg9[%c0_50, %c0_51, %c0_52, %c0_53], %95 {strides = array<i32>} : memref<1x1x2x128xf32, #tpu.memory_space<vmem>>, vector<1x1x2x128xf32>,
    return
  }
  func.func @transform_0(%arg0: i32, %arg1: i32) -> (i32, i32, i32, i32) {
    %c0_i32 = arith.constant 0 : i32
    %c0_i32_0 = arith.constant 0 : i32
    %c0_i32_1 = arith.constant 0 : i32
    return %arg0, %arg1, %c0_i32, %c0_i32_0 : i32, i32, i32, i32
  }
  func.func @transform_1(%arg0: i32, %arg1: i32) -> (i32, i32, i32, i32) {
    %c16_i32 = arith.constant 16 : i32
    %0 = arith.muli %arg1, %c16_i32 : i32
    %c1_i32 = arith.constant 1 : i32
    %1 = arith.subi %0, %c1_i32 : i32
    %c0_i32 = arith.constant 0 : i32
    %2 = arith.maxsi %1, %c0_i32 : i32
    %c0_i32_0 = arith.constant 0 : i32
    %c0_i32_1 = arith.constant 0 : i32
    %c0_i32_2 = arith.constant 0 : i32
    return %arg0, %2, %c0_i32_0, %c0_i32_1 : i32, i32, i32, i32
  }
  func.func @transform_2(%arg0: i32, %arg1: i32) -> (i32, i32, i32, i32) {
    %c1_i32 = arith.constant 1 : i32
    %0 = arith.addi %arg1, %c1_i32 : i32
    %c16_i32 = arith.constant 16 : i32
    %1 = arith.muli %0, %c16_i32 : i32
    %c15_i32 = arith.constant 15 : i32
    %2 = arith.minsi %1, %c15_i32 : i32
    %c0_i32 = arith.constant 0 : i32
    %c0_i32_0 = arith.constant 0 : i32
    %c0_i32_1 = arith.constant 0 : i32
    return %arg0, %2, %c0_i32, %c0_i32_0 : i32, i32, i32, i32
  }
  func.func @transform_3(%arg0: i32, %arg1: i32) -> (i32, i32) {
    %c0_i32 = arith.constant 0 : i32
    %c0_i32_0 = arith.constant 0 : i32
    %c0_i32_1 = arith.constant 0 : i32
    return %c0_i32, %c0_i32_0 : i32, i32
  }
  func.func @transform_4(%arg0: i32, %arg1: i32) -> (i32, i32) {
    %c0_i32 = arith.constant 0 : i32
    %c0_i32_0 = arith.constant 0 : i32
    %c0_i32_1 = arith.constant 0 : i32
    return %c0_i32, %c0_i32_0 : i32, i32
  }
  func.func @transform_5(%arg0: i32, %arg1: i32) -> (i32, i32, i32) {
    %c0_i32 = arith.constant 0 : i32
    %c0_i32_0 = arith.constant 0 : i32
    %c0_i32_1 = arith.constant 0 : i32
    %c0_i32_2 = arith.constant 0 : i32
    return %c0_i32, %c0_i32_0, %c0_i32_1 : i32, i32, i32
  }
  func.func @transform_6(%arg0: i32, %arg1: i32) -> (i32, i32, i32, i32) {
    %c0_i32 = arith.constant 0 : i32
    %c0_i32_0 = arith.constant 0 : i32
    %c0_i32_1 = arith.constant 0 : i32
    return %arg0, %arg1, %c0_i32, %c0_i32_0 : i32, i32, i32, i32
  }
  func.func @transform_7(%arg0: i32, %arg1: i32) -> (i32, i32, i32, i32) {
    %c0_i32 = arith.constant 0 : i32
    %c0_i32_0 = arith.constant 0 : i32
    %c0_i32_1 = arith.constant 0 : i32
    return %arg0, %arg1, %c0_i32, %c0_i32_0 : i32, i32, i32, i32
  }
}

module attributes {stable_mosaic.version = 11 : i64} {
  func.func @_bn_relu_kernel(%arg0: i32, %arg1: i32, %arg2: memref<1x16x24x128xbf16, #tpu.memory_space<vmem>>, %arg3: memref<1x128xf32, #tpu.memory_space<vmem>>, %arg4: memref<1x128xf32, #tpu.memory_space<vmem>>, %arg5: memref<1x16x24x128xf32, #tpu.memory_space<vmem>>) attributes {dimension_semantics = [#tpu.dimension_semantics<parallel>, #tpu.dimension_semantics<parallel>], iteration_bounds = array<i64: 2, 1>, scalar_prefetch = 0 : i64, scratch_operands = 0 : i64, tpu.core_type = #tpu.core_type<tc>, window_params = [{transform_indices = @transform_0, window_bounds = array<i64: 1, 16, 24, 128>}, {pipeline_mode = #tpu.pipeline_mode<synchronous>, transform_indices = @transform_1, window_bounds = array<i64: 1, 128>}, {pipeline_mode = #tpu.pipeline_mode<synchronous>, transform_indices = @transform_2, window_bounds = array<i64: 1, 128>}, {transform_indices = @transform_3, window_bounds = array<i64: 1, 16, 24, 128>}]} {
    %c0 = arith.constant 0 : index
    %c0_0 = arith.constant 0 : index
    %0 = vector.load %arg3[%c0, %c0_0] : memref<1x128xf32, #tpu.memory_space<vmem>>, vector<1x128xf32>
    %1 = vector.shape_cast %0 : vector<1x128xf32> to vector<1x1x1x128xf32>
    %c0_1 = arith.constant 0 : index
    %c0_2 = arith.constant 0 : index
    %2 = vector.load %arg4[%c0_1, %c0_2] : memref<1x128xf32, #tpu.memory_space<vmem>>, vector<1x128xf32>
    %3 = vector.shape_cast %2 : vector<1x128xf32> to vector<1x1x1x128xf32>
    %c0_3 = arith.constant 0 : index
    %c0_4 = arith.constant 0 : index
    %c0_5 = arith.constant 0 : index
    %c0_6 = arith.constant 0 : index
    %4 = vector.load %arg2[%c0_3, %c0_4, %c0_5, %c0_6] : memref<1x16x24x128xbf16, #tpu.memory_space<vmem>>, vector<1x16x24x128xbf16>
    %5 = arith.extf %4 : vector<1x16x24x128xbf16> to vector<1x16x24x128xf32>
    %6 = vector.broadcast %1 : vector<1x1x1x128xf32> to vector<1x16x24x128xf32>
    %7 = arith.mulf %5, %6 : vector<1x16x24x128xf32>
    %8 = vector.broadcast %3 : vector<1x1x1x128xf32> to vector<1x16x24x128xf32>
    %9 = arith.addf %7, %8 : vector<1x16x24x128xf32>
    %cst = arith.constant 0.000000e+00 : f32
    %10 = vector.broadcast %cst : f32 to vector<1x16x24x128xf32>
    %11 = arith.maximumf %9, %10 : vector<1x16x24x128xf32>
    %c0_7 = arith.constant 0 : index
    %c0_8 = arith.constant 0 : index
    %c0_9 = arith.constant 0 : index
    %c0_10 = arith.constant 0 : index
    %12 = vector.load %arg5[%c0_7, %c0_8, %c0_9, %c0_10] : memref<1x16x24x128xf32, #tpu.memory_space<vmem>>, vector<1x16x24x128xf32>
    tpu.vector_store %arg5[%c0_7, %c0_8, %c0_9, %c0_10], %11 {strides = array<i32>} : memref<1x16x24x128xf32, #tpu.memory_space<vmem>>, vector<1x16x24x128xf32>,
    return
  }
  func.func @transform_0(%arg0: i32, %arg1: i32) -> (i32, i32, i32, i32) {
    %c0_i32 = arith.constant 0 : i32
    %c0_i32_0 = arith.constant 0 : i32
    %c0_i32_1 = arith.constant 0 : i32
    return %arg0, %arg1, %c0_i32, %c0_i32_0 : i32, i32, i32, i32
  }
  func.func @transform_1(%arg0: i32, %arg1: i32) -> (i32, i32) {
    %c0_i32 = arith.constant 0 : i32
    %c0_i32_0 = arith.constant 0 : i32
    %c0_i32_1 = arith.constant 0 : i32
    return %c0_i32, %c0_i32_0 : i32, i32
  }
  func.func @transform_2(%arg0: i32, %arg1: i32) -> (i32, i32) {
    %c0_i32 = arith.constant 0 : i32
    %c0_i32_0 = arith.constant 0 : i32
    %c0_i32_1 = arith.constant 0 : i32
    return %c0_i32, %c0_i32_0 : i32, i32
  }
  func.func @transform_3(%arg0: i32, %arg1: i32) -> (i32, i32, i32, i32) {
    %c0_i32 = arith.constant 0 : i32
    %c0_i32_0 = arith.constant 0 : i32
    %c0_i32_1 = arith.constant 0 : i32
    return %arg0, %arg1, %c0_i32, %c0_i32_0 : i32, i32, i32, i32
  }
}

</mosaic_0001>

<bundles_post_ra>
// kernel: tpu_custom_call.1
= control target key start
LH: loop header
LB: loop body
LE: loop exit
PB: predicated region body
PF: predicated region fallthrough
CT: control target
= control target key end

     0   :  { %6 = vsyncpa [#allocation3], 0  ;;  %s228_s0 = inlined_call_operand.hbm [shape: f32[8,16,128], index: 0, kind: input, shape index: {}]   ;;  %s229_s1 = inlined_call_operand.hbm [shape: f32[8,16,128], index: 1, kind: output, shape index: {}]  }
   0x1   :  { %7 = vsyncpa [#allocation4], 0  ;;  %s12_s8 = sshll.u32 %s228_s0, 4  ;;  %s167_s9 = smov [#allocation2]   ;;  %s13_s8 = int_to_ptr.hbm [resolvable:$true] %s12_s8 }
   0x2   :  { %s14_s10 = sshll.u32 %s167_s9, 4  ;;  %s168_s11 = smov 128   ;;  %s15_s10 = int_to_ptr.vmem [resolvable:$true] %s14_s10 }
   0x3   :  { %s169_s12 = smov 8  }
   0x4   :  { %20 = dma.hbm_to_vmem [thread:$0]  %s13_s8, 2048, %s15_s10, [#allocation3], %s168_s11, %s168_s11, %s169_s12  }
   0x5   :  { %163 = dma.done.wait [#allocation3], 2048  }
   0x6   :  { %164 = vsyncadd [#allocation3], 4294965248  ;;  %v57_v0 = vlaneseq  ;;  %v25_v2 = vld [vmem:[#allocation2] sm:$0xff]  ;;  %v26_v3 = vld [vmem:[#allocation2 + $0x8] sm:$0xff]  ;;  %s170_s0 = smov [#allocation5]   ;;  %s98_s16 = sshll.u32 %s229_s1, 4  ;;  %s99_s16 = int_to_ptr.hbm [resolvable:$true] %s98_s16 }
   0x7   :  { %v27_v4 = vld [vmem:[#allocation2 + $0x10] sm:$0xff]  ;;  %v41_v5 = vrot.slane %v25_v2, 7  ;;  %v49_v6 = vrot.slane %v26_v3, 7  ;;  %v28_v7 = vld [vmem:[#allocation2 + $0x18] sm:$0xff]  ;;  %v29_v9 = vld [vmem:[#allocation2 + $0x20] sm:$0xff]  ;;  %s96_s13 = sshll.u32 %s170_s0, 4  ;;  %s97_s13 = int_to_ptr.vmem [resolvable:$true] %s96_s13 }
   0x8   :  { %v187_v1 = vshrl.u32 %v57_v0, 7  ;;  %v42_v8 = vrot.slane %v27_v4, 7  ;;  %v30_v10 = vld [vmem:[#allocation2 + $0x28] sm:$0xff]  ;;  %v50_v11 = vrot.slane %v28_v7, 7  ;;  %v43_v12 = vrot.slane %v29_v9, 7  ;;  %v31_v14 = vld [vmem:[#allocation2 + $0x30] sm:$0xff] }
   0x9   :  { %v51_v13 = vrot.slane %v30_v10, 7  ;;  %v32_v15 = vld [vmem:[#allocation2 + $0x38] sm:$0xff]  ;;  %v33_v16 = vld [vmem:[#allocation2 + $0x40] sm:$0xff]  ;;  %v44_v19 = vrot.slane %v31_v14, 7  ;;  %v34_v21 = vld [vmem:[#allocation2 + $0x48] sm:$0xff] }
   0xa   :  { %vm59_vm0 = vcmp.lt.s32.totalorder %v187_v1, 1  ;;  %v52_v20 = vrot.slane %v32_v15, 7  ;;  %v35_v24 = vld [vmem:[#allocation2 + $0x50] sm:$0xff]  ;;  %v36_v25 = vld [vmem:[#allocation2 + $0x58] sm:$0xff]  ;;  %v45_v27 = vrot.slane %v33_v16, 7  ;;  %v53_v28 = vrot.slane %v34_v21, 7 }
   0xb   :  { %v68_v17 = vsel %vm59_vm0, %v49_v6, %v41_v5  ;;  %v60_v18 = vsel %vm59_vm0, %v41_v5, %v49_v6  ;;  %v69_v22 = vsel %vm59_vm0, %v50_v11, %v42_v8  ;;  %v61_v23 = vsel %vm59_vm0, %v42_v8, %v50_v11  ;;  %v37_v30 = vld [vmem:[#allocation2 + $0x60] sm:$0xff]  ;;  %v38_v31 = vld [vmem:[#allocation2 + $0x68] sm:$0xff]  ;;  %v39_v36 = vld [vmem:[#allocation2 + $0x70] sm:$0xff] }
   0xc   :  { %76 = vst [vmem:[#allocation5] sm:$0xff] %v68_v17  ;;  %v70_v26 = vsel %vm59_vm0, %v51_v13, %v43_v12  ;;  %v62_v29 = vsel %vm59_vm0, %v43_v12, %v51_v13  ;;  %v71_v32 = vsel %vm59_vm0, %v52_v20, %v44_v19  ;;  %v46_v33 = vrot.slane %v35_v24, 7  ;;  %v40_v37 = vld [vmem:[#allocation2 + $0x78] sm:$0xff] }
   0xd   :  { %77 = vst [vmem:[#allocation5 + $0x8] sm:$0xff] %v60_v18  ;;  %v54_v34 = vrot.slane %v36_v25, 7  ;;  %v63_v35 = vsel %vm59_vm0, %v44_v19, %v52_v20  ;;  %v72_v38 = vsel %vm59_vm0, %v53_v28, %v45_v27  ;;  %v47_v39 = vrot.slane %v37_v30, 7 }
   0xe   :  { %78 = vst [vmem:[#allocation5 + $0x10] sm:$0xff] %v69_v22  ;;  %v55_v40 = vrot.slane %v38_v31, 7  ;;  %v64_v41 = vsel %vm59_vm0, %v45_v27, %v53_v28  ;;  %v48_v43 = vrot.slane %v39_v36, 7  ;;  %v56_v44 = vrot.slane %v40_v37, 7 }
   0xf   :  { %79 = vst [vmem:[#allocation5 + $0x18] sm:$0xff] %v61_v23  ;;  %v73_v42 = vsel %vm59_vm0, %v54_v34, %v46_v33  ;;  %v65_v45 = vsel %vm59_vm0, %v46_v33, %v54_v34 }
  0x10   :  { %80 = vst [vmem:[#allocation5 + $0x20] sm:$0xff] %v70_v26  ;;  %v74_v46 = vsel %vm59_vm0, %v55_v40, %v47_v39  ;;  %v66_v47 = vsel %vm59_vm0, %v47_v39, %v55_v40  ;;  %v75_v48 = vsel %vm59_vm0, %v56_v44, %v48_v43  ;;  %v67_v49 = vsel %vm59_vm0, %v48_v43, %v56_v44 }
  0x11   :  { %81 = vst [vmem:[#allocation5 + $0x28] sm:$0xff] %v62_v29 }
  0x12   :  { %82 = vst [vmem:[#allocation5 + $0x30] sm:$0xff] %v71_v32 }
  0x13   :  { %83 = vst [vmem:[#allocation5 + $0x38] sm:$0xff] %v63_v35 }
  0x14   :  { %84 = vst [vmem:[#allocation5 + $0x40] sm:$0xff] %v72_v38 }
  0x15   :  { %85 = vst [vmem:[#allocation5 + $0x48] sm:$0xff] %v64_v41 }
  0x16   :  { %86 = vst [vmem:[#allocation5 + $0x50] sm:$0xff] %v73_v42 }
  0x17   :  { %87 = vst [vmem:[#allocation5 + $0x58] sm:$0xff] %v65_v45 }
  0x18   :  { %88 = vst [vmem:[#allocation5 + $0x60] sm:$0xff] %v74_v46 }
  0x19   :  { %89 = vst [vmem:[#allocation5 + $0x68] sm:$0xff] %v66_v47 }
  0x1a   :  { %90 = vst [vmem:[#allocation5 + $0x70] sm:$0xff] %v75_v48 }
  0x1b   :  { %91 = vst [vmem:[#allocation5 + $0x78] sm:$0xff] %v67_v49 }
  0x1c   :  { %104 = dma.vmem_to_hbm [thread:$0]  %s97_s13, 2048, %s99_s16, [#allocation4], %s168_s11, %s168_s11, %s169_s12  }
  0x1d   :  { %165 = dma.done.wait [#allocation4], 2048  }
  0x1e   :  { %166 = vsyncadd [#allocation4], 4294965248 }
  0x1f   :  { %109 = vsyncpa [#allocation3], 1 }
  0x20   :  { %110 = vsyncpa [#allocation4], 1 }

// kernel: _double_conv_impl.5
= control target key start
LH: loop header
LB: loop body
LE: loop exit
PB: predicated region body
PF: predicated region fallthrough
CT: control target
= control target key end

     0   :  { %s807_s12 = smov 0   ;;  %s809_s13 = smov 0   ;;  %s1026_s0 = inlined_call_operand.vmem [shape: bf16[2,16,24,128], index: 0, kind: input, shape index: {}]   ;;  %s1027_s1 = inlined_call_operand.vmem [shape: f32[1,128], index: 1, kind: input, shape index: {}]   ;;  %s1028_s2 = inlined_call_operand.vmem [shape: f32[1,128], index: 2, kind: input, shape index: {}]   ;;  %s1029_s3 = inlined_call_operand.vmem [shape: f32[2,16,24,128], index: 3, kind: output, shape index: {}]  }
   0x1   :  { %s811_s14 = smov 0  }
   0x2 LB: > { %s25_s15 = sadd.s32 1, %s781_s13  ;;  %p611_p0 = scmp.ge.s32.totalorder %s785_s14, 1  ;;  %s785_s14 = sphi %s811_s14, %s13_s14   ;;  %s781_s13 = sphi %s809_s13, %s1031_s13   ;;  %s777_s12 = sphi %s807_s12, %s1030_s12  }
   0x3   : > { %p27_p1 = scmp.ge.s32.totalorder %s25_s15, 2  ;;  %p159_p2 = scmp.lt.s32.totalorder %s785_s14, 3 }
   0x5   : > { %s1033_s15 = smov (%p27_p1, %s25_s15), 0  ;;  %p160_p3 = pnand %p611_p0, %p159_p2 }
   0x6   : > { %p194_p4 = scmp.lt.s32.totalorder (!%p160_p3), %s777_s12, 1 }
   0x7   : > { %163 = sbr.rel (%p160_p3) target bundleno = 73 (0x49), region = 32 }
   0xc   : > { %s1035_s12 = smov (!%p194_p4, %s777_s12), 1  ;;  %v836_v0 = vld [vmem:[%s1027_s1] ss:$0 sm:$0xff] }
   0xd   : > { %s735_s16 = smul.u32 192, %s1035_s12  ;;  %v844_v5 = vld [vmem:[%s1028_s2] ss:$0 sm:$0xff] }
   0xe   : > { %s736_s24 = smul.u32 384, %s1035_s12 }
   0xf   : > { %s831_s19 = scalar_lea.vmem %s1026_s0, %s735_s16 }
  0x10   : > { %v617_v1 = vld [vmem:[%s831_s19] sm:$0xff]   ;;  %v712_v2 = vld [vmem:[%s831_s19 + $0x8] sm:$0xff]   ;;  %v713_v3 = vld [vmem:[%s831_s19 + $0x10] sm:$0xff]   ;;  %s863_s27 = scalar_lea.vmem %s1029_s3, %s736_s24 }
  0x11   : > { %v618_v4 = vunpack.c.l.bf16 %v617_v1  ;;  %v619_v6 = vunpack.c.h.bf16 %v617_v1  ;;  %v622_v7 = vunpack.c.l.bf16 %v712_v2  ;;  %v623_v8 = vunpack.c.h.bf16 %v712_v2  ;;  %v714_v9 = vld [vmem:[%s831_s19 + $0x18] sm:$0xff]   ;;  %v715_v30 = vld [vmem:[%s831_s19 + $0x20] sm:$0xff]   ;;  %v716_v31 = vld [vmem:[%s831_s19 + $0x28] sm:$0xff]  }
  0x12   : > { %v626_v10 = vunpack.c.l.bf16 %v713_v3  ;;  %v627_v11 = vunpack.c.h.bf16 %v713_v3  ;;  %v630_v12 = vunpack.c.l.bf16 %v714_v9  ;;  %v631_v13 = vunpack.c.h.bf16 %v714_v9  ;;  %v717_v36 = vld [vmem:[%s831_s19 + $0x30] sm:$0xff]   ;;  %v718_v37 = vld [vmem:[%s831_s19 + $0x38] sm:$0xff]   ;;  %v719_v3 = vld [vmem:[%s831_s19 + $0x40] sm:$0xff]  }
  0x13   : > { %v316_v14 = vmul.f32 %v836_v0, %v618_v4  ;;  %v317_v15 = vmul.f32 %v836_v0, %v619_v6  ;;  %v318_v16 = vmul.f32 %v836_v0, %v622_v7  ;;  %v319_v17 = vmul.f32 %v836_v0, %v623_v8  ;;  %v720_v4 = vld [vmem:[%s831_s19 + $0x48] sm:$0xff]   ;;  %v721_v6 = vld [vmem:[%s831_s19 + $0x50] sm:$0xff]  }
  0x14   : > { %v320_v18 = vmul.f32 %v836_v0, %v626_v10  ;;  %v321_v19 = vmul.f32 %v836_v0, %v627_v11  ;;  %v322_v20 = vmul.f32 %v836_v0, %v630_v12  ;;  %v323_v21 = vmul.f32 %v836_v0, %v631_v13  ;;  %v722_v11 = vld [vmem:[%s831_s19 + $0x58] sm:$0xff]  }
  0x15   : > { %v367_v22 = vadd.f32 %v844_v5, %v316_v14  ;;  %v368_v23 = vadd.f32 %v844_v5, %v317_v15  ;;  %v369_v24 = vadd.f32 %v844_v5, %v318_v16  ;;  %v370_v25 = vadd.f32 %v844_v5, %v319_v17 }
  0x16   : > { %v371_v26 = vadd.f32 %v844_v5, %v320_v18  ;;  %v372_v27 = vadd.f32 %v844_v5, %v321_v19  ;;  %v373_v28 = vadd.f32 %v844_v5, %v322_v20  ;;  %v374_v29 = vadd.f32 %v844_v5, %v323_v21 }
  0x17   : > { %v415_v32 = vmax.f32 %v367_v22, 0.0  ;;  %v416_v33 = vmax.f32 %v368_v23, 0.0  ;;  %v417_v34 = vmax.f32 %v369_v24, 0.0  ;;  %v418_v35 = vmax.f32 %v370_v25, 0.0 }
  0x18   : > { %v419_v38 = vmax.f32 %v371_v26, 0.0  ;;  %v420_v39 = vmax.f32 %v372_v27, 0.0  ;;  %v421_v40 = vmax.f32 %v373_v28, 0.0  ;;  %v422_v41 = vmax.f32 %v374_v29, 0.0 }
  0x19   : > { %463 = vst [vmem:[%s863_s27] sm:$0xff] %v415_v32  ;;  %v634_v42 = vunpack.c.l.bf16 %v715_v30  ;;  %v635_v43 = vunpack.c.h.bf16 %v715_v30  ;;  %v638_v44 = vunpack.c.l.bf16 %v716_v31  ;;  %v639_v45 = vunpack.c.h.bf16 %v716_v31 }
  0x1a   : > { %464 = vst [vmem:[%s863_s27 + $0x8] sm:$0xff] %v416_v33  ;;  %v642_v46 = vunpack.c.l.bf16 %v717_v36  ;;  %v643_v47 = vunpack.c.h.bf16 %v717_v36  ;;  %v646_v48 = vunpack.c.l.bf16 %v718_v37  ;;  %v647_v49 = vunpack.c.h.bf16 %v718_v37 }
  0x1b   : > { %465 = vst [vmem:[%s863_s27 + $0x10] sm:$0xff] %v417_v34  ;;  %v324_v50 = vmul.f32 %v836_v0, %v634_v42  ;;  %v325_v51 = vmul.f32 %v836_v0, %v635_v43  ;;  %v326_v52 = vmul.f32 %v836_v0, %v638_v44  ;;  %v327_v53 = vmul.f32 %v836_v0, %v639_v45  ;;  %v725_v42 = vld [vmem:[%s831_s19 + $0x70] sm:$0xff]  }
  0x1c   : > { %466 = vst [vmem:[%s863_s27 + $0x18] sm:$0xff] %v418_v35  ;;  %v328_v54 = vmul.f32 %v836_v0, %v642_v46  ;;  %v329_v55 = vmul.f32 %v836_v0, %v643_v47  ;;  %v330_v56 = vmul.f32 %v836_v0, %v646_v48  ;;  %v331_v57 = vmul.f32 %v836_v0, %v647_v49  ;;  %v726_v47 = vld [vmem:[%s831_s19 + $0x78] sm:$0xff]  }
  0x1d   : > { %467 = vst [vmem:[%s863_s27 + $0x20] sm:$0xff] %v419_v38  ;;  %v375_v58 = vadd.f32 %v844_v5, %v324_v50  ;;  %v376_v59 = vadd.f32 %v844_v5, %v325_v51  ;;  %v377_v60 = vadd.f32 %v844_v5, %v326_v52  ;;  %v378_v61 = vadd.f32 %v844_v5, %v327_v53 }
  0x1e   : > { %468 = vst [vmem:[%s863_s27 + $0x28] sm:$0xff] %v420_v39  ;;  %v379_v62 = vadd.f32 %v844_v5, %v328_v54  ;;  %v380_v63 = vadd.f32 %v844_v5, %v329_v55  ;;  %v381_v1 = vadd.f32 %v844_v5, %v330_v56  ;;  %v382_v2 = vadd.f32 %v844_v5, %v331_v57 }
  0x1f   : > { %469 = vst [vmem:[%s863_s27 + $0x30] sm:$0xff] %v421_v40  ;;  %v423_v7 = vmax.f32 %v375_v58, 0.0  ;;  %v424_v8 = vmax.f32 %v376_v59, 0.0  ;;  %v425_v9 = vmax.f32 %v377_v60, 0.0  ;;  %v426_v10 = vmax.f32 %v378_v61, 0.0  ;;  %v723_v40 = vld [vmem:[%s831_s19 + $0x60] sm:$0xff]  }
  0x20   : > { %470 = vst [vmem:[%s863_s27 + $0x38] sm:$0xff] %v422_v41  ;;  %v427_v12 = vmax.f32 %v379_v62, 0.0  ;;  %v428_v13 = vmax.f32 %v380_v63, 0.0  ;;  %v429_v14 = vmax.f32 %v381_v1, 0.0  ;;  %v430_v15 = vmax.f32 %v382_v2, 0.0  ;;  %v724_v41 = vld [vmem:[%s831_s19 + $0x68] sm:$0xff]  }
  0x21   : > { %471 = vst [vmem:[%s863_s27 + $0x40] sm:$0xff] %v423_v7  ;;  %v650_v16 = vunpack.c.l.bf16 %v719_v3  ;;  %v651_v17 = vunpack.c.h.bf16 %v719_v3  ;;  %v654_v18 = vunpack.c.l.bf16 %v720_v4  ;;  %v655_v19 = vunpack.c.h.bf16 %v720_v4 }
  0x22   : > { %472 = vst [vmem:[%s863_s27 + $0x48] sm:$0xff] %v424_v8  ;;  %v658_v20 = vunpack.c.l.bf16 %v721_v6  ;;  %v659_v21 = vunpack.c.h.bf16 %v721_v6  ;;  %v662_v22 = vunpack.c.l.bf16 %v722_v11  ;;  %v663_v23 = vunpack.c.h.bf16 %v722_v11 }
  0x23   : > { %473 = vst [vmem:[%s863_s27 + $0x50] sm:$0xff] %v425_v9  ;;  %v332_v24 = vmul.f32 %v836_v0, %v650_v16  ;;  %v333_v25 = vmul.f32 %v836_v0, %v651_v17  ;;  %v334_v26 = vmul.f32 %v836_v0, %v654_v18  ;;  %v335_v27 = vmul.f32 %v836_v0, %v655_v19  ;;  %v729_v16 = vld [vmem:[%s831_s19 + $0x90] sm:$0xff]  }
  0x24   : > { %474 = vst [vmem:[%s863_s27 + $0x58] sm:$0xff] %v426_v10  ;;  %v336_v28 = vmul.f32 %v836_v0, %v658_v20  ;;  %v337_v29 = vmul.f32 %v836_v0, %v659_v21  ;;  %v338_v30 = vmul.f32 %v836_v0, %v662_v22  ;;  %v339_v31 = vmul.f32 %v836_v0, %v663_v23  ;;  %v730_v21 = vld [vmem:[%s831_s19 + $0x98] sm:$0xff]  }
  0x25   : > { %475 = vst [vmem:[%s863_s27 + $0x60] sm:$0xff] %v427_v12  ;;  %v383_v32 = vadd.f32 %v844_v5, %v332_v24  ;;  %v384_v33 = vadd.f32 %v844_v5, %v333_v25  ;;  %v385_v34 = vadd.f32 %v844_v5, %v334_v26  ;;  %v386_v35 = vadd.f32 %v844_v5, %v335_v27 }
  0x26   : > { %476 = vst [vmem:[%s863_s27 + $0x68] sm:$0xff] %v428_v13  ;;  %v387_v36 = vadd.f32 %v844_v5, %v336_v28  ;;  %v388_v37 = vadd.f32 %v844_v5, %v337_v29  ;;  %v389_v38 = vadd.f32 %v844_v5, %v338_v30  ;;  %v390_v39 = vadd.f32 %v844_v5, %v339_v31 }
  0x27   : > { %477 = vst [vmem:[%s863_s27 + $0x70] sm:$0xff] %v429_v14  ;;  %v431_v43 = vmax.f32 %v383_v32, 0.0  ;;  %v432_v44 = vmax.f32 %v384_v33, 0.0  ;;  %v433_v45 = vmax.f32 %v385_v34, 0.0  ;;  %v434_v46 = vmax.f32 %v386_v35, 0.0  ;;  %v727_v14 = vld [vmem:[%s831_s19 + $0x80] sm:$0xff]  }
  0x28   : > { %478 = vst [vmem:[%s863_s27 + $0x78] sm:$0xff] %v430_v15  ;;  %v435_v48 = vmax.f32 %v387_v36, 0.0  ;;  %v436_v49 = vmax.f32 %v388_v37, 0.0  ;;  %v437_v50 = vmax.f32 %v389_v38, 0.0  ;;  %v438_v51 = vmax.f32 %v390_v39, 0.0  ;;  %v728_v15 = vld [vmem:[%s831_s19 + $0x88] sm:$0xff]  }
  0x29   : > { %479 = vst [vmem:[%s863_s27 + $0x80] sm:$0xff] %v431_v43  ;;  %v666_v52 = vunpack.c.l.bf16 %v723_v40  ;;  %v667_v53 = vunpack.c.h.bf16 %v723_v40  ;;  %v670_v54 = vunpack.c.l.bf16 %v724_v41  ;;  %v671_v55 = vunpack.c.h.bf16 %v724_v41 }
  0x2a   : > { %480 = vst [vmem:[%s863_s27 + $0x88] sm:$0xff] %v432_v44  ;;  %v674_v56 = vunpack.c.l.bf16 %v725_v42  ;;  %v675_v57 = vunpack.c.h.bf16 %v725_v42  ;;  %v678_v58 = vunpack.c.l.bf16 %v726_v47  ;;  %v679_v59 = vunpack.c.h.bf16 %v726_v47 }
  0x2b   : > { %481 = vst [vmem:[%s863_s27 + $0x90] sm:$0xff] %v433_v45  ;;  %v340_v60 = vmul.f32 %v836_v0, %v666_v52  ;;  %v341_v61 = vmul.f32 %v836_v0, %v667_v53  ;;  %v342_v62 = vmul.f32 %v836_v0, %v670_v54  ;;  %v343_v63 = vmul.f32 %v836_v0, %v671_v55  ;;  %v733_v52 = vld [vmem:[%s831_s19 + $0xb0] sm:$0xff]  }
  0x2c   : > { %482 = vst [vmem:[%s863_s27 + $0x98] sm:$0xff] %v434_v46  ;;  %v344_v1 = vmul.f32 %v836_v0, %v674_v56  ;;  %v345_v2 = vmul.f32 %v836_v0, %v675_v57  ;;  %v346_v3 = vmul.f32 %v836_v0, %v678_v58  ;;  %v347_v4 = vmul.f32 %v836_v0, %v679_v59  ;;  %v734_v57 = vld [vmem:[%s831_s19 + $0xb8] sm:$0xff]  }
  0x2d   : > { %483 = vst [vmem:[%s863_s27 + $0xa0] sm:$0xff] %v435_v48  ;;  %v391_v6 = vadd.f32 %v844_v5, %v340_v60  ;;  %v392_v7 = vadd.f32 %v844_v5, %v341_v61  ;;  %v393_v8 = vadd.f32 %v844_v5, %v342_v62  ;;  %v394_v9 = vadd.f32 %v844_v5, %v343_v63 }
  0x2e   : > { %484 = vst [vmem:[%s863_s27 + $0xa8] sm:$0xff] %v436_v49  ;;  %v395_v10 = vadd.f32 %v844_v5, %v344_v1  ;;  %v396_v11 = vadd.f32 %v844_v5, %v345_v2  ;;  %v397_v12 = vadd.f32 %v844_v5, %v346_v3  ;;  %v398_v13 = vadd.f32 %v844_v5, %v347_v4 }
  0x2f   : > { %485 = vst [vmem:[%s863_s27 + $0xb0] sm:$0xff] %v437_v50  ;;  %v439_v17 = vmax.f32 %v391_v6, 0.0  ;;  %v440_v18 = vmax.f32 %v392_v7, 0.0  ;;  %v441_v19 = vmax.f32 %v393_v8, 0.0  ;;  %v442_v20 = vmax.f32 %v394_v9, 0.0  ;;  %v731_v50 = vld [vmem:[%s831_s19 + $0xa0] sm:$0xff]  }
  0x30   : > { %486 = vst [vmem:[%s863_s27 + $0xb8] sm:$0xff] %v438_v51  ;;  %v443_v22 = vmax.f32 %v395_v10, 0.0  ;;  %v444_v23 = vmax.f32 %v396_v11, 0.0  ;;  %v445_v24 = vmax.f32 %v397_v12, 0.0  ;;  %v446_v25 = vmax.f32 %v398_v13, 0.0  ;;  %v732_v51 = vld [vmem:[%s831_s19 + $0xa8] sm:$0xff]  }
  0x31   : > { %487 = vst [vmem:[%s863_s27 + $0xc0] sm:$0xff] %v439_v17  ;;  %v682_v26 = vunpack.c.l.bf16 %v727_v14  ;;  %v683_v27 = vunpack.c.h.bf16 %v727_v14  ;;  %v686_v28 = vunpack.c.l.bf16 %v728_v15  ;;  %v687_v29 = vunpack.c.h.bf16 %v728_v15 }
  0x32   : > { %488 = vst [vmem:[%s863_s27 + $0xc8] sm:$0xff] %v440_v18  ;;  %v690_v30 = vunpack.c.l.bf16 %v729_v16  ;;  %v691_v31 = vunpack.c.h.bf16 %v729_v16  ;;  %v694_v32 = vunpack.c.l.bf16 %v730_v21  ;;  %v695_v33 = vunpack.c.h.bf16 %v730_v21 }
  0x33   : > { %489 = vst [vmem:[%s863_s27 + $0xd0] sm:$0xff] %v441_v19  ;;  %v348_v34 = vmul.f32 %v836_v0, %v682_v26  ;;  %v349_v35 = vmul.f32 %v836_v0, %v683_v27  ;;  %v350_v36 = vmul.f32 %v836_v0, %v686_v28  ;;  %v351_v37 = vmul.f32 %v836_v0, %v687_v29 }
  0x34   : > { %490 = vst [vmem:[%s863_s27 + $0xd8] sm:$0xff] %v442_v20  ;;  %v352_v38 = vmul.f32 %v836_v0, %v690_v30  ;;  %v353_v39 = vmul.f32 %v836_v0, %v691_v31  ;;  %v354_v40 = vmul.f32 %v836_v0, %v694_v32  ;;  %v355_v41 = vmul.f32 %v836_v0, %v695_v33 }
  0x35   : > { %491 = vst [vmem:[%s863_s27 + $0xe0] sm:$0xff] %v443_v22  ;;  %v399_v42 = vadd.f32 %v844_v5, %v348_v34  ;;  %v400_v43 = vadd.f32 %v844_v5, %v349_v35  ;;  %v401_v44 = vadd.f32 %v844_v5, %v350_v36  ;;  %v402_v45 = vadd.f32 %v844_v5, %v351_v37 }
  0x36   : > { %492 = vst [vmem:[%s863_s27 + $0xe8] sm:$0xff] %v444_v23  ;;  %v403_v46 = vadd.f32 %v844_v5, %v352_v38  ;;  %v404_v47 = vadd.f32 %v844_v5, %v353_v39  ;;  %v405_v48 = vadd.f32 %v844_v5, %v354_v40  ;;  %v406_v49 = vadd.f32 %v844_v5, %v355_v41 }
  0x37   : > { %493 = vst [vmem:[%s863_s27 + $0xf0] sm:$0xff] %v445_v24  ;;  %v447_v53 = vmax.f32 %v399_v42, 0.0  ;;  %v448_v54 = vmax.f32 %v400_v43, 0.0  ;;  %v449_v55 = vmax.f32 %v401_v44, 0.0  ;;  %v450_v56 = vmax.f32 %v402_v45, 0.0 }
  0x38   : > { %494 = vst [vmem:[%s863_s27 + $0xf8] sm:$0xff] %v446_v25  ;;  %v451_v58 = vmax.f32 %v403_v46, 0.0  ;;  %v452_v59 = vmax.f32 %v404_v47, 0.0  ;;  %v453_v60 = vmax.f32 %v405_v48, 0.0  ;;  %v454_v61 = vmax.f32 %v406_v49, 0.0 }
  0x39   : > { %495 = vst [vmem:[%s863_s27 + $0x100] sm:$0xff] %v447_v53  ;;  %v698_v62 = vunpack.c.l.bf16 %v731_v50  ;;  %v699_v63 = vunpack.c.h.bf16 %v731_v50  ;;  %v702_v1 = vunpack.c.l.bf16 %v732_v51  ;;  %v703_v2 = vunpack.c.h.bf16 %v732_v51 }
  0x3a   : > { %496 = vst [vmem:[%s863_s27 + $0x108] sm:$0xff] %v448_v54  ;;  %v706_v3 = vunpack.c.l.bf16 %v733_v52  ;;  %v707_v4 = vunpack.c.h.bf16 %v733_v52  ;;  %v710_v6 = vunpack.c.l.bf16 %v734_v57  ;;  %v711_v7 = vunpack.c.h.bf16 %v734_v57 }
  0x3b   : > { %497 = vst [vmem:[%s863_s27 + $0x110] sm:$0xff] %v449_v55  ;;  %v356_v8 = vmul.f32 %v836_v0, %v698_v62  ;;  %v357_v9 = vmul.f32 %v836_v0, %v699_v63  ;;  %v358_v10 = vmul.f32 %v836_v0, %v702_v1  ;;  %v359_v11 = vmul.f32 %v836_v0, %v703_v2 }
  0x3c   : > { %498 = vst [vmem:[%s863_s27 + $0x118] sm:$0xff] %v450_v56  ;;  %v360_v12 = vmul.f32 %v836_v0, %v706_v3  ;;  %v361_v13 = vmul.f32 %v836_v0, %v707_v4  ;;  %v362_v14 = vmul.f32 %v836_v0, %v710_v6  ;;  %v363_v15 = vmul.f32 %v836_v0, %v711_v7 }
  0x3d   : > { %499 = vst [vmem:[%s863_s27 + $0x120] sm:$0xff] %v451_v58  ;;  %v407_v16 = vadd.f32 %v844_v5, %v356_v8  ;;  %v408_v17 = vadd.f32 %v844_v5, %v357_v9  ;;  %v409_v18 = vadd.f32 %v844_v5, %v358_v10  ;;  %v410_v19 = vadd.f32 %v844_v5, %v359_v11 }
  0x3e   : > { %500 = vst [vmem:[%s863_s27 + $0x128] sm:$0xff] %v452_v59  ;;  %v411_v20 = vadd.f32 %v844_v5, %v360_v12  ;;  %v412_v21 = vadd.f32 %v844_v5, %v361_v13  ;;  %v413_v24 = vadd.f32 %v844_v5, %v362_v14  ;;  %v414_v26 = vadd.f32 %v844_v5, %v363_v15 }
  0x3f   : > { %501 = vst [vmem:[%s863_s27 + $0x130] sm:$0xff] %v453_v60  ;;  %v455_v0 = vmax.f32 %v407_v16, 0.0  ;;  %v456_v22 = vmax.f32 %v408_v17, 0.0  ;;  %v457_v23 = vmax.f32 %v409_v18, 0.0  ;;  %v458_v25 = vmax.f32 %v410_v19, 0.0 }
  0x40   : > { %502 = vst [vmem:[%s863_s27 + $0x138] sm:$0xff] %v454_v61  ;;  %v459_v27 = vmax.f32 %v411_v20, 0.0  ;;  %v460_v28 = vmax.f32 %v412_v21, 0.0  ;;  %v461_v29 = vmax.f32 %v413_v24, 0.0  ;;  %v462_v30 = vmax.f32 %v414_v26, 0.0 }
  0x41   : > { %503 = vst [vmem:[%s863_s27 + $0x140] sm:$0xff] %v455_v0 }
  0x42   : > { %504 = vst [vmem:[%s863_s27 + $0x148] sm:$0xff] %v456_v22 }
  0x43   : > { %505 = vst [vmem:[%s863_s27 + $0x150] sm:$0xff] %v457_v23 }
  0x44   : > { %506 = vst [vmem:[%s863_s27 + $0x158] sm:$0xff] %v458_v25 }
  0x45   : > { %507 = vst [vmem:[%s863_s27 + $0x160] sm:$0xff] %v459_v27 }
  0x46   : > { %508 = vst [vmem:[%s863_s27 + $0x168] sm:$0xff] %v460_v28 }
  0x47   : > { %509 = vst [vmem:[%s863_s27 + $0x170] sm:$0xff] %v461_v29 }
  0x48   : > { %510 = vst [vmem:[%s863_s27 + $0x178] sm:$0xff] %v462_v30 }
  0x49 PF: > { %s13_s14 = sadd.s32 1, %s785_s14   ;;  %s1030_s12 = smov %s781_s13 }
  0x4a   : > { %p10_p5 = scmp.ge.s32.totalorder %s13_s14, 4   ;;  %s1031_s13 = smov %s1033_s15 }
  0x4c   :  { %12 = sbr.rel (!%p10_p5) target bundleno = 2 (0x2), region = 62 }

// kernel: _double_conv_impl.3
= control target key start
LH: loop header
LB: loop body
LE: loop exit
PB: predicated region body
PF: predicated region fallthrough
CT: control target
= control target key end

     0   :  { %s6462_s18 = smov 0   ;;  %s6464_s19 = smov 0   ;;  %s8718_s0 = inlined_call_operand.vmem [shape: bf16[2,18,24,128], index: 0, kind: input, shape index: {}, may-alias: {0,1,2}]   ;;  %s8719_s1 = inlined_call_operand.vmem [shape: bf16[2,18,24,128], index: 1, kind: input, shape index: {}, may-alias: {0,1,2}]   ;;  %s8720_s2 = inlined_call_operand.vmem [shape: bf16[2,18,24,128], index: 2, kind: input, shape index: {}, may-alias: {0,1,2}]   ;;  %s8721_s3 = inlined_call_operand.vmem [shape: bf16[3,384,128], index: 3, kind: input, shape index: {}]   ;;  %s8722_s4 = inlined_call_operand.vmem [shape: bf16[2,16,24,128], index: 4, kind: output, shape index: {0}]   ;;  %s8723_s5 = inlined_call_operand.vmem [shape: f32[2,1,2,128], index: 5, kind: output, shape index: {1}]  }
   0x1   :  { %s6466_s20 = smov 0  }
   0x2 LB: > { %s28_s21 = sadd.s32 1, %s6425_s19  ;;  %p5298_p0 = scmp.ge.s32.totalorder %s6429_s20, 1  ;;  %s6429_s20 = sphi %s6466_s20, %s16_s20   ;;  %s6425_s19 = sphi %s6464_s19, %s9249_s19   ;;  %s6421_s18 = sphi %s6462_s18, %s9248_s18  }
   0x3   : > { %p30_p1 = scmp.ge.s32.totalorder %s28_s21, 2  ;;  %p276_p2 = scmp.lt.s32.totalorder %s6429_s20, 3 }
   0x5   : > { %s9251_s21 = smov (%p30_p1, %s28_s21), 0  ;;  %p277_p3 = pnand %p5298_p0, %p276_p2 }
   0x7   : > { %280 = sbr.rel (%p277_p3) target bundleno = 1059 (0x423), region = 36 }
   0xc   : > { %v5839_v0 = vld [vmem:[%s8721_s3 + $0xf8] sm:$0xff]  ;;  %p355_p4 = scmp.lt.s32.totalorder %s6421_s18, 1  ;;  %v5838_v1 = vld [vmem:[%s8721_s3 + $0xf0] sm:$0xff]  ;;  %v5837_v2 = vld [vmem:[%s8721_s3 + $0xe8] sm:$0xff]  ;;  %vm703_vm0 = vsmask.f32 256 }
   0xd   : > { %2288 = vmatpush.bf16.msra.mxu0 %v5839_v0  ;;  %6311 = vmatpush.bf16.msra.mxu1 %v5839_v0  ;;  %v5836_v8 = vld [vmem:[%s8721_s3 + $0xe0] sm:$0xff]  ;;  %v5835_v13 = vld [vmem:[%s8721_s3 + $0xd8] sm:$0xff]  ;;  %v5834_v21 = vld [vmem:[%s8721_s3 + $0xd0] sm:$0xff]  ;;  %vm960_vm1 = vcmask 1040384   ;;  %vm978_vm3 = vsmask.f32 7424 }
   0xe   : > { %s9253_s18 = smov (!%p355_p4, %s6421_s18), 1  ;;  %6312 = vmatpush.bf16.msra.mxu2 %v5839_v0  ;;  %6313 = vmatpush.bf16.msra.mxu3 %v5839_v0  ;;  %v5833_v37 = vld [vmem:[%s8721_s3 + $0xc8] sm:$0xff]  ;;  %vm6566_vm2 = vmand %vm960_vm1, %vm703_vm0  ;;  %v5832_v53 = vld [vmem:[%s8721_s3 + $0xc0] sm:$0xff]  ;;  %vm1075_vm4 = vcmask 1043456   ;;  %vm1076_vm5 = vsmask.f32 3328 }
   0xf   : > { %s6489_s26 = smul.u32 216, %s9253_s18  ;;  %v5855_v58 = vld [vmem:[%s8721_s3 + $0x178] sm:$0xff]  ;;  %vm7153_vm6 = vmand %vm1075_vm4, %vm1076_vm5  ;;  %s5303_s23 = sshll.u32 %s9253_s18, 1 }
  0x10   : > { %v5807_v59 = vld [vmem:[%s8721_s3 + $0x38] sm:$0xff]  ;;  %s6369_s12 = smul.u32 192, %s9253_s18  ;;  %s415_s27 = scalar_lea.vmem %s8723_s5, %s5303_s23 }
  0x11   : > { %2289 = vmatpush.bf16.msra.mxu0 %v5838_v1  ;;  %6314 = vmatpush.bf16.msra.mxu1 %v5838_v1  ;;  %s6498_s6 = scalar_lea.vmem %s8718_s0, %s6489_s26  ;;  %s5789_s11 = sadd.s32 192, %s6489_s26 }
  0x12   : > { %6315 = vmatpush.bf16.msra.mxu2 %v5838_v1  ;;  %6316 = vmatpush.bf16.msra.mxu3 %v5838_v1  ;;  %v420_v3 = vld [vmem:[%s6498_s6 + $0xc] sm:$0xff]   ;;  %v432_v4 = vld [vmem:[%s6498_s6 + $0x3c] sm:$0xff]   ;;  %v422_v7 = vld [vmem:[%s6498_s6 + $0x14] sm:$0xff]   ;;  %s6807_s14 = scalar_lea.vmem %s8719_s1, %s5789_s11  ;;  %s8251_s15 = scalar_lea.vmem %s8722_s4, %s6369_s12 }
  0x13   : > { %v444_v5 = vld [vmem:[%s6498_s6 + $0x6c] sm:$0xff]   ;;  %468 = vst [vmem:[#allocation2 + $0xc] sm:$0xff] %v420_v3   ;;  %v456_v6 = vld [vmem:[%s6498_s6 + $0x9c] sm:$0xff]   ;;  %v434_v10 = vld [vmem:[%s6498_s6 + $0x44] sm:$0xff]   ;;  %s5791_s16 = sadd.s32 204, %s6489_s26 }
  0x14   : > { %480 = vst [vmem:[#allocation2 + $0x3c] sm:$0xff] %v432_v4   ;;  %v424_v9 = vld [vmem:[%s6498_s6 + $0x1c] sm:$0xff]   ;;  %v436_v11 = vld [vmem:[%s6498_s6 + $0x4c] sm:$0xff]   ;;  %v446_v12 = vld [vmem:[%s6498_s6 + $0x74] sm:$0xff]   ;;  %s8512_s26 = scalar_lea.vmem %s8720_s2, %s5791_s16 }
  0x15   : > { %2290 = vmatpush.bf16.msra.mxu0 %v5837_v2  ;;  %6317 = vmatpush.bf16.msra.mxu1 %v5837_v2  ;;  %492 = vst [vmem:[#allocation2 + $0x6c] sm:$0xff] %v444_v5   ;;  %v448_v14 = vld [vmem:[%s6498_s6 + $0x7c] sm:$0xff]   ;;  %v458_v16 = vld [vmem:[%s6498_s6 + $0xa4] sm:$0xff]   ;;  %v460_v20 = vld [vmem:[%s6498_s6 + $0xac] sm:$0xff]  }
  0x16   : > { %6318 = vmatpush.bf16.msra.mxu2 %v5837_v2  ;;  %6319 = vmatpush.bf16.msra.mxu3 %v5837_v2  ;;  %504 = vst [vmem:[#allocation2 + $0x9c] sm:$0xff] %v456_v6  }
  0x17   : > { %470 = vst [vmem:[#allocation2 + $0x14] sm:$0xff] %v422_v7  }
  0x18   : > { %472 = vst [vmem:[#allocation2 + $0x1c] sm:$0xff] %v424_v9  }
  0x19   : > { %2291 = vmatpush.bf16.msra.mxu0 %v5836_v8  ;;  %6320 = vmatpush.bf16.msra.mxu1 %v5836_v8  ;;  %482 = vst [vmem:[#allocation2 + $0x44] sm:$0xff] %v434_v10  }
  0x1a   : > { %6321 = vmatpush.bf16.msra.mxu2 %v5836_v8  ;;  %6322 = vmatpush.bf16.msra.mxu3 %v5836_v8  ;;  %v6516_v15 = vld [vmem:[#allocation2 + $0xc] sm:$0xff]  ;;  %484 = vst [vmem:[#allocation2 + $0x4c] sm:$0xff] %v436_v11  }
  0x1b   : > { %v6519_v17 = vld [vmem:[#allocation2 + $0x3c] sm:$0xff]  ;;  %494 = vst [vmem:[#allocation2 + $0x74] sm:$0xff] %v446_v12   ;;  %v8759_v18 = vshrl.u32 %v6516_v15, 16  ;;  %v8760_v22 = vshll.u32 %v6516_v15, 16 }
  0x1c   : > { %v6522_v19 = vld [vmem:[#allocation2 + $0x6c] sm:$0xff]  ;;  %496 = vst [vmem:[#allocation2 + $0x7c] sm:$0xff] %v448_v14   ;;  %v8750_v23 = vshrl.u32 %v6519_v17, 16  ;;  %v8751_v29 = vshll.u32 %v6519_v17, 16  ;;  %v5815_v14 = vld [vmem:[%s8721_s3 + $0x78] sm:$0xff] }
  0x1d   : > { %2292 = vmatpush.bf16.msra.mxu0 %v5835_v13  ;;  %6323 = vmatpush.bf16.msra.mxu1 %v5835_v13  ;;  %v6530_v24 = vld [vmem:[#allocation2 + $0x9c] sm:$0xff]  ;;  %506 = vst [vmem:[#allocation2 + $0xa4] sm:$0xff] %v458_v16   ;;  %v6534_v25 = vrot.slane %v8759_v18, 7  ;;  %v8734_v26 = vshrl.u32 %v6522_v19, 16  ;;  %v8735_v30 = vshll.u32 %v6522_v19, 16 }
  0x1e   : > { %8903 = vst [vmem:[#allocation3_spill] sm:$0xff] %v6530_v24  ;;  %6324 = vmatpush.bf16.msra.mxu2 %v5835_v13  ;;  %6325 = vmatpush.bf16.msra.mxu3 %v5835_v13  ;;  %v1273_v27 = vld [vmem:[#allocation2 + $0x14] sm:$0xf]  ;;  %v6539_v28 = vrot.slane %v8750_v23, 7  ;;  %v8724_v31 = vshrl.u32 %v6530_v24, 16  ;;  %v8725_v34 = vshll.u32 %v6530_v24, 16 }
  0x1f   : > { %v6544_v32 = vld [vmem:[#allocation2 + $0x18] sm:$0xff]   ;;  %508 = vst [vmem:[#allocation2 + $0xac] sm:$0xff] %v460_v20   ;;  %v6548_v33 = vrot.slane %v8734_v26, 7  ;;  %v6551_v35 = vunpack.c.l.b16 %v1273_v27  ;;  %v1453_v38 = vor.u32 %v8760_v22, %v6534_v25 }
  0x20   : > { %v1285_v36 = vld [vmem:[#allocation2 + $0x44] sm:$0xf]  ;;  %v6561_v39 = vrot.slane %v8724_v31, 7  ;;  %v8762_v40 = vshrl.u32 %v6544_v32, 16  ;;  %v1513_v44 = vor.u32 %v8751_v29, %v6539_v28  ;;  %v8763_v52 = vshll.u32 %v6544_v32, 16  ;;  %v5847_v13 = vld [vmem:[%s8721_s3 + $0x138] sm:$0xff] }
  0x21   : > { %2293 = vmatpush.bf16.msra.mxu0 %v5834_v21  ;;  %6326 = vmatpush.bf16.msra.mxu1 %v5834_v21  ;;  %v6572_v42 = vpack.c.b16 %v6551_v35, %v6551_v35  ;;  %v6574_v43 = vld [vmem:[#allocation2 + $0x48] sm:$0xff]   ;;  %v1573_v45 = vor.u32 %v8735_v30, %v6548_v33  ;;  %v6582_v46 = vunpack.c.l.b16 %v1285_v36  ;;  %v1703_v54 = vsel %vm6566_vm2, 0, %v1453_v38  ;;  %v5806_v38 = vld [vmem:[%s8721_s3 + $0x30] sm:$0xff]  ;;  %v440_v26 = vld [vmem:[%s6498_s6 + $0x5c] sm:$0xff]  }
  0x22   : > { %6327 = vmatpush.bf16.msra.mxu2 %v5834_v21  ;;  %6328 = vmatpush.bf16.msra.mxu3 %v5834_v21  ;;  %v1297_v47 = vld [vmem:[#allocation2 + $0x74] sm:$0xf]  ;;  %v1633_v49 = vor.u32 %v8725_v34, %v6561_v39  ;;  %v6592_v51 = vrot.slane %v8762_v40, 7  ;;  %v8737_v57 = vshrl.u32 %v6574_v43, 16  ;;  %v8738_v61 = vshll.u32 %v6574_v43, 16  ;;  %488 = vst [vmem:[#allocation2 + $0x5c] sm:$0xff] %v440_v26  }
  0x23   : > { %v6584_v48 = vld [vmem:[#allocation2 + $0x78] sm:$0xff]   ;;  %v8755_v50 = vshrl.u32 %v6572_v42, 16  ;;  %v8757_v55 = vshll.u32 %v6572_v42, 16  ;;  %v6603_v56 = vpack.c.b16 %v6582_v46, %v6582_v46  ;;  %v6615_v62 = vunpack.c.l.b16 %v1297_v47  ;;  %v1288_v31 = vld [vmem:[#allocation2 + $0x50] sm:$0xf] }
  0x24   : > { %v8726_v63 = vshrl.u32 %v6584_v48, 16  ;;  %v1707_v0 = vsel %vm6566_vm2, 0, %v1513_v44  ;;  %v1711_v1 = vsel %vm6566_vm2, 0, %v1573_v45  ;;  %v6625_v3 = vrot.slane %v8737_v57, 7  ;;  %v1309_v4 = vld [vmem:[#allocation2 + $0xa4] sm:$0xf] }
  0x25   : > { %2294 = vmatpush.bf16.msra.mxu0 %v5833_v37  ;;  %6329 = vmatpush.bf16.msra.mxu1 %v5833_v37  ;;  %v1457_v60 = vrot.slane %v8755_v50, 7  ;;  %v8736_v2 = vshrl.u32 %v6603_v56, 16  ;;  %v1715_v5 = vsel %vm6566_vm2, 0, %v1633_v49  ;;  %v1468_v6 = vor.u32 %v8763_v52, %v6592_v51  ;;  %v1276_v44 = vld [vmem:[#allocation2 + $0x20] sm:$0xf]  ;;  %v452_v26 = vld [vmem:[%s6498_s6 + $0x8c] sm:$0xff]  }
  0x26   : > { %6330 = vmatpush.bf16.msra.mxu2 %v5833_v37  ;;  %6331 = vmatpush.bf16.msra.mxu3 %v5833_v37  ;;  %v8739_v7 = vshll.u32 %v6603_v56, 16  ;;  %v6635_v8 = vpack.c.b16 %v6615_v62, %v6615_v62  ;;  %v6643_v11 = vrot.slane %v8726_v63, 7  ;;  %v8731_v12 = vshll.u32 %v6584_v48, 16  ;;  %v6657_v27 = vld [vmem:[#allocation2 + $0xa8] sm:$0xff]   ;;  %v5854_v37 = vld [vmem:[%s8721_s3 + $0x170] sm:$0xff]  ;;  %500 = vst [vmem:[#allocation2 + $0x8c] sm:$0xff] %v452_v26  }
  0x27   : > { %v1460_v9 = vor.u32 %v8757_v55, %v1457_v60  ;;  %v1517_v10 = vrot.slane %v8736_v2, 7  ;;  %v1528_v16 = vor.u32 %v8738_v61, %v6625_v3  ;;  %8906 = vst [vmem:[#allocation4_spill] sm:$0xff] %v6657_v27  ;;  %v6659_v36 = vunpack.c.l.b16 %v1309_v4  ;;  %v450_v60 = vld [vmem:[%s6498_s6 + $0x84] sm:$0xff]  }
  0x28   : > { %v8728_v20 = vshrl.u32 %v6635_v8, 16  ;;  %v8733_v21 = vshll.u32 %v6635_v8, 16  ;;  %v1588_v49 = vor.u32 %v8731_v12, %v6643_v11  ;;  %v8727_v4 = vshrl.u32 %v6657_v27, 16  ;;  %v5853_v63 = vld [vmem:[%s8721_s3 + $0x168] sm:$0xff]  ;;  %498 = vst [vmem:[#allocation2 + $0x84] sm:$0xff] %v450_v60   ;;  %v513_v26 = vld [vmem:[%s6807_s14] sm:$0xff]  }
  0x29   : > { %2295 = vmatpush.bf16.msra.mxu0 %v5832_v53  ;;  %6332 = vmatpush.bf16.msra.mxu1 %v5832_v53  ;;  %8907 = vst [vmem:[#allocation5_spill] sm:$0xff] %v6659_v36  ;;  %v1520_v45 = vor.u32 %v8739_v7, %v1517_v10  ;;  %v5814_v10 = vld [vmem:[%s8721_s3 + $0x70] sm:$0xff]  ;;  %v1461_v34 = vsel %vm703_vm0, %v6534_v25, %v1460_v9  ;;  %v8730_v9 = vshll.u32 %v6657_v27, 16 }
  0x2a   : > { %6333 = vmatpush.bf16.msra.mxu2 %v5832_v53  ;;  %6334 = vmatpush.bf16.msra.mxu3 %v5832_v53  ;;  %v1577_v47 = vrot.slane %v8728_v20, 7  ;;  %v6676_v53 = vpack.c.b16 %v6659_v36, %v6659_v36  ;;  %v6707_v25 = vrot.slane %v8727_v4, 7  ;;  %v1867_v20 = vunpack.c.l.b16 %v1461_v34  ;;  %517 = vst [vmem:[#allocation2 + $0xc0] sm:$0xff] %v513_v26  }
  0x2c   : > { %2296 = vmatmul.bf16.vlgmr.msra.gmra.mxu0 %v1703_v54  ;;  %2326 = vmatmul.bf16.vlgmr.msra.gmra.mxu1 %v1707_v0  ;;  %8908 = vst [vmem:[#allocation6_spill] sm:$0xff] %v6676_v53  ;;  %v426_v54 = vld [vmem:[%s6498_s6 + $0x24] sm:$0xff]   ;;  %v6686_v0 = vsel %vm6566_vm2, 0, %v1468_v6  ;;  %v8729_v6 = vshrl.u32 %v6676_v53, 16  ;;  %v1648_v60 = vor.u32 %v8730_v9, %v6707_v25 }
  0x2d   : > { %2356 = vmatmul.bf16.vlgmr.msra.gmra.mxu2 %v1711_v1  ;;  %2386 = vmatmul.bf16.vlgmr.msra.gmra.mxu3 %v1715_v5  ;;  %474 = vst [vmem:[#allocation2 + $0x24] sm:$0xff] %v426_v54   ;;  %v6696_v1 = vsel %vm6566_vm2, 0, %v1528_v16  ;;  %v1580_v5 = vor.u32 %v8733_v21, %v1577_v47  ;;  %v1300_v54 = vld [vmem:[#allocation2 + $0x80] sm:$0xf]  ;;  %v6713_v16 = vunpack.c.l.b16 %v1276_v44  ;;  %v462_v47 = vld [vmem:[%s6498_s6 + $0xb4] sm:$0xff]   ;;  %v1869_v44 = vunpack.c.l.b16 %v6686_v0  ;;  %v428_v21 = vld [vmem:[%s6498_s6 + $0x2c] sm:$0xff]  }
  0x2e   : > { %2546 = vmatpush.bf16.msrb.mxu2 %v5855_v58  ;;  %2955 = vmatpush.bf16.msrb.mxu3 %v5807_v59  ;;  %v5846_v58 = vld [vmem:[%s8721_s3 + $0x130] sm:$0xff]  ;;  %v1637_v4 = vrot.slane %v8729_v6, 7  ;;  %510 = vst [vmem:[#allocation2 + $0xb4] sm:$0xff] %v462_v47   ;;  %v6739_v34 = vunpack.c.l.b16 %v1300_v54  ;;  %v5845_v47 = vld [vmem:[%s8721_s3 + $0x128] sm:$0xff] }
  0x2f   : > { %v438_v59 = vld [vmem:[%s6498_s6 + $0x54] sm:$0xff]   ;;  %2417 = vmatpush.bf16.msrb.mxu1 %v5847_v13  ;;  %3084 = vmatpush.bf16.msrb.mxu0 %v5815_v14  ;;  %v8732_v13 = vshll.u32 %v6676_v53, 16  ;;  %v5805_v14 = vld [vmem:[%s8721_s3 + $0x28] sm:$0xff]  ;;  %476 = vst [vmem:[#allocation2 + $0x2c] sm:$0xff] %v428_v21  }
  0x30   : > { %486 = vst [vmem:[#allocation2 + $0x54] sm:$0xff] %v438_v59   ;;  %v6722_v59 = vsel %vm6566_vm2, 0, %v1588_v49  ;;  %v6737_v49 = vunpack.c.l.b16 %v1288_v31  ;;  %v5813_v6 = vld [vmem:[%s8721_s3 + $0x68] sm:$0xff]  ;;  %v6750_v31 = vsel %vm6566_vm2, 0, %v1648_v60 }
  0x31   : > { %v1941_v60 = vunpack.c.l.b16 %v6750_v31 }
  0x32   : > { %2547 = vmatpush.bf16.msrb.mxu2 %v5854_v37  ;;  %2956 = vmatpush.bf16.msrb.mxu3 %v5806_v38  ;;  %v1521_v37 = vsel %vm703_vm0, %v6539_v28, %v1520_v45  ;;  %v1581_v38 = vsel %vm703_vm0, %v6548_v33, %v1580_v5  ;;  %v6732_v28 = vpack.c.b16 %v6713_v16, %v6713_v16  ;;  %v1893_v33 = vunpack.c.l.b16 %v6696_v1  ;;  %v1312_v5 = vld [vmem:[#allocation2 + $0xb0] sm:$0xf] }
  0x33   : > { %v1640_v45 = vor.u32 %v8732_v13, %v1637_v4  ;;  %2418 = vmatpush.bf16.msrb.mxu1 %v5846_v58  ;;  %3085 = vmatpush.bf16.msrb.mxu0 %v5814_v10  ;;  %v1891_v9 = vunpack.c.l.b16 %v1521_v37  ;;  %v1915_v12 = vunpack.c.l.b16 %v1581_v38  ;;  %v1917_v58 = vunpack.c.l.b16 %v6722_v59  ;;  %v5852_v4 = vld [vmem:[%s8721_s3 + $0x160] sm:$0xff] }
  0x34   : > { %v5804_v10 = vld [vmem:[%s8721_s3 + $0x20] sm:$0xff]  ;;  %v8756_v37 = vshrl.u32 %v6732_v28, 16  ;;  %v6763_v38 = vpack.c.b16 %v6737_v49, %v6737_v49  ;;  %v6770_v13 = vunpack.c.l.b16 %v1312_v5  ;;  %v2010_v5 = vpack.c.b16 %v1869_v44, %v1867_v20 }
  0x35   : > { %v1641_v54 = vsel %vm703_vm0, %v6561_v39, %v1640_v45  ;;  %v5844_v45 = vld [vmem:[%s8721_s3 + $0x120] sm:$0xff]  ;;  %v8761_v61 = vshll.u32 %v6732_v28, 16 }
  0x36   : > { %2548 = vmatpush.bf16.msrb.mxu2 %v5853_v63  ;;  %2957 = vmatpush.bf16.msrb.mxu3 %v5805_v14  ;;  %v6767_v63 = vpack.c.b16 %v6739_v34, %v6739_v34  ;;  %v1939_v14 = vunpack.c.l.b16 %v1641_v54  ;;  %8909 = vst [vmem:[#allocation7_spill] sm:$0xff] %v6770_v13  ;;  %v8747_v30 = vshrl.u32 %v6763_v38, 16  ;;  %v5812_v54 = vld [vmem:[%s8721_s3 + $0x60] sm:$0xff]  ;;  %v6784_v2 = vpack.c.b16 %v6770_v13, %v6770_v13 }
  0x37   : > { %2419 = vmatpush.bf16.msrb.mxu1 %v5845_v47  ;;  %3086 = vmatpush.bf16.msrb.mxu0 %v5813_v6  ;;  %v2026_v6 = vpack.c.b16 %v1893_v33, %v1891_v9  ;;  %v2042_v47 = vpack.c.b16 %v1917_v58, %v1915_v12  ;;  %v1472_v57 = vrot.slane %v8756_v37, 7  ;;  %v8748_v20 = vshll.u32 %v6763_v38, 16 }
  0x38   : > { %v8742_v39 = vshrl.u32 %v6767_v63, 16  ;;  %8910 = vst [vmem:[#allocation8_spill] sm:$0xff] %v6784_v2  ;;  %v2058_v7 = vpack.c.b16 %v1941_v60, %v1939_v14  ;;  %v1532_v21 = vrot.slane %v8747_v30, 7  ;;  %v8740_v44 = vshrl.u32 %v6784_v2, 16  ;;  %v454_v14 = vld [vmem:[%s6498_s6 + $0x94] sm:$0xff]  }
  0x39   : > { %v8745_v9 = vshll.u32 %v6767_v63, 16  ;;  %v8741_v33 = vshll.u32 %v6784_v2, 16  ;;  %v1475_v60 = vor.u32 %v8761_v61, %v1472_v57  ;;  %502 = vst [vmem:[#allocation2 + $0x94] sm:$0xff] %v454_v14  }
  0x3a   : > { %2549 = vmatpush.bf16.msrb.mxu2 %v5852_v4  ;;  %2958 = vmatpush.bf16.msrb.mxu3 %v5804_v10  ;;  %v430_v4 = vld [vmem:[%s6498_s6 + $0x34] sm:$0xff]   ;;  %v442_v10 = vld [vmem:[%s6498_s6 + $0x64] sm:$0xff]   ;;  %v1592_v12 = vrot.slane %v8742_v39, 7  ;;  %v1652_v58 = vrot.slane %v8740_v44, 7 }
  0x3b   : > { %2420 = vmatpush.bf16.msrb.mxu1 %v5844_v45  ;;  %3087 = vmatpush.bf16.msrb.mxu0 %v5812_v54  ;;  %478 = vst [vmem:[#allocation2 + $0x34] sm:$0xff] %v430_v4   ;;  %v1535_v45 = vor.u32 %v8748_v20, %v1532_v21  ;;  %v5851_v54 = vld [vmem:[%s8721_s3 + $0x158] sm:$0xff]  ;;  %v5850_v4 = vld [vmem:[%s8721_s3 + $0x150] sm:$0xff]  ;;  %v6849_v44 = vld [vmem:[#allocation2 + $0x24] sm:$0xff] }
  0x3c   : > { %490 = vst [vmem:[#allocation2 + $0x64] sm:$0xff] %v442_v10   ;;  %2301 = vmatmul.bf16.gmra.mxu0 %v2010_v5  ;;  %2331 = vmatmul.bf16.gmra.mxu1 %v2026_v6  ;;  %v5803_v5 = vld [vmem:[%s8721_s3 + $0x18] sm:$0xff]  ;;  %v1655_v57 = vor.u32 %v8741_v33, %v1652_v58  ;;  %v5802_v10 = vld [vmem:[%s8721_s3 + $0x10] sm:$0xff]  ;;  %v6934_v20 = vld [vmem:[#allocation2 + $0xc0] sm:$0xff]  }
  0x3d   : > { %2361 = vmatmul.bf16.gmra.mxu2 %v2042_v47  ;;  %2391 = vmatmul.bf16.gmra.mxu3 %v2058_v7  ;;  %v5843_v6 = vld [vmem:[%s8721_s3 + $0x118] sm:$0xff]  ;;  %v1595_v7 = vor.u32 %v8745_v9, %v1592_v12  ;;  %v1476_v12 = vsel %vm703_vm0, %v6592_v51, %v1475_v60  ;;  %v1536_v58 = vsel %vm703_vm0, %v6625_v3, %v1535_v45  ;;  %v1919_v60 = vunpack.c.h.b16 %v6722_v59 }
  0x3e   : > { %v5811_v47 = vld [vmem:[%s8721_s3 + $0x58] sm:$0xff]  ;;  %2550 = vmatpush.bf16.msrb.mxu2 %v5851_v54  ;;  %2959 = vmatpush.bf16.msrb.mxu3 %v5803_v5  ;;  %v1656_v5 = vsel %vm703_vm0, %v6707_v25, %v1655_v57  ;;  %v1873_v14 = vunpack.c.l.b16 %v1476_v12  ;;  %v1897_v51 = vunpack.c.l.b16 %v1536_v58  ;;  %v1943_v45 = vunpack.c.h.b16 %v6750_v31  ;;  %v515_v25 = vld [vmem:[%s6807_s14 + $0x8] sm:$0xf]  ;;  %v1279_v31 = vld [vmem:[#allocation2 + $0x2c] sm:$0xf]  ;;  %8917 = vst [vmem:[#allocation15_spill] sm:$0xff] %v6934_v20 }
  0x3f   : > { %v464_v21 = vld [vmem:[%s6498_s6 + $0xbc] sm:$0xf]  ;;  %2421 = vmatpush.bf16.msrb.mxu1 %v5843_v6  ;;  %3088 = vmatpush.bf16.msrb.mxu0 %v5811_v47  ;;  %v1596_v54 = vsel %vm703_vm0, %v6643_v11, %v1595_v7  ;;  %v1871_v6 = vunpack.c.h.b16 %v6686_v0  ;;  %v1895_v47 = vunpack.c.h.b16 %v6696_v1  ;;  %v6851_v11 = vld [vmem:[#allocation2 + $0x54] sm:$0xff]  ;;  %v6854_v7 = vld [vmem:[#allocation2 + $0x84] sm:$0xff]  ;;  %519 = vst [vmem:[#allocation2 + $0xc8] sm:$0xf] %v515_v25 }
  0x40   : > { %512 = vst [vmem:[#allocation2 + $0xbc] sm:$0xf] %v464_v21  ;;  %v1921_v3 = vunpack.c.l.b16 %v1596_v54  ;;  %v1945_v21 = vunpack.c.l.b16 %v1656_v5  ;;  %v8753_v59 = vshrl.u32 %v6849_v44, 16  ;;  %v8746_v26 = vshrl.u32 %v6851_v11, 16  ;;  %v1291_v12 = vld [vmem:[#allocation2 + $0x5c] sm:$0xf] }
  0x41   : > { %v2013_v57 = vpack.c.b16 %v1873_v14, %v1871_v6  ;;  %v2029_v0 = vpack.c.b16 %v1897_v51, %v1895_v47  ;;  %v8743_v58 = vshrl.u32 %v6854_v7, 16  ;;  %v1303_v54 = vld [vmem:[#allocation2 + $0x8c] sm:$0xf]  ;;  %v8754_v25 = vshll.u32 %v6849_v44, 16  ;;  %v1306_v13 = vld [vmem:[#allocation2 + $0x98] sm:$0xf] }
  0x42   : > { %2551 = vmatpush.bf16.msrb.mxu2 %v5850_v4  ;;  %2960 = vmatpush.bf16.msrb.mxu3 %v5802_v10  ;;  %v6856_v4 = vld [vmem:[#allocation2 + $0xb4] sm:$0xff]  ;;  %v2045_v1 = vpack.c.b16 %v1921_v3, %v1919_v60  ;;  %v2061_v10 = vpack.c.b16 %v1945_v21, %v1943_v45  ;;  %v6863_v14 = vunpack.c.l.b16 %v1279_v31  ;;  %v6865_v47 = vunpack.c.l.b16 %v1291_v12  ;;  %v5801_v12 = vld [vmem:[%s8721_s3 + $0x8] sm:$0xff] }
  0x43   : > { %8911 = vst [vmem:[#allocation9_spill] sm:$0xff] %v6856_v4  ;;  %v8744_v6 = vshrl.u32 %v6856_v4, 16  ;;  %v6869_v51 = vrot.slane %v8753_v59, 7  ;;  %v6873_v60 = vrot.slane %v8746_v26, 7  ;;  %v8749_v3 = vshll.u32 %v6851_v11, 16  ;;  %v5842_v21 = vld [vmem:[%s8721_s3 + $0x110] sm:$0xff] }
  0x44   : > { %v6876_v45 = vunpack.c.l.b16 %v1303_v54  ;;  %2422 = vmatpush.bf16.msrb.mxu1 %v5842_v21  ;;  %v8758_v33 = vshll.u32 %v6856_v4, 16  ;;  %v6902_v39 = vld [vmem:[#allocation2 + $0x30] sm:$0xff]  }
  0x45   : > { %v6899_v54 = vrot.slane %v8744_v6, 7  ;;  %v1483_v21 = vor.u32 %v8754_v25, %v6869_v51  ;;  %v6918_v6 = vld [vmem:[#allocation2 + $0x60] sm:$0xff]   ;;  %v8764_v30 = vshrl.u32 %v6902_v39, 16 }
  0x46   : > { %8912 = vst [vmem:[#allocation10_spill] sm:$0xff] %v6876_v45  ;;  %2961 = vmatpush.bf16.msrb.mxu3 %v5801_v12  ;;  %v6922_v9 = vpack.c.b16 %v6876_v45, %v6876_v45  ;;  %v1318_v36 = vld [vmem:[#allocation2 + $0xc8] sm:$0xf] }
  0x47   : > { %v1315_v5 = vld [vmem:[#allocation2 + $0xbc] sm:$0xf]  ;;  %v1705_v59 = vsel %vm6566_vm2, 0, %v1483_v21  ;;  %v6956_v21 = vrot.slane %v8764_v30, 7 }
  0x48   : > { %v6892_v31 = vunpack.c.l.b16 %v1315_v5  ;;  %v6910_v5 = vpack.c.b16 %v6865_v47, %v6865_v47  ;;  %8914 = vst [vmem:[#allocation12_spill] sm:$0xff] %v6922_v9  ;;  %v8769_v50 = vshrl.u32 %v6922_v9, 16  ;;  %v8923_v53 = vshll.u32 %v6922_v9, 16 }
  0x4a   : > { %8913 = vst [vmem:[#allocation11_spill] sm:$0xff] %v6892_v31  ;;  %v6931_v12 = vpack.c.b16 %v6892_v31, %v6892_v31  ;;  %v8766_v29 = vshrl.u32 %v6910_v5, 16  ;;  %v1607_v30 = vrot.slane %v8769_v50, 7  ;;  %v8921_v22 = vshll.u32 %v6910_v5, 16  ;;  %v417_v50 = vld [vmem:[%s6498_s6] sm:$0xff]  }
  0x4b   : > { %465 = vst [vmem:[#allocation2] sm:$0xff] %v417_v50  }
  0x4c   : > { %2306 = vmatmul.bf16.gmra.mxu0 %v2013_v57  ;;  %2336 = vmatmul.bf16.gmra.mxu1 %v2029_v0  ;;  %v5810_v57 = vld [vmem:[%s8721_s3 + $0x50] sm:$0xff]  ;;  %v5849_v0 = vld [vmem:[%s8721_s3 + $0x148] sm:$0xff]  ;;  %8916 = vst [vmem:[#allocation14_spill] sm:$0xff] %v6931_v12  ;;  %v8775_v18 = vshrl.u32 %v6931_v12, 16 }
  0x4d   : > { %2366 = vmatmul.bf16.gmra.mxu2 %v2045_v1  ;;  %2396 = vmatmul.bf16.gmra.mxu3 %v2061_v10  ;;  %v6889_v1 = vrot.slane %v8743_v58, 7  ;;  %v8752_v10 = vshll.u32 %v6854_v7, 16  ;;  %v6906_v58 = vpack.c.b16 %v6863_v14, %v6863_v14 }
  0x4e   : > { %3089 = vmatpush.bf16.msrb.mxu0 %v5810_v57  ;;  %2552 = vmatpush.bf16.msrb.mxu2 %v5849_v0  ;;  %v1543_v57 = vor.u32 %v8749_v3, %v6873_v60  ;;  %v6927_v0 = vld [vmem:[#allocation2 + $0x90] sm:$0xff]   ;;  %v1663_v3 = vor.u32 %v8758_v33, %v6899_v54  ;;  %v1547_v33 = vrot.slane %v8766_v29, 7  ;;  %v1667_v29 = vrot.slane %v8775_v18, 7 }
  0x4f   : > { %v1603_v26 = vor.u32 %v8752_v10, %v6889_v1  ;;  %8915 = vst [vmem:[#allocation13_spill] sm:$0xff] %v6927_v0  ;;  %v8765_v23 = vshrl.u32 %v6906_v58, 16  ;;  %v8767_v10 = vshrl.u32 %v6918_v6, 16  ;;  %v8770_v37 = vshrl.u32 %v6927_v0, 16 }
  0x50   : > { %v1709_v25 = vsel %vm6566_vm2, 0, %v1543_v57  ;;  %v1717_v52 = vsel %vm6566_vm2, 0, %v1663_v3  ;;  %v1294_v57 = vld [vmem:[#allocation2 + $0x68] sm:$0xf]  ;;  %v8920_v3 = vshll.u32 %v6906_v58, 16  ;;  %v1550_v2 = vor.u32 %v8921_v22, %v1547_v33 }
  0x51   : > { %v1713_v55 = vsel %vm6566_vm2, 0, %v1603_v26  ;;  %v1487_v26 = vrot.slane %v8765_v23, 7  ;;  %v6968_v61 = vrot.slane %v8767_v10, 7  ;;  %v6975_v40 = vrot.slane %v8770_v37, 7  ;;  %v1282_v23 = vld [vmem:[#allocation2 + $0x38] sm:$0xf] }
  0x52   : > { %v8918_v10 = vshrl.u32 %v6934_v20, 16  ;;  %v8919_v37 = vshll.u32 %v6902_v39, 16  ;;  %v7002_v24 = vunpack.c.l.b16 %v1282_v23  ;;  %v5841_v22 = vld [vmem:[%s8721_s3 + $0x108] sm:$0xff]  ;;  %v8926_v23 = vshll.u32 %v6934_v20, 16  ;;  %v7088_v9 = vld [vmem:[#allocation2] sm:$0xff] }
  0x53   : > { %v1490_v18 = vor.u32 %v8920_v3, %v1487_v26  ;;  %v7004_v26 = vunpack.c.l.b16 %v1294_v57  ;;  %v7020_v57 = vunpack.c.l.b16 %v1306_v13  ;;  %v7022_v3 = vunpack.c.l.b16 %v1318_v36  ;;  %2423 = vmatpush.bf16.msrb.mxu1 %v5841_v22 }
  0x54   : > { %v6983_v31 = vrot.slane %v8918_v10, 7  ;;  %v1498_v4 = vor.u32 %v8919_v37, %v6956_v21  ;;  %v8922_v10 = vshll.u32 %v6918_v6, 16  ;;  %v1610_v37 = vor.u32 %v8923_v53, %v1607_v30  ;;  %v5848_v30 = vld [vmem:[%s8721_s3 + $0x140] sm:$0xff] }
  0x55   : > { %8927 = vst [vmem:[#allocation16_spill] sm:$0xff] %v7020_v57  ;;  %v1491_v13 = vsel %vm703_vm0, %v6869_v51, %v1490_v18  ;;  %v1551_v50 = vsel %vm703_vm0, %v6873_v60, %v1550_v2  ;;  %2553 = vmatpush.bf16.msrb.mxu2 %v5848_v30  ;;  %v7053_v18 = vpack.c.b16 %v7002_v24, %v7002_v24 }
  0x56   : > { %v1558_v27 = vor.u32 %v8922_v10, %v6968_v61  ;;  %v1678_v33 = vor.u32 %v8926_v23, %v6983_v31  ;;  %8928 = vst [vmem:[#allocation17_spill] sm:$0xff] %v7022_v3  ;;  %v5800_v10 = vld [vmem:[%s8721_s3] sm:$0xff]  ;;  %v7037_v36 = vsel %vm6566_vm2, 0, %v1498_v4  ;;  %v7057_v2 = vpack.c.b16 %v7004_v26, %v7004_v26 }
  0x57   : > { %2962 = vmatpush.bf16.msrb.mxu3 %v5800_v10  ;;  %v7067_v51 = vpack.c.b16 %v7020_v57, %v7020_v57  ;;  %v7071_v60 = vpack.c.b16 %v7022_v3, %v7022_v3  ;;  %v8809_v10 = vshrl.u32 %v7053_v18, 16  ;;  %v419_v3 = vld [vmem:[%s6498_s6 + $0x8] sm:$0xf] }
  0x58   : > { %v7043_v22 = vsel %vm6566_vm2, 0, %v1558_v27  ;;  %v7063_v4 = vsel %vm6566_vm2, 0, %v1678_v33  ;;  %v8796_v20 = vshrl.u32 %v7057_v2, 16  ;;  %467 = vst [vmem:[#allocation2 + $0x8] sm:$0xf] %v419_v3 }
  0x59   : > { %8929 = vst [vmem:[#allocation18_spill] sm:$0xff] %v7071_v60  ;;  %v1953_v33 = vunpack.c.l.b16 %v7063_v4  ;;  %v8797_v3 = vshll.u32 %v7067_v51, 16 }
  0x5a   : > { %v1562_v45 = vrot.slane %v8796_v20, 7 }
  0x5c   : > { %2311 = vmatmul.bf16.gmra.mxu0 %v1705_v59  ;;  %2341 = vmatmul.bf16.gmra.mxu1 %v1709_v25  ;;  %v8924_v59 = vshll.u32 %v6927_v0, 16  ;;  %v8799_v0 = vshll.u32 %v7057_v2, 16 }
  0x5d   : > { %2371 = vmatmul.bf16.gmra.mxu2 %v1713_v55  ;;  %2401 = vmatmul.bf16.gmra.mxu3 %v1717_v52  ;;  %v5809_v55 = vld [vmem:[%s8721_s3 + $0x48] sm:$0xff]  ;;  %v8925_v52 = vshll.u32 %v6931_v12, 16  ;;  %v8795_v12 = vshrl.u32 %v7067_v51, 16 }
  0x5e   : > { %v1618_v25 = vor.u32 %v8924_v59, %v6975_v40  ;;  %3090 = vmatpush.bf16.msrb.mxu0 %v5809_v55  ;;  %v5840_v59 = vld [vmem:[%s8721_s3 + $0x100] sm:$0xff]  ;;  %v1611_v55 = vsel %vm703_vm0, %v6889_v1, %v1610_v37  ;;  %v1881_v1 = vunpack.c.l.b16 %v7037_v36  ;;  %v1905_v37 = vunpack.c.l.b16 %v7043_v22 }
  0x5f   : > { %v1670_v53 = vor.u32 %v8925_v52, %v1667_v29  ;;  %v5808_v29 = vld [vmem:[%s8721_s3 + $0x40] sm:$0xff]  ;;  %2424 = vmatpush.bf16.msrb.mxu1 %v5840_v59  ;;  %v1927_v30 = vunpack.c.l.b16 %v1611_v55  ;;  %v1622_v57 = vrot.slane %v8795_v12, 7 }
  0x60   : > { %v7049_v52 = vsel %vm6566_vm2, 0, %v1618_v25  ;;  %v1903_v25 = vunpack.c.l.b16 %v1551_v50  ;;  %v1503_v50 = vshll.u32 %v7053_v18, 16 }
  0x61   : > { %v1671_v27 = vsel %vm703_vm0, %v6899_v54, %v1670_v53  ;;  %v1879_v54 = vunpack.c.l.b16 %v1491_v13  ;;  %v1929_v53 = vunpack.c.l.b16 %v7049_v52 }
  0x62   : > { %3091 = vmatpush.bf16.msrb.mxu0 %v5808_v29  ;;  %v1951_v23 = vunpack.c.l.b16 %v1671_v27  ;;  %v2034_v29 = vpack.c.b16 %v1905_v37, %v1903_v25  ;;  %v1502_v27 = vrot.slane %v8809_v10, 7  ;;  %v708_v25 = vshll.u32 %v7088_v9, 16 }
  0x63   : > { %v2018_v59 = vpack.c.b16 %v1881_v1, %v1879_v54  ;;  %v2050_v13 = vpack.c.b16 %v1929_v53, %v1927_v30  ;;  %v8930_v1 = vshrl.u32 %v7071_v60, 16  ;;  %v8798_v54 = vshll.u32 %v7071_v60, 16 }
  0x64   : > { %v2066_v55 = vpack.c.b16 %v1953_v33, %v1951_v23  ;;  %v1505_v30 = vor.u32 %v1503_v50, %v1502_v27  ;;  %v1565_v53 = vor.u32 %v8799_v0, %v1562_v45  ;;  %v705_v23 = vshrl.u32 %v7088_v9, 16 }
  0x65   : > { %v1682_v37 = vrot.slane %v8930_v1, 7  ;;  %v979_v33 = vrot.slane %v708_v25, 1  ;;  %v5871_v1 = vld [vmem:[%s8721_s3 + $0x1b8] sm:$0xff] }
  0x66   : > { %4360 = vmatpush.bf16.msra.mxu2 %v5871_v1  ;;  %v1506_v12 = vsel %vm703_vm0, %v6956_v21, %v1505_v30  ;;  %v1566_v20 = vsel %vm703_vm0, %v6968_v61, %v1565_v53  ;;  %v1883_v1 = vunpack.c.h.b16 %v7037_v36  ;;  %v1931_v21 = vunpack.c.h.b16 %v7049_v52 }
  0x67   : > { %v1685_v45 = vor.u32 %v8798_v54, %v1682_v37  ;;  %v7118_v27 = vor.u32 %v979_v33, %v705_v23  ;;  %v1955_v61 = vunpack.c.h.b16 %v7063_v4  ;;  %v8935_v4 = vshll.u32 %v6516_v15, 16 }
  0x69   : > { %8931 = vst [vmem:[#allocation19_spill] sm:$0xff] %v7118_v27  ;;  %v1686_v33 = vsel %vm703_vm0, %v6983_v31, %v1685_v45  ;;  %v1719_v45 = vrot.slane %v8935_v4, 1  ;;  %v6169_v4 = vld [vmem:[#allocation2 + $0x10] sm:$0xff]  }
  0x6a   : > { %v1957_v53 = vunpack.c.l.b16 %v1686_v33 }
  0x6c   : > { %2316 = vmatmul.bf16.gmra.mxu0 %v2018_v59  ;;  %2346 = vmatmul.bf16.gmra.mxu1 %v2034_v29  ;;  %v5879_v59 = vld [vmem:[%s8721_s3 + $0x1f8] sm:$0xff] }
  0x6d   : > { %2376 = vmatmul.bf16.gmra.mxu2 %v2050_v13  ;;  %2406 = vmatmul.bf16.gmra.mxu3 %v2066_v55  ;;  %v5823_v29 = vld [vmem:[%s8721_s3 + $0xb8] sm:$0xff]  ;;  %v1625_v13 = vor.u32 %v8797_v3, %v1622_v57  ;;  %v8932_v57 = vshll.u32 %v6544_v32, 16 }
  0x6e   : > { %v5887_v55 = vld [vmem:[%s8721_s3 + $0x238] sm:$0xff]  ;;  %4489 = vmatpush.bf16.msra.mxu3 %v5879_v59  ;;  %3213 = vmatpush.bf16.msra.mxu1 %v5823_v29  ;;  %v1885_v59 = vunpack.c.l.b16 %v1506_v12  ;;  %v1907_v29 = vunpack.c.h.b16 %v7043_v22  ;;  %v2069_v12 = vpack.c.b16 %v1957_v53, %v1955_v61 }
  0x6f   : > { %4618 = vmatpush.bf16.msra.mxu0 %v5887_v55  ;;  %v1724_v3 = vrot.slane %v8932_v57, 1  ;;  %v1626_v37 = vsel %vm703_vm0, %v6975_v40, %v1625_v13  ;;  %v1909_v55 = vunpack.c.l.b16 %v1566_v20  ;;  %v8933_v57 = vshrl.u32 %v6544_v32, 16  ;;  %v6168_v20 = vld [vmem:[#allocation2 + $0x8] sm:$0xff]  }
  0x70   : > { %v1933_v30 = vunpack.c.l.b16 %v1626_v37  ;;  %v8934_v40 = vshll.u32 %v6732_v28, 16  ;;  %v2021_v0 = vpack.c.b16 %v1885_v59, %v1883_v1  ;;  %v5890_v52 = vunpack.c.l.b16 %v6168_v20  ;;  %v7141_v37 = vld [vmem:[#allocation2 + $0xc] sm:$0xff]  }
  0x71   : > { %v1725_v54 = vor.u32 %v1724_v3, %v8933_v57  ;;  %v2037_v31 = vpack.c.b16 %v1909_v55, %v1907_v29  ;;  %v707_v3 = vrot.slane %v705_v23, 7  ;;  %8936 = vst [vmem:[#allocation20_spill] sm:$0xff] %v7141_v37  ;;  %v8938_v1 = vshrl.u32 %v6516_v15, 16 }
  0x72   : > { %v1726_v13 = vrot.slane %v8934_v40, 1  ;;  %v2053_v36 = vpack.c.b16 %v1933_v30, %v1931_v21  ;;  %v7143_v33 = vpack.c.b16 %v5890_v52, %v5890_v52  ;;  %v8804_v21 = vshrl.u32 %v7141_v37, 16 }
  0x73   : > { %v1720_v59 = vor.u32 %v1719_v45, %v8938_v1  ;;  %v710_v29 = vor.u32 %v708_v25, %v707_v3  ;;  %v8940_v30 = vshrl.u32 %v6732_v28, 16  ;;  %v8943_v45 = vshrl.u32 %v6572_v42, 16 }
  0x74   : > { %v1727_v22 = vsel %vm978_vm3, %v1725_v54, %v1726_v13  ;;  %8937 = vst [vmem:[#allocation21_spill] sm:$0xff] %v7143_v33  ;;  %v8939_v54 = vshll.u32 %v6572_v42, 16  ;;  %v8805_v55 = vshrl.u32 %v7143_v33, 16  ;;  %v8808_v28 = vshll.u32 %v7143_v33, 16 }
  0x75   : > { %v1728_v23 = vor.u32 %v1726_v13, %v8940_v30  ;;  %v962_v40 = vsel %vm6566_vm2, 0, %v710_v29  ;;  %v1872_v25 = vunpack.c.h.b16 %v1727_v22  ;;  %v722_v13 = vrot.slane %v8804_v21, 7 }
  0x76   : > { %v5895_v29 = vunpack.c.h.b16 %v6169_v4  ;;  %v5954_v42 = vunpack.c.l.b16 %v6544_v32 }
  0x77   : > { %v1816_v53 = vsel %vm7153_vm6, %v1728_v23, 0 }
  0x7c   : > { %2321 = vmatmul.bf16.gmra.mxu0 %v2021_v0  ;;  %2351 = vmatmul.bf16.gmra.mxu1 %v2037_v31  ;;  %v1721_v0 = vrot.slane %v8939_v54, 1  ;;  %v1874_v31 = vunpack.c.l.b16 %v1816_v53  ;;  %v1870_v53 = vunpack.c.l.b16 %v1727_v22  ;;  %v5870_v22 = vld [vmem:[%s8721_s3 + $0x1b0] sm:$0xff] }
  0x7d   : > { %2381 = vmatmul.bf16.gmra.mxu2 %v2053_v36  ;;  %2411 = vmatmul.bf16.gmra.mxu3 %v2069_v12  ;;  %v714_v36 = vrot.slane %v8805_v55, 7  ;;  %v8806_v12 = vshll.u32 %v7141_v37, 16 }
  0x7e   : > { %v1722_v57 = vsel %vm978_vm3, %v1720_v59, %v1721_v0  ;;  %v2015_v52 = vpack.c.b16 %v1874_v31, %v1872_v25  ;;  %v1723_v1 = vor.u32 %v1721_v0, %v8943_v45  ;;  %v2011_v31 = vpack.c.b16 %v5954_v42, %v6551_v35  ;;  %4361 = vmatpush.bf16.msra.mxu2 %v5870_v22 }
  0x7f   : > { %v717_v59 = vor.u32 %v8808_v28, %v714_v36  ;;  %v725_v54 = vor.u32 %v8806_v12, %v722_v13  ;;  %v8957_v28 = vshrl.u32 %v6906_v58, 16 }
  0x80   : > { %v1815_v30 = vsel %vm7153_vm6, %v1723_v1, 0 }
  0x81   : > { %v718_v23 = vsel %vm703_vm0, %v707_v3, %v717_v59  ;;  %v1868_v0 = vunpack.c.l.b16 %v1815_v30  ;;  %v5878_v59 = vld [vmem:[%s8721_s3 + $0x1f0] sm:$0xff]  ;;  %v5955_v30 = vunpack.c.h.b16 %v6544_v32 }
  0x82   : > { %4490 = vmatpush.bf16.msra.mxu3 %v5878_v59 }
  0x83   : > { %v2012_v36 = vpack.c.b16 %v1870_v53, %v1868_v0  ;;  %v2014_v0 = vpack.c.b16 %v6713_v16, %v5955_v30  ;;  %v8952_v30 = vshll.u32 %v6906_v58, 16 }
  0x8c   : > { %2425 = vmatmul.bf16.vlgmr.msrb.gmra.mxu1 %v6516_v15  ;;  %3092 = vmatmul.bf16.vlgmr.msrb.gmra.mxu0 %v7088_v9  ;;  %v963_v15 = vsel %vm6566_vm2, 0, %v725_v54  ;;  %v7181_v9 = vpack.c.b16 %v5895_v29, %v5895_v29  ;;  %v5822_v54 = vld [vmem:[%s8721_s3 + $0xb0] sm:$0xff] }
  0x8d   : > { %2554 = vmatmul.bf16.vlgmr.msrb.gmra.mxu2 %v1722_v57  ;;  %2963 = vmatmul.bf16.vlgmr.msrb.gmra.mxu3 %v962_v40  ;;  %v1130_v57 = vunpack.c.l.b16 %v718_v23  ;;  %v1132_v40 = vunpack.c.l.b16 %v963_v15  ;;  %v1134_v23 = vunpack.c.h.b16 %v963_v15 }
  0x8e   : > { %8944 = vst [vmem:[#allocation22_spill] sm:$0xff] %v7181_v9  ;;  %v8801_v25 = vshrl.u32 %v7181_v9, 16  ;;  %v8802_v1 = vshll.u32 %v7181_v9, 16  ;;  %3214 = vmatpush.bf16.msra.mxu1 %v5822_v54 }
  0x8f   : > { %v2677_v45 = vpack.c.b16 %v1132_v40, %v1130_v57 }
  0x90   : > { %v729_v3 = vrot.slane %v8801_v25, 7 }
  0x92   : > { %v732_v35 = vor.u32 %v8802_v1, %v729_v3 }
  0x94   : > { %v733_v29 = vsel %vm703_vm0, %v722_v13, %v732_v35  ;;  %v7229_v35 = vld [vmem:[#allocation2 + $0x24] sm:$0xff]  }
  0x95   : > { %v1136_v42 = vunpack.c.l.b16 %v733_v29  ;;  %8949 = vst [vmem:[#allocation26_spill] sm:$0xff] %v7229_v35  ;;  %v8813_v12 = vshll.u32 %v7229_v35, 16 }
  0x97   : > { %v2680_v40 = vpack.c.b16 %v1136_v42, %v1134_v23  ;;  %v1731_v23 = vrot.slane %v8952_v30, 1 }
  0x99   : > { %v1733_v10 = vor.u32 %v1731_v23, %v8957_v28 }
  0x9b   : > { %v1817_v58 = vsel %vm7153_vm6, %v1733_v10, 0 }
  0x9c   : > { %2430 = vmatmul.bf16.gmra.mxu1 %v2011_v31  ;;  %3097 = vmatmul.bf16.gmra.mxu0 %v6168_v20  ;;  %v5886_v20 = vld [vmem:[%s8721_s3 + $0x230] sm:$0xff]  ;;  %v7210_v31 = vld [vmem:[#allocation2 + $0x18] sm:$0xff] }
  0x9d   : > { %2559 = vmatmul.bf16.gmra.mxu2 %v2012_v36  ;;  %2968 = vmatmul.bf16.gmra.mxu3 %v2677_v45  ;;  %8945 = vst [vmem:[#allocation23_spill] sm:$0xff] %v7210_v31  ;;  %v7212_v36 = vld [vmem:[#allocation2 + $0x20] sm:$0xff]   ;;  %v8800_v13 = vshrl.u32 %v7210_v31, 16  ;;  %v8948_v45 = vshll.u32 %v6849_v44, 16 }
  0x9e   : > { %4619 = vmatpush.bf16.msra.mxu0 %v5886_v20  ;;  %v5898_v32 = vunpack.c.l.b16 %v7212_v36  ;;  %v8951_v20 = vshrl.u32 %v6849_v44, 16 }
  0x9f   : > { %v1729_v3 = vrot.slane %v8948_v45, 1 }
  0xa0   : > { %v7231_v54 = vpack.c.b16 %v5898_v32, %v5898_v32  ;;  %v8955_v32 = vshll.u32 %v6902_v39, 16 }
  0xa1   : > { %v1730_v29 = vor.u32 %v1729_v3, %v8951_v20 }
  0xa2   : > { %8950 = vst [vmem:[#allocation27_spill] sm:$0xff] %v7231_v54  ;;  %v1734_v25 = vrot.slane %v8955_v32, 1  ;;  %v8814_v21 = vshll.u32 %v7231_v54, 16  ;;  %v7260_v32 = vld [vmem:[#allocation2 + $0x28] sm:$0xff]  }
  0xa3   : > { %v1732_v20 = vsel %vm978_vm3, %v1730_v29, %v1731_v23  ;;  %v8956_v29 = vshrl.u32 %v6902_v39, 16 }
  0xa9   : > { %v7206_v53 = vpop.f32.mrf.mxu0  ;;  %v7208_v57 = vpop.f32.mrf.mxu1 }
  0xac   : > { %2435 = vmatmul.bf16.gmra.mxu1 %v2014_v0  ;;  %3102 = vmatmul.bf16.gmra.mxu0 %v6169_v4  ;;  %v737_v4 = vrot.slane %v8800_v13, 7  ;;  %v8807_v0 = vshrl.u32 %v7231_v54, 16 }
  0xad   : > { %2564 = vmatmul.bf16.gmra.mxu2 %v2015_v52  ;;  %2973 = vmatmul.bf16.gmra.mxu3 %v2680_v40  ;;  %v8803_v52 = vshll.u32 %v7210_v31, 16  ;;  %v8810_v40 = vshrl.u32 %v7229_v35, 16 }
  0xaf   : > { %v740_v42 = vor.u32 %v8803_v52, %v737_v4  ;;  %v744_v52 = vrot.slane %v8807_v0, 7  ;;  %v752_v55 = vrot.slane %v8810_v40, 7  ;;  %v1736_v0 = vrot.slane %v1503_v50, 1 }
  0xb0   : > { %v7216_v15 = vpop.f32.mrf.mxu2  ;;  %v7218_v16 = vpop.f32.mrf.mxu3 }
  0xb1   : > { %8946 = vst [vmem:[#allocation24_spill] sm:$0xff] %v7216_v15  ;;  %v7222_v22 = vpop.f32.mrf.mxu0  ;;  %v7224_v59 = vpop.f32.mrf.mxu1  ;;  %v964_v30 = vsel %vm6566_vm2, 0, %v740_v42  ;;  %v1735_v42 = vor.u32 %v1734_v25, %v8956_v29  ;;  %v747_v40 = vor.u32 %v8814_v21, %v744_v52  ;;  %v5958_v29 = vunpack.c.l.b16 %v6902_v39 }
  0xb2   : > { %8947 = vst [vmem:[#allocation25_spill] sm:$0xff] %v7218_v16 }
  0xb3   : > { %v1737_v50 = vsel %vm978_vm3, %v1735_v42, %v1736_v0  ;;  %v748_v28 = vsel %vm703_vm0, %v737_v4, %v747_v40  ;;  %v2019_v10 = vpack.c.b16 %v5958_v29, %v6863_v14  ;;  %v5869_v14 = vld [vmem:[%s8721_s3 + $0x1a8] sm:$0xff] }
  0xb4   : > { %v1882_v21 = vunpack.c.l.b16 %v1737_v50  ;;  %v5877_v29 = vld [vmem:[%s8721_s3 + $0x1e8] sm:$0xff]  ;;  %4362 = vmatpush.bf16.msra.mxu2 %v5869_v14  ;;  %v5959_v14 = vunpack.c.h.b16 %v6902_v39 }
  0xb5   : > { %4491 = vmatpush.bf16.msra.mxu3 %v5877_v29  ;;  %v1884_v29 = vunpack.c.h.b16 %v1737_v50 }
  0xb8   : > { %v7241_v45 = vpop.f32.mrf.mxu2  ;;  %v7243_v13 = vpop.f32.mrf.mxu3 }
  0xb9   : > { %8953 = vst [vmem:[#allocation28_spill] sm:$0xff] %v7241_v45  ;;  %v7247_v1 = vpop.f32.mrf.mxu0  ;;  %v7249_v3 = vpop.f32.mrf.mxu1  ;;  %v7472_v45 = vld [vmem:[#allocation2 + $0x50] sm:$0xff]  }
  0xba   : > { %8954 = vst [vmem:[#allocation29_spill] sm:$0xff] %v7243_v13  ;;  %v755_v13 = vor.u32 %v8813_v12, %v752_v55  ;;  %v1880_v12 = vunpack.c.l.b16 %v1817_v58 }
  0xbc   : > { %2440 = vmatmul.bf16.gmra.mxu1 %v6849_v44  ;;  %3107 = vmatmul.bf16.gmra.mxu0 %v7210_v31  ;;  %v5903_v44 = vunpack.c.h.b16 %v7260_v32  ;;  %v965_v52 = vsel %vm6566_vm2, 0, %v755_v13  ;;  %v2020_v13 = vpack.c.b16 %v1882_v21, %v1880_v12  ;;  %v8963_v21 = vshrl.u32 %v7053_v18, 16  ;;  %v5885_v18 = vld [vmem:[%s8721_s3 + $0x228] sm:$0xff] }
  0xbd   : > { %2569 = vmatmul.bf16.gmra.mxu2 %v1732_v20  ;;  %2978 = vmatmul.bf16.gmra.mxu3 %v964_v30  ;;  %v1144_v35 = vunpack.c.l.b16 %v965_v52 }
  0xbe   : > { %v7289_v23 = vpack.c.b16 %v5903_v44, %v5903_v44  ;;  %v1738_v12 = vor.u32 %v1736_v0, %v8963_v21  ;;  %4620 = vmatpush.bf16.msra.mxu0 %v5885_v18  ;;  %v8971_v18 = vshll.u32 %v6519_v17, 16 }
  0xc0   : > { %v7275_v31 = vpop.f32.mrf.mxu2  ;;  %v7277_v20 = vpop.f32.mrf.mxu3  ;;  %8960 = vst [vmem:[#allocation32_spill] sm:$0xff] %v7289_v23  ;;  %v8819_v54 = vshrl.u32 %v7289_v23, 16  ;;  %v1818_v0 = vsel %vm7153_vm6, %v1738_v12, 0 }
  0xc1   : > { %8958 = vst [vmem:[#allocation30_spill] sm:$0xff] %v7275_v31  ;;  %v7279_v30 = vpop.f32.mrf.mxu0  ;;  %v7281_v25 = vpop.f32.mrf.mxu1  ;;  %v1886_v21 = vunpack.c.l.b16 %v1818_v0 }
  0xc2   : > { %8959 = vst [vmem:[#allocation31_spill] sm:$0xff] %v7277_v20  ;;  %v1142_v20 = vunpack.c.l.b16 %v748_v28  ;;  %v759_v58 = vrot.slane %v8819_v54, 7  ;;  %v8820_v28 = vshll.u32 %v7289_v23, 16  ;;  %v1146_v54 = vunpack.c.h.b16 %v965_v52 }
  0xc3   : > { %v2022_v23 = vpack.c.b16 %v7002_v24, %v5959_v14  ;;  %v2023_v12 = vpack.c.b16 %v1886_v21, %v1884_v29  ;;  %v8974_v29 = vshrl.u32 %v6519_v17, 16 }
  0xc4   : > { %v2685_v44 = vpack.c.b16 %v1144_v35, %v1142_v20  ;;  %v762_v35 = vor.u32 %v8820_v28, %v759_v58 }
  0xc6   : > { %v763_v58 = vsel %vm703_vm0, %v752_v55, %v762_v35  ;;  %v7343_v35 = vld [vmem:[#allocation2 + $0x30] sm:$0xff] }
  0xc7   : > { %v1148_v28 = vunpack.c.l.b16 %v763_v58  ;;  %8968 = vst [vmem:[#allocation39_spill] sm:$0xff] %v7343_v35  ;;  %v8825_v39 = vshrl.u32 %v7343_v35, 16  ;;  %v7363_v58 = vld [vmem:[#allocation2 + $0x3c] sm:$0xff]  }
  0xc8   : > { %v7293_v16 = vpop.f32.mrf.mxu2  ;;  %v7295_v42 = vpop.f32.mrf.mxu3  ;;  %8972 = vst [vmem:[#allocation42_spill] sm:$0xff] %v7363_v58  ;;  %v8983_v31 = vshll.u32 %v7363_v58, 16 }
  0xc9   : > { %8961 = vst [vmem:[#allocation33_spill] sm:$0xff] %v7293_v16  ;;  %v7298_v4 = vpop.f32.mrf.mxu0  ;;  %v7300_v40 = vpop.f32.mrf.mxu1  ;;  %v2688_v55 = vpack.c.b16 %v1148_v28, %v1146_v54  ;;  %v1739_v54 = vrot.slane %v8971_v18, 1 }
  0xca   : > { %8962 = vst [vmem:[#allocation34_spill] sm:$0xff] %v7295_v42 }
  0xcb   : > { %v1740_v21 = vor.u32 %v1739_v54, %v8974_v29 }
  0xcc   : > { %2445 = vmatmul.bf16.gmra.mxu1 %v2019_v10  ;;  %3112 = vmatmul.bf16.gmra.mxu0 %v7212_v36 }
  0xcd   : > { %2574 = vmatmul.bf16.gmra.mxu2 %v2020_v13  ;;  %2983 = vmatmul.bf16.gmra.mxu3 %v2685_v44  ;;  %v5821_v44 = vld [vmem:[%s8721_s3 + $0xa8] sm:$0xff] }
  0xce   : > { %3215 = vmatpush.bf16.msra.mxu1 %v5821_v44  ;;  %v7345_v44 = vld [vmem:[#allocation2 + $0x38] sm:$0xff]  }
  0xcf   : > { %v5906_v50 = vunpack.c.l.b16 %v7345_v44 }
  0xd0   : > { %v7316_v20 = vpop.f32.mrf.mxu2  ;;  %v7318_v36 = vpop.f32.mrf.mxu3 }
  0xd1   : > { %8964 = vst [vmem:[#allocation35_spill] sm:$0xff] %v7316_v20  ;;  %v7320_v10 = vpop.f32.mrf.mxu0  ;;  %v7322_v13 = vpop.f32.mrf.mxu1  ;;  %v7365_v14 = vpack.c.b16 %v5906_v50, %v5906_v50  ;;  %v8978_v50 = vshll.u32 %v6574_v43, 16 }
  0xd2   : > { %8965 = vst [vmem:[#allocation36_spill] sm:$0xff] %v7318_v36 }
  0xd3   : > { %8973 = vst [vmem:[#allocation43_spill] sm:$0xff] %v7365_v14  ;;  %v1744_v33 = vrot.slane %v8978_v50, 1  ;;  %v7394_v50 = vld [vmem:[#allocation2 + $0x40] sm:$0xff]  }
  0xd8   : > { %v7334_v36 = vpop.f32.mrf.mxu2  ;;  %v7336_v42 = vpop.f32.mrf.mxu3 }
  0xd9   : > { %8966 = vst [vmem:[#allocation37_spill] sm:$0xff] %v7334_v36  ;;  %v7339_v9 = vpop.f32.mrf.mxu0  ;;  %v7341_v27 = vpop.f32.mrf.mxu1  ;;  %v6396_v36 = vld [vmem:[#allocation2 + $0x3c] sm:$0xff] }
  0xda   : > { %8967 = vst [vmem:[#allocation38_spill] sm:$0xff] %v7336_v42  ;;  %v8832_v42 = vshrl.u32 %v7363_v58, 16 }
  0xdc   : > { %2450 = vmatmul.bf16.gmra.mxu1 %v2022_v23  ;;  %3117 = vmatmul.bf16.gmra.mxu0 %v7260_v32  ;;  %v767_v32 = vrot.slane %v8825_v39, 7  ;;  %v8830_v23 = vshll.u32 %v7343_v35, 16 }
  0xdd   : > { %2579 = vmatmul.bf16.gmra.mxu2 %v2023_v12  ;;  %2988 = vmatmul.bf16.gmra.mxu3 %v2688_v55  ;;  %v8975_v12 = vshll.u32 %v6603_v56, 16 }
  0xde   : > { %v770_v18 = vor.u32 %v8830_v23, %v767_v32  ;;  %v8981_v23 = vshrl.u32 %v6603_v56, 16 }
  0xdf   : > { %v1741_v55 = vrot.slane %v8975_v12, 1 }
  0xe0   : > { %v7350_v24 = vpop.f32.mrf.mxu2  ;;  %v7352_v52 = vpop.f32.mrf.mxu3  ;;  %v966_v29 = vsel %vm6566_vm2, 0, %v770_v18 }
  0xe1   : > { %8969 = vst [vmem:[#allocation40_spill] sm:$0xff] %v7350_v24  ;;  %v7356_v28 = vpop.f32.mrf.mxu0  ;;  %v7358_v0 = vpop.f32.mrf.mxu1  ;;  %v1742_v54 = vsel %vm978_vm3, %v1740_v21, %v1741_v55  ;;  %v8979_v21 = vshrl.u32 %v6574_v43, 16  ;;  %v1743_v16 = vor.u32 %v1741_v55, %v8981_v23  ;;  %v6397_v55 = vld [vmem:[#allocation2 + $0x48] sm:$0xff]  }
  0xe2   : > { %8970 = vst [vmem:[#allocation41_spill] sm:$0xff] %v7352_v52  ;;  %v8831_v52 = vshrl.u32 %v7365_v14, 16 }
  0xe3   : > { %v1745_v18 = vor.u32 %v1744_v33, %v8979_v21  ;;  %v1819_v56 = vsel %vm7153_vm6, %v1743_v16, 0 }
  0xe4   : > { %v774_v12 = vrot.slane %v8831_v52, 7  ;;  %v8980_v52 = vshll.u32 %v6763_v38, 16 }
  0xe6   : > { %v1746_v20 = vrot.slane %v8980_v52, 1 }
  0xe8   : > { %v7375_v39 = vpop.f32.mrf.mxu2  ;;  %v7377_v37 = vpop.f32.mrf.mxu3  ;;  %v1747_v52 = vsel %vm978_vm3, %v1745_v18, %v1746_v20 }
  0xe9   : > { %8976 = vst [vmem:[#allocation44_spill] sm:$0xff] %v7375_v39  ;;  %v7381_v24 = vpop.f32.mrf.mxu0  ;;  %v7383_v17 = vpop.f32.mrf.mxu1  ;;  %v1894_v21 = vunpack.c.l.b16 %v1747_v52 }
  0xea   : > { %8977 = vst [vmem:[#allocation45_spill] sm:$0xff] %v7377_v37  ;;  %v782_v37 = vrot.slane %v8832_v42, 7  ;;  %v8982_v42 = vshll.u32 %v7365_v14, 16 }
  0xec   : > { %2455 = vmatmul.bf16.gmra.mxu1 %v6396_v36  ;;  %3122 = vmatmul.bf16.gmra.mxu0 %v7343_v35  ;;  %v777_v39 = vor.u32 %v8982_v42, %v774_v12  ;;  %v785_v60 = vor.u32 %v8983_v31, %v782_v37  ;;  %v5911_v36 = vunpack.c.h.b16 %v7394_v50  ;;  %v1892_v12 = vunpack.c.l.b16 %v1819_v56 }
  0xed   : > { %2584 = vmatmul.bf16.gmra.mxu2 %v1742_v54  ;;  %2993 = vmatmul.bf16.gmra.mxu3 %v966_v29  ;;  %v5962_v29 = vunpack.c.l.b16 %v6397_v55 }
  0xee   : > { %v778_v42 = vsel %vm703_vm0, %v767_v32, %v777_v39  ;;  %v967_v31 = vsel %vm6566_vm2, 0, %v785_v60  ;;  %v7422_v23 = vpack.c.b16 %v5911_v36, %v5911_v36  ;;  %v2028_v60 = vpack.c.b16 %v1894_v21, %v1892_v12 }
  0xef   : > { %v1156_v58 = vunpack.c.l.b16 %v967_v31  ;;  %v2027_v16 = vpack.c.b16 %v5962_v29, %v6582_v46  ;;  %v5868_v46 = vld [vmem:[%s8721_s3 + $0x1a0] sm:$0xff] }
  0xf0   : > { %v7408_v35 = vpop.f32.mrf.mxu2  ;;  %v7410_v54 = vpop.f32.mrf.mxu3  ;;  %8986 = vst [vmem:[#allocation48_spill] sm:$0xff] %v7422_v23  ;;  %v8841_v14 = vshrl.u32 %v7422_v23, 16  ;;  %v5876_v29 = vld [vmem:[%s8721_s3 + $0x1e0] sm:$0xff]  ;;  %4363 = vmatpush.bf16.msra.mxu2 %v5868_v46  ;;  %v1896_v46 = vunpack.c.h.b16 %v1747_v52  ;;  %v5914_v52 = vunpack.c.l.b16 %v7472_v45 }
  0xf1   : > { %8984 = vst [vmem:[#allocation46_spill] sm:$0xff] %v7408_v35  ;;  %v7412_v43 = vpop.f32.mrf.mxu0  ;;  %v7414_v33 = vpop.f32.mrf.mxu1  ;;  %4492 = vmatpush.bf16.msra.mxu3 %v5876_v29 }
  0xf2   : > { %8985 = vst [vmem:[#allocation47_spill] sm:$0xff] %v7410_v54  ;;  %v1154_v54 = vunpack.c.l.b16 %v778_v42  ;;  %v789_v56 = vrot.slane %v8841_v14, 7  ;;  %v8842_v42 = vshll.u32 %v7422_v23, 16 }
  0xf4   : > { %v2693_v36 = vpack.c.b16 %v1156_v58, %v1154_v54  ;;  %v8989_v58 = vshrl.u32 %v6763_v38, 16  ;;  %v792_v12 = vor.u32 %v8842_v42, %v789_v56  ;;  %v5820_v38 = vld [vmem:[%s8721_s3 + $0xa0] sm:$0xff]  ;;  %v5963_v56 = vunpack.c.h.b16 %v6397_v55 }
  0xf5   : > { %3216 = vmatpush.bf16.msra.mxu1 %v5820_v38 }
  0xf6   : > { %v1748_v54 = vor.u32 %v1746_v20, %v8989_v58  ;;  %v793_v14 = vsel %vm703_vm0, %v782_v37, %v792_v12  ;;  %v5884_v20 = vld [vmem:[%s8721_s3 + $0x220] sm:$0xff]  ;;  %v1158_v58 = vunpack.c.h.b16 %v967_v31  ;;  %v2030_v37 = vpack.c.b16 %v6737_v49, %v5963_v56 }
  0xf7   : > { %v1160_v42 = vunpack.c.l.b16 %v793_v14  ;;  %4621 = vmatpush.bf16.msra.mxu0 %v5884_v20 }
  0xf8   : > { %v7425_v35 = vpop.f32.mrf.mxu2  ;;  %v7427_v18 = vpop.f32.mrf.mxu3 }
  0xf9   : > { %8987 = vst [vmem:[#allocation49_spill] sm:$0xff] %v7425_v35  ;;  %v7430_v39 = vpop.f32.mrf.mxu0  ;;  %v7432_v32 = vpop.f32.mrf.mxu1  ;;  %v7470_v35 = vld [vmem:[#allocation2 + $0x48] sm:$0xff] }
  0xfa   : > { %8988 = vst [vmem:[#allocation50_spill] sm:$0xff] %v7427_v18  ;;  %v8845_v14 = vshrl.u32 %v7470_v35, 16 }
  0xfc   : > { %2460 = vmatmul.bf16.gmra.mxu1 %v2027_v16  ;;  %3127 = vmatmul.bf16.gmra.mxu0 %v7345_v44 }
  0xfd   : > { %2589 = vmatmul.bf16.gmra.mxu2 %v2028_v60  ;;  %2998 = vmatmul.bf16.gmra.mxu3 %v2693_v36  ;;  %v1820_v36 = vsel %vm7153_vm6, %v1748_v54, 0 }
  0xfe   : > { %v1898_v29 = vunpack.c.l.b16 %v1820_v36  ;;  %v8994_v36 = vshll.u32 %v6851_v11, 16 }
 0x100   : > { %v7448_v21 = vpop.f32.mrf.mxu2  ;;  %v7450_v44 = vpop.f32.mrf.mxu3  ;;  %v2031_v23 = vpack.c.b16 %v1898_v29, %v1896_v46  ;;  %v797_v46 = vrot.slane %v8845_v14, 7 }
 0x101   : > { %8990 = vst [vmem:[#allocation51_spill] sm:$0xff] %v7448_v21  ;;  %v7452_v16 = vpop.f32.mrf.mxu0  ;;  %v7454_v60 = vpop.f32.mrf.mxu1  ;;  %v2696_v21 = vpack.c.b16 %v1160_v42, %v1158_v58  ;;  %v1749_v42 = vrot.slane %v8994_v36, 1 }
 0x102   : > { %8991 = vst [vmem:[#allocation52_spill] sm:$0xff] %v7450_v44 }
 0x108   : > { %v7465_v44 = vpop.f32.mrf.mxu2  ;;  %v7467_v54 = vpop.f32.mrf.mxu3 }
 0x109   : > { %8992 = vst [vmem:[#allocation53_spill] sm:$0xff] %v7465_v44  ;;  %v2426_v12 = vpop.f32.mrf.mxu1  ;;  %v3093_v18 = vpop.f32.mrf.mxu0 }
 0x10a   : > { %8993 = vst [vmem:[#allocation54_spill] sm:$0xff] %v7467_v54  ;;  %v2427_v31 = vadd.f32 %v2426_v12, %v7206_v53  ;;  %v8997_v53 = vshrl.u32 %v6851_v11, 16 }
 0x10c   : > { %2465 = vmatmul.bf16.gmra.mxu1 %v2030_v37  ;;  %3132 = vmatmul.bf16.gmra.mxu0 %v7394_v50  ;;  %v8846_v50 = vshll.u32 %v7470_v35, 16  ;;  %v1750_v58 = vor.u32 %v1749_v42, %v8997_v53  ;;  %v8998_v37 = vshll.u32 %v6910_v5, 16 }
 0x10d   : > { %2594 = vmatmul.bf16.gmra.mxu2 %v2031_v23  ;;  %3003 = vmatmul.bf16.gmra.mxu3 %v2696_v21  ;;  %v7483_v23 = vld [vmem:[#allocation2 + $0x54] sm:$0xff]   ;;  %v7485_v21 = vpack.c.b16 %v5914_v52, %v5914_v52 }
 0x10e   : > { %8995 = vst [vmem:[#allocation55_spill] sm:$0xff] %v7483_v23  ;;  %v1751_v12 = vrot.slane %v8998_v37, 1  ;;  %v8848_v14 = vshrl.u32 %v7483_v23, 16 }
 0x10f   : > { %8996 = vst [vmem:[#allocation56_spill] sm:$0xff] %v7485_v21  ;;  %v8847_v36 = vshrl.u32 %v7485_v21, 16 }
 0x110   : > { %v2555_v49 = vpop.f32.mrf.mxu2  ;;  %v2964_v55 = vpop.f32.mrf.mxu3  ;;  %v1752_v37 = vsel %vm978_vm3, %v1750_v58, %v1751_v12  ;;  %v9001_v58 = vshrl.u32 %v6910_v5, 16 }
 0x111   : > { %v2556_v38 = vadd.f32 %v2555_v49, %v2427_v31  ;;  %v2428_v20 = vpop.f32.mrf.mxu1  ;;  %v3095_v56 = vpop.f32.mrf.mxu0  ;;  %v800_v31 = vor.u32 %v8846_v50, %v797_v46 }
 0x112   : > { %v2429_v54 = vadd.f32 %v2428_v20, %v7222_v22  ;;  %v7508_v22 = vrot.slane %v8848_v14, 7  ;;  %v9004_v14 = vshll.u32 %v7057_v2, 16 }
 0x113   : > { %v2965_v29 = vadd.f32 %v2964_v55, %v2556_v38  ;;  %v9000_v55 = vshll.u32 %v6918_v6, 16 }
 0x114   : > { %v1756_v20 = vrot.slane %v9004_v14, 1 }
 0x115   : > { %v7493_v49 = vadd.f32 %v3093_v18, %v2965_v29  ;;  %v1754_v38 = vrot.slane %v9000_v55, 1  ;;  %v968_v18 = vsel %vm6566_vm2, 0, %v800_v31  ;;  %v804_v29 = vrot.slane %v8847_v36, 7 }
 0x116   : > { %v1753_v31 = vor.u32 %v1751_v12, %v9001_v58 }
 0x117   : > { %8999 = vst [vmem:[#allocation57_spill] sm:$0xff] %v7493_v49 }
 0x118   : > { %v2557_v52 = vpop.f32.mrf.mxu2  ;;  %v2966_v44 = vpop.f32.mrf.mxu3 }
 0x119   : > { %v2558_v42 = vadd.f32 %v2557_v52, %v2429_v54  ;;  %v2431_v53 = vpop.f32.mrf.mxu1  ;;  %v3098_v15 = vpop.f32.mrf.mxu0  ;;  %v7511_v54 = vld [vmem:[#allocation2 + $0x58] sm:$0xff]   ;;  %v9002_v52 = vshrl.u32 %v6918_v6, 16 }
 0x11a   : > { %v2432_v5 = vadd.f32 %v2431_v53, %v7247_v1  ;;  %v5966_v1 = vunpack.c.l.b16 %v6918_v6 }
 0x11b   : > { %v2967_v55 = vadd.f32 %v2966_v44, %v2558_v42  ;;  %v1755_v36 = vor.u32 %v1754_v38, %v9002_v52  ;;  %v9005_v44 = vshll.u32 %v7485_v21, 16 }
 0x11c   : > { %2470 = vmatmul.bf16.gmra.mxu1 %v6851_v11  ;;  %3137 = vmatmul.bf16.gmra.mxu0 %v7470_v35  ;;  %v9006_v11 = vshll.u32 %v7483_v23, 16 }
 0x11d   : > { %2599 = vmatmul.bf16.gmra.mxu2 %v1752_v37  ;;  %3008 = vmatmul.bf16.gmra.mxu3 %v968_v18  ;;  %v7519_v50 = vadd.f32 %v3095_v56, %v2967_v55  ;;  %v807_v42 = vor.u32 %v9005_v44, %v804_v29  ;;  %v5919_v37 = vunpack.c.h.b16 %v7511_v54  ;;  %v1821_v55 = vsel %vm7153_vm6, %v1753_v31, 0 }
 0x11e   : > { %v815_v49 = vor.u32 %v9006_v11, %v7508_v22  ;;  %v7533_v14 = vsel %vm978_vm3, %v1755_v36, %v1756_v20  ;;  %v1904_v53 = vunpack.c.l.b16 %v1821_v55 }
 0x11f   : > { %9003 = vst [vmem:[#allocation58_spill] sm:$0xff] %v7519_v50  ;;  %v808_v29 = vsel %vm703_vm0, %v797_v46, %v807_v42  ;;  %v7538_v44 = vpack.c.b16 %v5919_v37, %v5919_v37 }
 0x120   : > { %v2560_v12 = vpop.f32.mrf.mxu2  ;;  %v2969_v18 = vpop.f32.mrf.mxu3  ;;  %v969_v52 = vsel %vm6566_vm2, 0, %v815_v49  ;;  %v2035_v49 = vpack.c.b16 %v5966_v1, %v6865_v47  ;;  %v5867_v47 = vld [vmem:[%s8721_s3 + $0x198] sm:$0xff] }
 0x121   : > { %v2561_v58 = vadd.f32 %v2560_v12, %v2432_v5  ;;  %v2433_v38 = vpop.f32.mrf.mxu1  ;;  %v3100_v56 = vpop.f32.mrf.mxu0  ;;  %v1906_v5 = vunpack.c.l.b16 %v7533_v14  ;;  %v1166_v12 = vunpack.c.l.b16 %v808_v29  ;;  %v1168_v50 = vunpack.c.l.b16 %v969_v52  ;;  %4364 = vmatpush.bf16.msra.mxu2 %v5867_v47 }
 0x122   : > { %v8859_v36 = vshrl.u32 %v7538_v44, 16  ;;  %v2434_v31 = vadd.f32 %v2433_v38, %v7279_v30  ;;  %v8868_v29 = vshll.u32 %v7538_v44, 16  ;;  %v5875_v30 = vld [vmem:[%s8721_s3 + $0x1d8] sm:$0xff]  ;;  %v9007_v38 = vshrl.u32 %v7057_v2, 16 }
 0x123   : > { %v2970_v11 = vadd.f32 %v2969_v18, %v2561_v58  ;;  %v2036_v58 = vpack.c.b16 %v1906_v5, %v1904_v53  ;;  %v2701_v6 = vpack.c.b16 %v1168_v50, %v1166_v12  ;;  %4493 = vmatpush.bf16.msra.mxu3 %v5875_v30 }
 0x124   : > { %v819_v55 = vrot.slane %v8859_v36, 7 }
 0x125   : > { %v7542_v23 = vadd.f32 %v3098_v15, %v2970_v11  ;;  %v1758_v11 = vor.u32 %v1756_v20, %v9007_v38  ;;  %v5819_v20 = vld [vmem:[%s8721_s3 + $0x98] sm:$0xff] }
 0x126   : > { %v822_v1 = vor.u32 %v8868_v29, %v819_v55  ;;  %3217 = vmatpush.bf16.msra.mxu1 %v5819_v20 }
 0x128   : > { %v2562_v46 = vpop.f32.mrf.mxu2  ;;  %v2971_v42 = vpop.f32.mrf.mxu3 }
 0x129   : > { %v2563_v37 = vadd.f32 %v2562_v46, %v2434_v31  ;;  %v2436_v21 = vpop.f32.mrf.mxu1  ;;  %v3103_v18 = vpop.f32.mrf.mxu0 }
 0x12b   : > { %v2972_v15 = vadd.f32 %v2971_v42, %v2563_v37  ;;  %v1822_v42 = vsel %vm7153_vm6, %v1758_v11, 0  ;;  %v1908_v37 = vunpack.c.h.b16 %v7533_v14 }
 0x12c   : > { %2475 = vmatmul.bf16.gmra.mxu1 %v2035_v49  ;;  %3142 = vmatmul.bf16.gmra.mxu0 %v7472_v45  ;;  %v2437_v45 = vadd.f32 %v2436_v21, %v7298_v4  ;;  %v5883_v4 = vld [vmem:[%s8721_s3 + $0x218] sm:$0xff]  ;;  %v6398_v21 = vld [vmem:[#allocation2 + $0x60] sm:$0xff]  }
 0x12d   : > { %2604 = vmatmul.bf16.gmra.mxu2 %v2036_v58  ;;  %3013 = vmatmul.bf16.gmra.mxu3 %v2701_v6  ;;  %v7557_v50 = vadd.f32 %v3100_v56, %v2972_v15  ;;  %v823_v56 = vsel %vm703_vm0, %v7508_v22, %v822_v1  ;;  %v5967_v49 = vunpack.c.h.b16 %v6398_v21  ;;  %v1910_v58 = vunpack.c.l.b16 %v1822_v42 }
 0x12e   : > { %v1170_v6 = vunpack.c.h.b16 %v969_v52  ;;  %v1172_v55 = vunpack.c.l.b16 %v823_v56  ;;  %4622 = vmatpush.bf16.msra.mxu0 %v5883_v4  ;;  %v7581_v52 = vld [vmem:[#allocation2 + $0x68] sm:$0xff]  }
 0x12f   : > { %v2038_v38 = vpack.c.b16 %v7004_v26, %v5967_v49  ;;  %v5922_v26 = vunpack.c.l.b16 %v7581_v52 }
 0x130   : > { %v2565_v53 = vpop.f32.mrf.mxu2  ;;  %v2974_v5 = vpop.f32.mrf.mxu3 }
 0x131   : > { %v2566_v12 = vadd.f32 %v2565_v53, %v2437_v45  ;;  %v2438_v31 = vpop.f32.mrf.mxu1  ;;  %v3105_v46 = vpop.f32.mrf.mxu0  ;;  %v2039_v53 = vpack.c.b16 %v1910_v58, %v1908_v37  ;;  %v7594_v58 = vld [vmem:[#allocation2 + $0x6c] sm:$0xff]  }
 0x132   : > { %v2439_v22 = vadd.f32 %v2438_v31, %v7320_v10 }
 0x133   : > { %v2975_v2 = vadd.f32 %v2974_v5, %v2566_v12  ;;  %v2704_v5 = vpack.c.b16 %v1172_v55, %v1170_v6  ;;  %v7579_v12 = vld [vmem:[#allocation2 + $0x60] sm:$0xff] }
 0x134   : > { %v8857_v10 = vshrl.u32 %v7579_v12, 16  ;;  %v8858_v37 = vshll.u32 %v7579_v12, 16 }
 0x135   : > { %v7575_v15 = vadd.f32 %v3103_v18, %v2975_v2  ;;  %v9008_v2 = vshll.u32 %v6522_v19, 16 }
 0x137   : > { %v1759_v20 = vrot.slane %v9008_v2, 1 }
 0x138   : > { %v2567_v47 = vpop.f32.mrf.mxu2  ;;  %v2976_v30 = vpop.f32.mrf.mxu3 }
 0x139   : > { %v2568_v11 = vadd.f32 %v2567_v47, %v2439_v22  ;;  %v2441_v1 = vpop.f32.mrf.mxu1  ;;  %v3108_v45 = vpop.f32.mrf.mxu0  ;;  %v9010_v22 = vshll.u32 %v6635_v8, 16 }
 0x13a   : > { %v2442_v31 = vadd.f32 %v2441_v1, %v7339_v9  ;;  %v9009_v9 = vshrl.u32 %v6522_v19, 16  ;;  %v8853_v1 = vshrl.u32 %v7594_v58, 16 }
 0x13b   : > { %v2977_v14 = vadd.f32 %v2976_v30, %v2568_v11  ;;  %v1761_v47 = vrot.slane %v9010_v22, 1  ;;  %v6399_v22 = vld [vmem:[#allocation2 + $0x6c] sm:$0xff] }
 0x13c   : > { %2480 = vmatmul.bf16.gmra.mxu1 %v2038_v38  ;;  %3147 = vmatmul.bf16.gmra.mxu0 %v7511_v54  ;;  %v827_v54 = vrot.slane %v8857_v10, 7  ;;  %v1760_v55 = vor.u32 %v1759_v20, %v9009_v9  ;;  %v7622_v9 = vld [vmem:[#allocation2 + $0x70] sm:$0xff]  }
 0x13d   : > { %2609 = vmatmul.bf16.gmra.mxu2 %v2039_v53  ;;  %3018 = vmatmul.bf16.gmra.mxu3 %v2704_v5  ;;  %v7585_v18 = vadd.f32 %v3105_v46, %v2977_v14  ;;  %v7596_v46 = vpack.c.b16 %v5922_v26, %v5922_v26  ;;  %v9011_v26 = vshll.u32 %v6584_v48, 16 }
 0x13e   : > { %v830_v30 = vor.u32 %v8858_v37, %v827_v54  ;;  %v1762_v2 = vsel %vm978_vm3, %v1760_v55, %v1761_v47  ;;  %v9012_v55 = vshrl.u32 %v6635_v8, 16 }
 0x13f   : > { %v8854_v11 = vshrl.u32 %v7596_v46, 16  ;;  %v1764_v19 = vrot.slane %v9011_v26, 1 }
 0x140   : > { %v2570_v42 = vpop.f32.mrf.mxu2  ;;  %v2979_v56 = vpop.f32.mrf.mxu3 }
 0x141   : > { %v2571_v4 = vadd.f32 %v2570_v42, %v2442_v31  ;;  %v2443_v21 = vpop.f32.mrf.mxu1  ;;  %v3110_v49 = vpop.f32.mrf.mxu0  ;;  %v834_v20 = vrot.slane %v8854_v11, 7 }
 0x142   : > { %v2444_v53 = vadd.f32 %v2443_v21, %v7356_v28  ;;  %v7619_v28 = vrot.slane %v8853_v1, 7  ;;  %v8855_v21 = vshll.u32 %v7594_v58, 16  ;;  %v9014_v1 = vshll.u32 %v6767_v63, 16 }
 0x143   : > { %v2980_v6 = vadd.f32 %v2979_v56, %v2571_v4  ;;  %v8856_v4 = vshll.u32 %v7596_v46, 16 }
 0x144   : > { %v1766_v11 = vrot.slane %v9014_v1, 1 }
 0x145   : > { %v7604_v38 = vadd.f32 %v3108_v45, %v2980_v6  ;;  %v970_v45 = vsel %vm6566_vm2, 0, %v830_v30  ;;  %v1763_v30 = vor.u32 %v1761_v47, %v9012_v55 }
 0x148   : > { %v2572_v5 = vpop.f32.mrf.mxu2  ;;  %v2981_v14 = vpop.f32.mrf.mxu3 }
 0x149   : > { %v2573_v31 = vadd.f32 %v2572_v5, %v2444_v53  ;;  %v2446_v42 = vpop.f32.mrf.mxu1  ;;  %v3113_v56 = vpop.f32.mrf.mxu0  ;;  %v9013_v53 = vshrl.u32 %v6584_v48, 16 }
 0x14a   : > { %v2447_v8 = vadd.f32 %v2446_v42, %v7381_v24  ;;  %v6400_v24 = vld [vmem:[#allocation2 + $0x78] sm:$0xff]  }
 0x14b   : > { %v2982_v6 = vadd.f32 %v2981_v14, %v2573_v31  ;;  %v1765_v5 = vor.u32 %v1764_v19, %v9013_v53  ;;  %v837_v14 = vor.u32 %v8856_v4, %v834_v20  ;;  %v845_v31 = vor.u32 %v8855_v21, %v7619_v28 }
 0x14c   : > { %2485 = vmatmul.bf16.gmra.mxu1 %v6399_v22  ;;  %3152 = vmatmul.bf16.gmra.mxu0 %v7579_v12  ;;  %v5970_v42 = vunpack.c.l.b16 %v6400_v24 }
 0x14d   : > { %2614 = vmatmul.bf16.gmra.mxu2 %v1762_v2  ;;  %3023 = vmatmul.bf16.gmra.mxu3 %v970_v45  ;;  %v7629_v26 = vadd.f32 %v3110_v49, %v2982_v6  ;;  %v5927_v2 = vunpack.c.h.b16 %v7622_v9  ;;  %v1823_v6 = vsel %vm7153_vm6, %v1763_v30, 0  ;;  %v7643_v1 = vsel %vm978_vm3, %v1765_v5, %v1766_v11 }
 0x14e   : > { %v838_v20 = vsel %vm703_vm0, %v827_v54, %v837_v14  ;;  %v971_v22 = vsel %vm6566_vm2, 0, %v845_v31  ;;  %v1916_v21 = vunpack.c.l.b16 %v1823_v6  ;;  %v2043_v31 = vpack.c.b16 %v5970_v42, %v6615_v62  ;;  %v5866_v62 = vld [vmem:[%s8721_s3 + $0x190] sm:$0xff] }
 0x14f   : > { %v7648_v55 = vpack.c.b16 %v5927_v2, %v5927_v2  ;;  %v1180_v4 = vunpack.c.l.b16 %v971_v22  ;;  %4365 = vmatpush.bf16.msra.mxu2 %v5866_v62 }
 0x150   : > { %v2575_v47 = vpop.f32.mrf.mxu2  ;;  %v2984_v45 = vpop.f32.mrf.mxu3 }
 0x151   : > { %v2576_v48 = vadd.f32 %v2575_v47, %v2447_v8  ;;  %v2448_v19 = vpop.f32.mrf.mxu1  ;;  %v3115_v49 = vpop.f32.mrf.mxu0  ;;  %v1918_v8 = vunpack.c.l.b16 %v7643_v1  ;;  %v1178_v47 = vunpack.c.l.b16 %v838_v20  ;;  %v8866_v30 = vshrl.u32 %v7648_v55, 16 }
 0x152   : > { %v2449_v5 = vadd.f32 %v2448_v19, %v7412_v43  ;;  %v8867_v20 = vshll.u32 %v7648_v55, 16  ;;  %v5874_v43 = vld [vmem:[%s8721_s3 + $0x1d0] sm:$0xff] }
 0x153   : > { %v2985_v53 = vadd.f32 %v2984_v45, %v2576_v48  ;;  %v2044_v48 = vpack.c.b16 %v1918_v8, %v1916_v21  ;;  %v2709_v36 = vpack.c.b16 %v1180_v4, %v1178_v47  ;;  %v849_v6 = vrot.slane %v8866_v30, 7  ;;  %4494 = vmatpush.bf16.msra.mxu3 %v5874_v43  ;;  %v9027_v30 = vld [vmem:[#allocation10_spill] sm:$0xff] }
 0x154   : > { %v9015_v21 = vshrl.u32 %v6767_v63, 16 }
 0x155   : > { %v7651_v10 = vadd.f32 %v3113_v56, %v2985_v53  ;;  %v852_v53 = vor.u32 %v8867_v20, %v849_v6 }
 0x156   : > { %v1768_v19 = vor.u32 %v1766_v11, %v9015_v21  ;;  %v5818_v11 = vld [vmem:[%s8721_s3 + $0x90] sm:$0xff] }
 0x157   : > { %3218 = vmatpush.bf16.msra.mxu1 %v5818_v11 }
 0x158   : > { %v2577_v54 = vpop.f32.mrf.mxu2  ;;  %v2986_v14 = vpop.f32.mrf.mxu3 }
 0x159   : > { %v2578_v2 = vadd.f32 %v2577_v54, %v2449_v5  ;;  %v2451_v37 = vpop.f32.mrf.mxu1  ;;  %v3118_v45 = vpop.f32.mrf.mxu0  ;;  %v1824_v54 = vsel %vm7153_vm6, %v1768_v19, 0 }
 0x15b   : > { %v2987_v56 = vadd.f32 %v2986_v14, %v2578_v2  ;;  %v1920_v14 = vunpack.c.h.b16 %v7643_v1  ;;  %v1182_v2 = vunpack.c.h.b16 %v971_v22  ;;  %v7690_v22 = vld [vmem:[#allocation2 + $0x80] sm:$0xff]  }
 0x15c   : > { %2490 = vmatmul.bf16.gmra.mxu1 %v2043_v31  ;;  %3157 = vmatmul.bf16.gmra.mxu0 %v7581_v52  ;;  %v2452_v52 = vadd.f32 %v2451_v37, %v7430_v39  ;;  %v5882_v39 = vld [vmem:[%s8721_s3 + $0x210] sm:$0xff]  ;;  %v5971_v37 = vunpack.c.h.b16 %v6400_v24  ;;  %v1922_v31 = vunpack.c.l.b16 %v1824_v54  ;;  %v9016_v54 = vshll.u32 %v6854_v7, 16 }
 0x15d   : > { %2619 = vmatmul.bf16.gmra.mxu2 %v2044_v48  ;;  %3028 = vmatmul.bf16.gmra.mxu3 %v2709_v36  ;;  %v7666_v4 = vadd.f32 %v3115_v49, %v2987_v56  ;;  %v853_v49 = vsel %vm703_vm0, %v7619_v28, %v852_v53 }
 0x15e   : > { %v1184_v48 = vunpack.c.l.b16 %v853_v49  ;;  %4623 = vmatpush.bf16.msra.mxu0 %v5882_v39  ;;  %v2046_v43 = vpack.c.b16 %v6739_v34, %v5971_v37  ;;  %v5930_v34 = vunpack.c.l.b16 %v7690_v22  ;;  %v1769_v49 = vrot.slane %v9016_v54, 1 }
 0x160   : > { %v2580_v36 = vpop.f32.mrf.mxu2  ;;  %v2989_v42 = vpop.f32.mrf.mxu3  ;;  %v2712_v24 = vpack.c.b16 %v1184_v48, %v1182_v2  ;;  %v9018_v48 = vld [vmem:[#allocation12_spill] sm:$0xff] }
 0x161   : > { %v2581_v8 = vadd.f32 %v2580_v36, %v2452_v52  ;;  %v2453_v47 = vpop.f32.mrf.mxu1  ;;  %v3120_v5 = vpop.f32.mrf.mxu0  ;;  %v2047_v52 = vpack.c.b16 %v1922_v31, %v1920_v14  ;;  %v7688_v36 = vld [vmem:[#allocation2 + $0x78] sm:$0xff]  ;;  %v7703_v14 = vld [vmem:[#allocation2 + $0x84] sm:$0xff]  }
 0x162   : > { %v2454_v28 = vadd.f32 %v2453_v47, %v7452_v16  ;;  %v8862_v16 = vshrl.u32 %v7688_v36, 16  ;;  %v8865_v37 = vshll.u32 %v7688_v36, 16 }
 0x163   : > { %v2990_v63 = vadd.f32 %v2989_v42, %v2581_v8 }
 0x165   : > { %v7684_v6 = vadd.f32 %v3118_v45, %v2990_v63 }
 0x168   : > { %v2582_v56 = vpop.f32.mrf.mxu2  ;;  %v2991_v62 = vpop.f32.mrf.mxu3 }
 0x169   : > { %v2583_v21 = vadd.f32 %v2582_v56, %v2454_v28  ;;  %v2456_v19 = vpop.f32.mrf.mxu1  ;;  %v3123_v53 = vpop.f32.mrf.mxu0  ;;  %v9019_v28 = vshll.u32 %v9018_v48, 16 }
 0x16a   : > { %v2457_v42 = vadd.f32 %v2456_v19, %v7208_v57  ;;  %v9017_v57 = vshrl.u32 %v6854_v7, 16  ;;  %v8861_v19 = vshrl.u32 %v7703_v14, 16 }
 0x16b   : > { %v2992_v1 = vadd.f32 %v2991_v62, %v2583_v21  ;;  %v1771_v56 = vrot.slane %v9019_v28, 1  ;;  %v7731_v28 = vld [vmem:[#allocation2 + $0x88] sm:$0xff]  }
 0x16c   : > { %2495 = vmatmul.bf16.gmra.mxu1 %v2046_v43  ;;  %3162 = vmatmul.bf16.gmra.mxu0 %v7622_v9  ;;  %v857_v9 = vrot.slane %v8862_v16, 7  ;;  %v1770_v2 = vor.u32 %v1769_v49, %v9017_v57 }
 0x16d   : > { %2624 = vmatmul.bf16.gmra.mxu2 %v2047_v52  ;;  %3033 = vmatmul.bf16.gmra.mxu3 %v2712_v24  ;;  %v7694_v45 = vadd.f32 %v3120_v5, %v2992_v1  ;;  %v7705_v5 = vpack.c.b16 %v5930_v34, %v5930_v34  ;;  %v9020_v34 = vld [vmem:[#allocation13_spill] sm:$0xff] }
 0x16e   : > { %v860_v62 = vor.u32 %v8865_v37, %v857_v9  ;;  %v1772_v49 = vsel %vm978_vm3, %v1770_v2, %v1771_v56  ;;  %v9022_v2 = vshrl.u32 %v9018_v48, 16 }
 0x16f   : > { %v8860_v21 = vshrl.u32 %v7705_v5, 16 }
 0x170   : > { %v2585_v8 = vpop.f32.mrf.mxu2  ;;  %v2994_v47 = vpop.f32.mrf.mxu3 }
 0x171   : > { %v2586_v63 = vadd.f32 %v2585_v8, %v2457_v42  ;;  %v2458_v11 = vpop.f32.mrf.mxu1  ;;  %v3125_v39 = vpop.f32.mrf.mxu0  ;;  %v9021_v42 = vshll.u32 %v9020_v34, 16 }
 0x172   : > { %v2459_v52 = vadd.f32 %v2458_v11, %v7224_v59  ;;  %v7728_v59 = vrot.slane %v8861_v19, 7  ;;  %v8863_v11 = vshll.u32 %v7703_v14, 16  ;;  %v9024_v19 = vshll.u32 %v7067_v51, 16 }
 0x173   : > { %v2995_v31 = vadd.f32 %v2994_v47, %v2586_v63  ;;  %v1774_v7 = vrot.slane %v9021_v42, 1  ;;  %v864_v63 = vrot.slane %v8860_v21, 7 }
 0x174   : > { %v1776_v16 = vrot.slane %v9024_v19, 1 }
 0x175   : > { %v7713_v43 = vadd.f32 %v3123_v53, %v2995_v31  ;;  %v972_v53 = vsel %vm6566_vm2, 0, %v860_v62  ;;  %v8864_v31 = vshll.u32 %v7705_v5, 16  ;;  %v1773_v62 = vor.u32 %v1771_v56, %v9022_v2 }
 0x178   : > { %v2587_v24 = vpop.f32.mrf.mxu2  ;;  %v2996_v1 = vpop.f32.mrf.mxu3 }
 0x179   : > { %v2588_v8 = vadd.f32 %v2587_v24, %v2459_v52  ;;  %v2461_v47 = vpop.f32.mrf.mxu1  ;;  %v3128_v54 = vpop.f32.mrf.mxu0  ;;  %v6401_v52 = vld [vmem:[#allocation2 + $0x84] sm:$0xff]  ;;  %v9023_v24 = vshrl.u32 %v9020_v34, 16 }
 0x17a   : > { %v2462_v48 = vadd.f32 %v2461_v47, %v7249_v3  ;;  %v6402_v3 = vld [vmem:[#allocation2 + $0x90] sm:$0xff]  }
 0x17b   : > { %v2997_v57 = vadd.f32 %v2996_v1, %v2588_v8  ;;  %v1775_v42 = vor.u32 %v1774_v7, %v9023_v24  ;;  %v867_v1 = vor.u32 %v8864_v31, %v864_v63  ;;  %v875_v8 = vor.u32 %v8863_v11, %v7728_v59 }
 0x17c   : > { %2500 = vmatmul.bf16.gmra.mxu1 %v6401_v52  ;;  %3167 = vmatmul.bf16.gmra.mxu0 %v7688_v36  ;;  %v5974_v47 = vunpack.c.l.b16 %v6402_v3 }
 0x17d   : > { %2629 = vmatmul.bf16.gmra.mxu2 %v1772_v49  ;;  %3038 = vmatmul.bf16.gmra.mxu3 %v972_v53  ;;  %v7738_v21 = vadd.f32 %v3125_v39, %v2997_v57  ;;  %v5935_v49 = vunpack.c.h.b16 %v7731_v28  ;;  %v1825_v57 = vsel %vm7153_vm6, %v1773_v62, 0  ;;  %v7752_v19 = vsel %vm978_vm3, %v1775_v42, %v1776_v16 }
 0x17e   : > { %v868_v63 = vsel %vm703_vm0, %v857_v9, %v867_v1  ;;  %v973_v52 = vsel %vm6566_vm2, 0, %v875_v8  ;;  %v1928_v11 = vunpack.c.l.b16 %v1825_v57  ;;  %v2051_v8 = vpack.c.b16 %v5974_v47, %v9027_v30  ;;  %v5873_v30 = vld [vmem:[%s8721_s3 + $0x1c8] sm:$0xff] }
 0x17f   : > { %v7757_v2 = vpack.c.b16 %v5935_v49, %v5935_v49  ;;  %v1192_v31 = vunpack.c.l.b16 %v973_v52  ;;  %4495 = vmatpush.bf16.msra.mxu3 %v5873_v30  ;;  %v9031_v30 = vld [vmem:[#allocation16_spill] sm:$0xff] }
 0x180   : > { %v2590_v56 = vpop.f32.mrf.mxu2  ;;  %v2999_v53 = vpop.f32.mrf.mxu3 }
 0x181   : > { %v2591_v34 = vadd.f32 %v2590_v56, %v2462_v48  ;;  %v2463_v7 = vpop.f32.mrf.mxu1  ;;  %v3130_v39 = vpop.f32.mrf.mxu0  ;;  %9025 = vst [vmem:[#allocation12_spill] sm:$0xff] %v7757_v2  ;;  %v1930_v48 = vunpack.c.l.b16 %v7752_v19  ;;  %v1190_v56 = vunpack.c.l.b16 %v868_v63  ;;  %v8873_v62 = vshrl.u32 %v7757_v2, 16 }
 0x182   : > { %v2464_v42 = vadd.f32 %v2463_v7, %v7281_v25  ;;  %v8874_v63 = vshll.u32 %v7757_v2, 16  ;;  %v5865_v25 = vld [vmem:[%s8721_s3 + $0x188] sm:$0xff] }
 0x183   : > { %v3000_v24 = vadd.f32 %v2999_v53, %v2591_v34  ;;  %v2052_v34 = vpack.c.b16 %v1930_v48, %v1928_v11  ;;  %v2717_v29 = vpack.c.b16 %v1192_v31, %v1190_v56  ;;  %v879_v57 = vrot.slane %v8873_v62, 7  ;;  %4366 = vmatpush.bf16.msra.mxu2 %v5865_v25 }
 0x184   : > { %v9029_v11 = vshrl.u32 %v7067_v51, 16 }
 0x185   : > { %v7760_v37 = vadd.f32 %v3128_v54, %v3000_v24  ;;  %v882_v24 = vor.u32 %v8874_v63, %v879_v57 }
 0x186   : > { %v1778_v7 = vor.u32 %v1776_v16, %v9029_v11  ;;  %v5817_v16 = vld [vmem:[%s8721_s3 + $0x88] sm:$0xff] }
 0x187   : > { %9026 = vst [vmem:[#allocation13_spill] sm:$0xff] %v7760_v37  ;;  %3219 = vmatpush.bf16.msra.mxu1 %v5817_v16 }
 0x188   : > { %v2592_v9 = vpop.f32.mrf.mxu2  ;;  %v3001_v1 = vpop.f32.mrf.mxu3 }
 0x189   : > { %v2593_v49 = vadd.f32 %v2592_v9, %v2464_v42  ;;  %v2466_v20 = vpop.f32.mrf.mxu1  ;;  %v3133_v53 = vpop.f32.mrf.mxu0  ;;  %v1826_v9 = vsel %vm7153_vm6, %v1778_v7, 0 }
 0x18b   : > { %v3002_v54 = vadd.f32 %v3001_v1, %v2593_v49  ;;  %v1932_v1 = vunpack.c.h.b16 %v7752_v19  ;;  %v1194_v49 = vunpack.c.h.b16 %v973_v52  ;;  %v7799_v52 = vld [vmem:[#allocation2 + $0x98] sm:$0xff]  }
 0x18c   : > { %2505 = vmatmul.bf16.gmra.mxu1 %v2051_v8  ;;  %3172 = vmatmul.bf16.gmra.mxu0 %v7690_v22  ;;  %v2467_v22 = vadd.f32 %v2466_v20, %v7300_v40  ;;  %v5881_v40 = vld [vmem:[%s8721_s3 + $0x208] sm:$0xff]  ;;  %v5975_v20 = vunpack.c.h.b16 %v6402_v3  ;;  %v1934_v8 = vunpack.c.l.b16 %v1826_v9 }
 0x18d   : > { %2634 = vmatmul.bf16.gmra.mxu2 %v2052_v34  ;;  %3043 = vmatmul.bf16.gmra.mxu3 %v2717_v29  ;;  %v7775_v31 = vadd.f32 %v3130_v39, %v3002_v54  ;;  %v883_v39 = vsel %vm703_vm0, %v7728_v59, %v882_v24 }
 0x18e   : > { %v1196_v34 = vunpack.c.l.b16 %v883_v39  ;;  %4624 = vmatpush.bf16.msra.mxu0 %v5881_v40  ;;  %v2054_v11 = vpack.c.b16 %v9031_v30, %v5975_v20 }
 0x18f   : > { %9028 = vst [vmem:[#allocation10_spill] sm:$0xff] %v7775_v31 }
 0x190   : > { %v2595_v29 = vpop.f32.mrf.mxu2  ;;  %v3004_v47 = vpop.f32.mrf.mxu3  ;;  %v2720_v3 = vpack.c.b16 %v1196_v34, %v1194_v49  ;;  %v7812_v34 = vld [vmem:[#allocation2 + $0x9c] sm:$0xff]  }
 0x191   : > { %v2596_v48 = vadd.f32 %v2595_v29, %v2467_v22  ;;  %v2468_v56 = vpop.f32.mrf.mxu1  ;;  %v3135_v42 = vpop.f32.mrf.mxu0  ;;  %v2055_v29 = vpack.c.b16 %v1934_v8, %v1932_v1 }
 0x192   : > { %v2469_v59 = vadd.f32 %v2468_v56, %v7322_v13 }
 0x193   : > { %v3005_v51 = vadd.f32 %v3004_v47, %v2596_v48  ;;  %v7797_v47 = vld [vmem:[#allocation2 + $0x90] sm:$0xff]  ;;  %v5938_v48 = vunpack.c.l.b16 %v7799_v52 }
 0x194   : > { %9032 = vst [vmem:[#allocation16_spill] sm:$0xff] %v7797_v47  ;;  %v8870_v13 = vshrl.u32 %v7797_v47, 16  ;;  %v8871_v49 = vshll.u32 %v7797_v47, 16 }
 0x195   : > { %v7793_v57 = vadd.f32 %v3133_v53, %v3005_v51  ;;  %v9034_v51 = vld [vmem:[#allocation3_spill] sm:$0xff] }
 0x196   : > { %v9035_v16 = vshll.u32 %v9034_v51, 16  ;;  %9036 = vst [vmem:[#allocation3_spill] sm:$0xff] %v7812_v34 }
 0x197   : > { %9030 = vst [vmem:[#allocation59_spill] sm:$0xff] %v7793_v57 }
 0x198   : > { %v2597_v54 = vpop.f32.mrf.mxu2  ;;  %v3006_v25 = vpop.f32.mrf.mxu3  ;;  %v1779_v40 = vrot.slane %v9035_v16, 1 }
 0x199   : > { %v2598_v7 = vadd.f32 %v2597_v54, %v2469_v59  ;;  %v2471_v24 = vpop.f32.mrf.mxu1  ;;  %v3138_v22 = vpop.f32.mrf.mxu0 }
 0x19a   : > { %v2472_v56 = vadd.f32 %v2471_v24, %v7341_v27  ;;  %v9038_v27 = vshrl.u32 %v9034_v51, 16 }
 0x19b   : > { %v3007_v19 = vadd.f32 %v3006_v25, %v2598_v7  ;;  %v9039_v25 = vld [vmem:[#allocation6_spill] sm:$0xff] }
 0x19c   : > { %2510 = vmatmul.bf16.gmra.mxu1 %v2054_v11  ;;  %3177 = vmatmul.bf16.gmra.mxu0 %v7731_v28  ;;  %v887_v28 = vrot.slane %v8870_v13, 7  ;;  %v1780_v54 = vor.u32 %v1779_v40, %v9038_v27  ;;  %v9040_v30 = vshll.u32 %v9039_v25, 16 }
 0x19d   : > { %2639 = vmatmul.bf16.gmra.mxu2 %v2055_v29  ;;  %3048 = vmatmul.bf16.gmra.mxu3 %v2720_v3  ;;  %v7803_v53 = vadd.f32 %v3135_v42, %v3007_v19  ;;  %v7814_v42 = vpack.c.b16 %v5938_v48, %v5938_v48  ;;  %v8872_v3 = vshrl.u32 %v7812_v34, 16 }
 0x19e   : > { %v1781_v11 = vrot.slane %v9040_v30, 1  ;;  %v890_v7 = vor.u32 %v8871_v49, %v887_v28 }
 0x19f   : > { %9033 = vst [vmem:[#allocation60_spill] sm:$0xff] %v7803_v53  ;;  %v8869_v29 = vshrl.u32 %v7814_v42, 16  ;;  %v8876_v30 = vshll.u32 %v7814_v42, 16 }
 0x1a0   : > { %v2600_v9 = vpop.f32.mrf.mxu2  ;;  %v3009_v39 = vpop.f32.mrf.mxu3  ;;  %9037 = vst [vmem:[#allocation61_spill] sm:$0xff] %v7814_v42  ;;  %v1782_v27 = vsel %vm978_vm3, %v1780_v54, %v1781_v11  ;;  %v9044_v54 = vshrl.u32 %v9039_v25, 16 }
 0x1a1   : > { %v2601_v20 = vadd.f32 %v2600_v9, %v2472_v56  ;;  %v2473_v1 = vpop.f32.mrf.mxu1  ;;  %v3140_v8 = vpop.f32.mrf.mxu0  ;;  %v9042_v9 = vld [vmem:[#allocation4_spill] sm:$0xff] }
 0x1a2   : > { %v2474_v19 = vadd.f32 %v2473_v1, %v7358_v0  ;;  %v7837_v0 = vrot.slane %v8872_v3, 7  ;;  %v8875_v1 = vshll.u32 %v7812_v34, 16  ;;  %v9047_v3 = vld [vmem:[#allocation8_spill] sm:$0xff]  ;;  %v9051_v34 = vld [vmem:[#allocation5_spill] sm:$0xff] }
 0x1a3   : > { %v3010_v59 = vadd.f32 %v3009_v39, %v2601_v20  ;;  %v9043_v39 = vshll.u32 %v9042_v9, 16  ;;  %v9048_v62 = vshll.u32 %v9047_v3, 16 }
 0x1a5   : > { %v7822_v24 = vadd.f32 %v3138_v22, %v3010_v59  ;;  %v1784_v51 = vrot.slane %v9043_v39, 1  ;;  %v974_v22 = vsel %vm6566_vm2, 0, %v890_v7  ;;  %v894_v59 = vrot.slane %v8869_v29, 7 }
 0x1a6   : > { %v1783_v7 = vor.u32 %v1781_v11, %v9044_v54  ;;  %v9045_v29 = vshrl.u32 %v9042_v9, 16  ;;  %v1786_v63 = vrot.slane %v9048_v62, 1 }
 0x1a7   : > { %9041 = vst [vmem:[#allocation6_spill] sm:$0xff] %v7822_v24 }
 0x1a8   : > { %v2602_v48 = vpop.f32.mrf.mxu2  ;;  %v3011_v56 = vpop.f32.mrf.mxu3  ;;  %v1785_v13 = vor.u32 %v1784_v51, %v9045_v29  ;;  %v1827_v51 = vsel %vm7153_vm6, %v1783_v7, 0 }
 0x1a9   : > { %v2603_v16 = vadd.f32 %v2602_v48, %v2474_v19  ;;  %v2476_v40 = vpop.f32.mrf.mxu1  ;;  %v3143_v20 = vpop.f32.mrf.mxu0  ;;  %v7840_v19 = vld [vmem:[#allocation2 + $0xa0] sm:$0xff]  }
 0x1aa   : > { %v6403_v48 = vld [vmem:[#allocation2 + $0x9c] sm:$0xff]  ;;  %v2477_v25 = vadd.f32 %v2476_v40, %v7383_v17  ;;  %v7861_v62 = vsel %vm978_vm3, %v1785_v13, %v1786_v63  ;;  %v6404_v17 = vld [vmem:[#allocation2 + $0xa8] sm:$0xff]  }
 0x1ab   : > { %v3012_v39 = vadd.f32 %v3011_v56, %v2603_v16  ;;  %v897_v56 = vor.u32 %v8876_v30, %v894_v59  ;;  %v905_v16 = vor.u32 %v8875_v1, %v7837_v0  ;;  %v5978_v40 = vunpack.c.l.b16 %v6404_v17 }
 0x1ac   : > { %2515 = vmatmul.bf16.gmra.mxu1 %v6403_v48  ;;  %3182 = vmatmul.bf16.gmra.mxu0 %v7797_v47  ;;  %v1940_v1 = vunpack.c.l.b16 %v1827_v51 }
 0x1ad   : > { %2644 = vmatmul.bf16.gmra.mxu2 %v1782_v27  ;;  %3053 = vmatmul.bf16.gmra.mxu3 %v974_v22  ;;  %v7847_v49 = vadd.f32 %v3140_v8, %v3012_v39  ;;  %v5943_v27 = vunpack.c.h.b16 %v7840_v19  ;;  %v898_v59 = vsel %vm703_vm0, %v887_v28, %v897_v56  ;;  %v975_v39 = vsel %vm6566_vm2, 0, %v905_v16 }
 0x1ae   : > { %v1204_v30 = vunpack.c.l.b16 %v975_v39  ;;  %v2059_v16 = vpack.c.b16 %v5978_v40, %v9051_v34  ;;  %v5872_v34 = vld [vmem:[%s8721_s3 + $0x1c0] sm:$0xff] }
 0x1af   : > { %9046 = vst [vmem:[#allocation4_spill] sm:$0xff] %v7847_v49  ;;  %v7866_v48 = vpack.c.b16 %v5943_v27, %v5943_v27  ;;  %4496 = vmatpush.bf16.msra.mxu3 %v5872_v34  ;;  %v9055_v34 = vld [vmem:[#allocation7_spill] sm:$0xff] }
 0x1b0   : > { %v2605_v11 = vpop.f32.mrf.mxu2  ;;  %v3014_v22 = vpop.f32.mrf.mxu3 }
 0x1b1   : > { %v2606_v9 = vadd.f32 %v2605_v11, %v2477_v25  ;;  %v2478_v29 = vpop.f32.mrf.mxu1  ;;  %v3145_v8 = vpop.f32.mrf.mxu0  ;;  %9049 = vst [vmem:[#allocation8_spill] sm:$0xff] %v7866_v48  ;;  %v1942_v25 = vunpack.c.l.b16 %v7861_v62  ;;  %v1202_v11 = vunpack.c.l.b16 %v898_v59  ;;  %v8884_v13 = vshrl.u32 %v7866_v48, 16 }
 0x1b2   : > { %v2479_v7 = vadd.f32 %v2478_v29, %v7414_v33  ;;  %v8885_v59 = vshll.u32 %v7866_v48, 16  ;;  %v5864_v33 = vld [vmem:[%s8721_s3 + $0x180] sm:$0xff] }
 0x1b3   : > { %v3015_v54 = vadd.f32 %v3014_v22, %v2606_v9  ;;  %v2060_v9 = vpack.c.b16 %v1942_v25, %v1940_v1  ;;  %v2725_v24 = vpack.c.b16 %v1204_v30, %v1202_v11  ;;  %v909_v51 = vrot.slane %v8884_v13, 7  ;;  %4367 = vmatpush.bf16.msra.mxu2 %v5864_v33 }
 0x1b4   : > { %v9053_v1 = vshrl.u32 %v9047_v3, 16 }
 0x1b5   : > { %v7869_v49 = vadd.f32 %v3143_v20, %v3015_v54  ;;  %v912_v54 = vor.u32 %v8885_v59, %v909_v51 }
 0x1b6   : > { %v1788_v29 = vor.u32 %v1786_v63, %v9053_v1  ;;  %v5816_v63 = vld [vmem:[%s8721_s3 + $0x80] sm:$0xff] }
 0x1b7   : > { %9050 = vst [vmem:[#allocation62_spill] sm:$0xff] %v7869_v49  ;;  %3220 = vmatpush.bf16.msra.mxu1 %v5816_v63  ;;  %v9059_v63 = vld [vmem:[#allocation9_spill] sm:$0xff] }
 0x1b8   : > { %v2607_v28 = vpop.f32.mrf.mxu2  ;;  %v3016_v56 = vpop.f32.mrf.mxu3 }
 0x1b9   : > { %v2608_v27 = vadd.f32 %v2607_v28, %v2479_v7  ;;  %v2481_v42 = vpop.f32.mrf.mxu1  ;;  %v3148_v22 = vpop.f32.mrf.mxu0  ;;  %v1828_v28 = vsel %vm7153_vm6, %v1788_v29, 0 }
 0x1bb   : > { %v3017_v20 = vadd.f32 %v3016_v56, %v2608_v27  ;;  %v1944_v56 = vunpack.c.h.b16 %v7861_v62  ;;  %v1206_v27 = vunpack.c.h.b16 %v975_v39  ;;  %v7908_v39 = vld [vmem:[#allocation2 + $0xb0] sm:$0xff]  }
 0x1bc   : > { %2520 = vmatmul.bf16.gmra.mxu1 %v2059_v16  ;;  %3187 = vmatmul.bf16.gmra.mxu0 %v7799_v52  ;;  %v2482_v52 = vadd.f32 %v2481_v42, %v7432_v32  ;;  %v5880_v32 = vld [vmem:[%s8721_s3 + $0x200] sm:$0xff]  ;;  %v5979_v42 = vunpack.c.h.b16 %v6404_v17  ;;  %v1946_v16 = vunpack.c.l.b16 %v1828_v28 }
 0x1bd   : > { %2649 = vmatmul.bf16.gmra.mxu2 %v2060_v9  ;;  %3058 = vmatmul.bf16.gmra.mxu3 %v2725_v24  ;;  %v7884_v30 = vadd.f32 %v3145_v8, %v3017_v20  ;;  %v913_v8 = vsel %vm703_vm0, %v7837_v0, %v912_v54 }
 0x1be   : > { %v1208_v9 = vunpack.c.l.b16 %v913_v8  ;;  %4625 = vmatpush.bf16.msra.mxu0 %v5880_v32  ;;  %v2062_v1 = vpack.c.b16 %v9055_v34, %v5979_v42  ;;  %v9060_v32 = vshll.u32 %v9059_v63, 16 }
 0x1bf   : > { %9052 = vst [vmem:[#allocation5_spill] sm:$0xff] %v7884_v30 }
 0x1c0   : > { %v2610_v24 = vpop.f32.mrf.mxu2  ;;  %v3019_v40 = vpop.f32.mrf.mxu3  ;;  %v2728_v17 = vpack.c.b16 %v1208_v9, %v1206_v27  ;;  %v1789_v42 = vrot.slane %v9060_v32, 1 }
 0x1c1   : > { %v2611_v25 = vadd.f32 %v2610_v24, %v2482_v52  ;;  %v2483_v11 = vpop.f32.mrf.mxu1  ;;  %v3150_v7 = vpop.f32.mrf.mxu0  ;;  %v2063_v24 = vpack.c.b16 %v1946_v16, %v1944_v56 }
 0x1c2   : > { %v2484_v0 = vadd.f32 %v2483_v11, %v7454_v60  ;;  %v9058_v11 = vld [vmem:[#allocation24_spill] sm:$0xff] }
 0x1c3   : > { %v3020_v3 = vadd.f32 %v3019_v40, %v2611_v25  ;;  %v7906_v40 = vld [vmem:[#allocation2 + $0xa8] sm:$0xff]  ;;  %v5946_v25 = vunpack.c.l.b16 %v7908_v39 }
 0x1c4   : > { %9056 = vst [vmem:[#allocation7_spill] sm:$0xff] %v7906_v40  ;;  %v8881_v60 = vshrl.u32 %v7906_v40, 16  ;;  %v8882_v9 = vshll.u32 %v7906_v40, 16 }
 0x1c5   : > { %v7902_v51 = vadd.f32 %v3148_v22, %v3020_v3 }
 0x1c7   : > { %9054 = vst [vmem:[#allocation63_spill] sm:$0xff] %v7902_v51 }
 0x1c8   : > { %v2612_v20 = vpop.f32.mrf.mxu2  ;;  %v3021_v33 = vpop.f32.mrf.mxu3 }
 0x1c9   : > { %v2613_v29 = vadd.f32 %v2612_v20, %v2484_v0  ;;  %v2486_v54 = vpop.f32.mrf.mxu1  ;;  %v3153_v52 = vpop.f32.mrf.mxu0  ;;  %v7921_v0 = vld [vmem:[#allocation2 + $0xb4] sm:$0xff]  }
 0x1ca   : > { %v2487_v28 = vadd.f32 %v2486_v54, %v9058_v11  ;;  %9061 = vst [vmem:[#allocation24_spill] sm:$0xff] %v7921_v0  ;;  %v8886_v11 = vshrl.u32 %v7921_v0, 16 }
 0x1cb   : > { %v3022_v62 = vadd.f32 %v3021_v33, %v2613_v29  ;;  %v9063_v33 = vshrl.u32 %v9059_v63, 16 }
 0x1cc   : > { %2525 = vmatmul.bf16.gmra.mxu1 %v2062_v1  ;;  %3192 = vmatmul.bf16.gmra.mxu0 %v7840_v19  ;;  %v917_v19 = vrot.slane %v8881_v60, 7  ;;  %v9064_v1 = vld [vmem:[#allocation14_spill] sm:$0xff] }
 0x1cd   : > { %2654 = vmatmul.bf16.gmra.mxu2 %v2063_v24  ;;  %3063 = vmatmul.bf16.gmra.mxu3 %v2728_v17  ;;  %v7912_v22 = vadd.f32 %v3150_v7, %v3022_v62  ;;  %v7923_v7 = vpack.c.b16 %v5946_v25, %v5946_v25  ;;  %v1790_v34 = vor.u32 %v1789_v42, %v9063_v33  ;;  %v9065_v29 = vshll.u32 %v9064_v1, 16 }
 0x1ce   : > { %v920_v24 = vor.u32 %v8882_v9, %v917_v19 }
 0x1cf   : > { %9057 = vst [vmem:[#allocation64_spill] sm:$0xff] %v7912_v22  ;;  %v1791_v54 = vrot.slane %v9065_v29, 1  ;;  %v8883_v62 = vshrl.u32 %v7923_v7, 16 }
 0x1d0   : > { %v2615_v8 = vpop.f32.mrf.mxu2  ;;  %v3024_v3 = vpop.f32.mrf.mxu3  ;;  %9062 = vst [vmem:[#allocation9_spill] sm:$0xff] %v7923_v7 }
 0x1d1   : > { %v2616_v56 = vadd.f32 %v2615_v8, %v2487_v28  ;;  %v2488_v16 = vpop.f32.mrf.mxu1  ;;  %v3155_v27 = vpop.f32.mrf.mxu0  ;;  %v9067_v28 = vld [vmem:[#allocation28_spill] sm:$0xff]  ;;  %v1792_v29 = vsel %vm978_vm3, %v1790_v34, %v1791_v54  ;;  %v9070_v34 = vshrl.u32 %v9064_v1, 16 }
 0x1d2   : > { %v2489_v8 = vadd.f32 %v2488_v16, %v9067_v28  ;;  %v7946_v16 = vrot.slane %v8886_v11, 7  ;;  %v9073_v11 = vld [vmem:[#allocation18_spill] sm:$0xff] }
 0x1d3   : > { %v3025_v20 = vadd.f32 %v3024_v3, %v2616_v56  ;;  %v9068_v3 = vld [vmem:[#allocation15_spill] sm:$0xff]  ;;  %v9074_v9 = vshll.u32 %v9073_v11, 16 }
 0x1d4   : > { %v9069_v56 = vshll.u32 %v9068_v3, 16 }
 0x1d5   : > { %v7931_v17 = vadd.f32 %v3153_v52, %v3025_v20  ;;  %v976_v52 = vsel %vm6566_vm2, 0, %v920_v24  ;;  %v924_v20 = vrot.slane %v8883_v62, 7  ;;  %v1793_v24 = vor.u32 %v1791_v54, %v9070_v34 }
 0x1d6   : > { %v1794_v63 = vrot.slane %v9069_v56, 1  ;;  %v9071_v62 = vshrl.u32 %v9068_v3, 16  ;;  %v1796_v28 = vrot.slane %v9074_v9, 1 }
 0x1d7   : > { %9066 = vst [vmem:[#allocation14_spill] sm:$0xff] %v7931_v17 }
 0x1d8   : > { %v2617_v25 = vpop.f32.mrf.mxu2  ;;  %v3026_v32 = vpop.f32.mrf.mxu3  ;;  %v1795_v13 = vor.u32 %v1794_v63, %v9071_v62  ;;  %v1829_v63 = vsel %vm7153_vm6, %v1793_v24, 0 }
 0x1d9   : > { %v2618_v42 = vadd.f32 %v2617_v25, %v2489_v8  ;;  %v2491_v33 = vpop.f32.mrf.mxu1  ;;  %v3158_v60 = vpop.f32.mrf.mxu0  ;;  %v7949_v8 = vld [vmem:[#allocation2 + $0xb8] sm:$0xff]  }
 0x1da   : > { %v6405_v25 = vld [vmem:[#allocation2 + $0xb4] sm:$0xff]  ;;  %v1797_v9 = vsel %vm978_vm3, %v1795_v13, %v1796_v28 }
 0x1db   : > { %v3027_v56 = vadd.f32 %v3026_v32, %v2618_v42  ;;  %v9075_v32 = vshll.u32 %v7923_v7, 16 }
 0x1dc   : > { %2530 = vmatmul.bf16.gmra.mxu1 %v6405_v25  ;;  %3197 = vmatmul.bf16.gmra.mxu0 %v7906_v40  ;;  %v9076_v25 = vshll.u32 %v7921_v0, 16  ;;  %v1954_v0 = vunpack.c.l.b16 %v1797_v9  ;;  %v9080_v40 = vld [vmem:[#allocation33_spill] sm:$0xff] }
 0x1dd   : > { %2659 = vmatmul.bf16.gmra.mxu2 %v1792_v29  ;;  %3068 = vmatmul.bf16.gmra.mxu3 %v976_v52  ;;  %v7956_v59 = vadd.f32 %v3155_v27, %v3027_v56  ;;  %v927_v42 = vor.u32 %v9075_v32, %v924_v20  ;;  %v5951_v29 = vunpack.c.h.b16 %v7949_v8  ;;  %v9077_v52 = vld [vmem:[#allocation30_spill] sm:$0xff] }
 0x1de   : > { %v935_v17 = vor.u32 %v9076_v25, %v7946_v16  ;;  %v2492_v1 = vadd.f32 %v2491_v33, %v9077_v52  ;;  %v1952_v52 = vunpack.c.l.b16 %v1829_v63 }
 0x1df   : > { %9072 = vst [vmem:[#allocation28_spill] sm:$0xff] %v7956_v59  ;;  %v928_v20 = vsel %vm703_vm0, %v917_v19, %v927_v42  ;;  %v7973_v32 = vpack.c.b16 %v5951_v29, %v5951_v29  ;;  %v6406_v59 = vld [vmem:[#allocation2 + $0xc0] sm:$0xff]   ;;  %v9081_v42 = vld [vmem:[#allocation11_spill] sm:$0xff] }
 0x1e0   : > { %v2620_v54 = vpop.f32.mrf.mxu2  ;;  %v3029_v34 = vpop.f32.mrf.mxu3  ;;  %v977_v56 = vsel %vm6566_vm2, 0, %v935_v17  ;;  %v5982_v33 = vunpack.c.l.b16 %v6406_v59 }
 0x1e1   : > { %v2621_v3 = vadd.f32 %v2620_v54, %v2492_v1  ;;  %v2493_v62 = vpop.f32.mrf.mxu1  ;;  %v3160_v27 = vpop.f32.mrf.mxu0  ;;  %9078 = vst [vmem:[#allocation15_spill] sm:$0xff] %v7973_v32  ;;  %v1214_v1 = vunpack.c.l.b16 %v928_v20  ;;  %v1216_v54 = vunpack.c.l.b16 %v977_v56  ;;  %v8893_v24 = vshrl.u32 %v7973_v32, 16 }
 0x1e2   : > { %v2494_v13 = vadd.f32 %v2493_v62, %v9080_v40  ;;  %v2067_v51 = vpack.c.b16 %v5982_v33, %v9081_v42  ;;  %v8894_v20 = vshll.u32 %v7973_v32, 16  ;;  %v9083_v62 = vshrl.u32 %v9073_v11, 16 }
 0x1e3   : > { %v3030_v25 = vadd.f32 %v3029_v34, %v2621_v3  ;;  %v2068_v34 = vpack.c.b16 %v1954_v0, %v1952_v52  ;;  %v2733_v3 = vpack.c.b16 %v1216_v54, %v1214_v1  ;;  %v939_v63 = vrot.slane %v8893_v24, 7 }
 0x1e4   : > { %v5983_v42 = vunpack.c.h.b16 %v6406_v59  ;;  %v1956_v11 = vunpack.c.h.b16 %v1797_v9 }
 0x1e5   : > { %v7975_v7 = vadd.f32 %v3158_v60, %v3030_v25  ;;  %v942_v0 = vor.u32 %v8894_v20, %v939_v63  ;;  %v9084_v25 = vld [vmem:[#allocation35_spill] sm:$0xff]  ;;  %v9086_v63 = vld [vmem:[#allocation37_spill] sm:$0xff] }
 0x1e7   : > { %9079 = vst [vmem:[#allocation18_spill] sm:$0xff] %v7975_v7 }
 0x1e8   : > { %v2622_v22 = vpop.f32.mrf.mxu2  ;;  %v3031_v19 = vpop.f32.mrf.mxu3 }
 0x1e9   : > { %v2623_v17 = vadd.f32 %v2622_v22, %v2494_v13  ;;  %v2496_v29 = vpop.f32.mrf.mxu1  ;;  %v3163_v30 = vpop.f32.mrf.mxu0  ;;  %v1798_v22 = vor.u32 %v1796_v28, %v9083_v62 }
 0x1ea   : > { %v2497_v33 = vadd.f32 %v2496_v29, %v9084_v25  ;;  %v7997_v29 = vld [vmem:[#allocation2 + $0x20] sm:$0xff]  }
 0x1eb   : > { %v3032_v60 = vadd.f32 %v3031_v19, %v2623_v17  ;;  %v1218_v17 = vunpack.c.h.b16 %v977_v56  ;;  %v5986_v9 = vunpack.c.l.b16 %v7997_v29 }
 0x1ec   : > { %2535 = vmatmul.bf16.gmra.mxu1 %v2067_v51  ;;  %3202 = vmatmul.bf16.gmra.mxu0 %v7908_v39  ;;  %v1830_v51 = vsel %vm7153_vm6, %v1798_v22, 0  ;;  %v943_v39 = vsel %vm703_vm0, %v7946_v16, %v942_v0  ;;  %v5856_v22 = vld [vmem:[#allocation2 + $0x18] sm:$0xff] }
 0x1ed   : > { %2664 = vmatmul.bf16.gmra.mxu2 %v2068_v34  ;;  %3073 = vmatmul.bf16.gmra.mxu3 %v2733_v3  ;;  %v7984_v40 = vadd.f32 %v3160_v27, %v3032_v60  ;;  %v1958_v28 = vunpack.c.l.b16 %v1830_v51  ;;  %v1220_v34 = vunpack.c.l.b16 %v943_v39  ;;  %v8005_v51 = vld [vmem:[#allocation2 + $0x28] sm:$0xff]   ;;  %v9089_v39 = vld [vmem:[#allocation40_spill] sm:$0xff] }
 0x1ef   : > { %9082 = vst [vmem:[#allocation30_spill] sm:$0xff] %v7984_v40  ;;  %v2071_v0 = vpack.c.b16 %v1958_v28, %v1956_v11  ;;  %v2736_v59 = vpack.c.b16 %v1220_v34, %v1218_v17  ;;  %v9094_v40 = vld [vmem:[#allocation20_spill] sm:$0xff] }
 0x1f0   : > { %v2625_v52 = vpop.f32.mrf.mxu2  ;;  %v3034_v1 = vpop.f32.mrf.mxu3  ;;  %v9095_v7 = vshll.u32 %v9094_v40, 16 }
 0x1f1   : > { %v2626_v54 = vadd.f32 %v2625_v52, %v2497_v33  ;;  %v2498_v13 = vpop.f32.mrf.mxu1  ;;  %v3165_v19 = vpop.f32.mrf.mxu0  ;;  %v9087_v33 = vld [vmem:[#allocation17_spill] sm:$0xff] }
 0x1f2   : > { %v2499_v60 = vadd.f32 %v2498_v13, %v9086_v63  ;;  %v2070_v52 = vpack.c.b16 %v9087_v33, %v5983_v42  ;;  %v3520_v13 = vshrl.u32 %v5856_v22, 16  ;;  %v9090_v33 = vld [vmem:[#allocation21_spill] sm:$0xff]  ;;  %v984_v32 = vrot.slane %v9095_v7, 1 }
 0x1f3   : > { %v3035_v27 = vadd.f32 %v3034_v1, %v2626_v54  ;;  %v3488_v1 = vpack.c.b16 %v5986_v9, %v5986_v9 }
 0x1f5   : > { %v7995_v3 = vadd.f32 %v3163_v30, %v3035_v27  ;;  %v3523_v30 = vshll.u32 %v5856_v22, 16  ;;  %v3530_v63 = vshll.u32 %v3488_v1, 16 }
 0x1f7   : > { %9085 = vst [vmem:[#allocation33_spill] sm:$0xff] %v7995_v3  ;;  %v3791_v28 = vrot.slane %v3523_v30, 1 }
 0x1f8   : > { %v2627_v62 = vpop.f32.mrf.mxu2  ;;  %v3036_v25 = vpop.f32.mrf.mxu3 }
 0x1f9   : > { %v2628_v24 = vadd.f32 %v2627_v62, %v2499_v60  ;;  %v2501_v20 = vpop.f32.mrf.mxu1  ;;  %v3168_v16 = vpop.f32.mrf.mxu0  ;;  %v6352_v60 = vld [vmem:[#allocation2 + $0x24] sm:$0xff]   ;;  %v3522_v62 = vrot.slane %v3520_v13, 7 }
 0x1fa   : > { %v2502_v27 = vadd.f32 %v2501_v20, %v9089_v39  ;;  %v3538_v9 = vshll.u32 %v6352_v60, 16 }
 0x1fb   : > { %v3037_v56 = vadd.f32 %v3036_v25, %v2628_v24  ;;  %v3525_v39 = vor.u32 %v3523_v30, %v3522_v62 }
 0x1fc   : > { %2540 = vmatmul.bf16.gmra.mxu1 %v2070_v52  ;;  %3207 = vmatmul.bf16.gmra.mxu0 %v7949_v8  ;;  %v5991_v8 = vunpack.c.h.b16 %v8005_v51 }
 0x1fd   : > { %2669 = vmatmul.bf16.gmra.mxu2 %v2071_v0  ;;  %3078 = vmatmul.bf16.gmra.mxu3 %v2736_v59  ;;  %v8003_v54 = vadd.f32 %v3165_v19, %v3037_v56  ;;  %v9091_v19 = vshll.u32 %v9090_v33, 16  ;;  %v3792_v0 = vor.u32 %v3791_v28, %v3520_v13  ;;  %v3793_v59 = vrot.slane %v3530_v63, 1 }
 0x1fe   : > { %v8011_v56 = vpack.c.b16 %v5991_v8, %v5991_v8 }
 0x1ff   : > { %9088 = vst [vmem:[#allocation11_spill] sm:$0xff] %v8003_v54  ;;  %v981_v52 = vrot.slane %v9091_v19, 1  ;;  %v9093_v54 = vld [vmem:[#allocation44_spill] sm:$0xff]  ;;  %v3794_v8 = vsel %vm978_vm3, %v3792_v0, %v3793_v59 }
 0x200   : > { %v2630_v42 = vpop.f32.mrf.mxu2  ;;  %v3039_v11 = vpop.f32.mrf.mxu3  ;;  %v3545_v30 = vshll.u32 %v8011_v56, 16 }
 0x201   : > { %v2631_v17 = vadd.f32 %v2630_v42, %v2502_v27  ;;  %v2503_v34 = vpop.f32.mrf.mxu1  ;;  %v3170_v24 = vpop.f32.mrf.mxu0  ;;  %v3527_v27 = vshrl.u32 %v3488_v1, 16  ;;  %v3535_v42 = vshrl.u32 %v6352_v60, 16  ;;  %v3775_v1 = vsel %vm6566_vm2, 0, %v3525_v39 }
 0x202   : > { %v2504_v3 = vadd.f32 %v2503_v34, %v9093_v54  ;;  %v9097_v60 = vshrl.u32 %v9090_v33, 16  ;;  %v3798_v39 = vrot.slane %v3545_v30, 1 }
 0x203   : > { %v3040_v25 = vadd.f32 %v3039_v11, %v2631_v17  ;;  %v9096_v17 = vld [vmem:[#allocation19_spill] sm:$0xff]  ;;  %v3529_v54 = vrot.slane %v3527_v27, 7  ;;  %v8024_v34 = vrot.slane %v3535_v42, 7  ;;  %v3795_v47 = vor.u32 %v3793_v59, %v3527_v27 }
 0x204   : > { %v982_v19 = vsel %vm978_vm3, %v9096_v17, %v981_v52  ;;  %v9099_v17 = vld [vmem:[#allocation22_spill] sm:$0xff] }
 0x205   : > { %v8013_v20 = vadd.f32 %v3168_v16, %v3040_v25  ;;  %v3796_v16 = vrot.slane %v3538_v9, 1  ;;  %v983_v25 = vor.u32 %v981_v52, %v9097_v60  ;;  %v9100_v0 = vshll.u32 %v9099_v17, 16 }
 0x206   : > { %v3532_v31 = vor.u32 %v3530_v63, %v3529_v54 }
 0x207   : > { %9092 = vst [vmem:[#allocation35_spill] sm:$0xff] %v8013_v20  ;;  %v986_v20 = vrot.slane %v9100_v0, 1  ;;  %v3797_v53 = vor.u32 %v3796_v16, %v3535_v42 }
 0x208   : > { %v2632_v49 = vpop.f32.mrf.mxu2  ;;  %v3041_v11 = vpop.f32.mrf.mxu3  ;;  %v3533_v63 = vsel %vm703_vm0, %v3522_v62, %v3532_v31 }
 0x209   : > { %v2633_v13 = vadd.f32 %v2632_v49, %v2504_v3  ;;  %v2506_v28 = vpop.f32.mrf.mxu1  ;;  %v3173_v48 = vpop.f32.mrf.mxu0  ;;  %v9098_v49 = vshrl.u32 %v9094_v40, 16  ;;  %v3799_v59 = vsel %vm978_vm3, %v3797_v53, %v3798_v39  ;;  %v3939_v54 = vunpack.c.l.b16 %v3533_v63  ;;  %v9104_v53 = vld [vmem:[#allocation49_spill] sm:$0xff]  ;;  %v9107_v63 = vld [vmem:[#allocation51_spill] sm:$0xff] }
 0x20b   : > { %v3042_v7 = vadd.f32 %v3041_v11, %v2633_v13  ;;  %v985_v3 = vor.u32 %v984_v32, %v9098_v49  ;;  %v3540_v11 = vor.u32 %v3538_v9, %v8024_v34 }
 0x20c   : > { %3221 = vmatmul.bf16.vlgmr.msra.gmra.mxu1 %v982_v19  ;;  %4626 = vmatmul.bf16.vlgmr.msra.gmra.mxu0 %v3794_v8  ;;  %v9102_v19 = vld [vmem:[#allocation46_spill] sm:$0xff] }
 0x20d   : > { %4368 = vmatmul.bf16.vlgmr.msra.gmra.mxu2 %v3775_v1  ;;  %4497 = vmatmul.bf16.vlgmr.msra.gmra.mxu3 %v5856_v22  ;;  %v8032_v57 = vadd.f32 %v3170_v24, %v3042_v7  ;;  %v2507_v13 = vadd.f32 %v2506_v28, %v9102_v19  ;;  %v987_v40 = vsel %vm978_vm3, %v985_v3, %v986_v20  ;;  %v1078_v22 = vsel %vm7153_vm6, %v983_v25, 0 }
 0x20e   : > { %v3887_v24 = vsel %vm7153_vm6, %v3795_v47, 0  ;;  %v3776_v9 = vsel %vm6566_vm2, 0, %v3540_v11  ;;  %v1131_v42 = vunpack.c.l.b16 %v1078_v22  ;;  %v1133_v28 = vunpack.c.l.b16 %v987_v40 }
 0x20f   : > { %9101 = vst [vmem:[#allocation37_spill] sm:$0xff] %v8032_v57  ;;  %v3940_v16 = vunpack.c.l.b16 %v3887_v24  ;;  %v3942_v1 = vunpack.c.l.b16 %v3799_v59  ;;  %v3941_v7 = vunpack.c.l.b16 %v3776_v9  ;;  %v3542_v25 = vshrl.u32 %v8011_v56, 16 }
 0x210   : > { %v2635_v33 = vpop.f32.mrf.mxu2  ;;  %v3044_v52 = vpop.f32.mrf.mxu3  ;;  %v2679_v19 = vpack.c.b16 %v1133_v28, %v1131_v42 }
 0x211   : > { %v2636_v32 = vadd.f32 %v2635_v33, %v2507_v13  ;;  %v2508_v8 = vpop.f32.mrf.mxu1  ;;  %v3175_v60 = vpop.f32.mrf.mxu0  ;;  %v4084_v31 = vpack.c.b16 %v3942_v1, %v3940_v16  ;;  %v4082_v33 = vpack.c.b16 %v3941_v7, %v3939_v54  ;;  %v3800_v22 = vor.u32 %v3798_v39, %v3542_v25 }
 0x212   : > { %v2509_v3 = vadd.f32 %v2508_v8, %v9104_v53  ;;  %v1135_v39 = vunpack.c.h.b16 %v987_v40  ;;  %v3943_v53 = vunpack.c.h.b16 %v3776_v9 }
 0x213   : > { %v3045_v27 = vadd.f32 %v3044_v52, %v2636_v32  ;;  %v3544_v52 = vrot.slane %v3542_v25, 7 }
 0x215   : > { %v8045_v49 = vadd.f32 %v3173_v48, %v3045_v27  ;;  %v9105_v48 = vshrl.u32 %v9099_v17, 16  ;;  %v3547_v24 = vor.u32 %v3545_v30, %v3544_v52  ;;  %v3944_v30 = vunpack.c.h.b16 %v3799_v59 }
 0x217   : > { %9103 = vst [vmem:[#allocation17_spill] sm:$0xff] %v8045_v49  ;;  %v988_v56 = vor.u32 %v986_v20, %v9105_v48  ;;  %v3548_v20 = vsel %vm703_vm0, %v8024_v34, %v3547_v24 }
 0x218   : > { %v2637_v0 = vpop.f32.mrf.mxu2  ;;  %v3046_v47 = vpop.f32.mrf.mxu3 }
 0x219   : > { %v2638_v62 = vadd.f32 %v2637_v0, %v2509_v3  ;;  %v2511_v13 = vpop.f32.mrf.mxu1  ;;  %v3178_v11 = vpop.f32.mrf.mxu0  ;;  %v1079_v7 = vsel %vm7153_vm6, %v988_v56, 0  ;;  %v3945_v3 = vunpack.c.l.b16 %v3548_v20 }
 0x21a   : > { %v2512_v27 = vadd.f32 %v2511_v13, %v9107_v63 }
 0x21b   : > { %v3047_v32 = vadd.f32 %v3046_v47, %v2638_v62  ;;  %v8063_v47 = vld [vmem:[#allocation2 + $0x38] sm:$0xff]   ;;  %v4085_v40 = vpack.c.b16 %v3945_v3, %v3943_v53 }
 0x21c   : > { %3226 = vmatmul.bf16.gmra.mxu1 %v2679_v19  ;;  %4631 = vmatmul.bf16.gmra.mxu0 %v4084_v31  ;;  %v9109_v19 = vld [vmem:[#allocation53_spill] sm:$0xff]  ;;  %v5994_v59 = vunpack.c.l.b16 %v8063_v47  ;;  %v6354_v53 = vld [vmem:[#allocation2 + $0x3c] sm:$0xff]  }
 0x21d   : > { %4373 = vmatmul.bf16.gmra.mxu2 %v4082_v33  ;;  %4502 = vmatmul.bf16.gmra.mxu3 %v7997_v29  ;;  %v8052_v8 = vadd.f32 %v3175_v60, %v3047_v32  ;;  %v3888_v29 = vsel %vm7153_vm6, %v3800_v22, 0  ;;  %v1137_v60 = vunpack.c.l.b16 %v1079_v7  ;;  %v5857_v32 = vld [vmem:[#allocation2 + $0x30] sm:$0xff] }
 0x21e   : > { %v3946_v25 = vunpack.c.l.b16 %v3888_v29  ;;  %v3553_v9 = vshll.u32 %v5857_v32, 16  ;;  %v3550_v63 = vshrl.u32 %v5857_v32, 16 }
 0x21f   : > { %9106 = vst [vmem:[#allocation40_spill] sm:$0xff] %v8052_v8  ;;  %v2682_v33 = vpack.c.b16 %v1137_v60, %v1135_v39 }
 0x220   : > { %v2640_v42 = vpop.f32.mrf.mxu2  ;;  %v3049_v28 = vpop.f32.mrf.mxu3  ;;  %v4087_v52 = vpack.c.b16 %v3946_v25, %v3944_v30 }
 0x221   : > { %v2641_v16 = vadd.f32 %v2640_v42, %v2512_v27  ;;  %v2513_v1 = vpop.f32.mrf.mxu1  ;;  %v3180_v54 = vpop.f32.mrf.mxu0  ;;  %v8070_v27 = vld [vmem:[#allocation2 + $0x40] sm:$0xff]   ;;  %v9111_v42 = vld [vmem:[#allocation25_spill] sm:$0xff] }
 0x222   : > { %v2514_v31 = vadd.f32 %v2513_v1, %v9109_v19 }
 0x223   : > { %v3050_v17 = vadd.f32 %v3049_v28, %v2641_v16  ;;  %v9112_v16 = vld [vmem:[#allocation23_spill] sm:$0xff] }
 0x224   : > { %v9113_v1 = vshll.u32 %v9112_v16, 16  ;;  %v9114_v19 = vshrl.u32 %v9112_v16, 16 }
 0x225   : > { %v8061_v0 = vadd.f32 %v3178_v11, %v3050_v17  ;;  %v3492_v11 = vpack.c.b16 %v5994_v59, %v5994_v59  ;;  %v3801_v17 = vrot.slane %v3553_v9, 1 }
 0x226   : > { %v989_v7 = vrot.slane %v9113_v1, 1  ;;  %v9118_v1 = vld [vmem:[#allocation29_spill] sm:$0xff] }
 0x227   : > { %9108 = vst [vmem:[#allocation21_spill] sm:$0xff] %v8061_v0  ;;  %v3560_v25 = vshll.u32 %v3492_v11, 16 }
 0x228   : > { %v2642_v62 = vpop.f32.mrf.mxu2  ;;  %v3051_v13 = vpop.f32.mrf.mxu3 }
 0x229   : > { %v2643_v48 = vadd.f32 %v2642_v62, %v2514_v31  ;;  %v2516_v34 = vpop.f32.mrf.mxu1  ;;  %v3183_v56 = vpop.f32.mrf.mxu0  ;;  %v990_v31 = vor.u32 %v989_v7, %v9114_v19  ;;  %v9115_v62 = vld [vmem:[#allocation27_spill] sm:$0xff] }
 0x22a   : > { %v2517_v28 = vadd.f32 %v2516_v34, %v9111_v42  ;;  %v3568_v34 = vshll.u32 %v6354_v53, 16  ;;  %v3557_v42 = vshrl.u32 %v3492_v11, 16 }
 0x22b   : > { %v3052_v22 = vadd.f32 %v3051_v13, %v2643_v48  ;;  %v9116_v13 = vshll.u32 %v9115_v62, 16  ;;  %v3803_v48 = vrot.slane %v3560_v25, 1 }
 0x22c   : > { %3231 = vmatmul.bf16.gmra.mxu1 %v2682_v33  ;;  %4636 = vmatmul.bf16.gmra.mxu0 %v4087_v52  ;;  %v3802_v52 = vor.u32 %v3801_v17, %v3550_v63  ;;  %v3806_v0 = vrot.slane %v3568_v34, 1  ;;  %v3559_v11 = vrot.slane %v3557_v42, 7 }
 0x22d   : > { %4378 = vmatmul.bf16.gmra.mxu2 %v4085_v40  ;;  %4507 = vmatmul.bf16.gmra.mxu3 %v8005_v51  ;;  %v8068_v24 = vadd.f32 %v3180_v54, %v3052_v22  ;;  %v5999_v51 = vunpack.c.h.b16 %v8070_v27  ;;  %v3552_v54 = vrot.slane %v3550_v63, 7  ;;  %v991_v33 = vrot.slane %v9116_v13, 1 }
 0x22e   : > { %v3562_v57 = vor.u32 %v3560_v25, %v3559_v11 }
 0x22f   : > { %9110 = vst [vmem:[#allocation44_spill] sm:$0xff] %v8068_v24  ;;  %v8080_v40 = vpack.c.b16 %v5999_v51, %v5999_v51  ;;  %v3555_v22 = vor.u32 %v3553_v9, %v3552_v54  ;;  %v9119_v24 = vld [vmem:[#allocation26_spill] sm:$0xff]  ;;  %v992_v19 = vsel %vm978_vm3, %v990_v31, %v991_v33  ;;  %v3804_v51 = vsel %vm978_vm3, %v3802_v52, %v3803_v48 }
 0x230   : > { %v2645_v29 = vpop.f32.mrf.mxu2  ;;  %v3054_v20 = vpop.f32.mrf.mxu3  ;;  %v3563_v25 = vsel %vm703_vm0, %v3552_v54, %v3562_v57 }
 0x231   : > { %v2646_v39 = vadd.f32 %v2645_v29, %v2517_v28  ;;  %v2518_v60 = vpop.f32.mrf.mxu1  ;;  %v3185_v30 = vpop.f32.mrf.mxu0  ;;  %v3565_v28 = vshrl.u32 %v6354_v53, 16  ;;  %v3777_v9 = vsel %vm6566_vm2, 0, %v3555_v22  ;;  %v3951_v11 = vunpack.c.l.b16 %v3563_v25  ;;  %v9131_v25 = vld [vmem:[#allocation36_spill] sm:$0xff] }
 0x232   : > { %v2519_v29 = vadd.f32 %v2518_v60, %v9118_v1  ;;  %v9122_v1 = vshrl.u32 %v9119_v24, 16 }
 0x233   : > { %v3055_v3 = vadd.f32 %v3054_v20, %v2646_v39  ;;  %v9120_v20 = vshll.u32 %v9119_v24, 16  ;;  %v8092_v60 = vrot.slane %v3565_v28, 7  ;;  %v3807_v8 = vor.u32 %v3806_v0, %v3565_v28 }
 0x235   : > { %v8082_v59 = vadd.f32 %v3183_v56, %v3055_v3  ;;  %v994_v39 = vrot.slane %v9120_v20, 1  ;;  %v3575_v56 = vshll.u32 %v8080_v40, 16  ;;  %v9121_v3 = vshrl.u32 %v9115_v62, 16  ;;  %v9123_v20 = vld [vmem:[#allocation32_spill] sm:$0xff] }
 0x236   : > { %v9124_v52 = vshll.u32 %v9123_v20, 16 }
 0x237   : > { %9117 = vst [vmem:[#allocation20_spill] sm:$0xff] %v8082_v59  ;;  %v993_v31 = vor.u32 %v991_v33, %v9121_v3  ;;  %v3805_v59 = vor.u32 %v3803_v48, %v3557_v42  ;;  %v3808_v22 = vrot.slane %v3575_v56, 1 }
 0x238   : > { %v2647_v16 = vpop.f32.mrf.mxu2  ;;  %v3056_v7 = vpop.f32.mrf.mxu3 }
 0x239   : > { %v2648_v13 = vadd.f32 %v2647_v16, %v2519_v29  ;;  %v2521_v63 = vpop.f32.mrf.mxu1  ;;  %v3188_v17 = vpop.f32.mrf.mxu0  ;;  %v995_v29 = vor.u32 %v994_v39, %v9122_v1  ;;  %v996_v16 = vrot.slane %v9124_v52, 1  ;;  %v3809_v0 = vsel %vm978_vm3, %v3807_v8, %v3808_v22  ;;  %v9128_v8 = vld [vmem:[#allocation34_spill] sm:$0xff] }
 0x23b   : > { %v3057_v53 = vadd.f32 %v3056_v7, %v2648_v13  ;;  %v3570_v7 = vor.u32 %v3568_v34, %v8092_v60  ;;  %v997_v24 = vsel %vm978_vm3, %v995_v29, %v996_v16 }
 0x23c   : > { %3236 = vmatmul.bf16.gmra.mxu1 %v992_v19  ;;  %4641 = vmatmul.bf16.gmra.mxu0 %v3804_v51  ;;  %v9126_v19 = vld [vmem:[#allocation31_spill] sm:$0xff]  ;;  %v1145_v28 = vunpack.c.l.b16 %v997_v24 }
 0x23d   : > { %4383 = vmatmul.bf16.gmra.mxu2 %v3777_v9  ;;  %4512 = vmatmul.bf16.gmra.mxu3 %v5857_v32  ;;  %v8100_v49 = vadd.f32 %v3185_v30, %v3057_v53  ;;  %v2522_v13 = vadd.f32 %v2521_v63, %v9126_v19  ;;  %v1080_v32 = vsel %vm7153_vm6, %v993_v31, 0  ;;  %v3889_v30 = vsel %vm7153_vm6, %v3805_v59, 0 }
 0x23e   : > { %v3778_v48 = vsel %vm6566_vm2, 0, %v3570_v7  ;;  %v1143_v42 = vunpack.c.l.b16 %v1080_v32  ;;  %v3952_v63 = vunpack.c.l.b16 %v3889_v30  ;;  %v3954_v9 = vunpack.c.l.b16 %v3809_v0 }
 0x23f   : > { %9125 = vst [vmem:[#allocation19_spill] sm:$0xff] %v8100_v49  ;;  %v3953_v53 = vunpack.c.l.b16 %v3778_v48  ;;  %v3572_v31 = vshrl.u32 %v8080_v40, 16 }
 0x240   : > { %v2650_v62 = vpop.f32.mrf.mxu2  ;;  %v3059_v33 = vpop.f32.mrf.mxu3  ;;  %v2687_v19 = vpack.c.b16 %v1145_v28, %v1143_v42  ;;  %v4092_v57 = vpack.c.b16 %v3954_v9, %v3952_v63 }
 0x241   : > { %v2651_v39 = vadd.f32 %v2650_v62, %v2522_v13  ;;  %v2523_v51 = vpop.f32.mrf.mxu1  ;;  %v3190_v3 = vpop.f32.mrf.mxu0  ;;  %v4090_v62 = vpack.c.b16 %v3953_v53, %v3951_v11  ;;  %v3810_v32 = vor.u32 %v3808_v22, %v3572_v31  ;;  %v1147_v22 = vunpack.c.h.b16 %v997_v24 }
 0x242   : > { %v2524_v29 = vadd.f32 %v2523_v51, %v9128_v8  ;;  %v3955_v8 = vunpack.c.h.b16 %v3778_v48 }
 0x243   : > { %v3060_v34 = vadd.f32 %v3059_v33, %v2651_v39  ;;  %v3574_v33 = vrot.slane %v3572_v31, 7 }
 0x245   : > { %v8113_v1 = vadd.f32 %v3188_v17, %v3060_v34  ;;  %v9129_v17 = vshrl.u32 %v9123_v20, 16  ;;  %v3577_v30 = vor.u32 %v3575_v56, %v3574_v33  ;;  %v3956_v56 = vunpack.c.h.b16 %v3809_v0 }
 0x247   : > { %9127 = vst [vmem:[#allocation22_spill] sm:$0xff] %v8113_v1  ;;  %v998_v40 = vor.u32 %v996_v16, %v9129_v17  ;;  %v3578_v20 = vsel %vm703_vm0, %v8092_v60, %v3577_v30 }
 0x248   : > { %v2652_v52 = vpop.f32.mrf.mxu2  ;;  %v3061_v59 = vpop.f32.mrf.mxu3 }
 0x249   : > { %v2653_v54 = vadd.f32 %v2652_v52, %v2524_v29  ;;  %v2526_v13 = vpop.f32.mrf.mxu1  ;;  %v3193_v7 = vpop.f32.mrf.mxu0  ;;  %v1081_v53 = vsel %vm7153_vm6, %v998_v40, 0  ;;  %v3957_v29 = vunpack.c.l.b16 %v3578_v20 }
 0x24a   : > { %v2527_v34 = vadd.f32 %v2526_v13, %v9131_v25 }
 0x24b   : > { %v3062_v39 = vadd.f32 %v3061_v59, %v2653_v54  ;;  %v8131_v59 = vld [vmem:[#allocation2 + $0x50] sm:$0xff]   ;;  %v4093_v24 = vpack.c.b16 %v3957_v29, %v3955_v8 }
 0x24c   : > { %3241 = vmatmul.bf16.gmra.mxu1 %v2687_v19  ;;  %4646 = vmatmul.bf16.gmra.mxu0 %v4092_v57  ;;  %v9133_v19 = vld [vmem:[#allocation38_spill] sm:$0xff]  ;;  %v6002_v0 = vunpack.c.l.b16 %v8131_v59 }
 0x24d   : > { %4388 = vmatmul.bf16.gmra.mxu2 %v4090_v62  ;;  %4517 = vmatmul.bf16.gmra.mxu3 %v8063_v47  ;;  %v8120_v51 = vadd.f32 %v3190_v3, %v3062_v39  ;;  %v3890_v47 = vsel %vm7153_vm6, %v3810_v32, 0  ;;  %v1149_v3 = vunpack.c.l.b16 %v1081_v53  ;;  %v5858_v39 = vld [vmem:[#allocation2 + $0x48] sm:$0xff]  ;;  %v6356_v8 = vld [vmem:[#allocation2 + $0x54] sm:$0xff]  }
 0x24e   : > { %v3958_v31 = vunpack.c.l.b16 %v3890_v47  ;;  %v3583_v48 = vshll.u32 %v5858_v39, 16  ;;  %v3580_v25 = vshrl.u32 %v5858_v39, 16 }
 0x24f   : > { %9130 = vst [vmem:[#allocation46_spill] sm:$0xff] %v8120_v51  ;;  %v2690_v62 = vpack.c.b16 %v1149_v3, %v1147_v22 }
 0x250   : > { %v2655_v42 = vpop.f32.mrf.mxu2  ;;  %v3064_v28 = vpop.f32.mrf.mxu3  ;;  %v4095_v33 = vpack.c.b16 %v3958_v31, %v3956_v56 }
 0x251   : > { %v2656_v63 = vadd.f32 %v2655_v42, %v2527_v34  ;;  %v2528_v9 = vpop.f32.mrf.mxu1  ;;  %v3195_v11 = vpop.f32.mrf.mxu0  ;;  %v8138_v34 = vld [vmem:[#allocation2 + $0x58] sm:$0xff]   ;;  %v9135_v42 = vld [vmem:[#allocation41_spill] sm:$0xff] }
 0x252   : > { %v2529_v57 = vadd.f32 %v2528_v9, %v9133_v19 }
 0x253   : > { %v3065_v16 = vadd.f32 %v3064_v28, %v2656_v63  ;;  %v9136_v63 = vld [vmem:[#allocation39_spill] sm:$0xff] }
 0x254   : > { %v9137_v9 = vshll.u32 %v9136_v63, 16  ;;  %v9138_v19 = vshrl.u32 %v9136_v63, 16 }
 0x255   : > { %v8129_v52 = vadd.f32 %v3193_v7, %v3065_v16  ;;  %v3496_v7 = vpack.c.b16 %v6002_v0, %v6002_v0  ;;  %v3811_v16 = vrot.slane %v3583_v48, 1 }
 0x256   : > { %v999_v53 = vrot.slane %v9137_v9, 1  ;;  %v9142_v9 = vld [vmem:[#allocation45_spill] sm:$0xff] }
 0x257   : > { %9132 = vst [vmem:[#allocation49_spill] sm:$0xff] %v8129_v52  ;;  %v3590_v31 = vshll.u32 %v3496_v7, 16 }
 0x258   : > { %v2657_v54 = vpop.f32.mrf.mxu2  ;;  %v3066_v13 = vpop.f32.mrf.mxu3 }
 0x259   : > { %v2658_v17 = vadd.f32 %v2657_v54, %v2529_v57  ;;  %v2531_v60 = vpop.f32.mrf.mxu1  ;;  %v3198_v40 = vpop.f32.mrf.mxu0  ;;  %v1000_v57 = vor.u32 %v999_v53, %v9138_v19  ;;  %v9139_v54 = vld [vmem:[#allocation43_spill] sm:$0xff] }
 0x25a   : > { %v2532_v28 = vadd.f32 %v2531_v60, %v9135_v42  ;;  %v3598_v60 = vshll.u32 %v6356_v8, 16  ;;  %v3587_v42 = vshrl.u32 %v3496_v7, 16 }
 0x25b   : > { %v3067_v32 = vadd.f32 %v3066_v13, %v2658_v17  ;;  %v9140_v13 = vshll.u32 %v9139_v54, 16  ;;  %v3813_v17 = vrot.slane %v3590_v31, 1 }
 0x25c   : > { %3246 = vmatmul.bf16.gmra.mxu1 %v2690_v62  ;;  %4651 = vmatmul.bf16.gmra.mxu0 %v4095_v33  ;;  %v3812_v33 = vor.u32 %v3811_v16, %v3580_v25  ;;  %v3816_v52 = vrot.slane %v3598_v60, 1  ;;  %v3589_v7 = vrot.slane %v3587_v42, 7 }
 0x25d   : > { %4393 = vmatmul.bf16.gmra.mxu2 %v4093_v24  ;;  %4522 = vmatmul.bf16.gmra.mxu3 %v8070_v27  ;;  %v8136_v30 = vadd.f32 %v3195_v11, %v3067_v32  ;;  %v6007_v27 = vunpack.c.h.b16 %v8138_v34  ;;  %v3582_v11 = vrot.slane %v3580_v25, 7  ;;  %v1001_v62 = vrot.slane %v9140_v13, 1 }
 0x25e   : > { %v3592_v49 = vor.u32 %v3590_v31, %v3589_v7 }
 0x25f   : > { %9134 = vst [vmem:[#allocation51_spill] sm:$0xff] %v8136_v30  ;;  %v8148_v24 = vpack.c.b16 %v6007_v27, %v6007_v27  ;;  %v3585_v32 = vor.u32 %v3583_v48, %v3582_v11  ;;  %v9143_v30 = vld [vmem:[#allocation42_spill] sm:$0xff]  ;;  %v1002_v19 = vsel %vm978_vm3, %v1000_v57, %v1001_v62  ;;  %v3814_v27 = vsel %vm978_vm3, %v3812_v33, %v3813_v17 }
 0x260   : > { %v2660_v47 = vpop.f32.mrf.mxu2  ;;  %v3069_v20 = vpop.f32.mrf.mxu3  ;;  %v3593_v31 = vsel %vm703_vm0, %v3582_v11, %v3592_v49 }
 0x261   : > { %v2661_v22 = vadd.f32 %v2660_v47, %v2532_v28  ;;  %v2533_v3 = vpop.f32.mrf.mxu1  ;;  %v3200_v56 = vpop.f32.mrf.mxu0  ;;  %v3595_v28 = vshrl.u32 %v6356_v8, 16  ;;  %v3779_v48 = vsel %vm6566_vm2, 0, %v3585_v32  ;;  %v3963_v7 = vunpack.c.l.b16 %v3593_v31  ;;  %v9155_v31 = vld [vmem:[#allocation52_spill] sm:$0xff] }
 0x262   : > { %v2534_v47 = vadd.f32 %v2533_v3, %v9142_v9  ;;  %v9146_v9 = vshrl.u32 %v9143_v30, 16 }
 0x263   : > { %v3070_v29 = vadd.f32 %v3069_v20, %v2661_v22  ;;  %v9144_v20 = vshll.u32 %v9143_v30, 16  ;;  %v8160_v3 = vrot.slane %v3595_v28, 7  ;;  %v3817_v51 = vor.u32 %v3816_v52, %v3595_v28 }
 0x265   : > { %v8150_v0 = vadd.f32 %v3198_v40, %v3070_v29  ;;  %v1004_v22 = vrot.slane %v9144_v20, 1  ;;  %v3605_v40 = vshll.u32 %v8148_v24, 16  ;;  %v9145_v29 = vshrl.u32 %v9139_v54, 16  ;;  %v9147_v20 = vld [vmem:[#allocation48_spill] sm:$0xff] }
 0x266   : > { %v9148_v33 = vshll.u32 %v9147_v20, 16 }
 0x267   : > { %9141 = vst [vmem:[#allocation53_spill] sm:$0xff] %v8150_v0  ;;  %v1003_v57 = vor.u32 %v1001_v62, %v9145_v29  ;;  %v3815_v0 = vor.u32 %v3813_v17, %v3587_v42  ;;  %v3818_v32 = vrot.slane %v3605_v40, 1 }
 0x268   : > { %v2662_v63 = vpop.f32.mrf.mxu2  ;;  %v3071_v53 = vpop.f32.mrf.mxu3 }
 0x269   : > { %v2663_v13 = vadd.f32 %v2662_v63, %v2534_v47  ;;  %v2536_v25 = vpop.f32.mrf.mxu1  ;;  %v3203_v16 = vpop.f32.mrf.mxu0  ;;  %v1005_v47 = vor.u32 %v1004_v22, %v9146_v9  ;;  %v1006_v63 = vrot.slane %v9148_v33, 1  ;;  %v3819_v52 = vsel %vm978_vm3, %v3817_v51, %v3818_v32  ;;  %v9152_v51 = vld [vmem:[#allocation50_spill] sm:$0xff] }
 0x26b   : > { %v3072_v8 = vadd.f32 %v3071_v53, %v2663_v13  ;;  %v3600_v53 = vor.u32 %v3598_v60, %v8160_v3  ;;  %v1007_v30 = vsel %vm978_vm3, %v1005_v47, %v1006_v63 }
 0x26c   : > { %3251 = vmatmul.bf16.gmra.mxu1 %v1002_v19  ;;  %4656 = vmatmul.bf16.gmra.mxu0 %v3814_v27  ;;  %v9150_v19 = vld [vmem:[#allocation47_spill] sm:$0xff]  ;;  %v1157_v28 = vunpack.c.l.b16 %v1007_v30 }
 0x26d   : > { %4398 = vmatmul.bf16.gmra.mxu2 %v3779_v48  ;;  %4527 = vmatmul.bf16.gmra.mxu3 %v5858_v39  ;;  %v8168_v1 = vadd.f32 %v3200_v56, %v3072_v8  ;;  %v2537_v13 = vadd.f32 %v2536_v25, %v9150_v19  ;;  %v1082_v39 = vsel %vm7153_vm6, %v1003_v57, 0  ;;  %v3891_v56 = vsel %vm7153_vm6, %v3815_v0, 0 }
 0x26e   : > { %v3780_v17 = vsel %vm6566_vm2, 0, %v3600_v53  ;;  %v1155_v42 = vunpack.c.l.b16 %v1082_v39  ;;  %v3964_v25 = vunpack.c.l.b16 %v3891_v56  ;;  %v3966_v48 = vunpack.c.l.b16 %v3819_v52 }
 0x26f   : > { %9149 = vst [vmem:[#allocation25_spill] sm:$0xff] %v8168_v1  ;;  %v3965_v8 = vunpack.c.l.b16 %v3780_v17  ;;  %v3602_v57 = vshrl.u32 %v8148_v24, 16  ;;  %v9169_v1 = vshll.u32 %v7538_v44, 16 }
 0x270   : > { %v2665_v54 = vpop.f32.mrf.mxu2  ;;  %v3074_v62 = vpop.f32.mrf.mxu3  ;;  %v2695_v19 = vpack.c.b16 %v1157_v28, %v1155_v42  ;;  %v4100_v49 = vpack.c.b16 %v3966_v48, %v3964_v25 }
 0x271   : > { %v2666_v22 = vadd.f32 %v2665_v54, %v2537_v13  ;;  %v2538_v27 = vpop.f32.mrf.mxu1  ;;  %v3205_v29 = vpop.f32.mrf.mxu0  ;;  %v4098_v54 = vpack.c.b16 %v3965_v8, %v3963_v7  ;;  %v3820_v39 = vor.u32 %v3818_v32, %v3602_v57  ;;  %v1159_v32 = vunpack.c.h.b16 %v1007_v30 }
 0x272   : > { %v2539_v47 = vadd.f32 %v2538_v27, %v9152_v51  ;;  %v3967_v51 = vunpack.c.h.b16 %v3780_v17 }
 0x273   : > { %v3075_v60 = vadd.f32 %v3074_v62, %v2666_v22  ;;  %v3604_v62 = vrot.slane %v3602_v57, 7 }
 0x275   : > { %v8181_v9 = vadd.f32 %v3203_v16, %v3075_v60  ;;  %v9153_v16 = vshrl.u32 %v9147_v20, 16  ;;  %v3607_v56 = vor.u32 %v3605_v40, %v3604_v62  ;;  %v3968_v40 = vunpack.c.h.b16 %v3819_v52 }
 0x277   : > { %9151 = vst [vmem:[#allocation23_spill] sm:$0xff] %v8181_v9  ;;  %v1008_v24 = vor.u32 %v1006_v63, %v9153_v16  ;;  %v3608_v20 = vsel %vm703_vm0, %v8160_v3, %v3607_v56 }
 0x278   : > { %v2667_v33 = vpop.f32.mrf.mxu2  ;;  %v3076_v0 = vpop.f32.mrf.mxu3 }
 0x279   : > { %v2668_v11 = vadd.f32 %v2667_v33, %v2539_v47  ;;  %v2541_v13 = vpop.f32.mrf.mxu1  ;;  %v3208_v53 = vpop.f32.mrf.mxu0  ;;  %v1083_v8 = vsel %vm7153_vm6, %v1008_v24, 0  ;;  %v3969_v47 = vunpack.c.l.b16 %v3608_v20 }
 0x27a   : > { %v2542_v60 = vadd.f32 %v2541_v13, %v9155_v31 }
 0x27b   : > { %v3077_v22 = vadd.f32 %v3076_v0, %v2668_v11  ;;  %v8199_v0 = vld [vmem:[#allocation2 + $0x68] sm:$0xff]   ;;  %v4101_v24 = vpack.c.b16 %v3969_v47, %v3967_v51  ;;  %v9160_v47 = vshrl.u32 %v7470_v35, 16 }
 0x27c   : > { %3256 = vmatmul.bf16.gmra.mxu1 %v2695_v19  ;;  %4661 = vmatmul.bf16.gmra.mxu0 %v4100_v49  ;;  %v9157_v19 = vld [vmem:[#allocation54_spill] sm:$0xff]  ;;  %v6010_v52 = vunpack.c.l.b16 %v8199_v0 }
 0x27d   : > { %4403 = vmatmul.bf16.gmra.mxu2 %v4098_v54  ;;  %4532 = vmatmul.bf16.gmra.mxu3 %v8131_v59  ;;  %v8188_v27 = vadd.f32 %v3205_v29, %v3077_v22  ;;  %v3892_v59 = vsel %vm7153_vm6, %v3820_v39, 0  ;;  %v1161_v29 = vunpack.c.l.b16 %v1083_v8  ;;  %v8202_v22 = vld [vmem:[#allocation2 + $0x60] sm:$0xff]  ;;  %v4795_v39 = vlaneseq }
 0x27e   : > { %v3970_v57 = vunpack.c.l.b16 %v3892_v59  ;;  %v3500_v56 = vpack.c.b16 %v6010_v52, %v6010_v52 }
 0x27f   : > { %9154 = vst [vmem:[#allocation27_spill] sm:$0xff] %v8188_v27  ;;  %v2698_v54 = vpack.c.b16 %v1161_v29, %v1159_v32 }
 0x280   : > { %v2670_v42 = vpop.f32.mrf.mxu2  ;;  %v3079_v28 = vpop.f32.mrf.mxu3  ;;  %v4103_v62 = vpack.c.b16 %v3970_v57, %v3968_v40  ;;  %v3620_v40 = vshll.u32 %v3500_v56, 16  ;;  %v6358_v57 = vld [vmem:[#allocation2 + $0x6c] sm:$0xff]  }
 0x281   : > { %v2671_v25 = vadd.f32 %v2670_v42, %v2542_v60  ;;  %v2543_v48 = vpop.f32.mrf.mxu1  ;;  %v3210_v7 = vpop.f32.mrf.mxu0  ;;  %v3610_v60 = vshrl.u32 %v8202_v22, 16  ;;  %v8210_v42 = vld [vmem:[#allocation2 + $0x70] sm:$0xff]   ;;  %v3628_v52 = vshll.u32 %v6358_v57, 16 }
 0x282   : > { %v2544_v49 = vadd.f32 %v2543_v48, %v9157_v19 }
 0x283   : > { %v3080_v63 = vadd.f32 %v3079_v28, %v2671_v25  ;;  %v4796_v28 = vshrl.u32 %v4795_v39, 7  ;;  %v9159_v25 = vshll.u32 %v7470_v35, 16 }
 0x285   : > { %v8197_v33 = vadd.f32 %v3208_v53, %v3080_v63  ;;  %v3613_v53 = vshll.u32 %v8202_v22, 16  ;;  %v1009_v48 = vrot.slane %v9159_v25, 1  ;;  %vm4799_vm7 = vcmp.ge.s32.totalorder %v4796_v28, 1 }
 0x286   : > { %v3617_v25 = vshrl.u32 %v3500_v56, 16 }
 0x287   : > { %9156 = vst [vmem:[#allocation29_spill] sm:$0xff] %v8197_v33  ;;  %v3821_v20 = vrot.slane %v3613_v53, 1  ;;  %v1010_v19 = vor.u32 %v1009_v48, %v9160_v47  ;;  %v6431_v48 = vmov 0.0   ;;  %v9166_v33 = vld [vmem:[#allocation58_spill] sm:$0xff] }
 0x288   : > { %v2672_v11 = vpop.f32.mrf.mxu2  ;;  %v3081_v13 = vpop.f32.mrf.mxu3  ;;  %v8227_v47 = vsel %vm4799_vm7, 1.0, %v6431_v48 }
 0x289   : > { %v2673_v3 = vadd.f32 %v2672_v11, %v2544_v49  ;;  %v3222_v16 = vpop.f32.mrf.mxu1  ;;  %v4627_v30 = vpop.f32.mrf.mxu0  ;;  %v9161_v49 = vld [vmem:[#allocation56_spill] sm:$0xff] }
 0x28a   : > { %v9162_v11 = vshll.u32 %v9161_v49, 16 }
 0x28b   : > { %v3082_v17 = vadd.f32 %v3081_v13, %v2673_v3 }
 0x28c   : > { %3261 = vmatmul.bf16.gmra.mxu1 %v2698_v54  ;;  %4666 = vmatmul.bf16.gmra.mxu0 %v4103_v62  ;;  %v1011_v13 = vrot.slane %v9162_v11, 1  ;;  %v3822_v54 = vor.u32 %v3821_v20, %v3610_v60  ;;  %v9163_v62 = vld [vmem:[#allocation57_spill] sm:$0xff] }
 0x28d   : > { %4408 = vmatmul.bf16.gmra.mxu2 %v4101_v24  ;;  %4537 = vmatmul.bf16.gmra.mxu3 %v8138_v34  ;;  %v8207_v31 = vadd.f32 %v3210_v7, %v3082_v17  ;;  %v6015_v34 = vunpack.c.h.b16 %v8210_v42  ;;  %v8215_v7 = vrot.slane %v3610_v60, 7  ;;  %v3223_v3 = vadd.f32 %v3222_v16, %v9163_v62 }
 0x28e   : > { %v3823_v24 = vrot.slane %v3620_v40, 1  ;;  %v1012_v16 = vsel %vm978_vm3, %v1010_v19, %v1011_v13 }
 0x28f   : > { %9158 = vst [vmem:[#allocation26_spill] sm:$0xff] %v8207_v31  ;;  %v8222_v17 = vpack.c.b16 %v6015_v34, %v6015_v34  ;;  %v3615_v39 = vor.u32 %v3613_v53, %v8215_v7  ;;  %v3826_v53 = vrot.slane %v3628_v52, 1 }
 0x290   : > { %v4369_v8 = vpop.f32.mrf.mxu2  ;;  %v4498_v59 = vpop.f32.mrf.mxu3  ;;  %v3824_v31 = vsel %vm978_vm3, %v3822_v54, %v3823_v24  ;;  %v9167_v54 = vshrl.u32 %v9161_v49, 16 }
 0x291   : > { %v4499_v63 = vadd.f32 %v4498_v59, %v4369_v8  ;;  %v3224_v32 = vpop.f32.mrf.mxu1  ;;  %v4629_v29 = vpop.f32.mrf.mxu0  ;;  %v3625_v8 = vshrl.u32 %v6358_v57, 16  ;;  %v9164_v59 = vld [vmem:[#allocation55_spill] sm:$0xff]  ;;  %v3781_v57 = vsel %vm6566_vm2, 0, %v3615_v39  ;;  %v1016_v39 = vrot.slane %v9169_v1, 1 }
 0x292   : > { %v3225_v27 = vadd.f32 %v3224_v32, %v9166_v33  ;;  %v9168_v56 = vshrl.u32 %v9164_v59, 16  ;;  %v9170_v33 = vshll.u32 %v8222_v17, 16 }
 0x293   : > { %v4628_v51 = vadd.f32 %v4627_v30, %v4499_v63  ;;  %v9165_v63 = vshll.u32 %v9164_v59, 16  ;;  %v3827_v2 = vor.u32 %v3826_v53, %v3625_v8 }
 0x294   : > { %v3828_v32 = vrot.slane %v9170_v33, 1 }
 0x295   : > { %v4747_v30 = vadd.f32 %v4628_v51, %v3223_v3  ;;  %v1014_v35 = vrot.slane %v9165_v63, 1  ;;  %v3619_v51 = vrot.slane %v3617_v25, 7  ;;  %v8235_v3 = vrot.slane %v3625_v8, 7 }
 0x297   : > { %v4814_v63 = vmul.f32 %v8227_v47, %v4747_v30  ;;  %v1015_v9 = vor.u32 %v1014_v35, %v9168_v56  ;;  %v3825_v30 = vor.u32 %v3823_v24, %v3617_v25 }
 0x298   : > { %v4371_v11 = vpop.f32.mrf.mxu2  ;;  %v4500_v60 = vpop.f32.mrf.mxu3 }
 0x299   : > { %v4501_v20 = vadd.f32 %v4500_v60, %v4371_v11  ;;  %v3227_v62 = vpop.f32.mrf.mxu1  ;;  %v4632_v34 = vpop.f32.mrf.mxu0  ;;  %v4798_v11 = vadd.s32 16, %v4796_v28  ;;  %v1013_v60 = vor.u32 %v1011_v13, %v9167_v54  ;;  %v3630_v28 = vor.u32 %v3628_v52, %v8235_v3 }
 0x29a   : > { %v8255_v24 = vsel %vm978_vm3, %v1015_v9, %v1016_v39  ;;  %v8261_v52 = vsel %vm978_vm3, %v3827_v2, %v3828_v32 }
 0x29b   : > { %v4630_v19 = vadd.f32 %v4629_v29, %v4501_v20  ;;  %v5011_v29 = vmul.f32 %v4814_v63, %v4814_v63  ;;  %vm4804_vm8 = vcmp.le.s32.totalorder %v4798_v11, 16  ;;  %v1084_v25 = vsel %vm7153_vm6, %v1013_v60, 0 }
 0x29c   : > { %3266 = vmatmul.bf16.gmra.mxu1 %v1012_v16  ;;  %4671 = vmatmul.bf16.gmra.mxu0 %v3824_v31  ;;  %v3622_v31 = vor.u32 %v3620_v40, %v3619_v51  ;;  %v8269_v9 = vsel %vm6566_vm2, 0, %v3630_v28  ;;  %v3228_v20 = vadd.f32 %v3227_v62, %v7542_v23  ;;  %v8272_v56 = vsel %vm4804_vm8, 1.0, %v6431_v48 }
 0x29d   : > { %v4748_v37 = vadd.f32 %v4630_v19, %v3225_v27  ;;  %4413 = vmatmul.bf16.gmra.mxu2 %v3781_v57  ;;  %4542 = vmatmul.bf16.gmra.mxu3 %v8202_v22  ;;  %v1167_v57 = vunpack.c.l.b16 %v1084_v25  ;;  %v1169_v51 = vunpack.c.l.b16 %v8255_v24  ;;  %v3977_v54 = vunpack.c.l.b16 %v8269_v9 }
 0x29e   : > { %v3623_v16 = vsel %vm703_vm0, %v8215_v7, %v3622_v31  ;;  %v3632_v7 = vshrl.u32 %v8222_v17, 16 }
 0x29f   : > { %v6051_v1 = vpack.c.bf16 %v4748_v37, %v4814_v63  ;;  %v4958_v27 = vadd.f32 %v4814_v63, %v4748_v37  ;;  %v5012_v49 = vmul.f32 %v4748_v37, %v4748_v37  ;;  %v3893_v37 = vsel %vm7153_vm6, %v3825_v30, 0 }
 0x2a0   : > { %v4374_v13 = vpop.f32.mrf.mxu2  ;;  %v4503_v22 = vpop.f32.mrf.mxu3  ;;  %v3976_v2 = vunpack.c.l.b16 %v3893_v37  ;;  %v3978_v63 = vunpack.c.l.b16 %v8261_v52  ;;  %v3975_v11 = vunpack.c.l.b16 %v3623_v16  ;;  %v2703_v23 = vpack.c.b16 %v1169_v51, %v1167_v57 }
 0x2a1   : > { %6052 = vst [vmem:[%s8251_s15] sm:$0xff] %v6051_v1   ;;  %v5059_v8 = vadd.f32 %v5012_v49, %v5011_v29  ;;  %v4504_v59 = vadd.f32 %v4503_v22, %v4374_v13  ;;  %v3229_v35 = vpop.f32.mrf.mxu1  ;;  %v4634_v40 = vpop.f32.mrf.mxu0  ;;  %v3634_v49 = vrot.slane %v3632_v7, 7  ;;  %v3830_v16 = vor.u32 %v3828_v32, %v3632_v7 }
 0x2a2   : > { %v4108_v62 = vpack.c.b16 %v3978_v63, %v3976_v2  ;;  %v4106_v1 = vpack.c.b16 %v3977_v54, %v3975_v11  ;;  %v3230_v22 = vadd.f32 %v3229_v35, %v7557_v50  ;;  %v1171_v54 = vunpack.c.h.b16 %v8255_v24 }
 0x2a3   : > { %v4633_v53 = vadd.f32 %v4632_v34, %v4504_v59  ;;  %v9171_v59 = vshrl.u32 %v7538_v44, 16  ;;  %v3894_v44 = vsel %vm7153_vm6, %v3830_v16, 0 }
 0x2a5   : > { %v4749_v19 = vadd.f32 %v4633_v53, %v3228_v20  ;;  %v1018_v37 = vor.u32 %v1016_v39, %v9171_v59 }
 0x2a7   : > { %v4816_v60 = vmul.f32 %v8272_v56, %v4749_v19  ;;  %v1085_v50 = vsel %vm7153_vm6, %v1018_v37, 0 }
 0x2a8   : > { %v4376_v30 = vpop.f32.mrf.mxu2  ;;  %v4505_v33 = vpop.f32.mrf.mxu3  ;;  %v1173_v7 = vunpack.c.l.b16 %v1085_v50 }
 0x2a9   : > { %v4959_v48 = vadd.f32 %v4958_v27, %v4816_v60  ;;  %v5013_v34 = vmul.f32 %v4816_v60, %v4816_v60  ;;  %v4506_v31 = vadd.f32 %v4505_v33, %v4376_v30  ;;  %v3232_v28 = vpop.f32.mrf.mxu1  ;;  %v4637_v29 = vpop.f32.mrf.mxu0  ;;  %v9172_v27 = vshll.u32 %v8222_v17, 16 }
 0x2aa   : > { %v3233_v17 = vadd.f32 %v3232_v28, %v7575_v15  ;;  %v3980_v30 = vunpack.c.h.b16 %v8261_v52  ;;  %v3982_v33 = vunpack.c.l.b16 %v3894_v44  ;;  %v8299_v28 = vld [vmem:[#allocation2 + $0x78] sm:$0xff] }
 0x2ab   : > { %v5060_v13 = vadd.f32 %v5059_v8, %v5013_v34  ;;  %v4635_v25 = vadd.f32 %v4634_v40, %v4506_v31  ;;  %v3637_v53 = vor.u32 %v9172_v27, %v3634_v49  ;;  %v2706_v49 = vpack.c.b16 %v1173_v7, %v1171_v54  ;;  %v8307_v27 = vld [vmem:[#allocation2 + $0x88] sm:$0xff]  }
 0x2ac   : > { %3271 = vmatmul.bf16.gmra.mxu1 %v2703_v23  ;;  %4676 = vmatmul.bf16.gmra.mxu0 %v4108_v62  ;;  %v3979_v23 = vunpack.c.h.b16 %v8269_v9  ;;  %v4111_v15 = vpack.c.b16 %v3982_v33, %v3980_v30  ;;  %v3643_v37 = vshll.u32 %v8299_v28, 16  ;;  %v9174_v30 = vshrl.u32 %v7579_v12, 16 }
 0x2ad   : > { %v4750_v20 = vadd.f32 %v4635_v25, %v3230_v22  ;;  %4418 = vmatmul.bf16.gmra.mxu2 %v4106_v1  ;;  %4547 = vmatmul.bf16.gmra.mxu3 %v8199_v0  ;;  %v3638_v0 = vsel %vm703_vm0, %v8235_v3, %v3637_v53  ;;  %v3640_v53 = vshrl.u32 %v8299_v28, 16 }
 0x2ae   : > { %v3981_v62 = vunpack.c.l.b16 %v3638_v0  ;;  %v3831_v44 = vrot.slane %v3643_v37, 1 }
 0x2af   : > { %v4817_v57 = vmul.f32 %v8227_v47, %v4750_v20 }
 0x2b0   : > { %v4379_v8 = vpop.f32.mrf.mxu2  ;;  %v4508_v51 = vpop.f32.mrf.mxu3  ;;  %v4109_v25 = vpack.c.b16 %v3981_v62, %v3979_v23  ;;  %v9175_v23 = vshll.u32 %v7596_v46, 16 }
 0x2b1   : > { %v6056_v39 = vpack.c.bf16 %v4817_v57, %v4816_v60  ;;  %v5014_v32 = vmul.f32 %v4817_v57, %v4817_v57  ;;  %v4509_v35 = vadd.f32 %v4508_v51, %v4379_v8  ;;  %v4960_v40 = vadd.f32 %v4959_v48, %v4817_v57  ;;  %v3234_v2 = vpop.f32.mrf.mxu1  ;;  %v4639_v63 = vpop.f32.mrf.mxu0  ;;  %v8297_v48 = vld [vmem:[#allocation2 + $0x80] sm:$0xff]  }
 0x2b2   : > { %v6018_v24 = vunpack.c.l.b16 %v8297_v48  ;;  %v3235_v9 = vadd.f32 %v3234_v2, %v7585_v18  ;;  %v9173_v57 = vshll.u32 %v7579_v12, 16  ;;  %v1021_v62 = vrot.slane %v9175_v23, 1 }
 0x2b3   : > { %6208 = vst [vmem:[%s8251_s15 + $0x8] sm:$0xff] %v6056_v39   ;;  %v4638_v19 = vadd.f32 %v4637_v29, %v4509_v35  ;;  %v5061_v11 = vadd.f32 %v5060_v13, %v5014_v32  ;;  %v6360_v32 = vld [vmem:[#allocation2 + $0x84] sm:$0xff]   ;;  %v6023_v35 = vunpack.c.h.b16 %v8307_v27 }
 0x2b4   : > { %v8304_v16 = vpack.c.b16 %v6018_v24, %v6018_v24  ;;  %v1019_v8 = vrot.slane %v9173_v57, 1  ;;  %v3655_v24 = vshrl.u32 %v6360_v32, 16 }
 0x2b5   : > { %v4751_v60 = vadd.f32 %v4638_v19, %v3233_v17  ;;  %v3642_v19 = vrot.slane %v3640_v53, 7 }
 0x2b6   : > { %v3650_v39 = vshll.u32 %v8304_v16, 16  ;;  %v1020_v33 = vor.u32 %v1019_v8, %v9174_v30 }
 0x2b7   : > { %v4961_v34 = vadd.f32 %v4960_v40, %v4751_v60  ;;  %v5015_v31 = vmul.f32 %v4751_v60, %v4751_v60 }
 0x2b8   : > { %v4381_v3 = vpop.f32.mrf.mxu2  ;;  %v4510_v1 = vpop.f32.mrf.mxu3 }
 0x2b9   : > { %v5062_v29 = vadd.f32 %v5061_v11, %v5015_v31  ;;  %v4511_v13 = vadd.f32 %v4510_v1, %v4381_v3  ;;  %v3237_v52 = vpop.f32.mrf.mxu1  ;;  %v4642_v22 = vpop.f32.mrf.mxu0  ;;  %v3832_v31 = vor.u32 %v3831_v44, %v3640_v53  ;;  %v3833_v3 = vrot.slane %v3650_v39, 1 }
 0x2ba   : > { %v3238_v54 = vadd.f32 %v3237_v52, %v7604_v38  ;;  %v8321_v1 = vpack.c.b16 %v6023_v35, %v6023_v35  ;;  %v9176_v38 = vshll.u32 %v7594_v58, 16  ;;  %v9177_v35 = vshrl.u32 %v7596_v46, 16 }
 0x2bb   : > { %v4640_v59 = vadd.f32 %v4639_v63, %v4511_v13 }
 0x2bc   : > { %3276 = vmatmul.bf16.gmra.mxu1 %v2706_v49  ;;  %4681 = vmatmul.bf16.gmra.mxu0 %v4111_v15  ;;  %v3645_v49 = vor.u32 %v3643_v37, %v3642_v19  ;;  %v3647_v15 = vshrl.u32 %v8304_v16, 16  ;;  %v1024_v13 = vrot.slane %v9176_v38, 1  ;;  %v3665_v16 = vshll.u32 %v8321_v1, 16 }
 0x2bd   : > { %v4752_v20 = vadd.f32 %v4640_v59, %v3235_v9  ;;  %4423 = vmatmul.bf16.gmra.mxu2 %v4109_v25  ;;  %4552 = vmatmul.bf16.gmra.mxu3 %v8210_v42  ;;  %v3834_v25 = vsel %vm978_vm3, %v3832_v31, %v3833_v3 }
 0x2be   : > { %v3783_v8 = vsel %vm6566_vm2, 0, %v3645_v49 }
 0x2bf   : > { %v4819_v18 = vmul.f32 %v8272_v56, %v4752_v20 }
 0x2c0   : > { %v4384_v51 = vpop.f32.mrf.mxu2  ;;  %v4513_v50 = vpop.f32.mrf.mxu3 }
 0x2c1   : > { %v6061_v40 = vpack.c.bf16 %v4819_v18, %v4751_v60  ;;  %v4962_v42 = vadd.f32 %v4961_v34, %v4819_v18  ;;  %v5016_v2 = vmul.f32 %v4819_v18, %v4819_v18  ;;  %v4514_v63 = vadd.f32 %v4513_v50, %v4384_v51  ;;  %v3239_v0 = vpop.f32.mrf.mxu1  ;;  %v4644_v17 = vpop.f32.mrf.mxu0 }
 0x2c2   : > { %v3658_v60 = vshll.u32 %v6360_v32, 16  ;;  %v3649_v18 = vrot.slane %v3647_v15, 7  ;;  %v8332_v51 = vrot.slane %v3655_v24, 7  ;;  %v3240_v44 = vadd.f32 %v3239_v0, %v7629_v26 }
 0x2c3   : > { %6209 = vst [vmem:[%s8251_s15 + $0x10] sm:$0xff] %v6061_v40   ;;  %v5063_v11 = vadd.f32 %v5062_v29, %v5016_v2  ;;  %v4643_v7 = vadd.f32 %v4642_v22, %v4514_v63  ;;  %v1022_v22 = vsel %vm978_vm3, %v1020_v33, %v1021_v62  ;;  %v1023_v40 = vor.u32 %v1021_v62, %v9177_v35 }
 0x2c4   : > { %v3836_v9 = vrot.slane %v3658_v60, 1  ;;  %v9179_v63 = vshll.u32 %v7648_v55, 16  ;;  %v3838_v26 = vrot.slane %v3665_v16, 1  ;;  %v3652_v0 = vor.u32 %v3650_v39, %v3649_v18 }
 0x2c5   : > { %v4753_v34 = vadd.f32 %v4643_v7, %v3238_v54  ;;  %v3660_v46 = vor.u32 %v3658_v60, %v8332_v51 }
 0x2c6   : > { %v1026_v54 = vrot.slane %v9179_v63, 1  ;;  %v3837_v30 = vor.u32 %v3836_v9, %v3655_v24  ;;  %v3653_v24 = vsel %vm703_vm0, %v3642_v19, %v3652_v0 }
 0x2c7   : > { %v4820_v29 = vmul.f32 %v8227_v47, %v4753_v34  ;;  %v1086_v34 = vsel %vm7153_vm6, %v1023_v40, 0 }
 0x2c8   : > { %v4386_v12 = vpop.f32.mrf.mxu2  ;;  %v4515_v52 = vpop.f32.mrf.mxu3  ;;  %v8352_v39 = vsel %vm978_vm3, %v3837_v30, %v3838_v26 }
 0x2c9   : > { %v4963_v59 = vadd.f32 %v4962_v42, %v4820_v29  ;;  %v5017_v20 = vmul.f32 %v4820_v29, %v4820_v29  ;;  %v4516_v53 = vadd.f32 %v4515_v52, %v4386_v12  ;;  %v3242_v57 = vpop.f32.mrf.mxu1  ;;  %v4647_v37 = vpop.f32.mrf.mxu0  ;;  %v9178_v42 = vshrl.u32 %v7594_v58, 16 }
 0x2ca   : > { %v3243_v38 = vadd.f32 %v3242_v57, %v7651_v10  ;;  %v1179_v12 = vunpack.c.l.b16 %v1086_v34 }
 0x2cb   : > { %v5064_v50 = vadd.f32 %v5063_v11, %v5017_v20  ;;  %v4645_v32 = vadd.f32 %v4644_v17, %v4516_v53  ;;  %v1025_v2 = vor.u32 %v1024_v13, %v9178_v42  ;;  %v3835_v11 = vor.u32 %v3833_v3, %v3647_v15 }
 0x2cc   : > { %3281 = vmatmul.bf16.gmra.mxu1 %v1022_v22  ;;  %4686 = vmatmul.bf16.gmra.mxu0 %v3834_v25  ;;  %v3990_v25 = vunpack.c.l.b16 %v8352_v39  ;;  %v3662_v53 = vshrl.u32 %v8321_v1, 16 }
 0x2cd   : > { %v4754_v7 = vadd.f32 %v4645_v32, %v3240_v44  ;;  %4428 = vmatmul.bf16.gmra.mxu2 %v3783_v8  ;;  %4557 = vmatmul.bf16.gmra.mxu3 %v8299_v28  ;;  %v8346_v31 = vsel %vm978_vm3, %v1025_v2, %v1026_v54  ;;  %v3895_v60 = vsel %vm7153_vm6, %v3835_v11, 0  ;;  %v9180_v11 = vshrl.u32 %v7648_v55, 16 }
 0x2ce   : > { %v1181_v52 = vunpack.c.l.b16 %v8346_v31  ;;  %v3988_v22 = vunpack.c.l.b16 %v3895_v60  ;;  %v3664_v42 = vrot.slane %v3662_v53, 7  ;;  %v3840_v0 = vor.u32 %v3838_v26, %v3662_v53  ;;  %v8387_v53 = vld [vmem:[#allocation2 + $0x90] sm:$0xff] }
 0x2cf   : > { %v6066_v17 = vpack.c.bf16 %v4754_v7, %v4820_v29  ;;  %v4964_v33 = vadd.f32 %v4963_v59, %v4754_v7  ;;  %v5018_v58 = vmul.f32 %v4754_v7, %v4754_v7  ;;  %v8359_v29 = vsel %vm6566_vm2, 0, %v3660_v46 }
 0x2d0   : > { %v4389_v23 = vpop.f32.mrf.mxu2  ;;  %v4518_v62 = vpop.f32.mrf.mxu3  ;;  %v3987_v59 = vunpack.c.l.b16 %v3653_v24  ;;  %v3989_v20 = vunpack.c.l.b16 %v8359_v29  ;;  %v4116_v44 = vpack.c.b16 %v3990_v25, %v3988_v22  ;;  %v1028_v30 = vor.u32 %v1026_v54, %v9180_v11  ;;  %v8385_v22 = vld [vmem:[#allocation2 + $0x98] sm:$0xff]  }
 0x2d1   : > { %6210 = vst [vmem:[%s8251_s15 + $0x18] sm:$0xff] %v6066_v17   ;;  %v5065_v28 = vadd.f32 %v5064_v50, %v5018_v58  ;;  %v4519_v3 = vadd.f32 %v4518_v62, %v4389_v23  ;;  %v3244_v49 = vpop.f32.mrf.mxu1  ;;  %v4649_v15 = vpop.f32.mrf.mxu0  ;;  %v2711_v50 = vpack.c.b16 %v1181_v52, %v1179_v12  ;;  %v3667_v17 = vor.u32 %v3665_v16, %v3664_v42 }
 0x2d2   : > { %v4114_v40 = vpack.c.b16 %v3989_v20, %v3987_v59  ;;  %v3245_v63 = vadd.f32 %v3244_v49, %v7666_v4  ;;  %v1087_v4 = vsel %vm7153_vm6, %v1028_v30, 0  ;;  %v3896_v55 = vsel %vm7153_vm6, %v3840_v0, 0  ;;  %v6362_v30 = vld [vmem:[#allocation2 + $0x9c] sm:$0xff]  }
 0x2d3   : > { %v4648_v13 = vadd.f32 %v4647_v37, %v4519_v3  ;;  %v1185_v60 = vunpack.c.l.b16 %v1087_v4  ;;  %v3992_v24 = vunpack.c.h.b16 %v8352_v39  ;;  %v3991_v12 = vunpack.c.h.b16 %v8359_v29 }
 0x2d5   : > { %v4755_v9 = vadd.f32 %v4648_v13, %v3243_v38  ;;  %v3994_v38 = vunpack.c.l.b16 %v3896_v55 }
 0x2d7   : > { %v4822_v19 = vmul.f32 %v8272_v56, %v4755_v9 }
 0x2d8   : > { %v4391_v8 = vpop.f32.mrf.mxu2  ;;  %v4520_v18 = vpop.f32.mrf.mxu3 }
 0x2d9   : > { %v4965_v10 = vadd.f32 %v4964_v33, %v4822_v19  ;;  %v5019_v57 = vmul.f32 %v4822_v19, %v4822_v19  ;;  %v4521_v37 = vadd.f32 %v4520_v18, %v4391_v8  ;;  %v3247_v32 = vpop.f32.mrf.mxu1  ;;  %v4652_v35 = vpop.f32.mrf.mxu0 }
 0x2da   : > { %v3248_v1 = vadd.f32 %v3247_v32, %v7684_v6  ;;  %v4119_v6 = vpack.c.b16 %v3994_v38, %v3992_v24  ;;  %v8395_v32 = vld [vmem:[#allocation2 + $0xa0] sm:$0xff]   ;;  %v3685_v38 = vshrl.u32 %v6362_v30, 16 }
 0x2db   : > { %v5066_v2 = vadd.f32 %v5065_v28, %v5019_v57  ;;  %v4650_v7 = vadd.f32 %v4649_v15, %v4521_v37  ;;  %v1183_v15 = vunpack.c.h.b16 %v8346_v31  ;;  %v6026_v31 = vunpack.c.l.b16 %v8385_v22 }
 0x2dc   : > { %3286 = vmatmul.bf16.gmra.mxu1 %v2711_v50  ;;  %4691 = vmatmul.bf16.gmra.mxu0 %v4116_v44  ;;  %v6031_v0 = vunpack.c.h.b16 %v8395_v32 }
 0x2dd   : > { %v4756_v46 = vadd.f32 %v4650_v7, %v3245_v63  ;;  %4433 = vmatmul.bf16.gmra.mxu2 %v4114_v40  ;;  %4562 = vmatmul.bf16.gmra.mxu3 %v8297_v48  ;;  %v3668_v48 = vsel %vm703_vm0, %v8332_v51, %v3667_v17  ;;  %v2714_v20 = vpack.c.b16 %v1185_v60, %v1183_v15  ;;  %v9181_v40 = vshll.u32 %v7688_v36, 16 }
 0x2de   : > { %v3993_v52 = vunpack.c.l.b16 %v3668_v48  ;;  %v8392_v57 = vpack.c.b16 %v6026_v31, %v6026_v31  ;;  %v8409_v15 = vpack.c.b16 %v6031_v0, %v6031_v0 }
 0x2df   : > { %v4823_v33 = vmul.f32 %v8227_v47, %v4756_v46  ;;  %v1029_v42 = vrot.slane %v9181_v40, 1 }
 0x2e0   : > { %v4394_v58 = vpop.f32.mrf.mxu2  ;;  %v4523_v23 = vpop.f32.mrf.mxu3  ;;  %v4117_v50 = vpack.c.b16 %v3993_v52, %v3991_v12  ;;  %v3680_v11 = vshll.u32 %v8392_v57, 16  ;;  %v3677_v24 = vshrl.u32 %v8392_v57, 16  ;;  %v9185_v57 = vshrl.u32 %v7705_v5, 16 }
 0x2e1   : > { %v6071_v54 = vpack.c.bf16 %v4823_v33, %v4822_v19  ;;  %v5020_v26 = vmul.f32 %v4823_v33, %v4823_v33  ;;  %v4524_v62 = vadd.f32 %v4523_v23, %v4394_v58  ;;  %v4966_v34 = vadd.f32 %v4965_v10, %v4823_v33  ;;  %v3249_v28 = vpop.f32.mrf.mxu1  ;;  %v4654_v3 = vpop.f32.mrf.mxu0 }
 0x2e2   : > { %v3250_v29 = vadd.f32 %v3249_v28, %v7694_v45  ;;  %v3673_v10 = vshll.u32 %v8387_v53, 16  ;;  %v9183_v28 = vshll.u32 %v7705_v5, 16 }
 0x2e3   : > { %6211 = vst [vmem:[%s8251_s15 + $0x20] sm:$0xff] %v6071_v54   ;;  %v4653_v16 = vadd.f32 %v4652_v35, %v4524_v62  ;;  %v5067_v49 = vadd.f32 %v5066_v2, %v5020_v26  ;;  %v3670_v35 = vshrl.u32 %v8387_v53, 16  ;;  %v9182_v62 = vshrl.u32 %v7688_v36, 16 }
 0x2e4   : > { %v3841_v7 = vrot.slane %v3673_v10, 1 }
 0x2e5   : > { %v4757_v13 = vadd.f32 %v4653_v16, %v3248_v1  ;;  %v3672_v4 = vrot.slane %v3670_v35, 7  ;;  %v3843_v1 = vrot.slane %v3680_v11, 1  ;;  %v3688_v16 = vshll.u32 %v6362_v30, 16 }
 0x2e6   : > { %v3842_v48 = vor.u32 %v3841_v7, %v3670_v35  ;;  %v9186_v35 = vshrl.u32 %v7703_v14, 16 }
 0x2e7   : > { %v4967_v25 = vadd.f32 %v4966_v34, %v4757_v13  ;;  %v5021_v9 = vmul.f32 %v4757_v13, %v4757_v13  ;;  %v1030_v34 = vor.u32 %v1029_v42, %v9182_v62  ;;  %v3675_v60 = vor.u32 %v3673_v10, %v3672_v4  ;;  %v9187_v42 = vld [vmem:[#allocation12_spill] sm:$0xff] }
 0x2e8   : > { %v4396_v51 = vpop.f32.mrf.mxu2  ;;  %v4525_v59 = vpop.f32.mrf.mxu3  ;;  %v3845_v7 = vor.u32 %v3843_v1, %v3677_v24 }
 0x2e9   : > { %v5068_v19 = vadd.f32 %v5067_v49, %v5021_v9  ;;  %v4526_v8 = vadd.f32 %v4525_v59, %v4396_v51  ;;  %v3252_v39 = vpop.f32.mrf.mxu1  ;;  %v4657_v18 = vpop.f32.mrf.mxu0  ;;  %v3844_v9 = vsel %vm978_vm3, %v3842_v48, %v3843_v1  ;;  %v3846_v51 = vrot.slane %v3688_v16, 1 }
 0x2ea   : > { %v3253_v54 = vadd.f32 %v3252_v39, %v7713_v43  ;;  %v9184_v43 = vshll.u32 %v7703_v14, 16  ;;  %v3785_v39 = vsel %vm6566_vm2, 0, %v3675_v60  ;;  %v3897_v62 = vsel %vm7153_vm6, %v3845_v7, 0 }
 0x2eb   : > { %v4655_v44 = vadd.f32 %v4654_v3, %v4526_v8  ;;  %v1031_v3 = vrot.slane %v9183_v28, 1  ;;  %v3695_v8 = vshll.u32 %v8409_v15, 16  ;;  %v3847_v30 = vor.u32 %v3846_v51, %v3685_v38 }
 0x2ec   : > { %3291 = vmatmul.bf16.gmra.mxu1 %v2714_v20  ;;  %4696 = vmatmul.bf16.gmra.mxu0 %v4119_v6  ;;  %v1034_v12 = vrot.slane %v9184_v43, 1  ;;  %v4000_v60 = vunpack.c.l.b16 %v3897_v62 }
 0x2ed   : > { %v4758_v37 = vadd.f32 %v4655_v44, %v3250_v29  ;;  %4438 = vmatmul.bf16.gmra.mxu2 %v4117_v50  ;;  %4567 = vmatmul.bf16.gmra.mxu3 %v8307_v27  ;;  %v8420_v50 = vrot.slane %v3685_v38, 7 }
 0x2ee   : > { %v1035_v40 = vor.u32 %v1034_v12, %v9186_v35  ;;  %v3692_v12 = vshrl.u32 %v8409_v15, 16  ;;  %v9192_v15 = vld [vmem:[#allocation59_spill] sm:$0xff] }
 0x2ef   : > { %v4825_v45 = vmul.f32 %v8272_v56, %v4758_v37  ;;  %v1033_v37 = vor.u32 %v1031_v3, %v9185_v57  ;;  %v3690_v5 = vor.u32 %v3688_v16, %v8420_v50  ;;  %v9191_v57 = vshrl.u32 %v9187_v42, 16 }
 0x2f0   : > { %v4399_v2 = vpop.f32.mrf.mxu2  ;;  %v4528_v63 = vpop.f32.mrf.mxu3 }
 0x2f1   : > { %v6076_v46 = vpack.c.bf16 %v4825_v45, %v4757_v13  ;;  %v4968_v27 = vadd.f32 %v4967_v25, %v4825_v45  ;;  %v5022_v17 = vmul.f32 %v4825_v45, %v4825_v45  ;;  %v4529_v33 = vadd.f32 %v4528_v63, %v4399_v2  ;;  %v3254_v58 = vpop.f32.mrf.mxu1  ;;  %v4659_v23 = vpop.f32.mrf.mxu0 }
 0x2f2   : > { %v1032_v25 = vsel %vm978_vm3, %v1030_v34, %v1031_v3  ;;  %v3255_v44 = vadd.f32 %v3254_v58, %v7738_v21  ;;  %v9188_v45 = vshll.u32 %v9187_v42, 16  ;;  %v3848_v21 = vrot.slane %v3695_v8, 1  ;;  %v9189_v3 = vld [vmem:[#allocation13_spill] sm:$0xff] }
 0x2f3   : > { %6212 = vst [vmem:[%s8251_s15 + $0x28] sm:$0xff] %v6076_v46   ;;  %v5069_v55 = vadd.f32 %v5068_v19, %v5022_v17  ;;  %v4658_v26 = vadd.f32 %v4657_v18, %v4529_v33  ;;  %v3679_v18 = vrot.slane %v3677_v24, 7  ;;  %v8447_v28 = vsel %vm6566_vm2, 0, %v3690_v5 }
 0x2f4   : > { %v1036_v2 = vrot.slane %v9188_v45, 1  ;;  %v4001_v43 = vunpack.c.l.b16 %v8447_v28  ;;  %v3850_v35 = vor.u32 %v3848_v21, %v3692_v12  ;;  %v4003_v62 = vunpack.c.h.b16 %v8447_v28 }
 0x2f5   : > { %v4759_v49 = vadd.f32 %v4658_v26, %v3253_v54  ;;  %v3682_v0 = vor.u32 %v3680_v11, %v3679_v18  ;;  %v8440_v11 = vsel %vm978_vm3, %v3847_v30, %v3848_v21 }
 0x2f6   : > { %v8434_v58 = vsel %vm978_vm3, %v1035_v40, %v1036_v2  ;;  %v4002_v24 = vunpack.c.l.b16 %v8440_v11  ;;  %v3898_v42 = vsel %vm7153_vm6, %v3850_v35, 0 }
 0x2f7   : > { %v4826_v13 = vmul.f32 %v8227_v47, %v4759_v49  ;;  %v3683_v34 = vsel %vm703_vm0, %v3672_v4, %v3682_v0  ;;  %v1193_v49 = vunpack.c.l.b16 %v8434_v58 }
 0x2f8   : > { %v4401_v36 = vpop.f32.mrf.mxu2  ;;  %v4530_v52 = vpop.f32.mrf.mxu3 }
 0x2f9   : > { %v4969_v59 = vadd.f32 %v4968_v27, %v4826_v13  ;;  %v5023_v20 = vmul.f32 %v4826_v13, %v4826_v13  ;;  %v4531_v6 = vadd.f32 %v4530_v52, %v4401_v36  ;;  %v3257_v31 = vpop.f32.mrf.mxu1  ;;  %v4662_v19 = vpop.f32.mrf.mxu0 }
 0x2fa   : > { %v3258_v48 = vadd.f32 %v3257_v31, %v9189_v3  ;;  %v8473_v3 = vld [vmem:[#allocation2 + $0xb0] sm:$0xff]  }
 0x2fb   : > { %v5070_v29 = vadd.f32 %v5069_v55, %v5023_v20  ;;  %v4660_v10 = vadd.f32 %v4659_v23, %v4531_v6  ;;  %v1088_v23 = vsel %vm7153_vm6, %v1033_v37, 0  ;;  %v1038_v37 = vor.u32 %v1036_v2, %v9191_v57 }
 0x2fc   : > { %3296 = vmatmul.bf16.gmra.mxu1 %v1032_v25  ;;  %4701 = vmatmul.bf16.gmra.mxu0 %v3844_v9  ;;  %v1191_v16 = vunpack.c.l.b16 %v1088_v23  ;;  %v4124_v9 = vpack.c.b16 %v4002_v24, %v4000_v60  ;;  %v1195_v23 = vunpack.c.h.b16 %v8434_v58  ;;  %v8475_v24 = vld [vmem:[#allocation2 + $0xa8] sm:$0xff]  ;;  %v6034_v58 = vunpack.c.l.b16 %v8473_v3 }
 0x2fd   : > { %v4760_v63 = vadd.f32 %v4660_v10, %v3255_v44  ;;  %4443 = vmatmul.bf16.gmra.mxu2 %v3785_v39  ;;  %4572 = vmatmul.bf16.gmra.mxu3 %v8387_v53  ;;  %v3694_v39 = vrot.slane %v3692_v12, 7  ;;  %v1089_v0 = vsel %vm7153_vm6, %v1038_v37, 0 }
 0x2fe   : > { %v2719_v25 = vpack.c.b16 %v1193_v49, %v1191_v16 }
 0x2ff   : > { %v6081_v46 = vpack.c.bf16 %v4760_v63, %v4826_v13  ;;  %v4970_v27 = vadd.f32 %v4969_v59, %v4760_v63  ;;  %v5024_v14 = vmul.f32 %v4760_v63, %v4760_v63  ;;  %v3999_v13 = vunpack.c.l.b16 %v3683_v34 }
 0x300   : > { %v4404_v17 = vpop.f32.mrf.mxu2  ;;  %v4533_v33 = vpop.f32.mrf.mxu3  ;;  %v3697_v45 = vor.u32 %v3695_v8, %v3694_v39 }
 0x301   : > { %6213 = vst [vmem:[%s8251_s15 + $0x30] sm:$0xff] %v6081_v46   ;;  %v5071_v53 = vadd.f32 %v5070_v29, %v5024_v14  ;;  %v4534_v55 = vadd.f32 %v4533_v33, %v4404_v17  ;;  %v3259_v54 = vpop.f32.mrf.mxu1  ;;  %v4664_v26 = vpop.f32.mrf.mxu0  ;;  %v9190_v29 = vld [vmem:[#allocation10_spill] sm:$0xff] }
 0x302   : > { %v3260_v44 = vadd.f32 %v3259_v54, %v9190_v29  ;;  %v4006_v54 = vunpack.c.l.b16 %v3898_v42 }
 0x303   : > { %v4663_v1 = vadd.f32 %v4662_v19, %v4534_v55  ;;  %v4122_v19 = vpack.c.b16 %v4001_v43, %v3999_v13  ;;  %v4004_v55 = vunpack.c.h.b16 %v8440_v11 }
 0x305   : > { %v4761_v38 = vadd.f32 %v4663_v1, %v3258_v48  ;;  %v4127_v60 = vpack.c.b16 %v4006_v54, %v4004_v55 }
 0x307   : > { %v4828_v4 = vmul.f32 %v8272_v56, %v4761_v38 }
 0x308   : > { %v4406_v36 = vpop.f32.mrf.mxu2  ;;  %v4535_v52 = vpop.f32.mrf.mxu3 }
 0x309   : > { %v4971_v51 = vadd.f32 %v4970_v27, %v4828_v4  ;;  %v5025_v59 = vmul.f32 %v4828_v4, %v4828_v4  ;;  %v4536_v20 = vadd.f32 %v4535_v52, %v4406_v36  ;;  %v3262_v6 = vpop.f32.mrf.mxu1  ;;  %v4667_v31 = vpop.f32.mrf.mxu0  ;;  %v3703_v52 = vshll.u32 %v8475_v24, 16 }
 0x30a   : > { %v3263_v8 = vadd.f32 %v3262_v6, %v9192_v15 }
 0x30b   : > { %v5072_v18 = vadd.f32 %v5071_v53, %v5025_v59  ;;  %v4665_v10 = vadd.f32 %v4664_v26, %v4536_v20  ;;  %v1197_v53 = vunpack.c.l.b16 %v1089_v0  ;;  %v3700_v59 = vshrl.u32 %v8475_v24, 16  ;;  %v9194_v20 = vld [vmem:[#allocation16_spill] sm:$0xff]  ;;  %v9196_v0 = vld [vmem:[#allocation6_spill] sm:$0xff] }
 0x30c   : > { %3301 = vmatmul.bf16.gmra.mxu1 %v2719_v25  ;;  %4706 = vmatmul.bf16.gmra.mxu0 %v4124_v9  ;;  %v8480_v25 = vpack.c.b16 %v6034_v58, %v6034_v58  ;;  %v9195_v6 = vshll.u32 %v9194_v20, 16  ;;  %v3851_v29 = vrot.slane %v3703_v52, 1 }
 0x30d   : > { %v4762_v40 = vadd.f32 %v4665_v10, %v3260_v44  ;;  %4448 = vmatmul.bf16.gmra.mxu2 %v4122_v19  ;;  %4577 = vmatmul.bf16.gmra.mxu3 %v8385_v22  ;;  %v3698_v22 = vsel %vm703_vm0, %v8420_v50, %v3697_v45  ;;  %v2722_v49 = vpack.c.b16 %v1197_v53, %v1195_v23  ;;  %v6364_v10 = vld [vmem:[#allocation2 + $0xb4] sm:$0xff]  }
 0x30e   : > { %v4005_v34 = vunpack.c.l.b16 %v3698_v22  ;;  %v3710_v44 = vshll.u32 %v8480_v25, 16  ;;  %v3852_v22 = vor.u32 %v3851_v29, %v3700_v59  ;;  %v3707_v53 = vshrl.u32 %v8480_v25, 16 }
 0x30f   : > { %v4829_v63 = vmul.f32 %v8227_v47, %v4762_v40  ;;  %v3715_v55 = vshrl.u32 %v6364_v10, 16 }
 0x310   : > { %v4409_v7 = vpop.f32.mrf.mxu2  ;;  %v4538_v30 = vpop.f32.mrf.mxu3  ;;  %v4125_v12 = vpack.c.b16 %v4005_v34, %v4003_v62  ;;  %v3853_v15 = vrot.slane %v3710_v44, 1 }
 0x311   : > { %v6086_v2 = vpack.c.bf16 %v4829_v63, %v4828_v4  ;;  %v5026_v21 = vmul.f32 %v4829_v63, %v4829_v63  ;;  %v4539_v5 = vadd.f32 %v4538_v30, %v4409_v7  ;;  %v4972_v46 = vadd.f32 %v4971_v51, %v4829_v63  ;;  %v3264_v27 = vpop.f32.mrf.mxu1  ;;  %v4669_v14 = vpop.f32.mrf.mxu0  ;;  %v9193_v4 = vld [vmem:[#allocation60_spill] sm:$0xff]  ;;  %v8483_v51 = vld [vmem:[#allocation2 + $0xb8] sm:$0xff]  }
 0x312   : > { %v3265_v28 = vadd.f32 %v3264_v27, %v9193_v4  ;;  %v6039_v57 = vunpack.c.h.b16 %v8483_v51  ;;  %v8491_v7 = vrot.slane %v3700_v59, 7  ;;  %v3709_v4 = vrot.slane %v3707_v53, 7  ;;  %v520_v59 = vld [vmem:[%s8512_s26] sm:$0xff]  }
 0x313   : > { %6214 = vst [vmem:[%s8251_s15 + $0x38] sm:$0xff] %v6086_v2   ;;  %v4668_v17 = vadd.f32 %v4667_v31, %v4539_v5  ;;  %v5073_v33 = vadd.f32 %v5072_v18, %v5026_v21  ;;  %v1039_v31 = vrot.slane %v9195_v6, 1  ;;  %v9197_v21 = vshrl.u32 %v9194_v20, 16 }
 0x314   : > { %v3705_v23 = vor.u32 %v3703_v52, %v8491_v7  ;;  %v9202_v52 = vld [vmem:[#allocation4_spill] sm:$0xff]  ;;  %524 = vst [vmem:[#allocation2 + $0xcc] sm:$0xff] %v520_v59  }
 0x315   : > { %v4763_v26 = vadd.f32 %v4668_v17, %v3263_v8  ;;  %v1040_v5 = vor.u32 %v1039_v31, %v9197_v21  ;;  %v3718_v8 = vshll.u32 %v6364_v10, 16 }
 0x317   : > { %v4973_v48 = vadd.f32 %v4972_v46, %v4763_v26  ;;  %v5027_v1 = vmul.f32 %v4763_v26, %v4763_v26  ;;  %v9198_v46 = vld [vmem:[#allocation61_spill] sm:$0xff] }
 0x318   : > { %v4411_v50 = vpop.f32.mrf.mxu2  ;;  %v4540_v16 = vpop.f32.mrf.mxu3  ;;  %v9199_v27 = vshll.u32 %v9198_v46, 16  ;;  %v9203_v20 = vshrl.u32 %v9198_v46, 16 }
 0x319   : > { %v5074_v38 = vadd.f32 %v5073_v33, %v5027_v1  ;;  %v4541_v13 = vadd.f32 %v4540_v16, %v4411_v50  ;;  %v3267_v11 = vpop.f32.mrf.mxu1  ;;  %v4672_v43 = vpop.f32.mrf.mxu0  ;;  %v8499_v33 = vpack.c.b16 %v6039_v57, %v6039_v57  ;;  %v3854_v16 = vsel %vm978_vm3, %v3852_v22, %v3853_v15 }
 0x31a   : > { %v3268_v42 = vadd.f32 %v3267_v11, %v9196_v0  ;;  %v3855_v57 = vor.u32 %v3853_v15, %v3707_v53 }
 0x31b   : > { %v4670_v36 = vadd.f32 %v4669_v14, %v4541_v13  ;;  %v1041_v14 = vrot.slane %v9199_v27, 1 }
 0x31c   : > { %3306 = vmatmul.bf16.gmra.mxu1 %v2722_v49  ;;  %4711 = vmatmul.bf16.gmra.mxu0 %v4127_v60  ;;  %v3856_v49 = vrot.slane %v3718_v8, 1 }
 0x31d   : > { %v4764_v9 = vadd.f32 %v4670_v36, %v3265_v28  ;;  %4453 = vmatmul.bf16.gmra.mxu2 %v4125_v12  ;;  %4582 = vmatmul.bf16.gmra.mxu3 %v8395_v32  ;;  %v1042_v50 = vsel %vm978_vm3, %v1040_v5, %v1041_v14  ;;  %v3787_v12 = vsel %vm6566_vm2, 0, %v3705_v23  ;;  %v8517_v28 = vrot.slane %v3715_v55, 7 }
 0x31e   : > { %v1043_v6 = vor.u32 %v1041_v14, %v9203_v20  ;;  %v3899_v14 = vsel %vm7153_vm6, %v3855_v57, 0 }
 0x31f   : > { %v4831_v19 = vmul.f32 %v8272_v56, %v4764_v9 }
 0x320   : > { %v4414_v39 = vpop.f32.mrf.mxu2  ;;  %v4543_v18 = vpop.f32.mrf.mxu3  ;;  %v1090_v21 = vsel %vm7153_vm6, %v1043_v6, 0 }
 0x321   : > { %v6091_v37 = vpack.c.bf16 %v4831_v19, %v4763_v26  ;;  %v4974_v32 = vadd.f32 %v4973_v48, %v4831_v19  ;;  %v5028_v35 = vmul.f32 %v4831_v19, %v4831_v19  ;;  %v4544_v40 = vadd.f32 %v4543_v18, %v4414_v39  ;;  %v3269_v45 = vpop.f32.mrf.mxu1  ;;  %v4674_v63 = vpop.f32.mrf.mxu0  ;;  %v9200_v26 = vld [vmem:[#allocation3_spill] sm:$0xff]  ;;  %v9205_v39 = vld [vmem:[#allocation8_spill] sm:$0xff] }
 0x322   : > { %v9201_v62 = vshll.u32 %v9200_v26, 16  ;;  %v3270_v25 = vadd.f32 %v3269_v45, %v9202_v52  ;;  %v9204_v31 = vshrl.u32 %v9200_v26, 16  ;;  %v9206_v18 = vshll.u32 %v9205_v39, 16 }
 0x323   : > { %6215 = vst [vmem:[%s8251_s15 + $0x40] sm:$0xff] %v6091_v37   ;;  %v5075_v30 = vadd.f32 %v5074_v38, %v5028_v35  ;;  %v4673_v2 = vadd.f32 %v4672_v43, %v4544_v40  ;;  %v3725_v43 = vshll.u32 %v8499_v33, 16  ;;  %v3857_v37 = vor.u32 %v3856_v49, %v3715_v55 }
 0x324   : > { %v1044_v34 = vrot.slane %v9201_v62, 1  ;;  %v1046_v29 = vrot.slane %v9206_v18, 1  ;;  %v3712_v35 = vor.u32 %v3710_v44, %v3709_v4  ;;  %v3720_v40 = vor.u32 %v3718_v8, %v8517_v28  ;;  %v9207_v8 = vld [vmem:[#allocation62_spill] sm:$0xff] }
 0x325   : > { %v4765_v17 = vadd.f32 %v4673_v2, %v3268_v42  ;;  %v1203_v53 = vunpack.c.l.b16 %v1090_v21  ;;  %v9209_v6 = vshrl.u32 %v9205_v39, 16 }
 0x326   : > { %v1045_v19 = vor.u32 %v1044_v34, %v9204_v31  ;;  %v3713_v22 = vsel %vm703_vm0, %v8491_v7, %v3712_v35  ;;  %v8546_v15 = vsel %vm6566_vm2, 0, %v3720_v40 }
 0x327   : > { %v4832_v54 = vmul.f32 %v8227_v47, %v4765_v17  ;;  %v4011_v34 = vunpack.c.l.b16 %v3713_v22  ;;  %v1048_v31 = vor.u32 %v1046_v29, %v9209_v6  ;;  %v4015_v22 = vunpack.c.h.b16 %v8546_v15 }
 0x328   : > { %v4416_v48 = vpop.f32.mrf.mxu2  ;;  %v4545_v1 = vpop.f32.mrf.mxu3  ;;  %v8532_v2 = vsel %vm978_vm3, %v1045_v19, %v1046_v29 }
 0x329   : > { %v4975_v60 = vadd.f32 %v4974_v32, %v4832_v54  ;;  %v5029_v58 = vmul.f32 %v4832_v54, %v4832_v54  ;;  %v4546_v38 = vadd.f32 %v4545_v1, %v4416_v48  ;;  %v3272_v13 = vpop.f32.mrf.mxu1  ;;  %v4677_v11 = vpop.f32.mrf.mxu0  ;;  %v3858_v32 = vrot.slane %v3725_v43, 1 }
 0x32a   : > { %v3273_v17 = vadd.f32 %v3272_v13, %v9207_v8  ;;  %v1205_v55 = vunpack.c.l.b16 %v8532_v2  ;;  %v4013_v48 = vunpack.c.l.b16 %v8546_v15  ;;  %v3722_v1 = vshrl.u32 %v8499_v33, 16  ;;  %v9210_v33 = vld [vmem:[#allocation63_spill] sm:$0xff] }
 0x32b   : > { %v5076_v36 = vadd.f32 %v5075_v30, %v5029_v58  ;;  %v4675_v9 = vadd.f32 %v4674_v63, %v4546_v38  ;;  %v8538_v44 = vsel %vm978_vm3, %v3857_v37, %v3858_v32  ;;  %v1091_v40 = vsel %vm7153_vm6, %v1048_v31, 0 }
 0x32c   : > { %3311 = vmatmul.bf16.gmra.mxu1 %v1042_v50  ;;  %4716 = vmatmul.bf16.gmra.mxu0 %v3854_v16  ;;  %v4014_v26 = vunpack.c.l.b16 %v8538_v44  ;;  %v522_v50 = vld [vmem:[%s8512_s26 + $0x8] sm:$0xf]  ;;  %v3724_v52 = vrot.slane %v3722_v1, 7  ;;  %v3860_v19 = vor.u32 %v3858_v32, %v3722_v1 }
 0x32d   : > { %v4766_v10 = vadd.f32 %v4675_v9, %v3270_v25  ;;  %4458 = vmatmul.bf16.gmra.mxu2 %v3787_v12  ;;  %4587 = vmatmul.bf16.gmra.mxu3 %v8475_v24  ;;  %526 = vst [vmem:[#allocation2 + $0xd4] sm:$0xf] %v522_v50  ;;  %v9208_v9 = vld [vmem:[#allocation5_spill] sm:$0xff]  ;;  %v9211_v50 = vld [vmem:[#allocation64_spill] sm:$0xff] }
 0x32e   : > { %v3900_v39 = vsel %vm7153_vm6, %v3860_v19, 0 }
 0x32f   : > { %v6096_v45 = vpack.c.bf16 %v4766_v10, %v4832_v54  ;;  %v4976_v63 = vadd.f32 %v4975_v60, %v4766_v10  ;;  %v5030_v30 = vmul.f32 %v4766_v10, %v4766_v10  ;;  %v4012_v54 = vunpack.c.l.b16 %v3899_v14 }
 0x330   : > { %v4419_v0 = vpop.f32.mrf.mxu2  ;;  %v4548_v42 = vpop.f32.mrf.mxu3  ;;  %v2727_v60 = vpack.c.b16 %v1205_v55, %v1203_v53  ;;  %v3727_v10 = vor.u32 %v3725_v43, %v3724_v52 }
 0x331   : > { %6216 = vst [vmem:[%s8251_s15 + $0x48] sm:$0xff] %v6096_v45   ;;  %v5077_v24 = vadd.f32 %v5076_v36, %v5030_v30  ;;  %v4549_v5 = vadd.f32 %v4548_v42, %v4419_v0  ;;  %v3274_v46 = vpop.f32.mrf.mxu1  ;;  %v4679_v27 = vpop.f32.mrf.mxu0  ;;  %v4132_v58 = vpack.c.b16 %v4014_v26, %v4012_v54  ;;  %v4130_v36 = vpack.c.b16 %v4013_v48, %v4011_v34 }
 0x332   : > { %v3275_v59 = vadd.f32 %v3274_v46, %v9208_v9  ;;  %v4016_v46 = vunpack.c.h.b16 %v8538_v44 }
 0x333   : > { %v4678_v23 = vadd.f32 %v4677_v11, %v4549_v5  ;;  %v1209_v5 = vunpack.c.l.b16 %v1091_v40  ;;  %v9214_v40 = vld [vmem:[#allocation14_spill] sm:$0xff] }
 0x335   : > { %v4767_v62 = vadd.f32 %v4678_v23, %v3273_v17  ;;  %v8573_v17 = vld [vmem:[#allocation2 + $0xc8] sm:$0xff]  }
 0x337   : > { %v4834_v7 = vmul.f32 %v8272_v56, %v4767_v62  ;;  %v8575_v62 = vld [vmem:[#allocation2 + $0xc0] sm:$0xff] }
 0x338   : > { %v4421_v16 = vpop.f32.mrf.mxu2  ;;  %v4550_v49 = vpop.f32.mrf.mxu3 }
 0x339   : > { %v4977_v38 = vadd.f32 %v4976_v63, %v4834_v7  ;;  %v5031_v13 = vmul.f32 %v4834_v7, %v4834_v7  ;;  %v4551_v11 = vadd.f32 %v4550_v49, %v4421_v16  ;;  %v3277_v12 = vpop.f32.mrf.mxu1  ;;  %v4682_v4 = vpop.f32.mrf.mxu0  ;;  %v3733_v49 = vshll.u32 %v8575_v62, 16 }
 0x33a   : > { %v3278_v43 = vadd.f32 %v3277_v12, %v9210_v33 }
 0x33b   : > { %v5078_v25 = vadd.f32 %v5077_v24, %v5031_v13  ;;  %v4680_v20 = vadd.f32 %v4679_v27, %v4551_v11  ;;  %v1207_v24 = vunpack.c.h.b16 %v8532_v2  ;;  %v4018_v27 = vunpack.c.l.b16 %v3900_v39  ;;  %v9212_v11 = vld [vmem:[#allocation7_spill] sm:$0xff] }
 0x33c   : > { %3316 = vmatmul.bf16.gmra.mxu1 %v2727_v60  ;;  %4721 = vmatmul.bf16.gmra.mxu0 %v4132_v58  ;;  %v6042_v2 = vunpack.c.l.b16 %v8573_v17  ;;  %v3730_v13 = vshrl.u32 %v8575_v62, 16  ;;  %v9213_v12 = vshll.u32 %v9212_v11, 16  ;;  %v3861_v9 = vrot.slane %v3733_v49, 1 }
 0x33d   : > { %v4768_v18 = vadd.f32 %v4680_v20, %v3275_v59  ;;  %4463 = vmatmul.bf16.gmra.mxu2 %v4130_v36  ;;  %4592 = vmatmul.bf16.gmra.mxu3 %v8473_v3  ;;  %v3728_v3 = vsel %vm703_vm0, %v8517_v28, %v3727_v10  ;;  %v2730_v54 = vpack.c.b16 %v1209_v5, %v1207_v24  ;;  %v6366_v20 = vld [vmem:[#allocation2 + $0xcc] sm:$0xff]  }
 0x33e   : > { %v4017_v8 = vunpack.c.l.b16 %v3728_v3  ;;  %v4135_v26 = vpack.c.b16 %v4018_v27, %v4016_v46  ;;  %v8580_v60 = vpack.c.b16 %v6042_v2, %v6042_v2  ;;  %v3862_v3 = vor.u32 %v3861_v9, %v3730_v13 }
 0x33f   : > { %v4835_v57 = vmul.f32 %v8227_v47, %v4768_v18  ;;  %v3745_v46 = vshrl.u32 %v6366_v20, 16 }
 0x340   : > { %v4424_v37 = vpop.f32.mrf.mxu2  ;;  %v4553_v35 = vpop.f32.mrf.mxu3  ;;  %v3740_v59 = vshll.u32 %v8580_v60, 16  ;;  %v3737_v5 = vshrl.u32 %v8580_v60, 16 }
 0x341   : > { %v6101_v29 = vpack.c.bf16 %v4835_v57, %v4834_v7  ;;  %v5032_v32 = vmul.f32 %v4835_v57, %v4835_v57  ;;  %v4554_v45 = vadd.f32 %v4553_v35, %v4424_v37  ;;  %v4978_v63 = vadd.f32 %v4977_v38, %v4835_v57  ;;  %v3279_v30 = vpop.f32.mrf.mxu1  ;;  %v4684_v0 = vpop.f32.mrf.mxu0  ;;  %v8583_v38 = vld [vmem:[#allocation2 + $0xd0] sm:$0xff]  }
 0x342   : > { %v4133_v7 = vpack.c.b16 %v4017_v8, %v4015_v22  ;;  %v3280_v15 = vadd.f32 %v3279_v30, %v9211_v50  ;;  %v6047_v6 = vunpack.c.h.b16 %v8583_v38  ;;  %v3732_v37 = vrot.slane %v3730_v13, 7 }
 0x343   : > { %6217 = vst [vmem:[%s8251_s15 + $0x50] sm:$0xff] %v6101_v29   ;;  %v4683_v42 = vadd.f32 %v4682_v4, %v4554_v45  ;;  %v5079_v21 = vadd.f32 %v5078_v25, %v5032_v32  ;;  %v1049_v4 = vrot.slane %v9213_v12, 1  ;;  %v9215_v32 = vshrl.u32 %v9212_v11, 16 }
 0x344   : > { %v3863_v33 = vrot.slane %v3740_v59, 1  ;;  %v3735_v24 = vor.u32 %v3733_v49, %v3732_v37  ;;  %v3739_v50 = vrot.slane %v3737_v5, 7 }
 0x345   : > { %v4769_v14 = vadd.f32 %v4683_v42, %v3278_v43  ;;  %v1050_v45 = vor.u32 %v1049_v4, %v9215_v32  ;;  %v3748_v43 = vshll.u32 %v6366_v20, 16 }
 0x346   : > { %v3865_v20 = vor.u32 %v3863_v33, %v3737_v5 }
 0x347   : > { %v4979_v23 = vadd.f32 %v4978_v63, %v4769_v14  ;;  %v5033_v53 = vmul.f32 %v4769_v14, %v4769_v14  ;;  %v9216_v63 = vld [vmem:[#allocation9_spill] sm:$0xff] }
 0x348   : > { %v4426_v28 = vpop.f32.mrf.mxu2  ;;  %v4555_v55 = vpop.f32.mrf.mxu3  ;;  %v9217_v30 = vshll.u32 %v9216_v63, 16  ;;  %v9221_v13 = vshrl.u32 %v9216_v63, 16 }
 0x349   : > { %v5080_v34 = vadd.f32 %v5079_v21, %v5033_v53  ;;  %v4556_v48 = vadd.f32 %v4555_v55, %v4426_v28  ;;  %v3282_v44 = vpop.f32.mrf.mxu1  ;;  %v4687_v1 = vpop.f32.mrf.mxu0  ;;  %v8597_v21 = vpack.c.b16 %v6047_v6, %v6047_v6  ;;  %v3864_v55 = vsel %vm978_vm3, %v3862_v3, %v3863_v33  ;;  %v9225_v33 = vld [vmem:[#allocation18_spill] sm:$0xff] }
 0x34a   : > { %v3283_v39 = vadd.f32 %v3282_v44, %v9214_v40 }
 0x34b   : > { %v4685_v16 = vadd.f32 %v4684_v0, %v4556_v48  ;;  %v1051_v0 = vrot.slane %v9217_v30, 1  ;;  %v3901_v30 = vsel %vm7153_vm6, %v3865_v20, 0 }
 0x34c   : > { %3321 = vmatmul.bf16.gmra.mxu1 %v2730_v54  ;;  %4726 = vmatmul.bf16.gmra.mxu0 %v4135_v26  ;;  %v3866_v54 = vrot.slane %v3748_v43, 1 }
 0x34d   : > { %v4770_v58 = vadd.f32 %v4685_v16, %v3280_v15  ;;  %4468 = vmatmul.bf16.gmra.mxu2 %v4133_v7  ;;  %4597 = vmatmul.bf16.gmra.mxu3 %v8483_v51  ;;  %v1052_v28 = vsel %vm978_vm3, %v1050_v45, %v1051_v0  ;;  %v3789_v7 = vsel %vm6566_vm2, 0, %v3735_v24  ;;  %v8608_v15 = vrot.slane %v3745_v46, 7  ;;  %v9220_v16 = vld [vmem:[#allocation28_spill] sm:$0xff] }
 0x34e   : > { %v1053_v11 = vor.u32 %v1051_v0, %v9221_v13  ;;  %v3867_v6 = vor.u32 %v3866_v54, %v3745_v46  ;;  %v4024_v46 = vunpack.c.l.b16 %v3901_v30 }
 0x34f   : > { %v4837_v36 = vmul.f32 %v8272_v56, %v4770_v58 }
 0x350   : > { %v4429_v52 = vpop.f32.mrf.mxu2  ;;  %v4558_v25 = vpop.f32.mrf.mxu3 }
 0x351   : > { %v6106_v31 = vpack.c.bf16 %v4837_v36, %v4769_v14  ;;  %v4980_v51 = vadd.f32 %v4979_v23, %v4837_v36  ;;  %v5034_v19 = vmul.f32 %v4837_v36, %v4837_v36  ;;  %v4559_v18 = vadd.f32 %v4558_v25, %v4429_v52  ;;  %v3284_v10 = vpop.f32.mrf.mxu1  ;;  %v4689_v57 = vpop.f32.mrf.mxu0  ;;  %v9218_v14 = vld [vmem:[#allocation24_spill] sm:$0xff]  ;;  %v9223_v36 = vld [vmem:[#allocation15_spill] sm:$0xff] }
 0x352   : > { %v9219_v22 = vshll.u32 %v9218_v14, 16  ;;  %v3285_v49 = vadd.f32 %v3284_v10, %v9220_v16  ;;  %v9222_v12 = vshrl.u32 %v9218_v14, 16  ;;  %v9224_v52 = vshll.u32 %v9223_v36, 16  ;;  %v9226_v16 = vld [vmem:[#allocation30_spill] sm:$0xff] }
 0x353   : > { %6218 = vst [vmem:[%s8251_s15 + $0x58] sm:$0xff] %v6106_v31   ;;  %v5081_v35 = vadd.f32 %v5080_v34, %v5034_v19  ;;  %v4688_v29 = vadd.f32 %v4687_v1, %v4559_v18  ;;  %v3755_v1 = vshll.u32 %v8597_v21, 16  ;;  %v3750_v19 = vor.u32 %v3748_v43, %v8608_v15 }
 0x354   : > { %v1054_v8 = vrot.slane %v9219_v22, 1  ;;  %v1056_v25 = vrot.slane %v9224_v52, 1 }
 0x355   : > { %v4771_v42 = vadd.f32 %v4688_v29, %v3283_v39  ;;  %v3868_v31 = vrot.slane %v3755_v1, 1  ;;  %v1092_v29 = vsel %vm7153_vm6, %v1053_v11, 0  ;;  %v8635_v3 = vsel %vm6566_vm2, 0, %v3750_v19 }
 0x356   : > { %v1055_v4 = vor.u32 %v1054_v8, %v9222_v12  ;;  %v1215_v24 = vunpack.c.l.b16 %v1092_v29  ;;  %v4025_v8 = vunpack.c.l.b16 %v8635_v3 }
 0x357   : > { %v4838_v27 = vmul.f32 %v8227_v47, %v4771_v42 }
 0x358   : > { %v4431_v23 = vpop.f32.mrf.mxu2  ;;  %v4560_v53 = vpop.f32.mrf.mxu3  ;;  %v8622_v39 = vsel %vm978_vm3, %v1055_v4, %v1056_v25 }
 0x359   : > { %v5035_v26 = vmul.f32 %v4838_v27, %v4838_v27  ;;  %v4561_v2 = vadd.f32 %v4560_v53, %v4431_v23  ;;  %v4981_v34 = vadd.f32 %v4980_v51, %v4838_v27  ;;  %v3287_v48 = vpop.f32.mrf.mxu1  ;;  %v4692_v44 = vpop.f32.mrf.mxu0  ;;  %v3742_v51 = vor.u32 %v3740_v59, %v3739_v50 }
 0x35a   : > { %v8628_v59 = vsel %vm978_vm3, %v3867_v6, %v3868_v31  ;;  %v3288_v43 = vadd.f32 %v3287_v48, %v9225_v33  ;;  %v1217_v5 = vunpack.c.l.b16 %v8622_v39  ;;  %v3752_v23 = vshrl.u32 %v8597_v21, 16  ;;  %v9228_v21 = vld [vmem:[#allocation33_spill] sm:$0xff] }
 0x35b   : > { %v4690_v60 = vadd.f32 %v4689_v57, %v4561_v2  ;;  %v5082_v58 = vadd.f32 %v5081_v35, %v5035_v26  ;;  %v3743_v0 = vsel %vm703_vm0, %v3732_v37, %v3742_v51  ;;  %v4028_v61 = vunpack.c.h.b16 %v8628_v59 }
 0x35c   : > { %3326 = vmatmul.bf16.gmra.mxu1 %v1052_v28  ;;  %4731 = vmatmul.bf16.gmra.mxu0 %v3864_v55  ;;  %v4023_v22 = vunpack.c.l.b16 %v3743_v0  ;;  %v2735_v28 = vpack.c.b16 %v1217_v5, %v1215_v24  ;;  %v3870_v11 = vor.u32 %v3868_v31, %v3752_v23 }
 0x35d   : > { %v4772_v9 = vadd.f32 %v4690_v60, %v3285_v49  ;;  %4473 = vmatmul.bf16.gmra.mxu2 %v3789_v7  ;;  %4602 = vmatmul.bf16.gmra.mxu3 %v8575_v62  ;;  %v3754_v7 = vrot.slane %v3752_v23, 7 }
 0x35f   : > { %v6111_v18 = vpack.c.bf16 %v4772_v9, %v4838_v27  ;;  %v4982_v10 = vadd.f32 %v4981_v34, %v4772_v9  ;;  %v5036_v57 = vmul.f32 %v4772_v9, %v4772_v9  ;;  %v4026_v27 = vunpack.c.l.b16 %v8628_v59 }
 0x360   : > { %v4434_v35 = vpop.f32.mrf.mxu2  ;;  %v4563_v40 = vpop.f32.mrf.mxu3  ;;  %v3757_v4 = vor.u32 %v3755_v1, %v3754_v7 }
 0x361   : > { %6219 = vst [vmem:[%s8251_s15 + $0x60] sm:$0xff] %v6111_v18   ;;  %v5083_v62 = vadd.f32 %v5082_v58, %v5036_v57  ;;  %v4564_v32 = vadd.f32 %v4563_v40, %v4434_v35  ;;  %v3289_v45 = vpop.f32.mrf.mxu1  ;;  %v4694_v63 = vpop.f32.mrf.mxu0  ;;  %v4140_v55 = vpack.c.b16 %v4026_v27, %v4024_v46  ;;  %v9227_v58 = vshrl.u32 %v9223_v36, 16 }
 0x362   : > { %v3290_v49 = vadd.f32 %v3289_v45, %v9226_v16  ;;  %v3902_v36 = vsel %vm7153_vm6, %v3870_v11, 0  ;;  %v1219_v40 = vunpack.c.h.b16 %v8622_v39  ;;  %v4027_v45 = vunpack.c.h.b16 %v8635_v3  ;;  %v9229_v39 = vld [vmem:[#allocation11_spill] sm:$0xff] }
 0x363   : > { %v4693_v42 = vadd.f32 %v4692_v44, %v4564_v32  ;;  %v4138_v44 = vpack.c.b16 %v4025_v8, %v4023_v22  ;;  %v1058_v13 = vor.u32 %v1056_v25, %v9227_v58 }
 0x365   : > { %v4773_v14 = vadd.f32 %v4693_v42, %v3288_v43  ;;  %v1093_v6 = vsel %vm7153_vm6, %v1058_v13, 0 }
 0x366   : > { %v1221_v29 = vunpack.c.l.b16 %v1093_v6 }
 0x367   : > { %v4840_v37 = vmul.f32 %v8272_v56, %v4773_v14 }
 0x368   : > { %v4436_v41 = vpop.f32.mrf.mxu2  ;;  %v4565_v53 = vpop.f32.mrf.mxu3 }
 0x369   : > { %v4983_v54 = vadd.f32 %v4982_v10, %v4840_v37  ;;  %v5037_v26 = vmul.f32 %v4840_v37, %v4840_v37  ;;  %v4566_v2 = vadd.f32 %v4565_v53, %v4436_v41  ;;  %v3292_v34 = vpop.f32.mrf.mxu1  ;;  %v4697_v48 = vpop.f32.mrf.mxu0 }
 0x36a   : > { %v3293_v1 = vadd.f32 %v3292_v34, %v9228_v21  ;;  %v9230_v34 = vld [vmem:[#allocation35_spill] sm:$0xff]  ;;  %v9232_v21 = vld [vmem:[#allocation17_spill] sm:$0xff] }
 0x36b   : > { %v5084_v50 = vadd.f32 %v5083_v62, %v5037_v26  ;;  %v4695_v60 = vadd.f32 %v4694_v63, %v4566_v2  ;;  %v4030_v62 = vunpack.c.l.b16 %v3902_v36 }
 0x36c   : > { %3331 = vmatmul.bf16.gmra.mxu1 %v2735_v28  ;;  %4736 = vmatmul.bf16.gmra.mxu0 %v4140_v55 }
 0x36d   : > { %v4774_v12 = vadd.f32 %v4695_v60, %v3290_v49  ;;  %4478 = vmatmul.bf16.gmra.mxu2 %v4138_v44  ;;  %4607 = vmatmul.bf16.gmra.mxu3 %v8573_v17  ;;  %v3758_v17 = vsel %vm703_vm0, %v8608_v15, %v3757_v4  ;;  %v2738_v15 = vpack.c.b16 %v1221_v29, %v1219_v40 }
 0x36e   : > { %v4029_v63 = vunpack.c.l.b16 %v3758_v17  ;;  %v4143_v42 = vpack.c.b16 %v4030_v62, %v4028_v61 }
 0x36f   : > { %v4841_v52 = vmul.f32 %v8227_v47, %v4774_v12  ;;  %v9231_v12 = vld [vmem:[#allocation37_spill] sm:$0xff] }
 0x370   : > { %v4439_v9 = vpop.f32.mrf.mxu2  ;;  %v4568_v20 = vpop.f32.mrf.mxu3  ;;  %v4141_v14 = vpack.c.b16 %v4029_v63, %v4027_v45 }
 0x371   : > { %v6116_v25 = vpack.c.bf16 %v4841_v52, %v4840_v37  ;;  %v5038_v31 = vmul.f32 %v4841_v52, %v4841_v52  ;;  %v4569_v51 = vadd.f32 %v4568_v20, %v4439_v9  ;;  %v4984_v19 = vadd.f32 %v4983_v54, %v4841_v52  ;;  %v3294_v18 = vpop.f32.mrf.mxu1  ;;  %v4699_v10 = vpop.f32.mrf.mxu0 }
 0x372   : > { %v3295_v22 = vadd.f32 %v3294_v18, %v9229_v39 }
 0x373   : > { %6220 = vst [vmem:[%s8251_s15 + $0x68] sm:$0xff] %v6116_v25   ;;  %v4698_v57 = vadd.f32 %v4697_v48, %v4569_v51  ;;  %v5085_v35 = vadd.f32 %v5084_v50, %v5038_v31 }
 0x375   : > { %v4775_v32 = vadd.f32 %v4698_v57, %v3293_v1 }
 0x377   : > { %v4985_v30 = vadd.f32 %v4984_v19, %v4775_v32  ;;  %v5039_v0 = vmul.f32 %v4775_v32, %v4775_v32 }
 0x378   : > { %v4441_v33 = vpop.f32.mrf.mxu2  ;;  %v4570_v43 = vpop.f32.mrf.mxu3 }
 0x379   : > { %v5086_v24 = vadd.f32 %v5085_v35, %v5039_v0  ;;  %v4571_v5 = vadd.f32 %v4570_v43, %v4441_v33  ;;  %v3297_v46 = vpop.f32.mrf.mxu1  ;;  %v4702_v27 = vpop.f32.mrf.mxu0  ;;  %v9233_v33 = vld [vmem:[#allocation40_spill] sm:$0xff] }
 0x37a   : > { %v3298_v48 = vadd.f32 %v3297_v46, %v9230_v34 }
 0x37b   : > { %v4700_v59 = vadd.f32 %v4699_v10, %v4571_v5 }
 0x37c   : > { %3336 = vmatmul.bf16.gmra.mxu1 %v2738_v15  ;;  %4741 = vmatmul.bf16.gmra.mxu0 %v4143_v42 }
 0x37d   : > { %v4776_v8 = vadd.f32 %v4700_v59, %v3295_v22  ;;  %4483 = vmatmul.bf16.gmra.mxu2 %v4141_v14  ;;  %4612 = vmatmul.bf16.gmra.mxu3 %v8583_v38 }
 0x37f   : > { %v4843_v3 = vmul.f32 %v8272_v56, %v4776_v8 }
 0x380   : > { %v4444_v23 = vpop.f32.mrf.mxu2  ;;  %v4573_v37 = vpop.f32.mrf.mxu3 }
 0x381   : > { %v6121_v41 = vpack.c.bf16 %v4843_v3, %v4775_v32  ;;  %v4986_v53 = vadd.f32 %v4985_v30, %v4843_v3  ;;  %v5040_v28 = vmul.f32 %v4843_v3, %v4843_v3  ;;  %v4574_v55 = vadd.f32 %v4573_v37, %v4444_v23  ;;  %v3299_v54 = vpop.f32.mrf.mxu1  ;;  %v4704_v26 = vpop.f32.mrf.mxu0  ;;  %v9234_v3 = vld [vmem:[#allocation21_spill] sm:$0xff] }
 0x382   : > { %v3300_v4 = vadd.f32 %v3299_v54, %v9231_v12 }
 0x383   : > { %6221 = vst [vmem:[%s8251_s15 + $0x70] sm:$0xff] %v6121_v41   ;;  %v5087_v2 = vadd.f32 %v5086_v24, %v5040_v28  ;;  %v4703_v44 = vadd.f32 %v4702_v27, %v4574_v55 }
 0x385   : > { %v4777_v7 = vadd.f32 %v4703_v44, %v3298_v48 }
 0x387   : > { %v4844_v50 = vmul.f32 %v8227_v47, %v4777_v7  ;;  %v9235_v7 = vld [vmem:[#allocation44_spill] sm:$0xff] }
 0x388   : > { %v4446_v16 = vpop.f32.mrf.mxu2  ;;  %v4575_v38 = vpop.f32.mrf.mxu3 }
 0x389   : > { %v5041_v49 = vmul.f32 %v4844_v50, %v4844_v50  ;;  %v4576_v60 = vadd.f32 %v4575_v38, %v4446_v16  ;;  %v4987_v58 = vadd.f32 %v4986_v53, %v4844_v50  ;;  %v3302_v13 = vpop.f32.mrf.mxu1  ;;  %v4707_v11 = vpop.f32.mrf.mxu0 }
 0x38a   : > { %v3303_v1 = vadd.f32 %v3302_v13, %v9232_v21 }
 0x38b   : > { %v4705_v52 = vadd.f32 %v4704_v26, %v4576_v60  ;;  %v5088_v9 = vadd.f32 %v5087_v2, %v5041_v49 }
 0x38d   : > { %v4778_v20 = vadd.f32 %v4705_v52, %v3300_v4 }
 0x38f   : > { %v6126_v6 = vpack.c.bf16 %v4778_v20, %v4844_v50  ;;  %v4988_v36 = vadd.f32 %v4987_v58, %v4778_v20  ;;  %v5042_v25 = vmul.f32 %v4778_v20, %v4778_v20 }
 0x390   : > { %v4449_v31 = vpop.f32.mrf.mxu2  ;;  %v4578_v51 = vpop.f32.mrf.mxu3 }
 0x391   : > { %6222 = vst [vmem:[%s8251_s15 + $0x78] sm:$0xff] %v6126_v6   ;;  %v5089_v19 = vadd.f32 %v5088_v9, %v5042_v25  ;;  %v4579_v18 = vadd.f32 %v4578_v51, %v4449_v31  ;;  %v3304_v10 = vpop.f32.mrf.mxu1  ;;  %v4709_v17 = vpop.f32.mrf.mxu0  ;;  %v9236_v6 = vld [vmem:[#allocation20_spill] sm:$0xff] }
 0x392   : > { %v3305_v43 = vadd.f32 %v3304_v10, %v9233_v33 }
 0x393   : > { %v4708_v57 = vadd.f32 %v4707_v11, %v4579_v18 }
 0x395   : > { %v4779_v35 = vadd.f32 %v4708_v57, %v3303_v1 }
 0x397   : > { %v4846_v40 = vmul.f32 %v8272_v56, %v4779_v35  ;;  %v9237_v35 = vld [vmem:[#allocation19_spill] sm:$0xff] }
 0x398   : > { %v4451_v29 = vpop.f32.mrf.mxu2  ;;  %v4580_v61 = vpop.f32.mrf.mxu3 }
 0x399   : > { %v4989_v62 = vadd.f32 %v4988_v36, %v4846_v40  ;;  %v5043_v32 = vmul.f32 %v4846_v40, %v4846_v40  ;;  %v4581_v45 = vadd.f32 %v4580_v61, %v4451_v29  ;;  %v3307_v63 = vpop.f32.mrf.mxu1  ;;  %v4712_v30 = vpop.f32.mrf.mxu0 }
 0x39a   : > { %v3308_v23 = vadd.f32 %v3307_v63, %v9234_v3 }
 0x39b   : > { %v5090_v0 = vadd.f32 %v5089_v19, %v5043_v32  ;;  %v4710_v15 = vadd.f32 %v4709_v17, %v4581_v45 }
 0x39d   : > { %v4780_v42 = vadd.f32 %v4710_v15, %v3305_v43 }
 0x39f   : > { %v4847_v24 = vmul.f32 %v8227_v47, %v4780_v42 }
 0x3a0   : > { %v4454_v5 = vpop.f32.mrf.mxu2  ;;  %v4583_v46 = vpop.f32.mrf.mxu3 }
 0x3a1   : > { %v6131_v27 = vpack.c.bf16 %v4847_v24, %v4846_v40  ;;  %v5044_v14 = vmul.f32 %v4847_v24, %v4847_v24  ;;  %v4584_v39 = vadd.f32 %v4583_v46, %v4454_v5  ;;  %v4990_v22 = vadd.f32 %v4989_v62, %v4847_v24  ;;  %v3309_v59 = vpop.f32.mrf.mxu1  ;;  %v4714_v8 = vpop.f32.mrf.mxu0  ;;  %v9238_v24 = vld [vmem:[#allocation22_spill] sm:$0xff] }
 0x3a2   : > { %v3310_v50 = vadd.f32 %v3309_v59, %v9235_v7 }
 0x3a3   : > { %6223 = vst [vmem:[%s8251_s15 + $0x80] sm:$0xff] %v6131_v27   ;;  %v4713_v37 = vadd.f32 %v4712_v30, %v4584_v39  ;;  %v5091_v41 = vadd.f32 %v5090_v0, %v5044_v14 }
 0x3a5   : > { %v4781_v53 = vadd.f32 %v4713_v37, %v3308_v23 }
 0x3a7   : > { %v4991_v28 = vadd.f32 %v4990_v22, %v4781_v53  ;;  %v5045_v55 = vmul.f32 %v4781_v53, %v4781_v53 }
 0x3a8   : > { %v4456_v54 = vpop.f32.mrf.mxu2  ;;  %v4585_v26 = vpop.f32.mrf.mxu3 }
 0x3a9   : > { %v5092_v2 = vadd.f32 %v5091_v41, %v5045_v55  ;;  %v4586_v34 = vadd.f32 %v4585_v26, %v4456_v54  ;;  %v3312_v48 = vpop.f32.mrf.mxu1  ;;  %v4717_v44 = vpop.f32.mrf.mxu0 }
 0x3aa   : > { %v3313_v36 = vadd.f32 %v3312_v48, %v9236_v6 }
 0x3ab   : > { %v4715_v16 = vadd.f32 %v4714_v8, %v4586_v34 }
 0x3ad   : > { %v4782_v38 = vadd.f32 %v4715_v16, %v3310_v50 }
 0x3af   : > { %v4849_v49 = vmul.f32 %v8272_v56, %v4782_v38 }
 0x3b0   : > { %v4459_v60 = vpop.f32.mrf.mxu2  ;;  %v4588_v58 = vpop.f32.mrf.mxu3 }
 0x3b1   : > { %v6136_v13 = vpack.c.bf16 %v4849_v49, %v4781_v53  ;;  %v4992_v11 = vadd.f32 %v4991_v28, %v4849_v49  ;;  %v5046_v12 = vmul.f32 %v4849_v49, %v4849_v49  ;;  %v4589_v4 = vadd.f32 %v4588_v58, %v4459_v60  ;;  %v3314_v52 = vpop.f32.mrf.mxu1  ;;  %v4719_v9 = vpop.f32.mrf.mxu0  ;;  %v9239_v53 = vld [vmem:[#allocation46_spill] sm:$0xff]  ;;  %v9240_v49 = vld [vmem:[#allocation49_spill] sm:$0xff] }
 0x3b2   : > { %v3315_v40 = vadd.f32 %v3314_v52, %v9237_v35 }
 0x3b3   : > { %6224 = vst [vmem:[%s8251_s15 + $0x88] sm:$0xff] %v6136_v13   ;;  %v5093_v20 = vadd.f32 %v5092_v2, %v5046_v12  ;;  %v4718_v25 = vadd.f32 %v4717_v44, %v4589_v4 }
 0x3b5   : > { %v4783_v31 = vadd.f32 %v4718_v25, %v3313_v36 }
 0x3b7   : > { %v4850_v51 = vmul.f32 %v8227_v47, %v4783_v31  ;;  %v9241_v31 = vld [vmem:[#allocation51_spill] sm:$0xff] }
 0x3b8   : > { %v4461_v19 = vpop.f32.mrf.mxu2  ;;  %v4590_v18 = vpop.f32.mrf.mxu3 }
 0x3b9   : > { %v5047_v10 = vmul.f32 %v4850_v51, %v4850_v51  ;;  %v4591_v17 = vadd.f32 %v4590_v18, %v4461_v19  ;;  %v4993_v21 = vadd.f32 %v4992_v11, %v4850_v51  ;;  %v3317_v1 = vpop.f32.mrf.mxu1  ;;  %v4722_v57 = vpop.f32.mrf.mxu0 }
 0x3ba   : > { %v3318_v5 = vadd.f32 %v3317_v1, %v9238_v24 }
 0x3bb   : > { %v4720_v29 = vadd.f32 %v4719_v9, %v4591_v17  ;;  %v5094_v61 = vadd.f32 %v5093_v20, %v5047_v10 }
 0x3bd   : > { %v4784_v62 = vadd.f32 %v4720_v29, %v3315_v40 }
 0x3bf   : > { %v6141_v32 = vpack.c.bf16 %v4784_v62, %v4850_v51  ;;  %v4994_v45 = vadd.f32 %v4993_v21, %v4784_v62  ;;  %v5048_v63 = vmul.f32 %v4784_v62, %v4784_v62 }
 0x3c0   : > { %v4464_v30 = vpop.f32.mrf.mxu2  ;;  %v4593_v0 = vpop.f32.mrf.mxu3 }
 0x3c1   : > { %6225 = vst [vmem:[%s8251_s15 + $0x90] sm:$0xff] %v6141_v32   ;;  %v5095_v33 = vadd.f32 %v5094_v61, %v5048_v63  ;;  %v4594_v43 = vadd.f32 %v4593_v0, %v4464_v30  ;;  %v3319_v15 = vpop.f32.mrf.mxu1  ;;  %v4724_v42 = vpop.f32.mrf.mxu0  ;;  %v9242_v32 = vld [vmem:[#allocation53_spill] sm:$0xff] }
 0x3c2   : > { %v3320_v28 = vadd.f32 %v3319_v15, %v9239_v53 }
 0x3c3   : > { %v4723_v46 = vadd.f32 %v4722_v57, %v4594_v43 }
 0x3c5   : > { %v4785_v27 = vadd.f32 %v4723_v46, %v3318_v5  ;;  %v9243_v46 = vld [vmem:[#allocation25_spill] sm:$0xff] }
 0x3c7   : > { %v4852_v14 = vmul.f32 %v8272_v56, %v4785_v27 }
 0x3c8   : > { %v4466_v39 = vpop.f32.mrf.mxu2  ;;  %v4595_v22 = vpop.f32.mrf.mxu3 }
 0x3c9   : > { %v4995_v59 = vadd.f32 %v4994_v45, %v4852_v14  ;;  %v5049_v8 = vmul.f32 %v4852_v14, %v4852_v14  ;;  %v4596_v3 = vadd.f32 %v4595_v22, %v4466_v39  ;;  %v3322_v23 = vpop.f32.mrf.mxu1  ;;  %v4727_v37 = vpop.f32.mrf.mxu0 }
 0x3ca   : > { %v3323_v60 = vadd.f32 %v3322_v23, %v9240_v49 }
 0x3cb   : > { %v5096_v41 = vadd.f32 %v5095_v33, %v5049_v8  ;;  %v4725_v55 = vadd.f32 %v4724_v42, %v4596_v3 }
 0x3cd   : > { %v4786_v54 = vadd.f32 %v4725_v55, %v3320_v28  ;;  %v9244_v55 = vld [vmem:[#allocation23_spill] sm:$0xff] }
 0x3cf   : > { %v4853_v26 = vmul.f32 %v8227_v47, %v4786_v54 }
 0x3d0   : > { %v4469_v2 = vpop.f32.mrf.mxu2  ;;  %v4598_v34 = vpop.f32.mrf.mxu3 }
 0x3d1   : > { %v6146_v48 = vpack.c.bf16 %v4853_v26, %v4852_v14  ;;  %v5050_v44 = vmul.f32 %v4853_v26, %v4853_v26  ;;  %v4599_v7 = vadd.f32 %v4598_v34, %v4469_v2  ;;  %v4996_v50 = vadd.f32 %v4995_v59, %v4853_v26  ;;  %v3324_v16 = vpop.f32.mrf.mxu1  ;;  %v4729_v38 = vpop.f32.mrf.mxu0 }
 0x3d2   : > { %v3325_v51 = vadd.f32 %v3324_v16, %v9241_v31 }
 0x3d3   : > { %6226 = vst [vmem:[%s8251_s15 + $0x98] sm:$0xff] %v6146_v48   ;;  %v4728_v58 = vadd.f32 %v4727_v37, %v4599_v7  ;;  %v5097_v13 = vadd.f32 %v5096_v41, %v5050_v44 }
 0x3d5   : > { %v4787_v11 = vadd.f32 %v4728_v58, %v3323_v60  ;;  %v9245_v58 = vld [vmem:[#allocation27_spill] sm:$0xff] }
 0x3d7   : > { %v4997_v12 = vadd.f32 %v4996_v50, %v4787_v11  ;;  %v5051_v4 = vmul.f32 %v4787_v11, %v4787_v11 }
 0x3d8   : > { %v4471_v52 = vpop.f32.mrf.mxu2  ;;  %v4600_v9 = vpop.f32.mrf.mxu3 }
 0x3d9   : > { %v5098_v20 = vadd.f32 %v5097_v13, %v5051_v4  ;;  %v4601_v6 = vadd.f32 %v4600_v9, %v4471_v52  ;;  %v3327_v36 = vpop.f32.mrf.mxu1  ;;  %v4732_v25 = vpop.f32.mrf.mxu0 }
 0x3da   : > { %v3328_v45 = vadd.f32 %v3327_v36, %v9242_v32  ;;  %v9247_v32 = vld [vmem:[#allocation26_spill] sm:$0xff] }
 0x3db   : > { %v4730_v19 = vadd.f32 %v4729_v38, %v4601_v6 }
 0x3dd   : > { %v4788_v18 = vadd.f32 %v4730_v19, %v3325_v51  ;;  %v9246_v19 = vld [vmem:[#allocation29_spill] sm:$0xff] }
 0x3df   : > { %v4855_v10 = vmul.f32 %v8272_v56, %v4788_v18 }
 0x3e0   : > { %v4474_v17 = vpop.f32.mrf.mxu2  ;;  %v4603_v21 = vpop.f32.mrf.mxu3 }
 0x3e1   : > { %v6151_v1 = vpack.c.bf16 %v4855_v10, %v4787_v11  ;;  %v4998_v57 = vadd.f32 %v4997_v12, %v4855_v10  ;;  %v5052_v35 = vmul.f32 %v4855_v10, %v4855_v10  ;;  %v4604_v40 = vadd.f32 %v4603_v21, %v4474_v17  ;;  %v3329_v29 = vpop.f32.mrf.mxu1  ;;  %v4734_v61 = vpop.f32.mrf.mxu0 }
 0x3e2   : > { %v3330_v27 = vadd.f32 %v3329_v29, %v9243_v46 }
 0x3e3   : > { %6227 = vst [vmem:[%s8251_s15 + $0xa0] sm:$0xff] %v6151_v1   ;;  %v5099_v62 = vadd.f32 %v5098_v20, %v5052_v35  ;;  %v4733_v63 = vadd.f32 %v4732_v25, %v4604_v40 }
 0x3e5   : > { %v4789_v30 = vadd.f32 %v4733_v63, %v3328_v45 }
 0x3e7   : > { %v4856_v0 = vmul.f32 %v8227_v47, %v4789_v30 }
 0x3e8   : > { %v4476_v33 = vpop.f32.mrf.mxu2  ;;  %v4605_v43 = vpop.f32.mrf.mxu3 }
 0x3e9   : > { %v5053_v15 = vmul.f32 %v4856_v0, %v4856_v0  ;;  %v4606_v42 = vadd.f32 %v4605_v43, %v4476_v33  ;;  %v4999_v24 = vadd.f32 %v4998_v57, %v4856_v0  ;;  %v3332_v5 = vpop.f32.mrf.mxu1  ;;  %v4737_v22 = vpop.f32.mrf.mxu0 }
 0x3ea   : > { %v3333_v54 = vadd.f32 %v3332_v5, %v9244_v55 }
 0x3eb   : > { %v4735_v14 = vadd.f32 %v4734_v61, %v4606_v42  ;;  %v5100_v39 = vadd.f32 %v5099_v62, %v5053_v15 }
 0x3ed   : > { %v4790_v59 = vadd.f32 %v4735_v14, %v3330_v27 }
 0x3ef   : > { %v6156_v8 = vpack.c.bf16 %v4790_v59, %v4856_v0  ;;  %v5000_v3 = vadd.f32 %v4999_v24, %v4790_v59  ;;  %v5054_v23 = vmul.f32 %v4790_v59, %v4790_v59 }
 0x3f0   : > { %v4479_v37 = vpop.f32.mrf.mxu2  ;;  %v4608_v41 = vpop.f32.mrf.mxu3 }
 0x3f1   : > { %6228 = vst [vmem:[%s8251_s15 + $0xa8] sm:$0xff] %v6156_v8   ;;  %v5101_v53 = vadd.f32 %v5100_v39, %v5054_v23  ;;  %v4609_v28 = vadd.f32 %v4608_v41, %v4479_v37  ;;  %v3334_v2 = vpop.f32.mrf.mxu1  ;;  %v4739_v48 = vpop.f32.mrf.mxu0 }
 0x3f2   : > { %v3335_v13 = vadd.f32 %v3334_v2, %v9245_v58 }
 0x3f3   : > { %v4738_v26 = vadd.f32 %v4737_v22, %v4609_v28 }
 0x3f5   : > { %v4791_v34 = vadd.f32 %v4738_v26, %v3333_v54 }
 0x3f7   : > { %v4858_v44 = vmul.f32 %v8272_v56, %v4791_v34 }
 0x3f8   : > { %v4481_v7 = vpop.f32.mrf.mxu2  ;;  %v4610_v50 = vpop.f32.mrf.mxu3 }
 0x3f9   : > { %v5001_v16 = vadd.f32 %v5000_v3, %v4858_v44  ;;  %v5055_v38 = vmul.f32 %v4858_v44, %v4858_v44  ;;  %v4611_v49 = vadd.f32 %v4610_v50, %v4481_v7  ;;  %v3337_v4 = vpop.f32.mrf.mxu1  ;;  %v4742_v9 = vpop.f32.mrf.mxu0 }
 0x3fa   : > { %v3338_v18 = vadd.f32 %v3337_v4, %v9246_v19 }
 0x3fb   : > { %v5102_v60 = vadd.f32 %v5101_v53, %v5055_v38  ;;  %v4740_v11 = vadd.f32 %v4739_v48, %v4611_v49 }
 0x3fd   : > { %v4792_v12 = vadd.f32 %v4740_v11, %v3335_v13 }
 0x3ff   : > { %v4859_v52 = vmul.f32 %v8227_v47, %v4792_v12 }
 0x400   : > { %v4484_v20 = vpop.f32.mrf.mxu2  ;;  %v4613_v6 = vpop.f32.mrf.mxu3 }
 0x401   : > { %v6161_v36 = vpack.c.bf16 %v4859_v52, %v4858_v44  ;;  %v5056_v25 = vmul.f32 %v4859_v52, %v4859_v52  ;;  %v4614_v31 = vadd.f32 %v4613_v6, %v4484_v20  ;;  %v5002_v51 = vadd.f32 %v5001_v16, %v4859_v52  ;;  %v3339_v35 = vpop.f32.mrf.mxu1  ;;  %v4744_v62 = vpop.f32.mrf.mxu0 }
 0x402   : > { %v3340_v45 = vadd.f32 %v3339_v35, %v9247_v32 }
 0x403   : > { %6229 = vst [vmem:[%s8251_s15 + $0xb0] sm:$0xff] %v6161_v36   ;;  %v4743_v10 = vadd.f32 %v4742_v9, %v4614_v31  ;;  %v5103_v17 = vadd.f32 %v5102_v60, %v5056_v25 }
 0x405   : > { %v4793_v21 = vadd.f32 %v4743_v10, %v3338_v18 }
 0x407   : > { %v5003_v1 = vadd.f32 %v5002_v51, %v4793_v21  ;;  %v5057_v57 = vmul.f32 %v4793_v21, %v4793_v21 }
 0x408   : > { %v4486_v40 = vpop.f32.mrf.mxu2  ;;  %v4615_v29 = vpop.f32.mrf.mxu3 }
 0x409   : > { %v5104_v47 = vadd.f32 %v5103_v17, %v5057_v57  ;;  %v4616_v61 = vadd.f32 %v4615_v29, %v4486_v40 }
 0x40b   : > { %v4745_v63 = vadd.f32 %v4744_v62, %v4616_v61 }
 0x40d   : > { %v4794_v30 = vadd.f32 %v4745_v63, %v3340_v45 }
 0x40f   : > { %v4861_v0 = vmul.f32 %v8272_v56, %v4794_v30 }
 0x411   : > { %v6166_v33 = vpack.c.bf16 %v4861_v0, %v4793_v21  ;;  %v5004_v43 = vadd.f32 %v5003_v1, %v4861_v0  ;;  %v5058_v15 = vmul.f32 %v4861_v0, %v4861_v0 }
 0x413   : > { %6230 = vst [vmem:[%s8251_s15 + $0xb8] sm:$0xff] %v6166_v33   ;;  %v5005_v42 = vrot.slane %v5004_v43, 4  ;;  %v5105_v24 = vadd.f32 %v5104_v47, %v5058_v15 }
 0x415   : > { %v5006_v5 = vadd.f32 %v5005_v42, %v5004_v43  ;;  %v5106_v46 = vrot.slane %v5105_v24, 4 }
 0x417   : > { %v5007_v27 = vrot.slane %v5006_v5, 2  ;;  %v5107_v14 = vadd.f32 %v5106_v46, %v5105_v24 }
 0x419   : > { %v5008_v39 = vadd.f32 %v5007_v27, %v5006_v5  ;;  %v5108_v22 = vrot.slane %v5107_v14, 2 }
 0x41b   : > { %v5009_v59 = vrot.slane %v5008_v39, 1  ;;  %v5109_v8 = vadd.f32 %v5108_v22, %v5107_v14 }
 0x41d   : > { %v5110_v3 = vrot.slane %v5109_v8, 1  ;;  %v5010_v56 = vadd.f32 %v5009_v59, %v5008_v39 }
 0x41f   : > { %v5111_v23 = vadd.f32 %v5110_v3, %v5109_v8 }
 0x421   : > { %v5113_v37 = vsel %vm960_vm1, %v5010_v56, %v5111_v23 }
 0x422   : > { %5114 = vst [vmem:[%s415_s27] sm:$0x3] %v5113_v37 }
 0x423 PF: > { %s16_s20 = sadd.s32 1, %s6429_s20   ;;  %s9248_s18 = smov %s6425_s19 }
 0x424   : > { %p13_p5 = scmp.ge.s32.totalorder %s16_s20, 4   ;;  %s9249_s19 = smov %s9251_s21 }
 0x426   :  { %15 = sbr.rel (!%p13_p5) target bundleno = 2 (0x2), region = 90 }

// kernel: _double_conv_impl.4
= control target key start
LH: loop header
LB: loop body
LE: loop exit
PB: predicated region body
PF: predicated region fallthrough
CT: control target
= control target key end

     0   :  { %s7135_s24 = smov 0   ;;  %s7137_s1 = smov 0   ;;  %s9943_s0 = inlined_call_operand.vmem [shape: bf16[2,16,24,128], index: 0, kind: input, shape index: {}, may-alias: {0,1,2}]   ;;  %s9944_s1 = inlined_call_operand.vmem [shape: bf16[2,16,24,128], index: 1, kind: input, shape index: {}, may-alias: {0,1,2}]   ;;  %s9945_s2 = inlined_call_operand.vmem [shape: bf16[2,16,24,128], index: 2, kind: input, shape index: {}, may-alias: {0,1,2}]   ;;  %s9946_s3 = inlined_call_operand.vmem [shape: f32[1,128], index: 3, kind: input, shape index: {}]   ;;  %s9947_s4 = inlined_call_operand.vmem [shape: f32[1,128], index: 4, kind: input, shape index: {}]   ;;  %s9948_s5 = inlined_call_operand.vmem [shape: bf16[3,384,128], index: 5, kind: input, shape index: {}]   ;;  %s9949_s6 = inlined_call_operand.vmem [shape: bf16[2,16,24,128], index: 6, kind: output, shape index: {0}]   ;;  %s9950_s7 = inlined_call_operand.vmem [shape: f32[2,1,2,128], index: 7, kind: output, shape index: {1}]  }
   0x1   :  { %s7139_s2 = smov 0  }
   0x2 LB: > { %s30_s25 = sadd.s32 1, %s7087_s1  ;;  %p5701_p0 = scmp.ge.s32.totalorder %s7091_s2, 1  ;;  %s7091_s2 = sphi %s7139_s2, %s18_s2   ;;  %s7087_s1 = sphi %s7137_s1, %s10491_s1   ;;  %s7083_s24 = sphi %s7135_s24, %s10490_s24  }
   0x3   : > { %p32_p1 = scmp.ge.s32.totalorder %s30_s25, 2  ;;  %p328_p2 = scmp.lt.s32.totalorder %s7091_s2, 3 }
   0x5   : > { %s10493_s25 = smov (%p32_p1, %s30_s25), 0  ;;  %p329_p3 = pnand %p5701_p0, %p328_p2 }
   0x7   : > { %332 = sbr.rel (%p329_p3) target bundleno = 1100 (0x44c), region = 44 }
   0xc   : > { %v6240_v0 = vld [vmem:[%s9948_s5 + $0xf8] sm:$0xff]  ;;  %p404_p4 = scmp.lt.s32.totalorder %s7083_s24, 1  ;;  %v469_v1 = vlaneseq  ;;  %v6239_v2 = vld [vmem:[%s9948_s5 + $0xf0] sm:$0xff]  ;;  %v6238_v5 = vld [vmem:[%s9948_s5 + $0xe8] sm:$0xff]  ;;  %v7093_v11 = vmov 0.0   ;;  %vm1383_vm2 = vcmask 1040384  }
   0xd   : > { %2710 = vmatpush.bf16.msra.mxu0 %v6240_v0  ;;  %6969 = vmatpush.bf16.msra.mxu1 %v6240_v0  ;;  %v7175_v6 = vld [vmem:[%s9946_s3] ss:$0 sm:$0xff]  ;;  %v6236_v42 = vld [vmem:[%s9948_s5 + $0xd8] sm:$0xff]  ;;  %v6235_v60 = vld [vmem:[%s9948_s5 + $0xd0] sm:$0xff]  ;;  %vm1126_vm3 = vsmask.f32 256 }
   0xe   : > { %s10495_s24 = smov (!%p404_p4, %s7083_s24), 1  ;;  %v470_v3 = vshrl.u32 %v469_v1, 7  ;;  %6970 = vmatpush.bf16.msra.mxu2 %v6240_v0  ;;  %6971 = vmatpush.bf16.msra.mxu3 %v6240_v0  ;;  %v7180_v7 = vld [vmem:[%s9947_s4] ss:$0 sm:$0xff]  ;;  %vm7325_vm4 = vmand %vm1383_vm2, %vm1126_vm3  ;;  %vm1401_vm5 = vsmask.f32 7424 }
   0xf   : > { %s7025_s30 = smul.u32 192, %s10495_s24  ;;  %v6237_v23 = vld [vmem:[%s9948_s5 + $0xe0] sm:$0xff]  ;;  %vm1498_vm6 = vcmask 1043456   ;;  %vm1499_vm7 = vsmask.f32 3328 }
  0x10   : > { %v472_v4 = vadd.s32 16, %v470_v3  ;;  %vm473_vm0 = vcmp.ge.s32.totalorder %v470_v3, 1  ;;  %vm8047_vm8 = vmand %vm1498_vm6, %vm1499_vm7 }
  0x11   : > { %2711 = vmatpush.bf16.msra.mxu0 %v6239_v2  ;;  %6972 = vmatpush.bf16.msra.mxu1 %v6239_v2  ;;  %s7170_s12 = scalar_lea.vmem %s9943_s0, %s7025_s30  ;;  %v7189_v12 = vsel %vm473_vm0, 1.0, %v7093_v11  ;;  %s9316_s26 = scalar_lea.vmem %s9949_s6, %s7025_s30 }
  0x12   : > { %6973 = vmatpush.bf16.msra.mxu2 %v6239_v2  ;;  %6974 = vmatpush.bf16.msra.mxu3 %v6239_v2  ;;  %vm478_vm1 = vcmp.le.s32.totalorder %v472_v4, 16  ;;  %v6290_v8 = vld [vmem:[%s7170_s12] sm:$0xff]   ;;  %v7184_v9 = vld [vmem:[%s7170_s12 + $0x8] sm:$0xff]   ;;  %10138 = vst [vmem:[#allocation3_spill] sm:$0xff] %v7189_v12  ;;  %v6785_v16 = vld [vmem:[%s7170_s12 + $0x30] sm:$0xff]   ;;  %s5706_s30 = sshll.u32 %s10495_s24, 1 }
  0x13   : > { %v7187_v10 = vld [vmem:[%s7170_s12 + $0x28] sm:$0xff]   ;;  %v6291_v13 = vunpack.c.l.bf16 %v6290_v8  ;;  %v6292_v14 = vunpack.c.h.bf16 %v6290_v8  ;;  %v6295_v15 = vunpack.c.l.bf16 %v7184_v9  ;;  %v7194_v17 = vld [vmem:[%s7170_s12 + $0x38] sm:$0xff]   ;;  %v6315_v20 = vunpack.c.l.bf16 %v6785_v16  ;;  %v6791_v28 = vld [vmem:[%s7170_s12 + $0x60] sm:$0xff]   ;;  %s465_s28 = scalar_lea.vmem %s9950_s7, %s5706_s30 }
  0x14   : > { %v7197_v18 = vld [vmem:[%s7170_s12 + $0x58] sm:$0xff]   ;;  %v6312_v19 = vunpack.c.h.bf16 %v7187_v10  ;;  %v6316_v21 = vunpack.c.h.bf16 %v6785_v16  ;;  %v6319_v22 = vunpack.c.l.bf16 %v7194_v17  ;;  %v7205_v24 = vsel %vm478_vm1, 1.0, %v7093_v11  ;;  %v7223_v41 = vld [vmem:[%s7170_s12 + $0x68] sm:$0xff]   ;;  %v6797_v56 = vld [vmem:[%s7170_s12 + $0x90] sm:$0xff]  }
  0x15   : > { %2712 = vmatpush.bf16.msra.mxu0 %v6238_v5  ;;  %6975 = vmatpush.bf16.msra.mxu1 %v6238_v5  ;;  %10139 = vst [vmem:[#allocation4_spill] sm:$0xff] %v7205_v24  ;;  %v587_v25 = vmul.f32 %v7175_v6, %v6291_v13  ;;  %v588_v26 = vmul.f32 %v7175_v6, %v6292_v14  ;;  %v6336_v32 = vunpack.c.h.bf16 %v7197_v18  ;;  %v6339_v40 = vunpack.c.l.bf16 %v6791_v28  ;;  %v7230_v51 = vld [vmem:[%s7170_s12 + $0x88] sm:$0xff]   ;;  %v7245_v1 = vld [vmem:[%s7170_s12 + $0x98] sm:$0xff]   ;;  %v7250_v8 = vld [vmem:[%s7170_s12 + $0x10] sm:$0xff]  }
  0x16   : > { %v589_v27 = vmul.f32 %v7175_v6, %v6295_v15  ;;  %6976 = vmatpush.bf16.msra.mxu2 %v6238_v5  ;;  %6977 = vmatpush.bf16.msra.mxu3 %v6238_v5  ;;  %v598_v29 = vmul.f32 %v7175_v6, %v6312_v19  ;;  %v599_v30 = vmul.f32 %v7175_v6, %v6315_v20  ;;  %v6340_v50 = vunpack.c.h.bf16 %v6791_v28 }
  0x17   : > { %v600_v31 = vmul.f32 %v7175_v6, %v6316_v21  ;;  %v638_v33 = vadd.f32 %v7180_v7, %v587_v25  ;;  %v639_v34 = vadd.f32 %v7180_v7, %v588_v26  ;;  %v601_v36 = vmul.f32 %v7175_v6, %v6319_v22  ;;  %v6234_v22 = vld [vmem:[%s9948_s5 + $0xc8] sm:$0xff] }
  0x18   : > { %v640_v35 = vadd.f32 %v7180_v7, %v589_v27  ;;  %v649_v37 = vadd.f32 %v7180_v7, %v598_v29  ;;  %v650_v38 = vadd.f32 %v7180_v7, %v599_v30  ;;  %v6343_v55 = vunpack.c.l.bf16 %v7223_v41 }
  0x19   : > { %v651_v39 = vadd.f32 %v7180_v7, %v600_v31  ;;  %2713 = vmatpush.bf16.msra.mxu0 %v6237_v23  ;;  %6978 = vmatpush.bf16.msra.mxu1 %v6237_v23  ;;  %v686_v43 = vmax.f32 %v638_v33, 0.0  ;;  %v687_v44 = vmax.f32 %v639_v34, 0.0  ;;  %v652_v46 = vadd.f32 %v7180_v7, %v601_v36 }
  0x1a   : > { %v688_v45 = vmax.f32 %v640_v35, 0.0  ;;  %6979 = vmatpush.bf16.msra.mxu2 %v6237_v23  ;;  %6980 = vmatpush.bf16.msra.mxu3 %v6237_v23  ;;  %v697_v47 = vmax.f32 %v649_v37, 0.0  ;;  %v698_v48 = vmax.f32 %v650_v38, 0.0  ;;  %v610_v59 = vmul.f32 %v7175_v6, %v6336_v32  ;;  %v6233_v38 = vld [vmem:[%s9948_s5 + $0xc0] sm:$0xff] }
  0x1b   : > { %v699_v49 = vmax.f32 %v651_v39, 0.0  ;;  %v734_v52 = vmul.f32 %v7189_v12, %v686_v43  ;;  %v700_v54 = vmax.f32 %v652_v46, 0.0  ;;  %v6360_v0 = vunpack.c.h.bf16 %v7230_v51 }
  0x1c   : > { %v736_v53 = vmul.f32 %v7205_v24, %v688_v45  ;;  %v745_v57 = vmul.f32 %v7205_v24, %v697_v47  ;;  %v746_v58 = vmul.f32 %v7189_v12, %v698_v48  ;;  %v611_v3 = vmul.f32 %v7175_v6, %v6339_v40  ;;  %v6256_v47 = vld [vmem:[%s9948_s5 + $0x178] sm:$0xff] }
  0x1d   : > { %2714 = vmatpush.bf16.msra.mxu0 %v6236_v42  ;;  %6981 = vmatpush.bf16.msra.mxu1 %v6236_v42  ;;  %v782_v61 = vpack.c.bf16 %v734_v52, %v734_v52  ;;  %v748_v63 = vmul.f32 %v7205_v24, %v700_v54  ;;  %v612_v4 = vmul.f32 %v7175_v6, %v6340_v50  ;;  %v6363_v5 = vunpack.c.l.bf16 %v6797_v56 }
  0x1e   : > { %v6388_v62 = vpack.c.bf16 %v736_v53, %v687_v44  ;;  %6982 = vmatpush.bf16.msra.mxu2 %v6236_v42  ;;  %6983 = vmatpush.bf16.msra.mxu3 %v6236_v42  ;;  %v6413_v2 = vpack.c.bf16 %v746_v58, %v745_v57  ;;  %v613_v13 = vmul.f32 %v7175_v6, %v6343_v55  ;;  %v6364_v15 = vunpack.c.h.bf16 %v6797_v56 }
  0x1f   : > { %831 = vst [vmem:[#allocation2 + $0xc] sm:$0xf] %v782_v61  ;;  %v6418_v11 = vpack.c.bf16 %v748_v63, %v699_v49  ;;  %v661_v14 = vadd.f32 %v7180_v7, %v610_v59  ;;  %v6296_v16 = vunpack.c.h.bf16 %v7184_v9  ;;  %v662_v19 = vadd.f32 %v7180_v7, %v611_v3  ;;  %v7284_v49 = vld [vmem:[%s7170_s12 + $0x40] sm:$0xff]   ;;  %v6248_v59 = vld [vmem:[%s9948_s5 + $0x138] sm:$0xff] }
  0x20   : > { %6803 = vst [vmem:[#allocation2 + $0x10] sm:$0xff] %v6388_v62   ;;  %v663_v20 = vadd.f32 %v7180_v7, %v612_v4  ;;  %v6367_v21 = vunpack.c.l.bf16 %v7245_v1  ;;  %v664_v23 = vadd.f32 %v7180_v7, %v613_v13  ;;  %v622_v9 = vmul.f32 %v7175_v6, %v6360_v0 }
  0x21   : > { %2715 = vmatpush.bf16.msra.mxu0 %v6235_v60  ;;  %6984 = vmatpush.bf16.msra.mxu1 %v6235_v60  ;;  %6808 = vst [vmem:[#allocation2 + $0x38] sm:$0xff] %v6413_v2   ;;  %v709_v25 = vmax.f32 %v661_v14, 0.0  ;;  %v6299_v26 = vunpack.c.l.bf16 %v7250_v8  ;;  %v710_v27 = vmax.f32 %v662_v19, 0.0  ;;  %v623_v29 = vmul.f32 %v7175_v6, %v6363_v5 }
  0x22   : > { %6985 = vmatpush.bf16.msra.mxu2 %v6235_v60  ;;  %6986 = vmatpush.bf16.msra.mxu3 %v6235_v60  ;;  %6809 = vst [vmem:[#allocation2 + $0x40] sm:$0xff] %v6418_v11   ;;  %v711_v28 = vmax.f32 %v663_v20, 0.0  ;;  %v624_v30 = vmul.f32 %v7175_v6, %v6364_v15  ;;  %v712_v31 = vmax.f32 %v664_v23, 0.0  ;;  %v625_v33 = vmul.f32 %v7175_v6, %v6367_v21  ;;  %v6216_v60 = vld [vmem:[%s9948_s5 + $0x78] sm:$0xff]  ;;  %v6255_v11 = vld [vmem:[%s9948_s5 + $0x170] sm:$0xff] }
  0x23   : > { %v757_v32 = vmul.f32 %v7205_v24, %v709_v25  ;;  %v673_v34 = vadd.f32 %v7180_v7, %v622_v9  ;;  %v758_v35 = vmul.f32 %v7189_v12, %v710_v27  ;;  %v674_v36 = vadd.f32 %v7180_v7, %v623_v29  ;;  %v6207_v21 = vld [vmem:[%s9948_s5 + $0x30] sm:$0xff] }
  0x24   : > { %v675_v37 = vadd.f32 %v7180_v7, %v624_v30  ;;  %v760_v39 = vmul.f32 %v7205_v24, %v712_v31  ;;  %v676_v40 = vadd.f32 %v7180_v7, %v625_v33  ;;  %v590_v43 = vmul.f32 %v7175_v6, %v6296_v16 }
  0x25   : > { %2716 = vmatpush.bf16.msra.mxu0 %v6234_v22  ;;  %6987 = vmatpush.bf16.msra.mxu1 %v6234_v22  ;;  %v721_v42 = vmax.f32 %v673_v34, 0.0  ;;  %v6320_v44 = vunpack.c.h.bf16 %v7194_v17  ;;  %v6443_v45 = vpack.c.bf16 %v758_v35, %v757_v32  ;;  %v722_v46 = vmax.f32 %v674_v36, 0.0  ;;  %v6208_v17 = vld [vmem:[%s9948_s5 + $0x38] sm:$0xff]  ;;  %v7347_v35 = vld [vmem:[%s7170_s12 + $0x70] sm:$0xff]  }
  0x26   : > { %6988 = vmatpush.bf16.msra.mxu2 %v6234_v22  ;;  %6989 = vmatpush.bf16.msra.mxu3 %v6234_v22  ;;  %v591_v48 = vmul.f32 %v7175_v6, %v6299_v26  ;;  %v6448_v52 = vpack.c.bf16 %v760_v39, %v711_v28  ;;  %v724_v53 = vmax.f32 %v676_v40, 0.0  ;;  %v641_v55 = vadd.f32 %v7180_v7, %v590_v43 }
  0x27   : > { %v7286_v50 = vld [vmem:[#allocation2 + $0xc] sm:$0xff]  ;;  %v769_v54 = vmul.f32 %v7205_v24, %v721_v42  ;;  %v1695_v56 = vld [vmem:[#allocation2 + $0x14] sm:$0xf]  ;;  %6814 = vst [vmem:[#allocation2 + $0x68] sm:$0xff] %v6443_v45   ;;  %v723_v57 = vmax.f32 %v675_v37, 0.0  ;;  %v770_v58 = vmul.f32 %v7189_v12, %v722_v46  ;;  %v6323_v15 = vunpack.c.l.bf16 %v7284_v49 }
  0x28   : > { %v642_v61 = vadd.f32 %v7180_v7, %v591_v48  ;;  %v7301_v62 = vunpack.c.l.b16 %v1695_v56  ;;  %v9972_v63 = vshrl.u32 %v7286_v50, 16  ;;  %v9973_v0 = vshll.u32 %v7286_v50, 16  ;;  %6815 = vst [vmem:[#allocation2 + $0x70] sm:$0xff] %v6448_v52  }
  0x29   : > { %2717 = vmatpush.bf16.msra.mxu0 %v6233_v38  ;;  %6990 = vmatpush.bf16.msra.mxu1 %v6233_v38  ;;  %v7305_v2 = vld [vmem:[#allocation2 + $0x3c] sm:$0xff]  ;;  %v772_v3 = vmul.f32 %v7205_v24, %v724_v53  ;;  %v689_v4 = vmax.f32 %v641_v55, 0.0  ;;  %v6473_v5 = vpack.c.bf16 %v770_v58, %v769_v54  ;;  %v1707_v22 = vld [vmem:[#allocation2 + $0x44] sm:$0xf]  ;;  %v602_v30 = vmul.f32 %v7175_v6, %v6320_v44  ;;  %v6247_v58 = vld [vmem:[%s9948_s5 + $0x130] sm:$0xff] }
  0x2a   : > { %6991 = vmatpush.bf16.msra.mxu2 %v6233_v38  ;;  %6992 = vmatpush.bf16.msra.mxu3 %v6233_v38  ;;  %v690_v13 = vmax.f32 %v642_v61, 0.0  ;;  %v7313_v14 = vpack.c.b16 %v7301_v62, %v7301_v62  ;;  %v1872_v16 = vrot.slane %v9972_v63, 7  ;;  %v9967_v19 = vshrl.u32 %v7305_v2, 16 }
  0x2b   : > { %v9968_v20 = vshll.u32 %v7305_v2, 16  ;;  %6820 = vst [vmem:[#allocation2 + $0x98] sm:$0xff] %v6473_v5   ;;  %v6478_v25 = vpack.c.bf16 %v772_v3, %v723_v57  ;;  %v737_v9 = vmul.f32 %v7189_v12, %v689_v4  ;;  %v603_v33 = vmul.f32 %v7175_v6, %v6323_v15 }
  0x2c   : > { %v9969_v26 = vshrl.u32 %v7313_v14, 16  ;;  %v9970_v27 = vshll.u32 %v7313_v14, 16  ;;  %v1875_v28 = vor.u32 %v9973_v0, %v1872_v16  ;;  %v7336_v29 = vrot.slane %v9967_v19, 7 }
  0x2d   : > { %2839 = vmatpush.bf16.msrb.mxu1 %v6248_v59  ;;  %3506 = vmatpush.bf16.msrb.mxu0 %v6216_v60  ;;  %6821 = vst [vmem:[#allocation2 + $0xa0] sm:$0xff] %v6478_v25   ;;  %v7339_v31 = vpack.c.bf16 %v690_v13, %v737_v9  ;;  %v7344_v34 = vunpack.c.l.b16 %v1707_v22  ;;  %v6344_v38 = vunpack.c.h.bf16 %v7223_v41  ;;  %v653_v39 = vadd.f32 %v7180_v7, %v602_v30  ;;  %v6215_v59 = vld [vmem:[%s9948_s5 + $0x70] sm:$0xff]  ;;  %v6254_v60 = vld [vmem:[%s9948_s5 + $0x168] sm:$0xff] }
  0x2e   : > { %2968 = vmatpush.bf16.msrb.mxu2 %v6256_v47  ;;  %3377 = vmatpush.bf16.msrb.mxu3 %v6208_v17  ;;  %v1879_v32 = vrot.slane %v9969_v26, 7  ;;  %v2125_v36 = vsel %vm7325_vm4, 0, %v1875_v28  ;;  %v1935_v37 = vor.u32 %v9968_v20, %v7336_v29  ;;  %v654_v45 = vadd.f32 %v7180_v7, %v603_v33 }
  0x2f   : > { %2718 = vmatmul.bf16.vlgmr.msra.gmra.mxu0 %v2125_v36  ;;  %v7356_v40 = vld [vmem:[#allocation2 + $0x6c] sm:$0xff]  ;;  %6804 = vst [vmem:[#allocation2 + $0x18] sm:$0xff] %v7339_v31   ;;  %v9992_v43 = vshrl.u32 %v7339_v31, 16  ;;  %v9993_v44 = vshll.u32 %v7339_v31, 16  ;;  %v701_v46 = vmax.f32 %v653_v39, 0.0  ;;  %v7368_v47 = vpack.c.b16 %v7344_v34, %v7344_v34 }
  0x30   : > { %v1882_v42 = vor.u32 %v9970_v27, %v1879_v32  ;;  %v2129_v41 = vsel %vm7325_vm4, 0, %v1935_v37  ;;  %v6347_v48 = vunpack.c.l.bf16 %v7347_v35  ;;  %v9956_v52 = vshrl.u32 %v7356_v40, 16  ;;  %v1719_v55 = vld [vmem:[#allocation2 + $0x74] sm:$0xf] }
  0x31   : > { %2748 = vmatmul.bf16.vlgmr.msra.gmra.mxu1 %v2129_v41  ;;  %v9957_v53 = vshll.u32 %v7356_v40, 16  ;;  %v7376_v17 = vrot.slane %v9992_v43, 7  ;;  %v702_v56 = vmax.f32 %v654_v45, 0.0  ;;  %v749_v57 = vmul.f32 %v7189_v12, %v701_v46  ;;  %3507 = vmatpush.bf16.msrb.mxu0 %v6215_v59 }
  0x32   : > { %2969 = vmatpush.bf16.msrb.mxu2 %v6255_v11  ;;  %3378 = vmatpush.bf16.msrb.mxu3 %v6207_v21  ;;  %v1883_v54 = vsel %vm1126_vm3, %v1872_v16, %v1882_v42  ;;  %v7390_v61 = vrot.slane %v9956_v52, 7  ;;  %v9962_v5 = vshrl.u32 %v7368_v47, 16  ;;  %v6206_v11 = vld [vmem:[%s9948_s5 + $0x28] sm:$0xff]  ;;  %v9966_v16 = vshll.u32 %v7368_v47, 16 }
  0x33   : > { %v1890_v3 = vor.u32 %v9993_v44, %v7376_v17  ;;  %v2289_v4 = vunpack.c.l.b16 %v1883_v54  ;;  %v7401_v15 = vpack.c.bf16 %v702_v56, %v749_v57  ;;  %v614_v21 = vmul.f32 %v7175_v6, %v6344_v38  ;;  %2840 = vmatpush.bf16.msrb.mxu1 %v6247_v58 }
  0x34   : > { %v7399_v13 = vld [vmem:[#allocation2 + $0x9c] sm:$0xff]  ;;  %v615_v22 = vmul.f32 %v7175_v6, %v6347_v48  ;;  %v1995_v25 = vor.u32 %v9957_v53, %v7390_v61  ;;  %v1939_v28 = vrot.slane %v9962_v5, 7  ;;  %v7415_v30 = vunpack.c.l.b16 %v1719_v55 }
  0x35   : > { %10142 = vst [vmem:[#allocation5_spill] sm:$0xff] %v7399_v13  ;;  %v7411_v9 = vsel %vm7325_vm4, 0, %v1890_v3  ;;  %v9951_v32 = vshrl.u32 %v7399_v13, 16  ;;  %v9952_v33 = vshll.u32 %v7399_v13, 16  ;;  %v9961_v37 = vshrl.u32 %v7401_v15, 16  ;;  %v7439_v55 = vld [vmem:[%s7170_s12 + $0xa0] sm:$0xff]  }
  0x36   : > { %2970 = vmatpush.bf16.msrb.mxu2 %v6254_v60  ;;  %3379 = vmatpush.bf16.msrb.mxu3 %v6206_v11  ;;  %v2291_v36 = vunpack.c.l.b16 %v7411_v9  ;;  %6810 = vst [vmem:[#allocation2 + $0x48] sm:$0xff] %v7401_v15   ;;  %v2133_v38 = vsel %vm7325_vm4, 0, %v1995_v25  ;;  %v1942_v39 = vor.u32 %v9966_v16, %v1939_v28  ;;  %v9965_v42 = vshll.u32 %v7401_v15, 16  ;;  %v7458_v25 = vld [vmem:[%s7170_s12 + $0x18] sm:$0xff]  }
  0x37   : > { %v665_v45 = vadd.f32 %v7180_v7, %v614_v21  ;;  %2778 = vmatmul.bf16.vlgmr.msra.gmra.mxu2 %v2133_v38  ;;  %v6368_v41 = vunpack.c.h.bf16 %v7245_v1  ;;  %v7431_v46 = vrot.slane %v9951_v32, 7  ;;  %v6300_v48 = vunpack.c.h.bf16 %v7250_v8 }
  0x38   : > { %v7436_v54 = vrot.slane %v9961_v37, 7  ;;  %v6324_v56 = vunpack.c.h.bf16 %v7284_v49  ;;  %v1943_v57 = vsel %vm1126_vm3, %v7336_v29, %v1942_v39  ;;  %v666_v1 = vadd.f32 %v7180_v7, %v615_v22  ;;  %v1731_v22 = vld [vmem:[#allocation2 + $0xa4] sm:$0xf] }
  0x39   : > { %v713_v58 = vmax.f32 %v665_v45, 0.0  ;;  %v2055_v59 = vor.u32 %v9952_v33, %v7431_v46  ;;  %v2432_v8 = vpack.c.b16 %v2291_v36, %v2289_v4  ;;  %v7453_v3 = vpack.c.b16 %v7415_v30, %v7415_v30 }
  0x3a   : > { %v1950_v60 = vor.u32 %v9965_v42, %v7436_v54  ;;  %v2313_v49 = vunpack.c.l.b16 %v1943_v57  ;;  %v714_v11 = vmax.f32 %v666_v1, 0.0  ;;  %v6371_v21 = vunpack.c.l.bf16 %v7439_v55 }
  0x3b   : > { %v761_v29 = vmul.f32 %v7189_v12, %v713_v58  ;;  %v2137_v4 = vsel %vm7325_vm4, 0, %v2055_v59  ;;  %v9953_v36 = vshrl.u32 %v7453_v3, 16  ;;  %v9954_v38 = vshll.u32 %v7453_v3, 16 }
  0x3c   : > { %v7464_v28 = vsel %vm7325_vm4, 0, %v1950_v60  ;;  %2808 = vmatmul.bf16.vlgmr.msra.gmra.mxu3 %v2137_v4  ;;  %v626_v57 = vmul.f32 %v7175_v6, %v6368_v41  ;;  %v627_v1 = vmul.f32 %v7175_v6, %v6371_v21  ;;  %v7475_v59 = vunpack.c.l.b16 %v1731_v22 }
  0x3d   : > { %v2315_v39 = vunpack.c.l.b16 %v7464_v28  ;;  %v7469_v45 = vpack.c.bf16 %v714_v11, %v761_v29  ;;  %v1999_v58 = vrot.slane %v9953_v36, 7  ;;  %v6303_v60 = vunpack.c.l.bf16 %v7458_v25  ;;  %v7498_v36 = vld [vmem:[%s7170_s12 + $0x48] sm:$0xff]  }
  0x3e   : > { %10143 = vst [vmem:[#allocation6_spill] sm:$0xff] %v7475_v59  ;;  %v592_v32 = vmul.f32 %v7175_v6, %v6300_v48  ;;  %v677_v29 = vadd.f32 %v7180_v7, %v626_v57  ;;  %v678_v22 = vadd.f32 %v7180_v7, %v627_v1  ;;  %v7488_v33 = vpack.c.b16 %v7475_v59, %v7475_v59 }
  0x3f   : > { %2723 = vmatmul.bf16.gmra.mxu0 %v2432_v8  ;;  %v2448_v4 = vpack.c.b16 %v2315_v39, %v2313_v49  ;;  %6816 = vst [vmem:[#allocation2 + $0x78] sm:$0xff] %v7469_v45   ;;  %v9955_v11 = vshrl.u32 %v7469_v45, 16  ;;  %v9959_v41 = vshll.u32 %v7469_v45, 16  ;;  %v2002_v21 = vor.u32 %v9954_v38, %v1999_v58 }
  0x40   : > { %10144 = vst [vmem:[#allocation7_spill] sm:$0xff] %v7488_v33  ;;  %v593_v48 = vmul.f32 %v7175_v6, %v6303_v60  ;;  %v6348_v8 = vunpack.c.h.bf16 %v7347_v35  ;;  %v725_v39 = vmax.f32 %v677_v29, 0.0  ;;  %v643_v57 = vadd.f32 %v7180_v7, %v592_v32 }
  0x41   : > { %2753 = vmatmul.bf16.gmra.mxu1 %v2448_v4  ;;  %v7494_v49 = vrot.slane %v9955_v11, 7  ;;  %v2003_v1 = vsel %vm1126_vm3, %v7390_v61, %v2002_v21  ;;  %v726_v58 = vmax.f32 %v678_v22, 0.0  ;;  %v9958_v38 = vshrl.u32 %v7488_v33, 16 }
  0x42   : > { %v9960_v60 = vshll.u32 %v7488_v33, 16  ;;  %v6372_v4 = vunpack.c.h.bf16 %v7439_v55  ;;  %v773_v29 = vmul.f32 %v7189_v12, %v725_v39  ;;  %v644_v32 = vadd.f32 %v7180_v7, %v593_v48 }
  0x43   : > { %v2010_v35 = vor.u32 %v9959_v41, %v7494_v49  ;;  %v2337_v11 = vunpack.c.l.b16 %v2003_v1  ;;  %v2059_v52 = vrot.slane %v9958_v38, 7  ;;  %v691_v61 = vmax.f32 %v643_v57, 0.0 }
  0x44   : > { %v6327_v21 = vunpack.c.l.bf16 %v7498_v36  ;;  %v7517_v53 = vpack.c.bf16 %v726_v58, %v773_v29  ;;  %v692_v55 = vmax.f32 %v644_v32, 0.0  ;;  %v604_v39 = vmul.f32 %v7175_v6, %v6324_v56  ;;  %v7531_v56 = vld [vmem:[%s7170_s12 + $0x78] sm:$0xff]  }
  0x45   : > { %v7515_v22 = vsel %vm7325_vm4, 0, %v2010_v35  ;;  %v2062_v1 = vor.u32 %v9960_v60, %v2059_v52  ;;  %v739_v38 = vmul.f32 %v7205_v24, %v691_v61  ;;  %v7537_v60 = vld [vmem:[%s7170_s12 + $0xa8] sm:$0xff]  }
  0x46   : > { %10145 = vst [vmem:[#allocation8_spill] sm:$0xff] %v7517_v53  ;;  %v2339_v48 = vunpack.c.l.b16 %v7515_v22  ;;  %v605_v57 = vmul.f32 %v7175_v6, %v6327_v21  ;;  %v9963_v35 = vshrl.u32 %v7517_v53, 16  ;;  %v9964_v58 = vshll.u32 %v7517_v53, 16 }
  0x47   : > { %6822 = vst [vmem:[#allocation2 + $0xa8] sm:$0xff] %v7517_v53   ;;  %v740_v29 = vmul.f32 %v7189_v12, %v692_v55  ;;  %v655_v32 = vadd.f32 %v7180_v7, %v604_v39  ;;  %v2063_v52 = vsel %vm1126_vm3, %v7431_v46, %v2062_v1  ;;  %v6351_v39 = vunpack.c.l.bf16 %v7531_v56 }
  0x48   : > { %v2464_v41 = vpack.c.b16 %v2339_v48, %v2337_v11  ;;  %v656_v61 = vadd.f32 %v7180_v7, %v605_v57  ;;  %v7541_v21 = vrot.slane %v9963_v35, 7  ;;  %v616_v11 = vmul.f32 %v7175_v6, %v6348_v8 }
  0x49   : > { %v6398_v37 = vpack.c.bf16 %v740_v29, %v739_v38  ;;  %v703_v55 = vmax.f32 %v655_v32, 0.0  ;;  %v2361_v48 = vunpack.c.l.b16 %v2063_v52  ;;  %v6375_v1 = vunpack.c.l.bf16 %v7537_v60  ;;  %v7555_v32 = vld [vmem:[%s7170_s12 + $0x20] sm:$0xff]  }
  0x4a   : > { %2783 = vmatmul.bf16.gmra.mxu2 %v2464_v41  ;;  %v704_v5 = vmax.f32 %v656_v61, 0.0  ;;  %v2070_v46 = vor.u32 %v9964_v58, %v7541_v21  ;;  %v628_v57 = vmul.f32 %v7175_v6, %v6372_v4  ;;  %v617_v41 = vmul.f32 %v7175_v6, %v6351_v39 }
  0x4b   : > { %6805 = vst [vmem:[#allocation2 + $0x20] sm:$0xff] %v6398_v37   ;;  %v751_v35 = vmul.f32 %v7205_v24, %v703_v55  ;;  %v667_v29 = vadd.f32 %v7180_v7, %v616_v11  ;;  %v629_v37 = vmul.f32 %v7175_v6, %v6375_v1  ;;  %v6304_v4 = vunpack.c.h.bf16 %v7458_v25  ;;  %v6246_v11 = vld [vmem:[%s9948_s5 + $0x128] sm:$0xff]  ;;  %v6253_v1 = vld [vmem:[%s9948_s5 + $0x160] sm:$0xff] }
  0x4c   : > { %v752_v38 = vmul.f32 %v7189_v12, %v704_v5  ;;  %v7559_v8 = vsel %vm7325_vm4, 0, %v2070_v46  ;;  %v679_v52 = vadd.f32 %v7180_v7, %v628_v57  ;;  %v668_v55 = vadd.f32 %v7180_v7, %v617_v41  ;;  %v6214_v46 = vld [vmem:[%s9948_s5 + $0x68] sm:$0xff]  ;;  %v7581_v41 = vld [vmem:[%s7170_s12 + $0x50] sm:$0xff]   ;;  %2841 = vmatpush.bf16.msrb.mxu1 %v6246_v11  ;;  %2971 = vmatpush.bf16.msrb.mxu2 %v6253_v1 }
  0x4d   : > { %v2363_v61 = vunpack.c.l.b16 %v7559_v8  ;;  %v715_v39 = vmax.f32 %v667_v29, 0.0  ;;  %v680_v25 = vadd.f32 %v7180_v7, %v629_v37  ;;  %3508 = vmatpush.bf16.msrb.mxu0 %v6214_v46  ;;  %v6245_v37 = vld [vmem:[%s9948_s5 + $0x120] sm:$0xff]  ;;  %v6328_v11 = vunpack.c.h.bf16 %v7498_v36 }
  0x4e   : > { %v6428_v5 = vpack.c.bf16 %v752_v38, %v751_v35  ;;  %v727_v57 = vmax.f32 %v679_v52, 0.0  ;;  %v6205_v35 = vld [vmem:[%s9948_s5 + $0x20] sm:$0xff]  ;;  %v6307_v38 = vunpack.c.l.bf16 %v7555_v32  ;;  %v716_v58 = vmax.f32 %v668_v55, 0.0 }
  0x4f   : > { %v2480_v29 = vpack.c.b16 %v2363_v61, %v2361_v48  ;;  %v763_v42 = vmul.f32 %v7205_v24, %v715_v39  ;;  %v6213_v52 = vld [vmem:[%s9948_s5 + $0x60] sm:$0xff]  ;;  %v728_v16 = vmax.f32 %v680_v25, 0.0  ;;  %3380 = vmatpush.bf16.msrb.mxu3 %v6205_v35  ;;  %v594_v48 = vmul.f32 %v7175_v6, %v6304_v4 }
  0x50   : > { %6811 = vst [vmem:[#allocation2 + $0x50] sm:$0xff] %v6428_v5   ;;  %v775_v19 = vmul.f32 %v7205_v24, %v727_v57  ;;  %v595_v61 = vmul.f32 %v7175_v6, %v6307_v38  ;;  %v2293_v55 = vunpack.c.h.b16 %v7411_v9  ;;  %v764_v39 = vmul.f32 %v7189_v12, %v716_v58  ;;  %v7603_v35 = vld [vmem:[%s7170_s12 + $0x80] sm:$0xff]   ;;  %2842 = vmatpush.bf16.msrb.mxu1 %v6245_v37  ;;  %v6203_v9 = vld [vmem:[%s9948_s5 + $0x10] sm:$0xff] }
  0x51   : > { %2813 = vmatmul.bf16.gmra.mxu3 %v2480_v29  ;;  %v6331_v46 = vunpack.c.l.bf16 %v7581_v41  ;;  %v776_v57 = vmul.f32 %v7189_v12, %v728_v16  ;;  %v645_v1 = vadd.f32 %v7180_v7, %v594_v48  ;;  %3509 = vmatpush.bf16.msrb.mxu0 %v6213_v52  ;;  %v606_v29 = vmul.f32 %v7175_v6, %v6328_v11 }
  0x52   : > { %v1698_v5 = vld [vmem:[#allocation2 + $0x20] sm:$0xf]  ;;  %v646_v4 = vadd.f32 %v7180_v7, %v595_v61  ;;  %v6458_v38 = vpack.c.bf16 %v764_v39, %v763_v42  ;;  %v6352_v36 = vunpack.c.h.bf16 %v7531_v56  ;;  %v6355_v37 = vunpack.c.l.bf16 %v7603_v35 }
  0x53   : > { %v7597_v25 = vunpack.c.l.b16 %v1698_v5  ;;  %v607_v58 = vmul.f32 %v7175_v6, %v6331_v46  ;;  %v6488_v16 = vpack.c.bf16 %v776_v57, %v775_v19  ;;  %v693_v48 = vmax.f32 %v645_v1, 0.0  ;;  %v7621_v57 = vld [vmem:[%s7170_s12 + $0xb0] sm:$0xff]  }
  0x54   : > { %v694_v20 = vmax.f32 %v646_v4, 0.0  ;;  %6817 = vst [vmem:[#allocation2 + $0x80] sm:$0xff] %v6458_v38   ;;  %v657_v61 = vadd.f32 %v7180_v7, %v606_v29  ;;  %v618_v52 = vmul.f32 %v7175_v6, %v6352_v36  ;;  %v2317_v46 = vunpack.c.h.b16 %v7464_v28 }
  0x55   : > { %v7610_v5 = vpack.c.b16 %v7597_v25, %v7597_v25  ;;  %v658_v42 = vadd.f32 %v7180_v7, %v607_v58  ;;  %6823 = vst [vmem:[#allocation2 + $0xb0] sm:$0xff] %v6488_v16   ;;  %v619_v29 = vmul.f32 %v7175_v6, %v6355_v37  ;;  %v6376_v27 = vunpack.c.h.bf16 %v7537_v60 }
  0x56   : > { %v742_v19 = vmul.f32 %v7205_v24, %v694_v20  ;;  %v705_v4 = vmax.f32 %v657_v61, 0.0  ;;  %v669_v26 = vadd.f32 %v7180_v7, %v618_v52  ;;  %v6379_v61 = vunpack.c.l.bf16 %v7621_v57 }
  0x57   : > { %v9971_v39 = vshrl.u32 %v7610_v5, 16  ;;  %v9974_v56 = vshll.u32 %v7610_v5, 16  ;;  %v1710_v11 = vld [vmem:[#allocation2 + $0x50] sm:$0xf]  ;;  %v706_v38 = vmax.f32 %v658_v42, 0.0  ;;  %v6308_v37 = vunpack.c.h.bf16 %v7555_v32 }
  0x58   : > { %v7623_v1 = vunpack.c.l.b16 %v1710_v11  ;;  %v6403_v36 = vpack.c.bf16 %v742_v19, %v693_v48  ;;  %v670_v11 = vadd.f32 %v7180_v7, %v619_v29  ;;  %v717_v48 = vmax.f32 %v669_v26, 0.0 }
  0x59   : > { %v1894_v58 = vrot.slane %v9971_v39, 7  ;;  %v754_v20 = vmul.f32 %v7205_v24, %v706_v38  ;;  %v630_v52 = vmul.f32 %v7175_v6, %v6376_v27  ;;  %v631_v0 = vmul.f32 %v7175_v6, %v6379_v61 }
  0x5a   : > { %v7632_v16 = vpack.c.b16 %v7623_v1, %v7623_v1  ;;  %6806 = vst [vmem:[#allocation2 + $0x28] sm:$0xff] %v6403_v36   ;;  %v718_v63 = vmax.f32 %v670_v11, 0.0  ;;  %v6311_v32 = vunpack.c.l.bf16 %v7187_v10 }
  0x5b   : > { %v1897_v42 = vor.u32 %v9974_v56, %v1894_v58  ;;  %v6433_v39 = vpack.c.bf16 %v754_v20, %v705_v4  ;;  %v1722_v29 = vld [vmem:[#allocation2 + $0x80] sm:$0xf]  ;;  %v681_v58 = vadd.f32 %v7180_v7, %v630_v52  ;;  %v6204_v20 = vld [vmem:[%s9948_s5 + $0x18] sm:$0xff]  ;;  %v682_v10 = vadd.f32 %v7180_v7, %v631_v0 }
  0x5c   : > { %v9975_v60 = vshrl.u32 %v7632_v16, 16  ;;  %v9976_v19 = vshll.u32 %v7632_v16, 16  ;;  %v7650_v27 = vunpack.c.l.b16 %v1722_v29  ;;  %v1734_v56 = vld [vmem:[#allocation2 + $0xb0] sm:$0xf]  ;;  %v766_v4 = vmul.f32 %v7205_v24, %v718_v63  ;;  %v6212_v63 = vld [vmem:[%s9948_s5 + $0x58] sm:$0xff]  ;;  %3381 = vmatpush.bf16.msrb.mxu3 %v6204_v20 }
  0x5d   : > { %v1898_v38 = vsel %vm1126_vm3, %v7376_v17, %v1897_v42  ;;  %6812 = vst [vmem:[#allocation2 + $0x58] sm:$0xff] %v6433_v39   ;;  %v6252_v17 = vld [vmem:[%s9948_s5 + $0x158] sm:$0xff]  ;;  %v7659_v11 = vunpack.c.l.b16 %v1734_v56  ;;  %v729_v61 = vmax.f32 %v681_v58, 0.0  ;;  %v596_v39 = vmul.f32 %v7175_v6, %v6308_v37  ;;  %v6251_v29 = vld [vmem:[%s9948_s5 + $0x150] sm:$0xff]  ;;  %3510 = vmatpush.bf16.msrb.mxu0 %v6212_v63 }
  0x5e   : > { %v2295_v36 = vunpack.c.l.b16 %v1898_v38  ;;  %v1954_v26 = vrot.slane %v9975_v60, 7  ;;  %v6244_v42 = vld [vmem:[%s9948_s5 + $0x118] sm:$0xff]  ;;  %v7675_v0 = vpack.c.b16 %v7650_v27, %v7650_v27  ;;  %v6463_v38 = vpack.c.bf16 %v766_v4, %v717_v48  ;;  %2972 = vmatpush.bf16.msrb.mxu2 %v6252_v17 }
  0x5f   : > { %10146 = vst [vmem:[#allocation9_spill] sm:$0xff] %v7659_v11  ;;  %v7682_v58 = vpack.c.b16 %v7659_v11, %v7659_v11  ;;  %v730_v37 = vmax.f32 %v682_v10, 0.0  ;;  %2843 = vmatpush.bf16.msrb.mxu1 %v6244_v42  ;;  %v647_v48 = vadd.f32 %v7180_v7, %v596_v39 }
  0x60   : > { %v2435_v52 = vpack.c.b16 %v2295_v36, %v2293_v55  ;;  %v1957_v56 = vor.u32 %v9976_v19, %v1954_v26  ;;  %v597_v55 = vmul.f32 %v7175_v6, %v6311_v32  ;;  %v9977_v26 = vshrl.u32 %v7675_v0, 16  ;;  %6818 = vst [vmem:[#allocation2 + $0x88] sm:$0xff] %v6463_v38   ;;  %3382 = vmatpush.bf16.msrb.mxu3 %v6203_v9 }
  0x61   : > { %10147 = vst [vmem:[#allocation10_spill] sm:$0xff] %v7682_v58  ;;  %v9980_v4 = vshll.u32 %v7675_v0, 16  ;;  %v7693_v17 = vld [vmem:[#allocation2 + $0x24] sm:$0xff]  ;;  %v9978_v10 = vshrl.u32 %v7682_v58, 16  ;;  %v9979_v42 = vshll.u32 %v7682_v58, 16  ;;  %v778_v32 = vmul.f32 %v7205_v24, %v730_v37 }
  0x62   : > { %2728 = vmatmul.bf16.gmra.mxu0 %v2435_v52  ;;  %v1958_v36 = vsel %vm1126_vm3, %v7436_v54, %v1957_v56  ;;  %v2014_v39 = vrot.slane %v9977_v26, 7  ;;  %v9986_v54 = vshrl.u32 %v7693_v17, 16  ;;  %v9990_v52 = vshll.u32 %v7693_v17, 16  ;;  %2973 = vmatpush.bf16.msrb.mxu2 %v6251_v29  ;;  %v1701_v19 = vld [vmem:[#allocation2 + $0x2c] sm:$0xf] }
  0x63   : > { %v2319_v20 = vunpack.c.l.b16 %v1958_v36  ;;  %v648_v56 = vadd.f32 %v7180_v7, %v597_v55  ;;  %v2074_v36 = vrot.slane %v9978_v10, 7  ;;  %v6493_v37 = vpack.c.bf16 %v778_v32, %v729_v61  ;;  %v1704_v58 = vld [vmem:[#allocation2 + $0x38] sm:$0xf] }
  0x64   : > { %v7707_v60 = vld [vmem:[#allocation2 + $0x54] sm:$0xff]  ;;  %v695_v63 = vmax.f32 %v647_v48, 0.0  ;;  %v2017_v26 = vor.u32 %v9980_v4, %v2014_v39  ;;  %v7713_v29 = vrot.slane %v9986_v54, 7  ;;  %v6332_v55 = vunpack.c.h.bf16 %v7581_v41 }
  0x65   : > { %v2451_v38 = vpack.c.b16 %v2319_v20, %v2317_v46  ;;  %v696_v28 = vmax.f32 %v648_v56, 0.0  ;;  %v2341_v46 = vunpack.c.h.b16 %v7515_v22  ;;  %v2077_v20 = vor.u32 %v9979_v42, %v2074_v36  ;;  %6824 = vst [vmem:[#allocation2 + $0xb8] sm:$0xff] %v6493_v37  }
  0x66   : > { %v9981_v61 = vshrl.u32 %v7707_v60, 16  ;;  %v743_v9 = vmul.f32 %v7189_v12, %v695_v63  ;;  %v2018_v48 = vsel %vm1126_vm3, %v7494_v49, %v2017_v26  ;;  %v2365_v32 = vunpack.c.h.b16 %v7559_v8 }
  0x67   : > { %2758 = vmatmul.bf16.gmra.mxu1 %v2451_v38  ;;  %v7724_v39 = vunpack.c.l.b16 %v1701_v19  ;;  %v2343_v41 = vunpack.c.l.b16 %v2018_v48  ;;  %v2078_v56 = vsel %vm1126_vm3, %v7541_v21, %v2077_v20  ;;  %v1905_v22 = vor.u32 %v9990_v52, %v7713_v29  ;;  %v7731_v38 = vld [vmem:[#allocation2 + $0x84] sm:$0xff] }
  0x68   : > { %v6335_v36 = vunpack.c.l.bf16 %v7197_v18  ;;  %v2367_v37 = vunpack.c.l.b16 %v2078_v56  ;;  %v7734_v63 = vpack.c.bf16 %v696_v28, %v743_v9  ;;  %v608_v8 = vmul.f32 %v7175_v6, %v6332_v55  ;;  %v1713_v56 = vld [vmem:[#allocation2 + $0x5c] sm:$0xf] }
  0x69   : > { %v7738_v49 = vpack.c.b16 %v7724_v39, %v7724_v39  ;;  %v2467_v19 = vpack.c.b16 %v2343_v41, %v2341_v46  ;;  %v7743_v21 = vrot.slane %v9981_v61, 7  ;;  %v9983_v26 = vshll.u32 %v7707_v60, 16 }
  0x6a   : > { %v9982_v20 = vshrl.u32 %v7731_v38, 16  ;;  %v2483_v48 = vpack.c.b16 %v2367_v37, %v2365_v32  ;;  %6807 = vst [vmem:[#allocation2 + $0x30] sm:$0xff] %v7734_v63   ;;  %v9984_v9 = vshrl.u32 %v7734_v63, 16  ;;  %v2127_v55 = vsel %vm7325_vm4, 0, %v1905_v22 }
  0x6b   : > { %v9985_v18 = vshrl.u32 %v7738_v49, 16  ;;  %v9988_v28 = vshll.u32 %v7738_v49, 16  ;;  %2788 = vmatmul.bf16.gmra.mxu2 %v2467_v19  ;;  %v6356_v46 = vunpack.c.h.bf16 %v7603_v35  ;;  %v9987_v41 = vshll.u32 %v7734_v63, 16  ;;  %v6243_v35 = vld [vmem:[%s9948_s5 + $0x110] sm:$0xff] }
  0x6c   : > { %2818 = vmatmul.bf16.gmra.mxu3 %v2483_v48  ;;  %v7755_v10 = vld [vmem:[#allocation2 + $0xb4] sm:$0xff]  ;;  %v7761_v37 = vrot.slane %v9984_v9, 7  ;;  %v609_v42 = vmul.f32 %v7175_v6, %v6335_v36  ;;  %v659_v19 = vadd.f32 %v7180_v7, %v608_v8  ;;  %v1965_v22 = vor.u32 %v9983_v26, %v7743_v21  ;;  %v6250_v7 = vld [vmem:[%s9948_s5 + $0x148] sm:$0xff]  ;;  %2844 = vmatpush.bf16.msrb.mxu1 %v6243_v35  ;;  %v7797_v9 = vld [vmem:[%s9947_s4] ss:$0 sm:$0xff] }
  0x6d   : > { %10148 = vst [vmem:[#allocation11_spill] sm:$0xff] %v7755_v10  ;;  %v1909_v32 = vrot.slane %v9985_v18, 7  ;;  %v7773_v48 = vrot.slane %v9982_v20, 7  ;;  %v9991_v4 = vshll.u32 %v7731_v38, 16  ;;  %v7776_v61 = vunpack.c.l.b16 %v1713_v56  ;;  %v6211_v6 = vld [vmem:[%s9948_s5 + $0x50] sm:$0xff]  ;;  %v6202_v36 = vld [vmem:[%s9948_s5 + $0x8] sm:$0xff]  ;;  %2974 = vmatpush.bf16.msrb.mxu2 %v6250_v7 }
  0x6e   : > { %v6380_v8 = vunpack.c.h.bf16 %v7621_v57  ;;  %v9989_v20 = vshrl.u32 %v7755_v10, 16  ;;  %v1920_v26 = vor.u32 %v9987_v41, %v7761_v37  ;;  %v660_v18 = vadd.f32 %v7797_v9, %v609_v42  ;;  %3511 = vmatpush.bf16.msrb.mxu0 %v6211_v6  ;;  %3383 = vmatpush.bf16.msrb.mxu3 %v6202_v36  ;;  %v7830_v36 = vld [vmem:[%s9946_s3] ss:$0 sm:$0xff] }
  0x6f   : > { %v1912_v56 = vor.u32 %v9988_v28, %v1909_v32  ;;  %v707_v54 = vmax.f32 %v659_v19, 0.0  ;;  %v7802_v57 = vpack.c.b16 %v7776_v61, %v7776_v61  ;;  %v6359_v32 = vunpack.c.l.bf16 %v7230_v51  ;;  %v1725_v28 = vld [vmem:[#allocation2 + $0x8c] sm:$0xf] }
  0x70   : > { %v7807_v35 = vrot.slane %v9989_v20, 7  ;;  %v9994_v41 = vshll.u32 %v7755_v10, 16  ;;  %v7814_v19 = vsel %vm7325_vm4, 0, %v1920_v26  ;;  %v2131_v51 = vsel %vm7325_vm4, 0, %v1965_v22  ;;  %v7823_v20 = vld [vmem:[%s7170_s12 + $0xb8] sm:$0xff]  }
  0x71   : > { %v1913_v42 = vsel %vm1126_vm3, %v7713_v29, %v1912_v56  ;;  %v708_v6 = vmax.f32 %v660_v18, 0.0  ;;  %v755_v7 = vmul.f32 %v7189_v12, %v707_v54  ;;  %v9995_v29 = vshrl.u32 %v7802_v57, 16  ;;  %v1737_v10 = vld [vmem:[#allocation2 + $0xbc] sm:$0xf] }
  0x72   : > { %2733 = vmatmul.bf16.gmra.mxu0 %v2127_v55  ;;  %v2025_v55 = vor.u32 %v9991_v4, %v7773_v48  ;;  %v2301_v52 = vunpack.c.l.b16 %v1913_v42  ;;  %v620_v22 = vmul.f32 %v7830_v36, %v6356_v46  ;;  %v2303_v56 = vunpack.c.l.b16 %v7814_v19 }
  0x73   : > { %v7834_v4 = vpack.c.bf16 %v708_v6, %v755_v7  ;;  %v621_v54 = vmul.f32 %v7830_v36, %v6359_v32  ;;  %v7837_v18 = vunpack.c.l.b16 %v1725_v28  ;;  %v2085_v42 = vor.u32 %v9994_v41, %v7807_v35 }
  0x74   : > { %v1969_v43 = vrot.slane %v9995_v29, 7  ;;  %v671_v44 = vadd.f32 %v7797_v9, %v620_v22  ;;  %v6383_v26 = vunpack.c.l.bf16 %v7823_v20  ;;  %v2135_v7 = vsel %vm7325_vm4, 0, %v2025_v55 }
  0x75   : > { %6813 = vst [vmem:[#allocation2 + $0x60] sm:$0xff] %v7834_v4   ;;  %v10004_v46 = vshrl.u32 %v7834_v4, 16  ;;  %v672_v28 = vadd.f32 %v7797_v9, %v621_v54  ;;  %v7852_v6 = vpack.c.b16 %v7837_v18, %v7837_v18  ;;  %v10149_v22 = vshll.u32 %v7802_v57, 16 }
  0x76   : > { %v719_v29 = vmax.f32 %v671_v44, 0.0  ;;  %v2440_v11 = vpack.c.b16 %v2303_v56, %v2301_v52  ;;  %v633_v44 = vmul.f32 %v7830_v36, %v6383_v26  ;;  %v2139_v52 = vsel %vm7325_vm4, 0, %v2085_v42 }
  0x77   : > { %2763 = vmatmul.bf16.gmra.mxu1 %v2131_v51  ;;  %v1972_v41 = vor.u32 %v10149_v22, %v1969_v43  ;;  %v632_v51 = vmul.f32 %v7830_v36, %v6380_v8  ;;  %v7861_v32 = vrot.slane %v10004_v46, 7  ;;  %v720_v54 = vmax.f32 %v672_v28, 0.0 }
  0x78   : > { %v10005_v59 = vshrl.u32 %v7852_v6, 16  ;;  %v767_v55 = vmul.f32 %v7189_v12, %v719_v29  ;;  %v10006_v43 = vshll.u32 %v7852_v6, 16  ;;  %v10150_v8 = vshll.u32 %v7834_v4, 16 }
  0x79   : > { %v1973_v53 = vsel %vm1126_vm3, %v7743_v21, %v1972_v41  ;;  %v683_v22 = vadd.f32 %v7797_v9, %v632_v51  ;;  %v684_v21 = vadd.f32 %v7797_v9, %v633_v44  ;;  %v7880_v41 = vunpack.c.l.b16 %v1737_v10  ;;  %v1716_v44 = vld [vmem:[#allocation2 + $0x68] sm:$0xf] }
  0x7a   : > { %v1980_v56 = vor.u32 %v10150_v8, %v7861_v32  ;;  %v2029_v28 = vrot.slane %v10005_v59, 7  ;;  %v7877_v46 = vpack.c.bf16 %v720_v54, %v767_v55  ;;  %v7882_v29 = vunpack.c.l.b16 %v1704_v58  ;;  %v1728_v58 = vld [vmem:[#allocation2 + $0x98] sm:$0xf] }
  0x7b   : > { %10151 = vst [vmem:[#allocation12_spill] sm:$0xff] %v7880_v41  ;;  %2793 = vmatmul.bf16.gmra.mxu2 %v2135_v7  ;;  %v2325_v42 = vunpack.c.l.b16 %v1973_v53  ;;  %v731_v59 = vmax.f32 %v683_v22, 0.0  ;;  %v732_v54 = vmax.f32 %v684_v21, 0.0  ;;  %v7897_v55 = vpack.c.b16 %v7880_v41, %v7880_v41 }
  0x7c   : > { %v7886_v26 = vsel %vm7325_vm4, 0, %v1980_v56  ;;  %v2032_v8 = vor.u32 %v10006_v43, %v2029_v28  ;;  %2823 = vmatmul.bf16.gmra.mxu3 %v2139_v52  ;;  %6819 = vst [vmem:[#allocation2 + $0x90] sm:$0xff] %v7877_v46   ;;  %v10009_v10 = vshrl.u32 %v7877_v46, 16  ;;  %v7901_v53 = vpack.c.b16 %v7882_v29, %v7882_v29 }
  0x7d   : > { %v2327_v51 = vunpack.c.l.b16 %v7886_v26  ;;  %v779_v7 = vmul.f32 %v7189_v12, %v731_v59  ;;  %10152 = vst [vmem:[#allocation13_spill] sm:$0xff] %v7897_v55  ;;  %v6384_v28 = vunpack.c.h.bf16 %v7823_v20  ;;  %v10011_v59 = vshrl.u32 %v7897_v55, 16 }
  0x7e   : > { %v2033_v52 = vsel %vm1126_vm3, %v7773_v48, %v2032_v8  ;;  %v7907_v56 = vrot.slane %v10009_v10, 7  ;;  %v10018_v21 = vshll.u32 %v7897_v55, 16  ;;  %v10012_v43 = vshrl.u32 %v7901_v53, 16 }
  0x7f   : > { %v7910_v22 = vpack.c.bf16 %v732_v54, %v779_v7  ;;  %v2456_v12 = vpack.c.b16 %v2327_v51, %v2325_v42  ;;  %v10154_v48 = vshll.u32 %v7877_v46, 16  ;;  %v7919_v41 = vunpack.c.l.b16 %v1716_v44 }
  0x80   : > { %v2089_v20 = vrot.slane %v10011_v59, 7  ;;  %v2349_v51 = vunpack.c.l.b16 %v2033_v52 }
  0x81   : > { %10153 = vst [vmem:[#allocation14_spill] sm:$0xff] %v7910_v22  ;;  %v2040_v8 = vor.u32 %v10154_v48, %v7907_v56  ;;  %v10017_v54 = vshrl.u32 %v7910_v22, 16  ;;  %v7934_v44 = vpack.c.b16 %v7919_v41, %v7919_v41  ;;  %v7936_v48 = vunpack.c.l.b16 %v1728_v58 }
  0x82   : > { %2738 = vmatmul.bf16.gmra.mxu0 %v2440_v11  ;;  %6825 = vst [vmem:[#allocation2 + $0xc0] sm:$0xff] %v7910_v22   ;;  %v1924_v11 = vrot.slane %v10012_v43, 7  ;;  %v2092_v10 = vor.u32 %v10018_v21, %v2089_v20  ;;  %v634_v43 = vmul.f32 %v7830_v36, %v6384_v28  ;;  %v2305_v36 = vunpack.c.h.b16 %v7814_v19  ;;  %v6249_v19 = vld [vmem:[%s9948_s5 + $0x140] sm:$0xff] }
  0x83   : > { %v7930_v42 = vsel %vm7325_vm4, 0, %v2040_v8  ;;  %10155 = vst [vmem:[#allocation15_spill] sm:$0xff] %v7936_v48  ;;  %v7943_v7 = vrot.slane %v10017_v54, 7  ;;  %v10156_v8 = vshll.u32 %v7901_v53, 16  ;;  %v10019_v33 = vshrl.u32 %v7934_v44, 16  ;;  %2975 = vmatpush.bf16.msrb.mxu2 %v6249_v19 }
  0x84   : > { %v2351_v59 = vunpack.c.l.b16 %v7930_v42  ;;  %v7952_v58 = vpack.c.b16 %v7936_v48, %v7936_v48  ;;  %v2093_v20 = vsel %vm1126_vm3, %v7807_v35, %v2092_v10  ;;  %v10157_v54 = vshll.u32 %v7910_v22, 16  ;;  %v6210_v35 = vld [vmem:[%s9948_s5 + $0x48] sm:$0xff] }
  0x85   : > { %v1927_v52 = vor.u32 %v10156_v8, %v1924_v11  ;;  %v2373_v28 = vunpack.c.l.b16 %v2093_v20  ;;  %v1984_v8 = vrot.slane %v10019_v33, 7  ;;  %v6201_v20 = vld [vmem:[%s9948_s5] sm:$0xff]  ;;  %v10158_v13 = vshll.u32 %v7934_v44, 16  ;;  %3512 = vmatpush.bf16.msrb.mxu0 %v6210_v35 }
  0x86   : > { %v2100_v21 = vor.u32 %v10157_v54, %v7943_v7  ;;  %v2472_v10 = vpack.c.b16 %v2351_v59, %v2349_v51  ;;  %v10159_v55 = vshrl.u32 %v7952_v58, 16  ;;  %v10033_v59 = vshll.u32 %v7952_v58, 16  ;;  %3384 = vmatpush.bf16.msrb.mxu3 %v6201_v20  ;;  %v6272_v20 = vld [vmem:[%s9948_s5 + $0x1b8] sm:$0xff] }
  0x87   : > { %2768 = vmatmul.bf16.gmra.mxu1 %v2456_v12  ;;  %v1928_v11 = vsel %vm1126_vm3, %v7761_v37, %v1927_v52  ;;  %v6242_v12 = vld [vmem:[%s9948_s5 + $0x108] sm:$0xff]  ;;  %v685_v52 = vadd.f32 %v7797_v9, %v634_v43  ;;  %v1987_v22 = vor.u32 %v10158_v13, %v1984_v8  ;;  %v6241_v9 = vld [vmem:[%s9948_s5 + $0x100] sm:$0xff]  ;;  %v2329_v35 = vunpack.c.h.b16 %v7886_v26  ;;  %4782 = vmatpush.bf16.msra.mxu2 %v6272_v20 }
  0x88   : > { %v7976_v37 = vsel %vm7325_vm4, 0, %v2100_v21  ;;  %v2307_v54 = vunpack.c.l.b16 %v1928_v11  ;;  %v2044_v48 = vrot.slane %v10159_v55, 7  ;;  %2845 = vmatpush.bf16.msrb.mxu1 %v6242_v12  ;;  %v6209_v21 = vld [vmem:[%s9948_s5 + $0x40] sm:$0xff]  ;;  %v7094_v12 = vmov 0  }
  0x89   : > { %v2375_v33 = vunpack.c.l.b16 %v7976_v37  ;;  %v733_v43 = vmax.f32 %v685_v52, 0.0  ;;  %v1988_v13 = vsel %vm1126_vm3, %v7861_v32, %v1987_v22  ;;  %883 = vst [vmem:[#allocation2] sm:$0xf] %v7094_v12  ;;  %3513 = vmatpush.bf16.msrb.mxu0 %v6209_v21  ;;  %v10160_v22 = vshll.u32 %v7339_v31, 16  ;;  %v6288_v21 = vld [vmem:[%s9948_s5 + $0x238] sm:$0xff] }
  0x8a   : > { %v2443_v11 = vpack.c.b16 %v2307_v54, %v2305_v36  ;;  %v2047_v8 = vor.u32 %v10033_v59, %v2044_v48  ;;  %v2331_v19 = vunpack.c.l.b16 %v1988_v13  ;;  %884 = vst [vmem:[#allocation2 + $0x4] sm:$0xf] %v7094_v12  ;;  %v2353_v36 = vunpack.c.h.b16 %v7930_v42  ;;  %v6224_v42 = vld [vmem:[%s9948_s5 + $0xb8] sm:$0xff] }
  0x8b   : > { %v2488_v51 = vpack.c.b16 %v2375_v33, %v2373_v28  ;;  %2798 = vmatmul.bf16.gmra.mxu2 %v2472_v10  ;;  %v781_v55 = vmul.f32 %v7205_v24, %v733_v43  ;;  %885 = vst [vmem:[#allocation2 + $0x8] sm:$0xf] %v7094_v12  ;;  %v2146_v48 = vrot.slane %v10160_v22, 1  ;;  %v10166_v22 = vshll.u32 %v7286_v50, 16 }
  0x8c   : > { %2846 = vmatpush.bf16.msrb.mxu1 %v6241_v9  ;;  %v2048_v33 = vsel %vm1126_vm3, %v7907_v56, %v2047_v8  ;;  %918 = vst [vmem:[#allocation2 + $0xcc] sm:$0xf] %v7094_v12  ;;  %v2459_v32 = vpack.c.b16 %v2331_v19, %v2329_v35  ;;  %v6280_v56 = vld [vmem:[%s9948_s5 + $0x1f8] sm:$0xff]  ;;  %v10163_v8 = vshll.u32 %v7610_v5, 16 }
  0x8d   : > { %2828 = vmatmul.bf16.gmra.mxu3 %v2488_v51  ;;  %v829_v52 = vpack.c.bf16 %v781_v55, %v781_v55  ;;  %919 = vst [vmem:[#allocation2 + $0xd0] sm:$0xf] %v7094_v12  ;;  %v2355_v26 = vunpack.c.l.b16 %v2048_v33  ;;  %v10162_v51 = vshrl.u32 %v7339_v31, 16  ;;  %5040 = vmatpush.bf16.msra.mxu0 %v6288_v21  ;;  %v10168_v21 = vshll.u32 %v7313_v14, 16 }
  0x8e   : > { %920 = vst [vmem:[#allocation2 + $0xd4] sm:$0xf] %v7094_v12  ;;  %4911 = vmatpush.bf16.msra.mxu3 %v6280_v56  ;;  %v2148_v12 = vrot.slane %v10163_v8, 1  ;;  %v10167_v56 = vshrl.u32 %v7286_v50, 16 }
  0x8f   : > { %878 = vst [vmem:[#allocation2 + $0xc8] sm:$0xf] %v829_v52  ;;  %v2475_v9 = vpack.c.b16 %v2355_v26, %v2353_v36  ;;  %v2147_v13 = vor.u32 %v2146_v48, %v10162_v51  ;;  %v2141_v48 = vrot.slane %v10166_v22, 1  ;;  %v2377_v26 = vunpack.c.h.b16 %v7976_v37 }
  0x90   : > { %3635 = vmatpush.bf16.msra.mxu1 %v6224_v42  ;;  %v2143_v51 = vrot.slane %v10168_v21, 1  ;;  %v10169_v37 = vshrl.u32 %v7610_v5, 16 }
  0x91   : > { %v6193_v28 = vld [vmem:[#allocation2] sm:$0xff]  ;;  %v2149_v52 = vsel %vm1401_vm5, %v2147_v13, %v2148_v12 }
  0x92   : > { %2743 = vmatmul.bf16.gmra.mxu0 %v2443_v11  ;;  %v1131_v54 = vshll.u32 %v6193_v28, 16  ;;  %v1128_v55 = vshrl.u32 %v6193_v28, 16  ;;  %v6826_v13 = vld [vmem:[#allocation2 + $0x8] sm:$0xff]   ;;  %v2294_v50 = vunpack.c.h.b16 %v2149_v52 }
  0x94   : > { %v1402_v11 = vrot.slane %v1131_v54, 1 }
  0x96   : > { %v1740_v10 = vld [vmem:[#allocation2 + $0xc8] sm:$0xf]  ;;  %v8027_v19 = vor.u32 %v1402_v11, %v1128_v55  ;;  %v7056_v11 = vld [vmem:[#allocation2 + $0xc] sm:$0xff] }
  0x97   : > { %2773 = vmatmul.bf16.gmra.mxu1 %v2459_v32  ;;  %v8011_v43 = vunpack.c.l.b16 %v1740_v10 }
  0x98   : > { %10165 = vst [vmem:[#allocation18_spill] sm:$0xff] %v8027_v19 }
  0x99   : > { %10161 = vst [vmem:[#allocation16_spill] sm:$0xff] %v8011_v43  ;;  %v8025_v35 = vpack.c.b16 %v8011_v43, %v8011_v43 }
  0x9b   : > { %10164 = vst [vmem:[#allocation17_spill] sm:$0xff] %v8025_v35  ;;  %2803 = vmatmul.bf16.gmra.mxu2 %v2475_v9  ;;  %v10031_v31 = vshrl.u32 %v8025_v35, 16  ;;  %v10032_v33 = vshll.u32 %v8025_v35, 16  ;;  %v2142_v9 = vor.u32 %v2141_v48, %v10167_v56  ;;  %v7057_v56 = vld [vmem:[#allocation2 + $0x18] sm:$0xff] }
  0x9d   : > { %v2104_v32 = vrot.slane %v10031_v31, 7 }
  0x9f   : > { %v2107_v36 = vor.u32 %v10032_v33, %v2104_v32  ;;  %v2144_v32 = vsel %vm1401_vm5, %v2142_v9, %v2143_v51 }
  0xa1   : > { %v2108_v10 = vsel %vm1126_vm3, %v7943_v7, %v2107_v36  ;;  %v6502_v7 = vunpack.c.l.b16 %v6826_v13  ;;  %v1130_v36 = vrot.slane %v1128_v55, 7 }
  0xa2   : > { %3514 = vmatmul.bf16.vlgmr.msrb.gmra.mxu0 %v6193_v28  ;;  %v2379_v20 = vunpack.c.l.b16 %v2108_v10  ;;  %v2150_v28 = vor.u32 %v2148_v12, %v10169_v37 }
  0xa3   : > { %v8058_v5 = vpack.c.b16 %v6502_v7, %v6502_v7  ;;  %v1133_v21 = vor.u32 %v1131_v54, %v1130_v36 }
  0xa4   : > { %v2491_v42 = vpack.c.b16 %v2379_v20, %v2377_v26  ;;  %v2238_v22 = vsel %vm8047_vm8, %v2150_v28, 0  ;;  %v10172_v26 = vshrl.u32 %v7313_v14, 16  ;;  %v8056_v20 = vld [vmem:[#allocation2 + $0xc] sm:$0xff]   ;;  %v2292_v28 = vunpack.c.l.b16 %v2149_v52 }
  0xa5   : > { %v2296_v48 = vunpack.c.l.b16 %v2238_v22  ;;  %10173 = vst [vmem:[#allocation19_spill] sm:$0xff] %v8056_v20  ;;  %v10025_v37 = vshrl.u32 %v8056_v20, 16  ;;  %v1385_v14 = vsel %vm7325_vm4, 0, %v1133_v21  ;;  %v10030_v54 = vshll.u32 %v8058_v5, 16  ;;  %v6827_v22 = vld [vmem:[#allocation2 + $0x10] sm:$0xff]  }
  0xa6   : > { %2833 = vmatmul.bf16.gmra.mxu3 %v2491_v42  ;;  %v2145_v10 = vor.u32 %v2143_v51, %v10172_v26  ;;  %10174 = vst [vmem:[#allocation20_spill] sm:$0xff] %v8058_v5  ;;  %v6566_v42 = vunpack.c.l.b16 %v7057_v56  ;;  %v6507_v26 = vunpack.c.h.b16 %v6827_v22 }
  0xa7   : > { %2847 = vmatmul.bf16.vlgmr.msrb.gmra.mxu1 %v7056_v11  ;;  %v2437_v12 = vpack.c.b16 %v2296_v48, %v2294_v50  ;;  %v10026_v11 = vshrl.u32 %v8058_v5, 16  ;;  %v1145_v50 = vrot.slane %v10025_v37, 7 }
  0xa8   : > { %v2237_v9 = vsel %vm8047_vm8, %v2145_v10, 0  ;;  %v2433_v55 = vpack.c.b16 %v6566_v42, %v7301_v62 }
  0xa9   : > { %v2290_v51 = vunpack.c.l.b16 %v2237_v9  ;;  %v1137_v7 = vrot.slane %v10026_v11, 7  ;;  %v8084_v9 = vpack.c.b16 %v6507_v26, %v6507_v26 }
  0xab   : > { %2976 = vmatmul.bf16.vlgmr.msrb.gmra.mxu2 %v2144_v32  ;;  %v10029_v32 = vshll.u32 %v8056_v20, 16  ;;  %v2434_v62 = vpack.c.b16 %v2292_v28, %v2290_v51  ;;  %v1140_v48 = vor.u32 %v10030_v54, %v1137_v7  ;;  %10175 = vst [vmem:[#allocation21_spill] sm:$0xff] %v8084_v9  ;;  %v10027_v28 = vshrl.u32 %v8084_v9, 16 }
  0xad   : > { %v1148_v52 = vor.u32 %v10029_v32, %v1145_v50  ;;  %v1141_v42 = vsel %vm1126_vm3, %v1130_v36, %v1140_v48  ;;  %v10028_v36 = vshll.u32 %v8084_v9, 16 }
  0xae   : > { %v8079_v10 = vpop.f32.mrf.mxu1 }
  0xaf   : > { %v1386_v21 = vsel %vm7325_vm4, 0, %v1148_v52  ;;  %v6271_v52 = vld [vmem:[%s9948_s5 + $0x1b0] sm:$0xff] }
  0xb0   : > { %v1555_v51 = vunpack.c.l.b16 %v1386_v21  ;;  %4783 = vmatpush.bf16.msra.mxu2 %v6271_v52 }
  0xb2   : > { %3519 = vmatmul.bf16.gmra.mxu0 %v6826_v13  ;;  %v8073_v13 = vpop.f32.mrf.mxu0 }
  0xb6   : > { %3385 = vmatmul.bf16.vlgmr.msrb.gmra.mxu3 %v1385_v14  ;;  %v1553_v14 = vunpack.c.l.b16 %v1141_v42  ;;  %v8093_v48 = vpop.f32.mrf.mxu1 }
  0xb7   : > { %2852 = vmatmul.bf16.gmra.mxu1 %v2433_v55  ;;  %v6567_v55 = vunpack.c.h.b16 %v7057_v56 }
  0xb8   : > { %v3099_v11 = vpack.c.b16 %v1555_v51, %v1553_v14  ;;  %v1557_v14 = vunpack.c.h.b16 %v1386_v21  ;;  %v10183_v21 = vshll.u32 %v7738_v49, 16 }
  0xb9   : > { %v2436_v37 = vpack.c.b16 %v7597_v25, %v6567_v55  ;;  %v6279_v25 = vld [vmem:[%s9948_s5 + $0x1f0] sm:$0xff] }
  0xba   : > { %v8087_v7 = vpop.f32.mrf.mxu0  ;;  %v8095_v56 = vpop.f32.mrf.mxu2  ;;  %4912 = vmatpush.bf16.msra.mxu3 %v6279_v25 }
  0xbb   : > { %2981 = vmatmul.bf16.gmra.mxu2 %v2434_v62  ;;  %v1152_v62 = vrot.slane %v10027_v28, 7  ;;  %10176 = vst [vmem:[#allocation22_spill] sm:$0xff] %v8095_v56 }
  0xbd   : > { %v1155_v26 = vor.u32 %v10028_v36, %v1152_v62  ;;  %v8118_v62 = vld [vmem:[#allocation2 + $0x18] sm:$0xff]  ;;  %v10179_v36 = vshll.u32 %v7693_v17, 16 }
  0xbe   : > { %v8116_v28 = vpop.f32.mrf.mxu1  ;;  %10178 = vst [vmem:[#allocation24_spill] sm:$0xff] %v8118_v62 }
  0xbf   : > { %v8108_v42 = vpop.f32.mrf.mxu3  ;;  %v1156_v55 = vsel %vm1126_vm3, %v1145_v50, %v1155_v26  ;;  %v2151_v32 = vrot.slane %v10179_v36, 1  ;;  %v2153_v26 = vrot.slane %v10183_v21, 1  ;;  %v10038_v36 = vshrl.u32 %v8118_v62, 16 }
  0xc0   : > { %10177 = vst [vmem:[#allocation23_spill] sm:$0xff] %v8108_v42  ;;  %v1559_v51 = vunpack.c.l.b16 %v1156_v55  ;;  %v10184_v55 = vshll.u32 %v7734_v63, 16  ;;  %v8153_v42 = vld [vmem:[#allocation2 + $0x24] sm:$0xff]  }
  0xc1   : > { %10190 = vst [vmem:[#allocation29_spill] sm:$0xff] %v8153_v42  ;;  %v10049_v20 = vshll.u32 %v8153_v42, 16 }
  0xc2   : > { %3524 = vmatmul.bf16.gmra.mxu0 %v6827_v22  ;;  %v6223_v22 = vld [vmem:[%s9948_s5 + $0xb0] sm:$0xff]  ;;  %v8122_v54 = vpop.f32.mrf.mxu2  ;;  %v3102_v25 = vpack.c.b16 %v1559_v51, %v1557_v14  ;;  %v2156_v31 = vrot.slane %v10184_v55, 1  ;;  %v10188_v55 = vshrl.u32 %v7734_v63, 16 }
  0xc3   : > { %3636 = vmatpush.bf16.msra.mxu1 %v6223_v22  ;;  %10180 = vst [vmem:[#allocation25_spill] sm:$0xff] %v8122_v54 }
  0xc4   : > { %v2157_v24 = vor.u32 %v2156_v31, %v10188_v55 }
  0xc6   : > { %3390 = vmatmul.bf16.gmra.mxu3 %v3099_v11  ;;  %v6287_v11 = vld [vmem:[%s9948_s5 + $0x230] sm:$0xff]  ;;  %v8138_v51 = vpop.f32.mrf.mxu1 }
  0xc7   : > { %2857 = vmatmul.bf16.gmra.mxu1 %v2436_v37  ;;  %v8113_v37 = vpop.f32.mrf.mxu0  ;;  %5041 = vmatpush.bf16.msra.mxu0 %v6287_v11  ;;  %v8125_v52 = vpop.f32.mrf.mxu3  ;;  %v6828_v11 = vld [vmem:[#allocation2 + $0x20] sm:$0xff]  }
  0xc8   : > { %10181 = vst [vmem:[#allocation26_spill] sm:$0xff] %v8125_v52  ;;  %v6510_v33 = vunpack.c.l.b16 %v6828_v11 }
  0xca   : > { %v8155_v9 = vpack.c.b16 %v6510_v33, %v6510_v33 }
  0xcb   : > { %2986 = vmatmul.bf16.gmra.mxu2 %v2437_v12  ;;  %v10182_v12 = vshrl.u32 %v7693_v17, 16 }
  0xcc   : > { %10191 = vst [vmem:[#allocation30_spill] sm:$0xff] %v8155_v9  ;;  %v10043_v31 = vshrl.u32 %v8155_v9, 16 }
  0xcd   : > { %v2152_v50 = vor.u32 %v2151_v32, %v10182_v12  ;;  %v1160_v32 = vrot.slane %v10038_v36, 7  ;;  %v8143_v21 = vpop.f32.mrf.mxu2  ;;  %v6570_v12 = vunpack.c.l.b16 %v7734_v63 }
  0xce   : > { %10185 = vst [vmem:[#allocation27_spill] sm:$0xff] %v8143_v21 }
  0xcf   : > { %v8127_v22 = vpop.f32.mrf.mxu0  ;;  %v2154_v14 = vsel %vm1401_vm5, %v2152_v50, %v2153_v26  ;;  %v10189_v50 = vshll.u32 %v7901_v53, 16  ;;  %v2441_v33 = vpack.c.b16 %v6570_v12, %v7724_v39  ;;  %v6829_v39 = vld [vmem:[#allocation2 + $0x28] sm:$0xff]  }
  0xd0   : > { %v6515_v43 = vunpack.c.h.b16 %v6829_v39 }
  0xd1   : > { %v2158_v52 = vrot.slane %v10189_v50, 1 }
  0xd2   : > { %3529 = vmatmul.bf16.gmra.mxu0 %v8118_v62 }
  0xd6   : > { %3395 = vmatmul.bf16.gmra.mxu3 %v3102_v25  ;;  %v10187_v25 = vshrl.u32 %v7738_v49, 16  ;;  %v2159_v49 = vsel %vm1401_vm5, %v2157_v24, %v2158_v52  ;;  %v1167_v24 = vrot.slane %v10043_v31, 7 }
  0xd7   : > { %2862 = vmatmul.bf16.gmra.mxu1 %v7693_v17  ;;  %v8145_v17 = vpop.f32.mrf.mxu3 }
  0xd8   : > { %10186 = vst [vmem:[#allocation28_spill] sm:$0xff] %v8145_v17  ;;  %v2155_v59 = vor.u32 %v2153_v26, %v10187_v25  ;;  %v10047_v25 = vshrl.u32 %v8153_v42, 16 }
  0xda   : > { %v2239_v26 = vsel %vm8047_vm8, %v2155_v59, 0  ;;  %v1175_v59 = vrot.slane %v10047_v25, 7 }
  0xdb   : > { %2991 = vmatmul.bf16.gmra.mxu2 %v2154_v14  ;;  %v10192_v14 = vshll.u32 %v8118_v62, 16  ;;  %v2302_v19 = vunpack.c.l.b16 %v2239_v26  ;;  %v2304_v62 = vunpack.c.l.b16 %v2159_v49 }
  0xdc   : > { %v1178_v5 = vor.u32 %v10049_v20, %v1175_v59 }
  0xdd   : > { %v1163_v17 = vor.u32 %v10192_v14, %v1160_v32  ;;  %v10048_v14 = vshll.u32 %v8155_v9, 16  ;;  %v2442_v26 = vpack.c.b16 %v2304_v62, %v2302_v19 }
  0xdf   : > { %v8157_v36 = vpop.f32.mrf.mxu0  ;;  %v1387_v55 = vsel %vm7325_vm4, 0, %v1163_v17  ;;  %v8180_v12 = vpop.f32.mrf.mxu3  ;;  %v1170_v31 = vor.u32 %v10048_v14, %v1167_v24  ;;  %v6571_v24 = vunpack.c.h.b16 %v7734_v63 }
  0xe0   : > { %10194 = vst [vmem:[#allocation32_spill] sm:$0xff] %v8180_v12  ;;  %v1388_v12 = vsel %vm7325_vm4, 0, %v1178_v5 }
  0xe1   : > { %v1567_v20 = vunpack.c.l.b16 %v1388_v12 }
  0xe2   : > { %3534 = vmatmul.bf16.gmra.mxu0 %v6828_v11  ;;  %v8178_v11 = vpop.f32.mrf.mxu2 }
  0xe3   : > { %10193 = vst [vmem:[#allocation31_spill] sm:$0xff] %v8178_v11  ;;  %v1171_v11 = vsel %vm1126_vm3, %v1160_v32, %v1170_v31  ;;  %v2306_v31 = vunpack.c.h.b16 %v2159_v49  ;;  %v6222_v49 = vld [vmem:[%s9948_s5 + $0xa8] sm:$0xff] }
  0xe4   : > { %v8170_v50 = vpop.f32.mrf.mxu1  ;;  %v1565_v14 = vunpack.c.l.b16 %v1171_v11  ;;  %3637 = vmatpush.bf16.msra.mxu1 %v6222_v49 }
  0xe6   : > { %3400 = vmatmul.bf16.gmra.mxu3 %v1387_v55  ;;  %v10196_v55 = vshrl.u32 %v7901_v53, 16  ;;  %v3107_v53 = vpack.c.b16 %v1567_v20, %v1565_v14  ;;  %v6278_v20 = vld [vmem:[%s9948_s5 + $0x1e8] sm:$0xff] }
  0xe7   : > { %2867 = vmatmul.bf16.gmra.mxu1 %v2441_v33  ;;  %v8182_v17 = vpop.f32.mrf.mxu0  ;;  %v8193_v33 = vpack.c.b16 %v6515_v43, %v6515_v43  ;;  %v2444_v43 = vpack.c.b16 %v7882_v29, %v6571_v24  ;;  %v6270_v29 = vld [vmem:[%s9948_s5 + $0x1a8] sm:$0xff]  ;;  %4913 = vmatpush.bf16.msra.mxu3 %v6278_v20 }
  0xe8   : > { %v2160_v19 = vor.u32 %v2158_v52, %v10196_v55  ;;  %v6286_v24 = vld [vmem:[%s9948_s5 + $0x228] sm:$0xff]  ;;  %4784 = vmatpush.bf16.msra.mxu2 %v6270_v29 }
  0xe9   : > { %10195 = vst [vmem:[#allocation33_spill] sm:$0xff] %v8193_v33  ;;  %v10054_v32 = vshrl.u32 %v8193_v33, 16  ;;  %v10055_v11 = vshll.u32 %v8193_v33, 16  ;;  %5042 = vmatpush.bf16.msra.mxu0 %v6286_v24  ;;  %v6830_v24 = vld [vmem:[#allocation2 + $0x38] sm:$0xff]  }
  0xea   : > { %v2240_v5 = vsel %vm8047_vm8, %v2160_v19, 0 }
  0xeb   : > { %2996 = vmatmul.bf16.gmra.mxu2 %v2442_v26  ;;  %v2308_v26 = vunpack.c.l.b16 %v2240_v5  ;;  %v1182_v63 = vrot.slane %v10054_v32, 7  ;;  %v1569_v32 = vunpack.c.h.b16 %v1388_v12  ;;  %v10209_v12 = vshll.u32 %v7368_v47, 16 }
  0xec   : > { %v8188_v25 = vpop.f32.mrf.mxu1 }
  0xed   : > { %v1185_v19 = vor.u32 %v10055_v11, %v1182_v63  ;;  %v8240_v63 = vld [vmem:[#allocation2 + $0x30] sm:$0xff]  ;;  %v10205_v11 = vshll.u32 %v7305_v2, 16 }
  0xee   : > { %v8200_v42 = vpop.f32.mrf.mxu2  ;;  %10204 = vst [vmem:[#allocation41_spill] sm:$0xff] %v8240_v63 }
  0xef   : > { %v8197_v62 = vpop.f32.mrf.mxu0  ;;  %10197 = vst [vmem:[#allocation34_spill] sm:$0xff] %v8200_v42  ;;  %v8202_v9 = vpop.f32.mrf.mxu3 }
  0xf0   : > { %10198 = vst [vmem:[#allocation35_spill] sm:$0xff] %v8202_v9 }
  0xf2   : > { %3539 = vmatmul.bf16.gmra.mxu0 %v6829_v39  ;;  %v2445_v39 = vpack.c.b16 %v2308_v26, %v2306_v31 }
  0xf4   : > { %v8208_v52 = vpop.f32.mrf.mxu1 }
  0xf5   : > { %10199 = vst [vmem:[#allocation36_spill] sm:$0xff] %v8208_v52 }
  0xf6   : > { %3405 = vmatmul.bf16.gmra.mxu3 %v3107_v53  ;;  %v8215_v9 = vpop.f32.mrf.mxu2 }
  0xf7   : > { %2872 = vmatmul.bf16.gmra.mxu1 %v2444_v43  ;;  %v8213_v55 = vpop.f32.mrf.mxu0  ;;  %10200 = vst [vmem:[#allocation37_spill] sm:$0xff] %v8215_v9  ;;  %v8226_v14 = vpop.f32.mrf.mxu3  ;;  %v1186_v43 = vsel %vm1126_vm3, %v1175_v59, %v1185_v19  ;;  %v10208_v59 = vshrl.u32 %v7305_v2, 16  ;;  %v2163_v19 = vrot.slane %v10209_v12, 1  ;;  %v10215_v9 = vshrl.u32 %v7401_v15, 16 }
  0xf8   : > { %10201 = vst [vmem:[#allocation38_spill] sm:$0xff] %v8226_v14  ;;  %v1571_v31 = vunpack.c.l.b16 %v1186_v43  ;;  %v2161_v14 = vrot.slane %v10205_v11, 1  ;;  %v7058_v43 = vld [vmem:[#allocation2 + $0x3c] sm:$0xff] }
  0xfa   : > { %v3110_v20 = vpack.c.b16 %v1571_v31, %v1569_v32  ;;  %v10211_v32 = vshll.u32 %v7401_v15, 16 }
  0xfb   : > { %3001 = vmatmul.bf16.gmra.mxu2 %v2445_v39  ;;  %v2162_v39 = vor.u32 %v2161_v14, %v10208_v59  ;;  %v7059_v59 = vld [vmem:[#allocation2 + $0x48] sm:$0xff] }
  0xfc   : > { %v8233_v5 = vpop.f32.mrf.mxu1  ;;  %v2166_v31 = vrot.slane %v10211_v32, 1  ;;  %v10216_v32 = vshll.u32 %v7632_v16, 16  ;;  %v6574_v54 = vunpack.c.l.b16 %v7059_v59 }
  0xfd   : > { %10202 = vst [vmem:[#allocation39_spill] sm:$0xff] %v8233_v5  ;;  %v2164_v2 = vsel %vm1401_vm5, %v2162_v39, %v2163_v19  ;;  %v8274_v39 = vld [vmem:[#allocation2 + $0x3c] sm:$0xff]  }
  0xfe   : > { %v8238_v26 = vpop.f32.mrf.mxu2  ;;  %v2167_v42 = vor.u32 %v2166_v31, %v10215_v9  ;;  %v2168_v21 = vrot.slane %v10216_v32, 1  ;;  %10217 = vst [vmem:[#allocation47_spill] sm:$0xff] %v8274_v39 }
  0xff   : > { %v8236_v53 = vpop.f32.mrf.mxu0  ;;  %10203 = vst [vmem:[#allocation40_spill] sm:$0xff] %v8238_v26  ;;  %v8245_v29 = vpop.f32.mrf.mxu3  ;;  %v10060_v26 = vshrl.u32 %v8240_v63, 16 }
 0x100   : > { %10206 = vst [vmem:[#allocation42_spill] sm:$0xff] %v8245_v29  ;;  %v6518_v29 = vunpack.c.l.b16 %v6830_v24 }
 0x101   : > { %v1190_v14 = vrot.slane %v10060_v26, 7 }
 0x102   : > { %3544 = vmatmul.bf16.gmra.mxu0 %v8240_v63  ;;  %v8276_v35 = vpack.c.b16 %v6518_v29, %v6518_v29  ;;  %v2449_v29 = vpack.c.b16 %v6574_v54, %v7344_v34 }
 0x104   : > { %v8247_v49 = vpop.f32.mrf.mxu1  ;;  %10218 = vst [vmem:[#allocation48_spill] sm:$0xff] %v8276_v35  ;;  %v10063_v9 = vshrl.u32 %v8276_v35, 16 }
 0x105   : > { %10207 = vst [vmem:[#allocation43_spill] sm:$0xff] %v8247_v49 }
 0x106   : > { %3410 = vmatmul.bf16.gmra.mxu3 %v3110_v20  ;;  %v8255_v11 = vpop.f32.mrf.mxu2  ;;  %v10214_v20 = vshrl.u32 %v7368_v47, 16  ;;  %v2169_v47 = vsel %vm1401_vm5, %v2167_v42, %v2168_v21  ;;  %v1197_v42 = vrot.slane %v10063_v9, 7 }
 0x107   : > { %2877 = vmatmul.bf16.gmra.mxu1 %v7058_v43  ;;  %v8253_v33 = vpop.f32.mrf.mxu0  ;;  %10210 = vst [vmem:[#allocation44_spill] sm:$0xff] %v8255_v11  ;;  %v8266_v43 = vpop.f32.mrf.mxu3  ;;  %v2316_v32 = vunpack.c.l.b16 %v2169_v47 }
 0x108   : > { %10213 = vst [vmem:[#allocation46_spill] sm:$0xff] %v8266_v43  ;;  %v2165_v11 = vor.u32 %v2163_v19, %v10214_v20  ;;  %v10219_v43 = vshll.u32 %v8240_v63, 16  ;;  %v10064_v19 = vshrl.u32 %v8274_v39, 16  ;;  %v10065_v63 = vshll.u32 %v8276_v35, 16 }
 0x10a   : > { %v2241_v15 = vsel %vm8047_vm8, %v2165_v11, 0  ;;  %v1205_v11 = vrot.slane %v10064_v19, 7 }
 0x10b   : > { %3006 = vmatmul.bf16.gmra.mxu2 %v2164_v2  ;;  %v1193_v2 = vor.u32 %v10219_v43, %v1190_v14  ;;  %v2314_v43 = vunpack.c.l.b16 %v2241_v15  ;;  %v1200_v15 = vor.u32 %v10065_v63, %v1197_v42  ;;  %v6575_v42 = vunpack.c.h.b16 %v7059_v59 }
 0x10c   : > { %v8264_v12 = vpop.f32.mrf.mxu1 }
 0x10d   : > { %10212 = vst [vmem:[#allocation45_spill] sm:$0xff] %v8264_v12  ;;  %v1389_v31 = vsel %vm7325_vm4, 0, %v1193_v2  ;;  %v2450_v2 = vpack.c.b16 %v2316_v32, %v2314_v43  ;;  %v1201_v49 = vsel %vm1126_vm3, %v1190_v14, %v1200_v15 }
 0x10e   : > { %v8282_v56 = vpop.f32.mrf.mxu2  ;;  %v1577_v63 = vunpack.c.l.b16 %v1201_v49 }
 0x10f   : > { %v8278_v26 = vpop.f32.mrf.mxu0  ;;  %10220 = vst [vmem:[#allocation49_spill] sm:$0xff] %v8282_v56  ;;  %v10068_v56 = vshll.u32 %v8274_v39, 16 }
 0x110   : > { %v8300_v12 = vpop.f32.mrf.mxu3 }
 0x111   : > { %10222 = vst [vmem:[#allocation51_spill] sm:$0xff] %v8300_v12  ;;  %v1208_v9 = vor.u32 %v10068_v56, %v1205_v11 }
 0x112   : > { %3549 = vmatmul.bf16.gmra.mxu0 %v6830_v24  ;;  %v6831_v24 = vld [vmem:[#allocation2 + $0x40] sm:$0xff]  }
 0x114   : > { %v8292_v20 = vpop.f32.mrf.mxu1 }
 0x115   : > { %10221 = vst [vmem:[#allocation50_spill] sm:$0xff] %v8292_v20  ;;  %v6523_v20 = vunpack.c.h.b16 %v6831_v24 }
 0x116   : > { %3415 = vmatmul.bf16.gmra.mxu3 %v1389_v31  ;;  %v8304_v54 = vpop.f32.mrf.mxu2  ;;  %v10226_v31 = vshrl.u32 %v7632_v16, 16 }
 0x117   : > { %2882 = vmatmul.bf16.gmra.mxu1 %v2449_v29  ;;  %v8302_v34 = vpop.f32.mrf.mxu0  ;;  %10223 = vst [vmem:[#allocation52_spill] sm:$0xff] %v8304_v54  ;;  %v1390_v29 = vsel %vm7325_vm4, 0, %v1208_v9  ;;  %v8315_v12 = vpack.c.b16 %v6523_v20, %v6523_v20  ;;  %v2452_v9 = vpack.c.b16 %v7623_v1, %v6575_v42  ;;  %v6277_v1 = vld [vmem:[%s9948_s5 + $0x1e0] sm:$0xff] }
 0x118   : > { %v2170_v43 = vor.u32 %v2168_v21, %v10226_v31  ;;  %v1579_v39 = vunpack.c.l.b16 %v1390_v29  ;;  %v8323_v35 = vpop.f32.mrf.mxu3  ;;  %v2318_v21 = vunpack.c.h.b16 %v2169_v47  ;;  %4914 = vmatpush.bf16.msra.mxu3 %v6277_v1  ;;  %v6221_v42 = vld [vmem:[%s9948_s5 + $0xa0] sm:$0xff]  ;;  %v8356_v1 = vld [vmem:[#allocation2 + $0x48] sm:$0xff] }
 0x119   : > { %10225 = vst [vmem:[#allocation54_spill] sm:$0xff] %v8315_v12  ;;  %v10072_v59 = vshll.u32 %v8315_v12, 16  ;;  %3638 = vmatpush.bf16.msra.mxu1 %v6221_v42  ;;  %v6832_v42 = vld [vmem:[#allocation2 + $0x50] sm:$0xff]  }
 0x11a   : > { %10228 = vst [vmem:[#allocation56_spill] sm:$0xff] %v8323_v35  ;;  %v2242_v14 = vsel %vm8047_vm8, %v2170_v43, 0  ;;  %v3115_v20 = vpack.c.b16 %v1579_v39, %v1577_v63 }
 0x11b   : > { %3011 = vmatmul.bf16.gmra.mxu2 %v2450_v2  ;;  %v10071_v2 = vshrl.u32 %v8315_v12, 16  ;;  %v2320_v15 = vunpack.c.l.b16 %v2242_v14  ;;  %v6285_v14 = vld [vmem:[%s9948_s5 + $0x220] sm:$0xff]  ;;  %10231 = vst [vmem:[#allocation59_spill] sm:$0xff] %v8356_v1  ;;  %v7060_v12 = vld [vmem:[#allocation2 + $0x54] sm:$0xff] }
 0x11c   : > { %v8310_v19 = vpop.f32.mrf.mxu1  ;;  %5043 = vmatpush.bf16.msra.mxu0 %v6285_v14 }
 0x11d   : > { %10224 = vst [vmem:[#allocation53_spill] sm:$0xff] %v8310_v19  ;;  %v1212_v49 = vrot.slane %v10071_v2, 7  ;;  %v2453_v63 = vpack.c.b16 %v2320_v15, %v2318_v21  ;;  %v1581_v15 = vunpack.c.h.b16 %v1390_v29  ;;  %v10235_v29 = vshll.u32 %v7802_v57, 16 }
 0x11e   : > { %v8321_v56 = vpop.f32.mrf.mxu2 }
 0x11f   : > { %v8319_v32 = vpop.f32.mrf.mxu0  ;;  %10227 = vst [vmem:[#allocation55_spill] sm:$0xff] %v8321_v56  ;;  %v1215_v39 = vor.u32 %v10072_v59, %v1212_v49  ;;  %v10232_v59 = vshll.u32 %v7707_v60, 16  ;;  %v2173_v14 = vrot.slane %v10235_v29, 1 }
 0x122   : > { %3554 = vmatmul.bf16.gmra.mxu0 %v6831_v24  ;;  %v6269_v24 = vld [vmem:[%s9948_s5 + $0x1a0] sm:$0xff] }
 0x123   : > { %4785 = vmatpush.bf16.msra.mxu2 %v6269_v24 }
 0x124   : > { %v2848_v16 = vpop.f32.mrf.mxu1 }
 0x126   : > { %3420 = vmatmul.bf16.gmra.mxu3 %v3115_v20  ;;  %v8334_v35 = vpop.f32.mrf.mxu2  ;;  %v2849_v20 = vadd.f32 %v2848_v16, %v8073_v13  ;;  %v10234_v13 = vshrl.u32 %v7707_v60, 16 }
 0x127   : > { %2887 = vmatmul.bf16.gmra.mxu1 %v2452_v9  ;;  %v8332_v31 = vpop.f32.mrf.mxu0  ;;  %10229 = vst [vmem:[#allocation57_spill] sm:$0xff] %v8334_v35  ;;  %v1216_v9 = vsel %vm1126_vm3, %v1205_v11, %v1215_v39 }
 0x128   : > { %v1583_v49 = vunpack.c.l.b16 %v1216_v9 }
 0x129   : > { %v8344_v47 = vpop.f32.mrf.mxu3 }
 0x12a   : > { %10230 = vst [vmem:[#allocation58_spill] sm:$0xff] %v8344_v47  ;;  %v2171_v47 = vrot.slane %v10232_v59, 1  ;;  %v3118_v11 = vpack.c.b16 %v1583_v49, %v1581_v15  ;;  %v10236_v49 = vshll.u32 %v7834_v4, 16 }
 0x12b   : > { %3016 = vmatmul.bf16.gmra.mxu2 %v2453_v63 }
 0x12c   : > { %v2850_v43 = vpop.f32.mrf.mxu1  ;;  %v2172_v16 = vor.u32 %v2171_v47, %v10234_v13  ;;  %v2176_v35 = vrot.slane %v10236_v49, 1  ;;  %v10238_v49 = vshrl.u32 %v7834_v4, 16 }
 0x12d   : > { %v2851_v9 = vadd.f32 %v2850_v43, %v8087_v7 }
 0x12e   : > { %v2977_v24 = vpop.f32.mrf.mxu2  ;;  %v2174_v60 = vsel %vm1401_vm5, %v2172_v16, %v2173_v14  ;;  %v2177_v56 = vor.u32 %v2176_v35, %v10238_v49  ;;  %v10239_v16 = vshll.u32 %v7934_v44, 16 }
 0x12f   : > { %v8354_v21 = vpop.f32.mrf.mxu0  ;;  %v2978_v2 = vadd.f32 %v2977_v24, %v2849_v20  ;;  %v10075_v24 = vshrl.u32 %v8356_v1, 16 }
 0x131   : > { %v8361_v63 = vpop.f32.mrf.mxu3  ;;  %v1220_v7 = vrot.slane %v10075_v24, 7 }
 0x132   : > { %3559 = vmatmul.bf16.gmra.mxu0 %v8356_v1  ;;  %10233 = vst [vmem:[#allocation60_spill] sm:$0xff] %v8361_v63  ;;  %v6526_v63 = vunpack.c.l.b16 %v6832_v42 }
 0x134   : > { %v2853_v39 = vpop.f32.mrf.mxu1  ;;  %v8377_v29 = vpack.c.b16 %v6526_v63, %v6526_v63  ;;  %v6578_v63 = vunpack.c.l.b16 %v7834_v4 }
 0x135   : > { %v2854_v24 = vadd.f32 %v2853_v39, %v8113_v37 }
 0x136   : > { %3425 = vmatmul.bf16.gmra.mxu3 %v3118_v11  ;;  %v2979_v59 = vpop.f32.mrf.mxu2  ;;  %v8379_v11 = vld [vmem:[#allocation2 + $0x54] sm:$0xff]   ;;  %v2457_v39 = vpack.c.b16 %v6578_v63, %v7776_v61 }
 0x137   : > { %2892 = vmatmul.bf16.gmra.mxu1 %v7060_v12  ;;  %v8368_v20 = vpop.f32.mrf.mxu0  ;;  %v2980_v15 = vadd.f32 %v2979_v59, %v2851_v9  ;;  %v10237_v9 = vshrl.u32 %v7802_v57, 16 }
 0x139   : > { %v3386_v47 = vpop.f32.mrf.mxu3  ;;  %v2175_v59 = vor.u32 %v2173_v14, %v10237_v9  ;;  %v10078_v14 = vshrl.u32 %v8377_v29, 16 }
 0x13a   : > { %v3387_v13 = vadd.f32 %v3386_v47, %v2978_v2  ;;  %v2178_v2 = vrot.slane %v10239_v16, 1 }
 0x13b   : > { %3021 = vmatmul.bf16.gmra.mxu2 %v2174_v60  ;;  %v10241_v60 = vshll.u32 %v8356_v1, 16  ;;  %v6833_v1 = vld [vmem:[#allocation2 + $0x58] sm:$0xff]  }
 0x13c   : > { %v2855_v43 = vpop.f32.mrf.mxu1  ;;  %v8388_v47 = vadd.f32 %v8319_v32, %v3387_v13  ;;  %v8399_v49 = vsel %vm1401_vm5, %v2177_v56, %v2178_v2  ;;  %v2243_v32 = vsel %vm8047_vm8, %v2175_v59, 0  ;;  %v6531_v19 = vunpack.c.h.b16 %v6833_v1 }
 0x13d   : > { %v1223_v54 = vor.u32 %v10241_v60, %v1220_v7  ;;  %v2326_v35 = vunpack.c.l.b16 %v2243_v32  ;;  %v2328_v56 = vunpack.c.l.b16 %v8399_v49 }
 0x13e   : > { %10240 = vst [vmem:[#allocation61_spill] sm:$0xff] %v8388_v47  ;;  %v2982_v57 = vpop.f32.mrf.mxu2  ;;  %v10242_v47 = vshrl.u32 %v8379_v11, 16 }
 0x13f   : > { %v8391_v12 = vpop.f32.mrf.mxu0  ;;  %v2983_v9 = vadd.f32 %v2982_v57, %v2854_v24  ;;  %v1391_v16 = vsel %vm7325_vm4, 0, %v1223_v54  ;;  %v1227_v24 = vrot.slane %v10078_v14, 7  ;;  %v10100_v57 = vshll.u32 %v8377_v29, 16 }
 0x140   : > { %v1235_v59 = vrot.slane %v10242_v47, 7  ;;  %v2856_v54 = vadd.f32 %v2855_v43, %v8127_v22  ;;  %v2458_v14 = vpack.c.b16 %v2328_v56, %v2326_v35 }
 0x141   : > { %v3388_v37 = vpop.f32.mrf.mxu3  ;;  %v1230_v32 = vor.u32 %v10100_v57, %v1227_v24  ;;  %v6839_v57 = vld [vmem:[#allocation2 + $0xa0] sm:$0xff]  }
 0x142   : > { %3564 = vmatmul.bf16.gmra.mxu0 %v6832_v42  ;;  %v3389_v13 = vadd.f32 %v3388_v37, %v2980_v15  ;;  %v10099_v42 = vshll.u32 %v8379_v11, 16 }
 0x143   : > { %v1231_v22 = vsel %vm1126_vm3, %v1220_v7, %v1230_v32 }
 0x144   : > { %v2858_v60 = vpop.f32.mrf.mxu1  ;;  %v8414_v61 = vadd.f32 %v8332_v31, %v3389_v13  ;;  %v1238_v47 = vor.u32 %v10099_v42, %v1235_v59  ;;  %v10243_v13 = vshrl.u32 %v7934_v44, 16 }
 0x145   : > { %v2859_v24 = vadd.f32 %v2858_v60, %v8157_v36  ;;  %v2330_v60 = vunpack.c.h.b16 %v8399_v49  ;;  %v6268_v49 = vld [vmem:[%s9948_s5 + $0x198] sm:$0xff] }
 0x146   : > { %3430 = vmatmul.bf16.gmra.mxu3 %v1391_v16  ;;  %v2984_v63 = vpop.f32.mrf.mxu2  ;;  %v1392_v43 = vsel %vm7325_vm4, 0, %v1238_v47  ;;  %v2180_v16 = vor.u32 %v2178_v2, %v10243_v13  ;;  %4786 = vmatpush.bf16.msra.mxu2 %v6268_v49 }
 0x147   : > { %2897 = vmatmul.bf16.gmra.mxu1 %v2457_v39  ;;  %v8417_v15 = vpop.f32.mrf.mxu0  ;;  %v2985_v37 = vadd.f32 %v2984_v63, %v2856_v54  ;;  %v8426_v39 = vpack.c.b16 %v6531_v19, %v6531_v19 }
 0x148   : > { %v2244_v19 = vsel %vm8047_vm8, %v2180_v16, 0 }
 0x149   : > { %v3391_v5 = vpop.f32.mrf.mxu3  ;;  %v10083_v63 = vshrl.u32 %v8426_v39, 16  ;;  %v2332_v32 = vunpack.c.l.b16 %v2244_v19  ;;  %v10084_v47 = vshll.u32 %v8426_v39, 16 }
 0x14a   : > { %v3392_v52 = vadd.f32 %v3391_v5, %v2983_v9  ;;  %v6579_v5 = vunpack.c.h.b16 %v7834_v4  ;;  %v1591_v9 = vunpack.c.l.b16 %v1392_v43 }
 0x14b   : > { %3026 = vmatmul.bf16.gmra.mxu2 %v2458_v14  ;;  %v1589_v14 = vunpack.c.l.b16 %v1231_v22  ;;  %v1242_v4 = vrot.slane %v10083_v63, 7 }
 0x14c   : > { %v2860_v31 = vpop.f32.mrf.mxu1  ;;  %v8431_v35 = vadd.f32 %v8354_v21, %v3392_v52  ;;  %v2460_v52 = vpack.c.b16 %v7919_v41, %v6579_v5 }
 0x14d   : > { %v3123_v2 = vpack.c.b16 %v1591_v9, %v1589_v14  ;;  %v2861_v13 = vadd.f32 %v2860_v31, %v8182_v17  ;;  %v6220_v14 = vld [vmem:[%s9948_s5 + $0x98] sm:$0xff] }
 0x14e   : > { %v2987_v7 = vpop.f32.mrf.mxu2  ;;  %v6284_v9 = vld [vmem:[%s9948_s5 + $0x218] sm:$0xff]  ;;  %3639 = vmatpush.bf16.msra.mxu1 %v6220_v14 }
 0x14f   : > { %v8434_v56 = vpop.f32.mrf.mxu0  ;;  %v2988_v54 = vadd.f32 %v2987_v7, %v2859_v24  ;;  %v2461_v24 = vpack.c.b16 %v2332_v32, %v2330_v60  ;;  %5044 = vmatpush.bf16.msra.mxu0 %v6284_v9  ;;  %v8472_v60 = vld [vmem:[#allocation2 + $0x60] sm:$0xff] }
 0x150   : > { %v10079_v9 = vshrl.u32 %v8472_v60, 16 }
 0x151   : > { %v3393_v44 = vpop.f32.mrf.mxu3 }
 0x152   : > { %3569 = vmatmul.bf16.gmra.mxu0 %v6833_v1  ;;  %v3394_v21 = vadd.f32 %v3393_v44, %v2985_v37  ;;  %v6276_v37 = vld [vmem:[%s9948_s5 + $0x1d8] sm:$0xff] }
 0x153   : > { %4915 = vmatpush.bf16.msra.mxu3 %v6276_v37  ;;  %v6834_v37 = vld [vmem:[#allocation2 + $0x68] sm:$0xff]  }
 0x154   : > { %v2863_v36 = vpop.f32.mrf.mxu1  ;;  %v8446_v22 = vadd.f32 %v8368_v20, %v3394_v21  ;;  %v1245_v20 = vor.u32 %v10084_v47, %v1242_v4  ;;  %v10244_v4 = vshll.u32 %v7356_v40, 16 }
 0x155   : > { %v2864_v44 = vadd.f32 %v2863_v36, %v8197_v62  ;;  %v10245_v62 = vshrl.u32 %v7356_v40, 16  ;;  %v10247_v40 = vshll.u32 %v7469_v45, 16 }
 0x156   : > { %3435 = vmatmul.bf16.gmra.mxu3 %v3123_v2  ;;  %v2989_v41 = vpop.f32.mrf.mxu2  ;;  %v1246_v7 = vsel %vm1126_vm3, %v1235_v59, %v1245_v20 }
 0x157   : > { %2902 = vmatmul.bf16.gmra.mxu1 %v2460_v52  ;;  %v8449_v1 = vpop.f32.mrf.mxu0  ;;  %v2990_v16 = vadd.f32 %v2989_v41, %v2861_v13  ;;  %v1593_v52 = vunpack.c.h.b16 %v1392_v43  ;;  %v1595_v21 = vunpack.c.l.b16 %v1246_v7  ;;  %v2181_v13 = vrot.slane %v10244_v4, 1 }
 0x158   : > { %v10246_v43 = vshll.u32 %v7453_v3, 16  ;;  %v6534_v7 = vunpack.c.l.b16 %v6834_v37  ;;  %v10082_v4 = vshll.u32 %v8472_v60, 16 }
 0x159   : > { %v3396_v17 = vpop.f32.mrf.mxu3  ;;  %v3126_v49 = vpack.c.b16 %v1595_v21, %v1593_v52  ;;  %v2182_v36 = vor.u32 %v2181_v13, %v10245_v62  ;;  %v2186_v52 = vrot.slane %v10247_v40, 1  ;;  %v10249_v62 = vshrl.u32 %v7469_v45, 16 }
 0x15a   : > { %v3397_v31 = vadd.f32 %v3396_v17, %v2988_v54  ;;  %v7061_v17 = vld [vmem:[#allocation2 + $0x6c] sm:$0xff]  ;;  %v8494_v13 = vpack.c.b16 %v6534_v7, %v6534_v7  ;;  %v7062_v7 = vld [vmem:[#allocation2 + $0x78] sm:$0xff] }
 0x15b   : > { %3031 = vmatmul.bf16.gmra.mxu2 %v2461_v24  ;;  %v2183_v24 = vrot.slane %v10246_v43, 1  ;;  %v2187_v43 = vor.u32 %v2186_v52, %v10249_v62  ;;  %v6582_v40 = vunpack.c.l.b16 %v7062_v7 }
 0x15c   : > { %v2865_v5 = vpop.f32.mrf.mxu1  ;;  %v8467_v19 = vadd.f32 %v8391_v12, %v3397_v31 }
 0x15d   : > { %v2866_v20 = vadd.f32 %v2865_v5, %v8213_v55  ;;  %v2184_v21 = vsel %vm1401_vm5, %v2182_v36, %v2183_v24  ;;  %v1250_v5 = vrot.slane %v10079_v9, 7  ;;  %v10250_v36 = vshll.u32 %v7675_v0, 16  ;;  %v6835_v9 = vld [vmem:[#allocation2 + $0x70] sm:$0xff]  }
 0x15e   : > { %v2992_v2 = vpop.f32.mrf.mxu2 }
 0x15f   : > { %v8470_v54 = vpop.f32.mrf.mxu0  ;;  %v2993_v32 = vadd.f32 %v2992_v2, %v2864_v44 }
 0x161   : > { %v3398_v59 = vpop.f32.mrf.mxu3 }
 0x162   : > { %3574 = vmatmul.bf16.gmra.mxu0 %v8472_v60  ;;  %v3399_v41 = vadd.f32 %v3398_v59, %v2990_v16  ;;  %v8496_v59 = vld [vmem:[#allocation2 + $0x6c] sm:$0xff]  }
 0x163   : > { %v10081_v52 = vshrl.u32 %v8496_v59, 16 }
 0x164   : > { %v2868_v12 = vpop.f32.mrf.mxu1  ;;  %v8485_v14 = vadd.f32 %v8417_v15, %v3399_v41  ;;  %v10248_v41 = vshrl.u32 %v7453_v3, 16 }
 0x166   : > { %3440 = vmatmul.bf16.gmra.mxu3 %v3126_v49  ;;  %v2994_v16 = vpop.f32.mrf.mxu2  ;;  %v2185_v49 = vor.u32 %v2183_v24, %v10248_v41  ;;  %v10080_v24 = vshrl.u32 %v8494_v13, 16 }
 0x167   : > { %2907 = vmatmul.bf16.gmra.mxu1 %v7061_v17  ;;  %v8482_v31 = vpop.f32.mrf.mxu0  ;;  %v2995_v44 = vadd.f32 %v2994_v16, %v2866_v20  ;;  %v2869_v17 = vadd.f32 %v2868_v12, %v8236_v53  ;;  %v2465_v12 = vpack.c.b16 %v6582_v40, %v7415_v30 }
 0x169   : > { %v3401_v2 = vpop.f32.mrf.mxu3 }
 0x16a   : > { %v3402_v55 = vadd.f32 %v3401_v2, %v2993_v32  ;;  %v2188_v32 = vrot.slane %v10250_v36, 1  ;;  %v1257_v36 = vrot.slane %v10080_v24, 7 }
 0x16b   : > { %3036 = vmatmul.bf16.gmra.mxu2 %v2184_v21  ;;  %v1253_v21 = vor.u32 %v10082_v4, %v1250_v5  ;;  %v6539_v4 = vunpack.c.h.b16 %v6835_v9 }
 0x16c   : > { %v2870_v15 = vpop.f32.mrf.mxu1  ;;  %v8505_v20 = vadd.f32 %v8434_v56, %v3402_v55  ;;  %v8515_v2 = vsel %vm1401_vm5, %v2187_v43, %v2188_v32  ;;  %v2245_v56 = vsel %vm8047_vm8, %v2185_v49, 0  ;;  %v1265_v49 = vrot.slane %v10081_v52, 7 }
 0x16d   : > { %v1393_v41 = vsel %vm7325_vm4, 0, %v1253_v21  ;;  %v2340_v43 = vunpack.c.l.b16 %v8515_v2 }
 0x16e   : > { %v2997_v3 = vpop.f32.mrf.mxu2 }
 0x16f   : > { %v8508_v16 = vpop.f32.mrf.mxu0  ;;  %v2998_v45 = vadd.f32 %v2997_v3, %v2869_v17  ;;  %v10097_v17 = vshll.u32 %v8494_v13, 16  ;;  %v2338_v3 = vunpack.c.l.b16 %v2245_v56 }
 0x171   : > { %v3403_v53 = vpop.f32.mrf.mxu3  ;;  %v1260_v56 = vor.u32 %v10097_v17, %v1257_v36  ;;  %v2466_v24 = vpack.c.b16 %v2340_v43, %v2338_v3 }
 0x172   : > { %3579 = vmatmul.bf16.gmra.mxu0 %v6834_v37  ;;  %v3404_v55 = vadd.f32 %v3403_v53, %v2995_v44  ;;  %v10096_v37 = vshll.u32 %v8496_v59, 16  ;;  %v2871_v44 = vadd.f32 %v2870_v15, %v8253_v33 }
 0x173   : > { %v1261_v33 = vsel %vm1126_vm3, %v1250_v5, %v1260_v56 }
 0x174   : > { %v2873_v62 = vpop.f32.mrf.mxu1  ;;  %v8530_v30 = vadd.f32 %v8449_v1, %v3404_v55  ;;  %v1268_v52 = vor.u32 %v10096_v37, %v1265_v49  ;;  %v10251_v55 = vshrl.u32 %v7675_v0, 16 }
 0x175   : > { %v2874_v3 = vadd.f32 %v2873_v62, %v8278_v26  ;;  %v2342_v26 = vunpack.c.h.b16 %v8515_v2  ;;  %v6267_v2 = vld [vmem:[%s9948_s5 + $0x190] sm:$0xff] }
 0x176   : > { %3445 = vmatmul.bf16.gmra.mxu3 %v1393_v41  ;;  %v2999_v21 = vpop.f32.mrf.mxu2  ;;  %v1394_v15 = vsel %vm7325_vm4, 0, %v1268_v52  ;;  %v2190_v41 = vor.u32 %v2188_v32, %v10251_v55  ;;  %4787 = vmatpush.bf16.msra.mxu2 %v6267_v2 }
 0x177   : > { %2912 = vmatmul.bf16.gmra.mxu1 %v2465_v12  ;;  %v8533_v40 = vpop.f32.mrf.mxu0  ;;  %v3000_v53 = vadd.f32 %v2999_v21, %v2871_v44  ;;  %v8542_v12 = vpack.c.b16 %v6539_v4, %v6539_v4 }
 0x178   : > { %v2246_v4 = vsel %vm8047_vm8, %v2190_v41, 0 }
 0x179   : > { %v3406_v63 = vpop.f32.mrf.mxu3  ;;  %v10089_v21 = vshrl.u32 %v8542_v12, 16  ;;  %v2344_v62 = vunpack.c.l.b16 %v2246_v4  ;;  %v10090_v56 = vshll.u32 %v8542_v12, 16 }
 0x17a   : > { %v3407_v47 = vadd.f32 %v3406_v63, %v2998_v45  ;;  %v6583_v63 = vunpack.c.h.b16 %v7062_v7  ;;  %v1601_v45 = vunpack.c.l.b16 %v1261_v33 }
 0x17b   : > { %3041 = vmatmul.bf16.gmra.mxu2 %v2466_v24  ;;  %v1603_v24 = vunpack.c.l.b16 %v1394_v15  ;;  %v1272_v7 = vrot.slane %v10089_v21, 7 }
 0x17c   : > { %v2875_v1 = vpop.f32.mrf.mxu1  ;;  %v8547_v36 = vadd.f32 %v8470_v54, %v3407_v47  ;;  %v2468_v32 = vpack.c.b16 %v7650_v27, %v6583_v63 }
 0x17d   : > { %v3131_v54 = vpack.c.b16 %v1603_v24, %v1601_v45  ;;  %v2876_v55 = vadd.f32 %v2875_v1, %v8302_v34  ;;  %v6219_v45 = vld [vmem:[%s9948_s5 + $0x90] sm:$0xff] }
 0x17e   : > { %v3002_v44 = vpop.f32.mrf.mxu2  ;;  %v6283_v24 = vld [vmem:[%s9948_s5 + $0x210] sm:$0xff]  ;;  %3640 = vmatpush.bf16.msra.mxu1 %v6219_v45 }
 0x17f   : > { %v8550_v43 = vpop.f32.mrf.mxu0  ;;  %v3003_v5 = vadd.f32 %v3002_v44, %v2874_v3  ;;  %v2469_v3 = vpack.c.b16 %v2344_v62, %v2342_v26  ;;  %5045 = vmatpush.bf16.msra.mxu0 %v6283_v24  ;;  %v8587_v26 = vld [vmem:[#allocation2 + $0x78] sm:$0xff] }
 0x180   : > { %v10085_v24 = vshrl.u32 %v8587_v26, 16 }
 0x181   : > { %v3408_v0 = vpop.f32.mrf.mxu3 }
 0x182   : > { %3584 = vmatmul.bf16.gmra.mxu0 %v6835_v9  ;;  %v3409_v47 = vadd.f32 %v3408_v0, %v3000_v53  ;;  %v6275_v53 = vld [vmem:[%s9948_s5 + $0x1d0] sm:$0xff] }
 0x183   : > { %4916 = vmatpush.bf16.msra.mxu3 %v6275_v53  ;;  %v6836_v53 = vld [vmem:[#allocation2 + $0x80] sm:$0xff]  }
 0x184   : > { %v2878_v52 = vpop.f32.mrf.mxu1  ;;  %v8561_v33 = vadd.f32 %v8482_v31, %v3409_v47  ;;  %v1275_v31 = vor.u32 %v10090_v56, %v1272_v7  ;;  %v10252_v7 = vshll.u32 %v7731_v38, 16 }
 0x185   : > { %v2879_v0 = vadd.f32 %v2878_v52, %v8079_v10  ;;  %v10253_v10 = vshrl.u32 %v7731_v38, 16  ;;  %v10255_v38 = vshll.u32 %v7877_v46, 16 }
 0x186   : > { %3450 = vmatmul.bf16.gmra.mxu3 %v3131_v54  ;;  %v3004_v27 = vpop.f32.mrf.mxu2  ;;  %v1276_v44 = vsel %vm1126_vm3, %v1265_v49, %v1275_v31 }
 0x187   : > { %2917 = vmatmul.bf16.gmra.mxu1 %v2468_v32  ;;  %v8564_v9 = vpop.f32.mrf.mxu0  ;;  %v3005_v41 = vadd.f32 %v3004_v27, %v2876_v55  ;;  %v1605_v32 = vunpack.c.h.b16 %v1394_v15  ;;  %v1607_v47 = vunpack.c.l.b16 %v1276_v44  ;;  %v2191_v55 = vrot.slane %v10252_v7, 1 }
 0x188   : > { %v10254_v15 = vshll.u32 %v7852_v6, 16  ;;  %v6542_v44 = vunpack.c.l.b16 %v6836_v53  ;;  %v10088_v7 = vshll.u32 %v8587_v26, 16 }
 0x189   : > { %v3411_v34 = vpop.f32.mrf.mxu3  ;;  %v3134_v2 = vpack.c.b16 %v1607_v47, %v1605_v32  ;;  %v2192_v52 = vor.u32 %v2191_v55, %v10253_v10  ;;  %v2196_v32 = vrot.slane %v10255_v38, 1  ;;  %v10257_v10 = vshrl.u32 %v7877_v46, 16 }
 0x18a   : > { %v3412_v1 = vadd.f32 %v3411_v34, %v3003_v5  ;;  %v7063_v34 = vld [vmem:[#allocation2 + $0x84] sm:$0xff]  ;;  %v8609_v55 = vpack.c.b16 %v6542_v44, %v6542_v44  ;;  %v7064_v44 = vld [vmem:[#allocation2 + $0x90] sm:$0xff] }
 0x18b   : > { %3046 = vmatmul.bf16.gmra.mxu2 %v2469_v3  ;;  %v2193_v3 = vrot.slane %v10254_v15, 1  ;;  %v2197_v15 = vor.u32 %v2196_v32, %v10257_v10  ;;  %v6586_v38 = vunpack.c.l.b16 %v7064_v44 }
 0x18c   : > { %v2880_v63 = vpop.f32.mrf.mxu1  ;;  %v8582_v4 = vadd.f32 %v8508_v16, %v3412_v1 }
 0x18d   : > { %v2881_v31 = vadd.f32 %v2880_v63, %v8093_v48  ;;  %v2194_v47 = vsel %vm1401_vm5, %v2192_v52, %v2193_v3  ;;  %v1280_v63 = vrot.slane %v10085_v24, 7  ;;  %v10258_v52 = vshll.u32 %v7952_v58, 16  ;;  %v6837_v24 = vld [vmem:[#allocation2 + $0x88] sm:$0xff]  }
 0x18e   : > { %v3007_v54 = vpop.f32.mrf.mxu2 }
 0x18f   : > { %v8585_v5 = vpop.f32.mrf.mxu0  ;;  %v3008_v62 = vadd.f32 %v3007_v54, %v2879_v0 }
 0x191   : > { %v3413_v49 = vpop.f32.mrf.mxu3 }
 0x192   : > { %3589 = vmatmul.bf16.gmra.mxu0 %v8587_v26  ;;  %v3414_v27 = vadd.f32 %v3413_v49, %v3005_v41  ;;  %v8611_v49 = vld [vmem:[#allocation2 + $0x84] sm:$0xff]  }
 0x193   : > { %v10087_v32 = vshrl.u32 %v8611_v49, 16 }
 0x194   : > { %v2883_v16 = vpop.f32.mrf.mxu1  ;;  %v8600_v45 = vadd.f32 %v8533_v40, %v3414_v27  ;;  %v10256_v27 = vshrl.u32 %v7852_v6, 16 }
 0x196   : > { %3455 = vmatmul.bf16.gmra.mxu3 %v3134_v2  ;;  %v3009_v41 = vpop.f32.mrf.mxu2  ;;  %v2195_v2 = vor.u32 %v2193_v3, %v10256_v27  ;;  %v10086_v3 = vshrl.u32 %v8609_v55, 16 }
 0x197   : > { %2922 = vmatmul.bf16.gmra.mxu1 %v7063_v34  ;;  %v8597_v1 = vpop.f32.mrf.mxu0  ;;  %v3010_v0 = vadd.f32 %v3009_v41, %v2881_v31  ;;  %v2884_v34 = vadd.f32 %v2883_v16, %v8116_v28  ;;  %v2473_v16 = vpack.c.b16 %v6586_v38, %v7837_v18 }
 0x199   : > { %v3416_v54 = vpop.f32.mrf.mxu3 }
 0x19a   : > { %v3417_v48 = vadd.f32 %v3416_v54, %v3008_v62  ;;  %v2198_v62 = vrot.slane %v10258_v52, 1  ;;  %v1287_v52 = vrot.slane %v10086_v3, 7 }
 0x19b   : > { %3051 = vmatmul.bf16.gmra.mxu2 %v2194_v47  ;;  %v1283_v47 = vor.u32 %v10088_v7, %v1280_v63  ;;  %v6547_v7 = vunpack.c.h.b16 %v6837_v24 }
 0x19c   : > { %v2885_v40 = vpop.f32.mrf.mxu1  ;;  %v8620_v31 = vadd.f32 %v8550_v43, %v3417_v48  ;;  %v8630_v54 = vsel %vm1401_vm5, %v2197_v15, %v2198_v62  ;;  %v2247_v43 = vsel %vm8047_vm8, %v2195_v2, 0  ;;  %v1295_v2 = vrot.slane %v10087_v32, 7 }
 0x19d   : > { %v1395_v27 = vsel %vm7325_vm4, 0, %v1283_v47  ;;  %v2352_v15 = vunpack.c.l.b16 %v8630_v54 }
 0x19e   : > { %10259 = vst [vmem:[#allocation62_spill] sm:$0xff] %v8620_v31  ;;  %v3012_v6 = vpop.f32.mrf.mxu2  ;;  %v10334_v31 = vld [vmem:[#allocation18_spill] sm:$0xff] }
 0x19f   : > { %v8623_v41 = vpop.f32.mrf.mxu0  ;;  %v3013_v46 = vadd.f32 %v3012_v6, %v2884_v34  ;;  %v10095_v34 = vshll.u32 %v8609_v55, 16  ;;  %v2350_v6 = vunpack.c.l.b16 %v2247_v43 }
 0x1a1   : > { %v3418_v28 = vpop.f32.mrf.mxu3  ;;  %v1290_v43 = vor.u32 %v10095_v34, %v1287_v52  ;;  %v2474_v3 = vpack.c.b16 %v2352_v15, %v2350_v6 }
 0x1a2   : > { %3594 = vmatmul.bf16.gmra.mxu0 %v6836_v53  ;;  %v3419_v48 = vadd.f32 %v3418_v28, %v3010_v0  ;;  %v10093_v53 = vshll.u32 %v8611_v49, 16  ;;  %v2886_v0 = vadd.f32 %v2885_v40, %v8138_v51 }
 0x1a3   : > { %v1291_v51 = vsel %vm1126_vm3, %v1280_v63, %v1290_v43 }
 0x1a4   : > { %v2888_v10 = vpop.f32.mrf.mxu1  ;;  %v8645_v18 = vadd.f32 %v8564_v9, %v3419_v48  ;;  %v1298_v32 = vor.u32 %v10093_v53, %v1295_v2  ;;  %v10262_v48 = vshrl.u32 %v7952_v58, 16 }
 0x1a5   : > { %v2889_v6 = vadd.f32 %v2888_v10, %v8170_v50  ;;  %v2354_v50 = vunpack.c.h.b16 %v8630_v54  ;;  %v6266_v54 = vld [vmem:[%s9948_s5 + $0x188] sm:$0xff] }
 0x1a6   : > { %10260 = vst [vmem:[#allocation63_spill] sm:$0xff] %v8645_v18  ;;  %3460 = vmatmul.bf16.gmra.mxu3 %v1395_v27  ;;  %v3014_v47 = vpop.f32.mrf.mxu2  ;;  %v1396_v40 = vsel %vm7325_vm4, 0, %v1298_v32  ;;  %v2200_v27 = vor.u32 %v2198_v62, %v10262_v48  ;;  %v10264_v62 = vld [vmem:[#allocation15_spill] sm:$0xff]  ;;  %4788 = vmatpush.bf16.msra.mxu2 %v6266_v54 }
 0x1a7   : > { %2927 = vmatmul.bf16.gmra.mxu1 %v2473_v16  ;;  %v8648_v38 = vpop.f32.mrf.mxu0  ;;  %v3015_v28 = vadd.f32 %v3014_v47, %v2886_v0  ;;  %v8657_v16 = vpack.c.b16 %v6547_v7, %v6547_v7 }
 0x1a8   : > { %v2248_v7 = vsel %vm8047_vm8, %v2200_v27, 0 }
 0x1a9   : > { %v3421_v21 = vpop.f32.mrf.mxu3  ;;  %10261 = vst [vmem:[#allocation64_spill] sm:$0xff] %v8657_v16  ;;  %v10091_v47 = vshrl.u32 %v8657_v16, 16  ;;  %v2356_v10 = vunpack.c.l.b16 %v2248_v7  ;;  %v6282_v7 = vld [vmem:[%s9948_s5 + $0x208] sm:$0xff] }
 0x1aa   : > { %v3422_v56 = vadd.f32 %v3421_v21, %v3013_v46  ;;  %v6587_v21 = vunpack.c.h.b16 %v7064_v44  ;;  %v1613_v46 = vunpack.c.l.b16 %v1291_v51  ;;  %v10092_v51 = vshll.u32 %v8657_v16, 16  ;;  %5046 = vmatpush.bf16.msra.mxu0 %v6282_v7 }
 0x1ab   : > { %3056 = vmatmul.bf16.gmra.mxu2 %v2474_v3  ;;  %v1615_v3 = vunpack.c.l.b16 %v1396_v40  ;;  %v1302_v44 = vrot.slane %v10091_v47, 7  ;;  %v7065_v47 = vld [vmem:[#allocation2 + $0x9c] sm:$0xff] }
 0x1ac   : > { %v2890_v9 = vpop.f32.mrf.mxu1  ;;  %v8662_v52 = vadd.f32 %v8585_v5, %v3422_v56  ;;  %v2476_v32 = vpack.c.b16 %v10264_v62, %v6587_v21 }
 0x1ad   : > { %v3139_v5 = vpack.c.b16 %v1615_v3, %v1613_v46  ;;  %v2891_v27 = vadd.f32 %v2890_v9, %v8188_v25  ;;  %v2477_v46 = vpack.c.b16 %v2356_v10, %v2354_v50 }
 0x1ae   : > { %10263 = vst [vmem:[#allocation65_spill] sm:$0xff] %v8662_v52  ;;  %v3017_v0 = vpop.f32.mrf.mxu2 }
 0x1af   : > { %v8665_v15 = vpop.f32.mrf.mxu0  ;;  %v3018_v63 = vadd.f32 %v3017_v0, %v2889_v6  ;;  %v6274_v6 = vld [vmem:[%s9948_s5 + $0x1c8] sm:$0xff] }
 0x1b0   : > { %4917 = vmatpush.bf16.msra.mxu3 %v6274_v6  ;;  %v6218_v0 = vld [vmem:[%s9948_s5 + $0x88] sm:$0xff] }
 0x1b1   : > { %v3423_v58 = vpop.f32.mrf.mxu3  ;;  %3641 = vmatpush.bf16.msra.mxu1 %v6218_v0  ;;  %v10272_v0 = vld [vmem:[#allocation7_spill] sm:$0xff] }
 0x1b2   : > { %3599 = vmatmul.bf16.gmra.mxu0 %v6837_v24  ;;  %v3424_v56 = vadd.f32 %v3423_v58, %v3015_v28 }
 0x1b4   : > { %v2893_v43 = vpop.f32.mrf.mxu1  ;;  %v8676_v48 = vadd.f32 %v8597_v1, %v3424_v56  ;;  %v1305_v1 = vor.u32 %v10092_v51, %v1302_v44  ;;  %v8702_v44 = vld [vmem:[#allocation2 + $0x90] sm:$0xff] }
 0x1b6   : > { %10265 = vst [vmem:[#allocation15_spill] sm:$0xff] %v8676_v48  ;;  %3465 = vmatmul.bf16.gmra.mxu3 %v3139_v5  ;;  %v3019_v28 = vpop.f32.mrf.mxu2  ;;  %v1306_v58 = vsel %vm1126_vm3, %v1295_v2, %v1305_v1  ;;  %v1617_v5 = vunpack.c.h.b16 %v1396_v40  ;;  %v10273_v40 = vshll.u32 %v10272_v0, 16 }
 0x1b7   : > { %2932 = vmatmul.bf16.gmra.mxu1 %v2476_v32  ;;  %v8679_v24 = vpop.f32.mrf.mxu0  ;;  %v3020_v21 = vadd.f32 %v3019_v28, %v2891_v27  ;;  %v10267_v32 = vld [vmem:[#allocation36_spill] sm:$0xff]  ;;  %v1619_v50 = vunpack.c.l.b16 %v1306_v58  ;;  %v10269_v28 = vld [vmem:[#allocation5_spill] sm:$0xff]  ;;  %v10274_v58 = vld [vmem:[#allocation39_spill] sm:$0xff] }
 0x1b8   : > { %v2894_v56 = vadd.f32 %v2893_v43, %v10267_v32  ;;  %10268 = vst [vmem:[#allocation36_spill] sm:$0xff] %v8702_v44  ;;  %v10270_v54 = vshll.u32 %v10269_v28, 16  ;;  %v10271_v43 = vshrl.u32 %v10269_v28, 16  ;;  %v2203_v7 = vrot.slane %v10273_v40, 1  ;;  %v10276_v28 = vld [vmem:[#allocation8_spill] sm:$0xff] }
 0x1b9   : > { %v3426_v25 = vpop.f32.mrf.mxu3  ;;  %v3142_v1 = vpack.c.b16 %v1619_v50, %v1617_v5  ;;  %v10094_v5 = vshrl.u32 %v8702_v44, 16 }
 0x1ba   : > { %v3427_v9 = vadd.f32 %v3426_v25, %v3018_v63  ;;  %v2201_v6 = vrot.slane %v10270_v54, 1  ;;  %v6838_v25 = vld [vmem:[#allocation2 + $0x98] sm:$0xff]  }
 0x1bb   : > { %3061 = vmatmul.bf16.gmra.mxu2 %v2477_v46  ;;  %v6550_v50 = vunpack.c.l.b16 %v6838_v25 }
 0x1bc   : > { %v2895_v3 = vpop.f32.mrf.mxu1  ;;  %v8697_v62 = vadd.f32 %v8623_v41, %v3427_v9  ;;  %v2202_v9 = vor.u32 %v2201_v6, %v10271_v43  ;;  %v10277_v6 = vshll.u32 %v10276_v28, 16 }
 0x1bd   : > { %v2896_v32 = vadd.f32 %v2895_v3, %v10274_v58  ;;  %v10098_v58 = vshll.u32 %v8702_v44, 16 }
 0x1be   : > { %10266 = vst [vmem:[#allocation66_spill] sm:$0xff] %v8697_v62  ;;  %v3022_v10 = vpop.f32.mrf.mxu2  ;;  %v2204_v43 = vsel %vm1401_vm5, %v2202_v9, %v2203_v7  ;;  %v10282_v9 = vld [vmem:[#allocation10_spill] sm:$0xff] }
 0x1bf   : > { %v8700_v63 = vpop.f32.mrf.mxu0  ;;  %v3023_v27 = vadd.f32 %v3022_v10, %v2894_v56  ;;  %v10283_v53 = vshll.u32 %v10282_v9, 16 }
 0x1c1   : > { %v3428_v2 = vpop.f32.mrf.mxu3 }
 0x1c2   : > { %3604 = vmatmul.bf16.gmra.mxu0 %v8702_v44  ;;  %v3429_v46 = vadd.f32 %v3428_v2, %v3020_v21  ;;  %v2206_v2 = vrot.slane %v10277_v6, 1  ;;  %v10281_v6 = vshrl.u32 %v10276_v28, 16 }
 0x1c4   : > { %v2898_v41 = vpop.f32.mrf.mxu1  ;;  %v8715_v10 = vadd.f32 %v8648_v38, %v3429_v46  ;;  %v8724_v46 = vpack.c.b16 %v6550_v50, %v6550_v50  ;;  %v2207_v51 = vor.u32 %v2206_v2, %v10281_v6  ;;  %v7066_v50 = vld [vmem:[#allocation2 + $0xa8] sm:$0xff] }
 0x1c6   : > { %10275 = vst [vmem:[#allocation5_spill] sm:$0xff] %v8715_v10  ;;  %3470 = vmatmul.bf16.gmra.mxu3 %v3142_v1  ;;  %v3024_v21 = vpop.f32.mrf.mxu2  ;;  %v8726_v1 = vld [vmem:[#allocation2 + $0x9c] sm:$0xff]   ;;  %v6555_v10 = vunpack.c.h.b16 %v6839_v57 }
 0x1c7   : > { %2937 = vmatmul.bf16.gmra.mxu1 %v7065_v47  ;;  %v8712_v56 = vpop.f32.mrf.mxu0  ;;  %v3025_v54 = vadd.f32 %v3024_v21, %v2896_v32  ;;  %v1310_v47 = vrot.slane %v10094_v5, 7  ;;  %10278 = vst [vmem:[#allocation7_spill] sm:$0xff] %v8724_v46  ;;  %v10280_v32 = vshrl.u32 %v10272_v0, 16  ;;  %v10285_v5 = vld [vmem:[#allocation43_spill] sm:$0xff]  ;;  %v10102_v2 = vshrl.u32 %v8726_v1, 16 }
 0x1c8   : > { %10279 = vst [vmem:[#allocation39_spill] sm:$0xff] %v8726_v1  ;;  %v2899_v34 = vadd.f32 %v2898_v41, %v10285_v5  ;;  %v10286_v5 = vld [vmem:[#allocation6_spill] sm:$0xff] }
 0x1c9   : > { %v3431_v40 = vpop.f32.mrf.mxu3  ;;  %v2205_v21 = vor.u32 %v2203_v7, %v10280_v32  ;;  %v1313_v17 = vor.u32 %v10098_v58, %v1310_v47  ;;  %v10101_v7 = vshrl.u32 %v8724_v46, 16 }
 0x1ca   : > { %v3432_v3 = vadd.f32 %v3431_v40, %v3023_v27  ;;  %v2208_v27 = vrot.slane %v10283_v53, 1 }
 0x1cb   : > { %3066 = vmatmul.bf16.gmra.mxu2 %v2204_v43  ;;  %v6590_v43 = vunpack.c.l.b16 %v7066_v50  ;;  %v1397_v6 = vsel %vm7325_vm4, 0, %v1313_v17 }
 0x1cc   : > { %v2900_v38 = vpop.f32.mrf.mxu1  ;;  %v8735_v40 = vadd.f32 %v8665_v15, %v3432_v3  ;;  %v8745_v53 = vsel %vm1401_vm5, %v2207_v51, %v2208_v27  ;;  %v2249_v15 = vsel %vm8047_vm8, %v2205_v21, 0  ;;  %v1325_v21 = vrot.slane %v10102_v2, 7 }
 0x1cd   : > { %v2481_v3 = vpack.c.b16 %v6590_v43, %v10286_v5  ;;  %v2362_v42 = vunpack.c.l.b16 %v2249_v15  ;;  %v2364_v51 = vunpack.c.l.b16 %v8745_v53  ;;  %v10288_v43 = vld [vmem:[#allocation45_spill] sm:$0xff] }
 0x1ce   : > { %10284 = vst [vmem:[#allocation8_spill] sm:$0xff] %v8735_v40  ;;  %v3027_v0 = vpop.f32.mrf.mxu2  ;;  %v2901_v17 = vadd.f32 %v2900_v38, %v10288_v43 }
 0x1cf   : > { %v8738_v37 = vpop.f32.mrf.mxu0  ;;  %v3028_v28 = vadd.f32 %v3027_v0, %v2899_v34  ;;  %v1317_v34 = vrot.slane %v10101_v7, 7  ;;  %v10108_v0 = vshll.u32 %v8724_v46, 16  ;;  %v2482_v40 = vpack.c.b16 %v2364_v51, %v2362_v42  ;;  %v10292_v51 = vld [vmem:[#allocation50_spill] sm:$0xff] }
 0x1d1   : > { %v3433_v41 = vpop.f32.mrf.mxu3  ;;  %v1320_v15 = vor.u32 %v10108_v0, %v1317_v34 }
 0x1d2   : > { %3609 = vmatmul.bf16.gmra.mxu0 %v6838_v25  ;;  %v3434_v32 = vadd.f32 %v3433_v41, %v3025_v54  ;;  %v10107_v25 = vshll.u32 %v8726_v1, 16 }
 0x1d3   : > { %v1321_v38 = vsel %vm1126_vm3, %v1310_v47, %v1320_v15 }
 0x1d4   : > { %v2903_v58 = vpop.f32.mrf.mxu1  ;;  %v8760_v54 = vadd.f32 %v8679_v24, %v3434_v32  ;;  %v1328_v2 = vor.u32 %v10107_v25, %v1325_v21  ;;  %v8772_v32 = vpack.c.b16 %v6555_v10, %v6555_v10  ;;  %v7067_v25 = vld [vmem:[#allocation2 + $0xb4] sm:$0xff] }
 0x1d5   : > { %v2904_v43 = vadd.f32 %v2903_v58, %v10292_v51  ;;  %v2366_v58 = vunpack.c.h.b16 %v8745_v53  ;;  %v6265_v53 = vld [vmem:[%s9948_s5 + $0x180] sm:$0xff] }
 0x1d6   : > { %10287 = vst [vmem:[#allocation10_spill] sm:$0xff] %v8760_v54  ;;  %3475 = vmatmul.bf16.gmra.mxu3 %v1397_v6  ;;  %v3029_v5 = vpop.f32.mrf.mxu2  ;;  %v10290_v6 = vshrl.u32 %v10282_v9, 16  ;;  %v10105_v15 = vshrl.u32 %v8772_v32, 16  ;;  %4789 = vmatpush.bf16.msra.mxu2 %v6265_v53 }
 0x1d7   : > { %2942 = vmatmul.bf16.gmra.mxu1 %v2481_v3  ;;  %v8763_v41 = vpop.f32.mrf.mxu0  ;;  %v3030_v7 = vadd.f32 %v3029_v5, %v2901_v17  ;;  %v1398_v3 = vsel %vm7325_vm4, 0, %v1328_v2  ;;  %10289 = vst [vmem:[#allocation43_spill] sm:$0xff] %v8772_v32 }
 0x1d8   : > { %v2210_v34 = vor.u32 %v2208_v27, %v10290_v6  ;;  %v10293_v27 = vld [vmem:[#allocation9_spill] sm:$0xff] }
 0x1d9   : > { %v3436_v62 = vpop.f32.mrf.mxu3 }
 0x1da   : > { %v3437_v44 = vadd.f32 %v3436_v62, %v3028_v28  ;;  %v6591_v62 = vunpack.c.h.b16 %v7066_v50  ;;  %v1625_v28 = vunpack.c.l.b16 %v1321_v38  ;;  %v2250_v10 = vsel %vm8047_vm8, %v2210_v34, 0 }
 0x1db   : > { %3071 = vmatmul.bf16.gmra.mxu2 %v2482_v40  ;;  %v1627_v40 = vunpack.c.l.b16 %v1398_v3  ;;  %v2368_v51 = vunpack.c.l.b16 %v2250_v10  ;;  %v1332_v50 = vrot.slane %v10105_v15, 7  ;;  %v10106_v38 = vshll.u32 %v8772_v32, 16  ;;  %v10304_v15 = vld [vmem:[#allocation25_spill] sm:$0xff] }
 0x1dc   : > { %v2905_v24 = vpop.f32.mrf.mxu1  ;;  %v8777_v42 = vadd.f32 %v8700_v63, %v3437_v44  ;;  %v2484_v2 = vpack.c.b16 %v10293_v27, %v6591_v62  ;;  %v6273_v62 = vld [vmem:[%s9948_s5 + $0x1c0] sm:$0xff] }
 0x1dd   : > { %v3147_v44 = vpack.c.b16 %v1627_v40, %v1625_v28  ;;  %v2485_v40 = vpack.c.b16 %v2368_v51, %v2366_v58  ;;  %4918 = vmatpush.bf16.msra.mxu3 %v6273_v62  ;;  %v6217_v27 = vld [vmem:[%s9948_s5 + $0x80] sm:$0xff]  ;;  %v10297_v58 = vld [vmem:[#allocation22_spill] sm:$0xff]  ;;  %v10299_v62 = vld [vmem:[#allocation11_spill] sm:$0xff] }
 0x1de   : > { %10291 = vst [vmem:[#allocation6_spill] sm:$0xff] %v8777_v42  ;;  %v3032_v5 = vpop.f32.mrf.mxu2  ;;  %3642 = vmatpush.bf16.msra.mxu1 %v6217_v27 }
 0x1df   : > { %v8780_v17 = vpop.f32.mrf.mxu0  ;;  %v3033_v47 = vadd.f32 %v3032_v5, %v2904_v43  ;;  %v10295_v5 = vld [vmem:[#allocation53_spill] sm:$0xff] }
 0x1e0   : > { %v2906_v34 = vadd.f32 %v2905_v24, %v10295_v5 }
 0x1e1   : > { %v3438_v9 = vpop.f32.mrf.mxu3 }
 0x1e2   : > { %3614 = vmatmul.bf16.gmra.mxu0 %v6839_v57  ;;  %v3439_v63 = vadd.f32 %v3438_v9, %v3030_v7 }
 0x1e4   : > { %v2908_v6 = vpop.f32.mrf.mxu1  ;;  %v8791_v43 = vadd.f32 %v8712_v56, %v3439_v63  ;;  %v1335_v56 = vor.u32 %v10106_v38, %v1332_v50  ;;  %v1629_v50 = vunpack.c.h.b16 %v1398_v3 }
 0x1e5   : > { %v2909_v51 = vadd.f32 %v2908_v6, %v10297_v58  ;;  %v10301_v6 = vshrl.u32 %v10299_v62, 16  ;;  %v10302_v58 = vld [vmem:[#allocation13_spill] sm:$0xff] }
 0x1e6   : > { %10294 = vst [vmem:[#allocation45_spill] sm:$0xff] %v8791_v43  ;;  %3480 = vmatmul.bf16.gmra.mxu3 %v3147_v44  ;;  %v3034_v7 = vpop.f32.mrf.mxu2  ;;  %v1336_v63 = vsel %vm1126_vm3, %v1325_v21, %v1335_v56  ;;  %v10303_v3 = vshll.u32 %v10302_v58, 16 }
 0x1e7   : > { %2947 = vmatmul.bf16.gmra.mxu1 %v2484_v2  ;;  %v8794_v57 = vpop.f32.mrf.mxu0  ;;  %v3035_v28 = vadd.f32 %v3034_v7, %v2906_v34  ;;  %v6281_v2 = vld [vmem:[%s9948_s5 + $0x200] sm:$0xff]  ;;  %v1631_v5 = vunpack.c.l.b16 %v1336_v63  ;;  %v8817_v7 = vld [vmem:[#allocation2 + $0xa8] sm:$0xff] }
 0x1e8   : > { %5047 = vmatpush.bf16.msra.mxu0 %v6281_v2  ;;  %10298 = vst [vmem:[#allocation9_spill] sm:$0xff] %v8817_v7  ;;  %v2213_v63 = vrot.slane %v10303_v3, 1  ;;  %v10316_v43 = vshll.u32 %v8817_v7, 16 }
 0x1e9   : > { %v3441_v24 = vpop.f32.mrf.mxu3  ;;  %v3150_v27 = vpack.c.b16 %v1631_v5, %v1629_v50  ;;  %v10109_v50 = vshrl.u32 %v8817_v7, 16 }
 0x1ea   : > { %v3442_v10 = vadd.f32 %v3441_v24, %v3033_v47  ;;  %v10300_v24 = vshll.u32 %v10299_v62, 16  ;;  %v10306_v62 = vld [vmem:[#allocation14_spill] sm:$0xff] }
 0x1eb   : > { %3076 = vmatmul.bf16.gmra.mxu2 %v2485_v40 }
 0x1ec   : > { %v2910_v9 = vpop.f32.mrf.mxu1  ;;  %v8812_v44 = vadd.f32 %v8738_v37, %v3442_v10  ;;  %v2211_v40 = vrot.slane %v10300_v24, 1  ;;  %v6840_v10 = vld [vmem:[#allocation2 + $0xb0] sm:$0xff]  }
 0x1ed   : > { %v2911_v38 = vadd.f32 %v2910_v9, %v10304_v15  ;;  %v6558_v5 = vunpack.c.l.b16 %v6840_v10 }
 0x1ee   : > { %10296 = vst [vmem:[#allocation50_spill] sm:$0xff] %v8812_v44  ;;  %v3037_v34 = vpop.f32.mrf.mxu2  ;;  %v2212_v2 = vor.u32 %v2211_v40, %v10301_v6  ;;  %v10307_v40 = vshll.u32 %v10306_v62, 16 }
 0x1ef   : > { %v8815_v47 = vpop.f32.mrf.mxu0  ;;  %v3038_v53 = vadd.f32 %v3037_v34, %v2909_v51 }
 0x1f0   : > { %v2214_v6 = vsel %vm1401_vm5, %v2212_v2, %v2213_v63  ;;  %v10312_v2 = vld [vmem:[#allocation17_spill] sm:$0xff] }
 0x1f1   : > { %v3443_v21 = vpop.f32.mrf.mxu3 }
 0x1f2   : > { %3619 = vmatmul.bf16.gmra.mxu0 %v8817_v7  ;;  %v3444_v56 = vadd.f32 %v3443_v21, %v3035_v28  ;;  %v2216_v21 = vrot.slane %v10307_v40, 1  ;;  %v10311_v40 = vshrl.u32 %v10306_v62, 16 }
 0x1f4   : > { %v2913_v37 = vpop.f32.mrf.mxu1  ;;  %v8830_v34 = vadd.f32 %v8763_v41, %v3444_v56  ;;  %v8839_v56 = vpack.c.b16 %v6558_v5, %v6558_v5  ;;  %v2217_v0 = vor.u32 %v2216_v21, %v10311_v40  ;;  %v7068_v5 = vld [vmem:[#allocation2 + $0xc0] sm:$0xff] }
 0x1f6   : > { %10305 = vst [vmem:[#allocation53_spill] sm:$0xff] %v8830_v34  ;;  %3485 = vmatmul.bf16.gmra.mxu3 %v3150_v27  ;;  %v3039_v28 = vpop.f32.mrf.mxu2  ;;  %v8841_v27 = vld [vmem:[#allocation2 + $0xb4] sm:$0xff]   ;;  %v10313_v34 = vshll.u32 %v10312_v2, 16 }
 0x1f7   : > { %2952 = vmatmul.bf16.gmra.mxu1 %v7067_v25  ;;  %v8827_v51 = vpop.f32.mrf.mxu0  ;;  %v3040_v24 = vadd.f32 %v3039_v28, %v2911_v38  ;;  %v1340_v25 = vrot.slane %v10109_v50, 7  ;;  %10308 = vst [vmem:[#allocation22_spill] sm:$0xff] %v8839_v56  ;;  %v10310_v38 = vshrl.u32 %v10302_v58, 16  ;;  %v10315_v50 = vld [vmem:[#allocation27_spill] sm:$0xff] }
 0x1f8   : > { %10309 = vst [vmem:[#allocation11_spill] sm:$0xff] %v8841_v27  ;;  %v2914_v9 = vadd.f32 %v2913_v37, %v10315_v50  ;;  %v10317_v50 = vld [vmem:[#allocation12_spill] sm:$0xff] }
 0x1f9   : > { %v3446_v3 = vpop.f32.mrf.mxu3  ;;  %v2215_v28 = vor.u32 %v2213_v63, %v10310_v38  ;;  %v1343_v42 = vor.u32 %v10316_v43, %v1340_v25  ;;  %v10110_v63 = vshrl.u32 %v8839_v56, 16 }
 0x1fa   : > { %v3447_v15 = vadd.f32 %v3446_v3, %v3038_v53  ;;  %v2218_v53 = vrot.slane %v10313_v34, 1 }
 0x1fb   : > { %3081 = vmatmul.bf16.gmra.mxu2 %v2214_v6  ;;  %v6594_v6 = vunpack.c.l.b16 %v7068_v5  ;;  %v1399_v43 = vsel %vm7325_vm4, 0, %v1343_v42  ;;  %v10320_v42 = vld [vmem:[#allocation31_spill] sm:$0xff] }
 0x1fc   : > { %v2915_v41 = vpop.f32.mrf.mxu1  ;;  %v8850_v3 = vadd.f32 %v8780_v17, %v3447_v15  ;;  %v8860_v34 = vsel %vm1401_vm5, %v2217_v0, %v2218_v53  ;;  %v2251_v17 = vsel %vm8047_vm8, %v2215_v28, 0 }
 0x1fd   : > { %v2489_v15 = vpack.c.b16 %v6594_v6, %v10317_v50  ;;  %v2374_v21 = vunpack.c.l.b16 %v2251_v17  ;;  %v2376_v0 = vunpack.c.l.b16 %v8860_v34  ;;  %v6841_v6 = vld [vmem:[#allocation2 + $0xb8] sm:$0xff]  }
 0x1fe   : > { %10314 = vst [vmem:[#allocation13_spill] sm:$0xff] %v8850_v3  ;;  %v3042_v58 = vpop.f32.mrf.mxu2  ;;  %v10318_v3 = vshrl.u32 %v8841_v27, 16  ;;  %v6563_v32 = vunpack.c.h.b16 %v6841_v6 }
 0x1ff   : > { %v8853_v44 = vpop.f32.mrf.mxu0  ;;  %v3043_v62 = vadd.f32 %v3042_v58, %v2914_v9  ;;  %v1347_v9 = vrot.slane %v10110_v63, 7  ;;  %v10118_v58 = vshll.u32 %v8839_v56, 16  ;;  %v2490_v54 = vpack.c.b16 %v2376_v0, %v2374_v21 }
 0x200   : > { %v8873_v28 = vrot.slane %v10318_v3, 7 }
 0x201   : > { %v3448_v37 = vpop.f32.mrf.mxu3  ;;  %v1350_v17 = vor.u32 %v10118_v58, %v1347_v9  ;;  %v8896_v9 = vld [vmem:[#allocation2 + $0x20] sm:$0xff]  }
 0x202   : > { %3624 = vmatmul.bf16.gmra.mxu0 %v6840_v10  ;;  %v3449_v38 = vadd.f32 %v3448_v37, %v3040_v24  ;;  %v10117_v10 = vshll.u32 %v8841_v27, 16  ;;  %v2916_v37 = vadd.f32 %v2915_v41, %v10320_v42  ;;  %v10324_v42 = vld [vmem:[#allocation34_spill] sm:$0xff]  ;;  %v10330_v27 = vld [vmem:[#allocation20_spill] sm:$0xff] }
 0x203   : > { %v1351_v41 = vsel %vm1126_vm3, %v1340_v25, %v1350_v17  ;;  %v8904_v25 = vld [vmem:[#allocation2 + $0x18] sm:$0xff]  ;;  %v10331_v56 = vshll.u32 %v10330_v27, 16 }
 0x204   : > { %v2918_v40 = vpop.f32.mrf.mxu1  ;;  %v8877_v24 = vadd.f32 %v8794_v57, %v3449_v38  ;;  %v1358_v3 = vor.u32 %v10117_v10, %v8873_v28  ;;  %v1637_v17 = vunpack.c.l.b16 %v1351_v41 }
 0x206   : > { %10319 = vst [vmem:[#allocation25_spill] sm:$0xff] %v8877_v24  ;;  %3490 = vmatmul.bf16.gmra.mxu3 %v1399_v43  ;;  %v3044_v63 = vpop.f32.mrf.mxu2  ;;  %v8892_v43 = vpack.c.b16 %v6563_v32, %v6563_v32 }
 0x207   : > { %2957 = vmatmul.bf16.gmra.mxu1 %v2489_v15  ;;  %v8880_v50 = vpop.f32.mrf.mxu0  ;;  %v3045_v7 = vadd.f32 %v3044_v63, %v2916_v37  ;;  %v8890_v15 = vsel %vm7325_vm4, 0, %v1358_v3  ;;  %v10322_v63 = vshrl.u32 %v10312_v2, 16  ;;  %v6598_v37 = vunpack.c.l.b16 %v8896_v9 }
 0x208   : > { %10321 = vst [vmem:[#allocation14_spill] sm:$0xff] %v8892_v43  ;;  %v1639_v32 = vunpack.c.l.b16 %v8890_v15 }
 0x209   : > { %v3451_v1 = vpop.f32.mrf.mxu3  ;;  %v2220_v21 = vor.u32 %v2218_v53, %v10322_v63  ;;  %v10119_v53 = vshrl.u32 %v8892_v43, 16 }
 0x20a   : > { %v3452_v57 = vadd.f32 %v3451_v1, %v3043_v62  ;;  %v2919_v1 = vadd.f32 %v2918_v40, %v10324_v42  ;;  %v10325_v40 = vld [vmem:[#allocation16_spill] sm:$0xff]  ;;  %v8913_v42 = vpack.c.b16 %v6598_v37, %v6598_v37  ;;  %v3155_v58 = vpack.c.b16 %v1639_v32, %v1637_v17 }
 0x20b   : > { %3086 = vmatmul.bf16.gmra.mxu2 %v2490_v54  ;;  %v6595_v54 = vunpack.c.h.b16 %v7068_v5  ;;  %v3945_v5 = vshll.u32 %v8904_v25, 16 }
 0x20c   : > { %v2920_v38 = vpop.f32.mrf.mxu1  ;;  %v8899_v0 = vadd.f32 %v8815_v47, %v3452_v57  ;;  %v2252_v47 = vsel %vm8047_vm8, %v2220_v21, 0  ;;  %v10327_v21 = vld [vmem:[#allocation37_spill] sm:$0xff] }
 0x20d   : > { %v2492_v63 = vpack.c.b16 %v10325_v40, %v6595_v54  ;;  %v2380_v24 = vunpack.c.l.b16 %v2252_v47  ;;  %v2921_v54 = vadd.f32 %v2920_v38, %v10327_v21  ;;  %v4213_v37 = vrot.slane %v3945_v5, 1 }
 0x20e   : > { %10323 = vst [vmem:[#allocation17_spill] sm:$0xff] %v8899_v0  ;;  %v3047_v3 = vpop.f32.mrf.mxu2  ;;  %v2378_v0 = vunpack.c.h.b16 %v8860_v34 }
 0x20f   : > { %v8902_v62 = vpop.f32.mrf.mxu0  ;;  %v3048_v2 = vadd.f32 %v3047_v3, %v2919_v1  ;;  %v1362_v1 = vrot.slane %v10119_v53, 7  ;;  %v10120_v3 = vshll.u32 %v8892_v43, 16  ;;  %v8929_v53 = vld [vmem:[#allocation2 + $0x28] sm:$0xff]  }
 0x210   : > { %v2493_v32 = vpack.c.b16 %v2380_v24, %v2378_v0  ;;  %v6603_v21 = vunpack.c.h.b16 %v8929_v53 }
 0x211   : > { %v3453_v57 = vpop.f32.mrf.mxu3  ;;  %v1365_v47 = vor.u32 %v10120_v3, %v1362_v1 }
 0x212   : > { %3629 = vmatmul.bf16.gmra.mxu0 %v6841_v6  ;;  %v3454_v10 = vadd.f32 %v3453_v57, %v3045_v7  ;;  %v10121_v7 = vshll.u32 %v8913_v42, 16  ;;  %v3942_v57 = vshrl.u32 %v8904_v25, 16  ;;  %v8936_v1 = vpack.c.b16 %v6603_v21, %v6603_v21 }
 0x213   : > { %v1366_v24 = vsel %vm1126_vm3, %v8873_v28, %v1365_v47  ;;  %v1404_v28 = vrot.slane %v10331_v56, 1 }
 0x214   : > { %v2923_v41 = vpop.f32.mrf.mxu1  ;;  %v8920_v6 = vadd.f32 %v8827_v51, %v3454_v10  ;;  %v4214_v10 = vor.u32 %v4213_v37, %v3942_v57  ;;  %v4215_v38 = vrot.slane %v10121_v7, 1  ;;  %v10132_v47 = vshll.u32 %v8936_v1, 16 }
 0x215   : > { %v3944_v46 = vrot.slane %v3942_v57, 7 }
 0x216   : > { %10326 = vst [vmem:[#allocation27_spill] sm:$0xff] %v8920_v6  ;;  %3495 = vmatmul.bf16.gmra.mxu3 %v3155_v58  ;;  %v3049_v17 = vpop.f32.mrf.mxu2  ;;  %v4216_v7 = vsel %vm1401_vm5, %v4214_v10, %v4215_v38  ;;  %v4220_v10 = vrot.slane %v10132_v47, 1 }
 0x217   : > { %2962 = vmatmul.bf16.gmra.mxu1 %v2492_v63  ;;  %v8923_v40 = vpop.f32.mrf.mxu0  ;;  %v3050_v34 = vadd.f32 %v3049_v17, %v2921_v54  ;;  %v7010_v63 = vld [vmem:[#allocation2 + $0x24] sm:$0xff]   ;;  %v3947_v57 = vor.u32 %v3945_v5, %v3944_v46 }
 0x218   : > { %v3960_v0 = vshll.u32 %v7010_v63, 16  ;;  %v10329_v17 = vld [vmem:[#allocation40_spill] sm:$0xff] }
 0x219   : > { %v3456_v51 = vpop.f32.mrf.mxu3  ;;  %v2924_v37 = vadd.f32 %v2923_v41, %v10329_v17 }
 0x21a   : > { %v3457_v6 = vadd.f32 %v3456_v51, %v3048_v2  ;;  %v4218_v43 = vrot.slane %v3960_v0, 1  ;;  %v1641_v2 = vunpack.c.h.b16 %v8890_v15  ;;  %v1643_v51 = vunpack.c.l.b16 %v1366_v24  ;;  %v10332_v15 = vld [vmem:[#allocation19_spill] sm:$0xff] }
 0x21b   : > { %3091 = vmatmul.bf16.gmra.mxu2 %v2493_v32  ;;  %v10333_v24 = vshll.u32 %v10332_v15, 16 }
 0x21c   : > { %v2925_v58 = vpop.f32.mrf.mxu1  ;;  %v8939_v54 = vadd.f32 %v8853_v44, %v3457_v6  ;;  %v3949_v44 = vshrl.u32 %v8913_v42, 16  ;;  %v3957_v6 = vshrl.u32 %v7010_v63, 16  ;;  %v3158_v18 = vpack.c.b16 %v1643_v51, %v1641_v2 }
 0x21d   : > { %v1407_v48 = vrot.slane %v10333_v24, 1  ;;  %v10337_v2 = vshrl.u32 %v10330_v27, 16 }
 0x21e   : > { %10328 = vst [vmem:[#allocation12_spill] sm:$0xff] %v8939_v54  ;;  %v3052_v32 = vpop.f32.mrf.mxu2  ;;  %v4217_v17 = vor.u32 %v4215_v38, %v3949_v44  ;;  %v4219_v54 = vor.u32 %v4218_v43, %v3957_v6 }
 0x21f   : > { %v8942_v3 = vpop.f32.mrf.mxu0  ;;  %v3053_v21 = vadd.f32 %v3052_v32, %v2924_v37  ;;  %v1405_v37 = vsel %vm1401_vm5, %v10334_v31, %v1404_v28  ;;  %v10335_v32 = vld [vmem:[#allocation44_spill] sm:$0xff]  ;;  %v1406_v51 = vor.u32 %v1404_v28, %v10337_v2  ;;  %v10338_v31 = vshrl.u32 %v10332_v15, 16 }
 0x220   : > { %v2926_v16 = vadd.f32 %v2925_v58, %v10335_v32  ;;  %v4221_v43 = vsel %vm1401_vm5, %v4219_v54, %v4220_v10  ;;  %v4309_v38 = vsel %vm8047_vm8, %v4217_v17, 0  ;;  %v10339_v58 = vld [vmem:[#allocation21_spill] sm:$0xff]  ;;  %v4197_v54 = vsel %vm7325_vm4, 0, %v3947_v57 }
 0x221   : > { %v3458_v41 = vpop.f32.mrf.mxu3  ;;  %v1408_v5 = vor.u32 %v1407_v48, %v10338_v31  ;;  %v3951_v32 = vrot.slane %v3949_v44, 7  ;;  %v3959_v17 = vrot.slane %v3957_v6, 7  ;;  %v4362_v47 = vunpack.c.l.b16 %v4309_v38  ;;  %v10343_v44 = vld [vmem:[#allocation49_spill] sm:$0xff] }
 0x222   : > { %5048 = vmatmul.bf16.vlgmr.msra.gmra.mxu0 %v4216_v7  ;;  %v3459_v52 = vadd.f32 %v3458_v41, %v3050_v34  ;;  %v10340_v41 = vshll.u32 %v10339_v58, 16  ;;  %v1501_v28 = vsel %vm8047_vm8, %v1406_v51, 0  ;;  %v10341_v48 = vshll.u32 %v8913_v42, 16 }
 0x224   : > { %v2928_v56 = vpop.f32.mrf.mxu1  ;;  %v8963_v63 = vadd.f32 %v8880_v50, %v3459_v52  ;;  %v1409_v24 = vrot.slane %v10340_v41, 1  ;;  %v4364_v52 = vunpack.c.l.b16 %v4221_v43  ;;  %v3954_v15 = vor.u32 %v10341_v48, %v3951_v32 }
 0x225   : > { %v2929_v6 = vadd.f32 %v2928_v56, %v10343_v44  ;;  %v3964_v41 = vshrl.u32 %v8936_v1, 16 }
 0x226   : > { %10336 = vst [vmem:[#allocation31_spill] sm:$0xff] %v8963_v63  ;;  %3500 = vmatmul.bf16.gmra.mxu3 %v3158_v18  ;;  %v3054_v34 = vpop.f32.mrf.mxu2  ;;  %v1410_v27 = vsel %vm1401_vm5, %v1408_v5, %v1409_v24  ;;  %v3955_v51 = vsel %vm1126_vm3, %v3944_v46, %v3954_v15 }
 0x227   : > { %3643 = vmatmul.bf16.vlgmr.msra.gmra.mxu1 %v1405_v37  ;;  %v8957_v7 = vpop.f32.mrf.mxu0  ;;  %v3055_v37 = vadd.f32 %v3054_v34, %v2926_v16  ;;  %v3962_v16 = vor.u32 %v3960_v0, %v3959_v17  ;;  %v4506_v34 = vpack.c.b16 %v4364_v52, %v4362_v47  ;;  %v1556_v2 = vunpack.c.l.b16 %v1410_v27 }
 0x228   : > { %v4361_v56 = vunpack.c.l.b16 %v3955_v51  ;;  %v3966_v44 = vrot.slane %v3964_v41, 7  ;;  %v10347_v51 = vshll.u32 %v8936_v1, 16 }
 0x229   : > { %v3461_v50 = vpop.f32.mrf.mxu3  ;;  %v4198_v42 = vsel %vm7325_vm4, 0, %v3962_v16 }
 0x22a   : > { %v3462_v18 = vadd.f32 %v3461_v50, %v3053_v21  ;;  %v1554_v21 = vunpack.c.l.b16 %v1501_v28  ;;  %v4363_v52 = vunpack.c.l.b16 %v4198_v42 }
 0x22b   : > { %4790 = vmatmul.bf16.vlgmr.msra.gmra.mxu2 %v4197_v54 }
 0x22c   : > { %v2930_v63 = vpop.f32.mrf.mxu1  ;;  %v8979_v57 = vadd.f32 %v8902_v62, %v3462_v18  ;;  %v3101_v47 = vpack.c.b16 %v1556_v2, %v1554_v21  ;;  %v4222_v62 = vor.u32 %v4220_v10, %v3964_v41  ;;  %v10345_v18 = vld [vmem:[#allocation52_spill] sm:$0xff]  ;;  %v10346_v10 = vshrl.u32 %v10339_v58, 16 }
 0x22d   : > { %v2931_v28 = vadd.f32 %v2930_v63, %v10345_v18 }
 0x22e   : > { %10342 = vst [vmem:[#allocation34_spill] sm:$0xff] %v8979_v57  ;;  %v3057_v31 = vpop.f32.mrf.mxu2  ;;  %v4310_v46 = vsel %vm8047_vm8, %v4222_v62, 0  ;;  %v1558_v62 = vunpack.c.h.b16 %v1410_v27 }
 0x22f   : > { %v8982_v38 = vpop.f32.mrf.mxu0  ;;  %v3058_v5 = vadd.f32 %v3057_v31, %v2929_v6  ;;  %v4366_v6 = vunpack.c.h.b16 %v4221_v43 }
 0x231   : > { %v3463_v0 = vpop.f32.mrf.mxu3 }
 0x232   : > { %5053 = vmatmul.bf16.gmra.mxu0 %v4506_v34  ;;  %v3464_v54 = vadd.f32 %v3463_v0, %v3055_v37  ;;  %v1411_v37 = vor.u32 %v1409_v24, %v10346_v10  ;;  %v4504_v34 = vpack.c.b16 %v4363_v52, %v4361_v56  ;;  %v3969_v0 = vor.u32 %v10347_v51, %v3966_v44  ;;  %v10349_v24 = vld [vmem:[#allocation55_spill] sm:$0xff]  ;;  %v10351_v44 = vld [vmem:[#allocation57_spill] sm:$0xff] }
 0x234   : > { %v2933_v32 = vpop.f32.mrf.mxu1  ;;  %v8989_v50 = vadd.f32 %v8923_v40, %v3464_v54  ;;  %v4368_v40 = vunpack.c.l.b16 %v4310_v46  ;;  %v1502_v31 = vsel %vm8047_vm8, %v1411_v37, 0  ;;  %v9011_v54 = vld [vmem:[#allocation2 + $0x30] sm:$0xff]  ;;  %v3970_v1 = vsel %vm1126_vm3, %v3959_v17, %v3969_v0 }
 0x235   : > { %v2934_v41 = vadd.f32 %v2933_v32, %v10349_v24  ;;  %v4365_v37 = vunpack.c.h.b16 %v4198_v42  ;;  %v4367_v27 = vunpack.c.l.b16 %v3970_v1  ;;  %v9027_v42 = vld [vmem:[#allocation2 + $0x40] sm:$0xff]  }
 0x236   : > { %10344 = vst [vmem:[#allocation16_spill] sm:$0xff] %v8989_v50  ;;  %4919 = vmatmul.bf16.vlgmr.msra.gmra.mxu3 %v8904_v25  ;;  %v3059_v15 = vpop.f32.mrf.mxu2  ;;  %v4509_v25 = vpack.c.b16 %v4368_v40, %v4366_v6  ;;  %v6611_v24 = vunpack.c.h.b16 %v9027_v42 }
 0x237   : > { %3648 = vmatmul.bf16.gmra.mxu1 %v3101_v47  ;;  %v8992_v48 = vpop.f32.mrf.mxu0  ;;  %v3060_v16 = vadd.f32 %v3059_v15, %v2931_v28  ;;  %v9003_v47 = vld [vmem:[#allocation2 + $0x38] sm:$0xff]   ;;  %v4507_v51 = vpack.c.b16 %v4367_v27, %v4365_v37 }
 0x238   : > { %v6606_v56 = vunpack.c.l.b16 %v9003_v47  ;;  %v9034_v1 = vpack.c.b16 %v6611_v24, %v6611_v24 }
 0x239   : > { %v3466_v21 = vpop.f32.mrf.mxu3 }
 0x23a   : > { %v3467_v2 = vadd.f32 %v3466_v21, %v3058_v5  ;;  %v1560_v5 = vunpack.c.l.b16 %v1502_v31  ;;  %v9016_v15 = vpack.c.b16 %v6606_v56, %v6606_v56 }
 0x23b   : > { %4795 = vmatmul.bf16.gmra.mxu2 %v4504_v34 }
 0x23c   : > { %v2935_v63 = vpop.f32.mrf.mxu1  ;;  %v9006_v58 = vadd.f32 %v8942_v3, %v3467_v2  ;;  %v3104_v46 = vpack.c.b16 %v1560_v5, %v1558_v62  ;;  %v3975_v3 = vshll.u32 %v9011_v54, 16  ;;  %v10133_v21 = vshll.u32 %v9016_v15, 16 }
 0x23d   : > { %v2936_v6 = vadd.f32 %v2935_v63, %v10351_v44 }
 0x23e   : > { %10348 = vst [vmem:[#allocation37_spill] sm:$0xff] %v9006_v58  ;;  %v3062_v52 = vpop.f32.mrf.mxu2  ;;  %v4223_v17 = vrot.slane %v3975_v3, 1  ;;  %v4225_v63 = vrot.slane %v10133_v21, 1 }
 0x23f   : > { %v9009_v43 = vpop.f32.mrf.mxu0  ;;  %v3063_v18 = vadd.f32 %v3062_v52, %v2934_v41  ;;  %v10352_v41 = vld [vmem:[#allocation24_spill] sm:$0xff] }
 0x240   : > { %v10353_v62 = vshll.u32 %v10352_v41, 16 }
 0x241   : > { %v3468_v28 = vpop.f32.mrf.mxu3 }
 0x242   : > { %5058 = vmatmul.bf16.gmra.mxu0 %v4509_v25  ;;  %v3469_v32 = vadd.f32 %v3468_v28, %v3060_v16  ;;  %v3972_v16 = vshrl.u32 %v9011_v54, 16  ;;  %v7012_v25 = vld [vmem:[#allocation2 + $0x3c] sm:$0xff]   ;;  %v1412_v5 = vrot.slane %v10353_v62, 1 }
 0x243   : > { %v3990_v52 = vshll.u32 %v7012_v25, 16 }
 0x244   : > { %v2938_v10 = vpop.f32.mrf.mxu1  ;;  %v9019_v34 = vadd.f32 %v8957_v7, %v3469_v32  ;;  %v4224_v7 = vor.u32 %v4223_v17, %v3972_v16  ;;  %v3974_v21 = vrot.slane %v3972_v16, 7 }
 0x245   : > { %v4228_v44 = vrot.slane %v3990_v52, 1 }
 0x246   : > { %10350 = vst [vmem:[#allocation40_spill] sm:$0xff] %v9019_v34  ;;  %4924 = vmatmul.bf16.gmra.mxu3 %v8896_v9  ;;  %v3064_v2 = vpop.f32.mrf.mxu2  ;;  %v4226_v27 = vsel %vm1401_vm5, %v4224_v7, %v4225_v63  ;;  %v10359_v34 = vld [vmem:[#allocation29_spill] sm:$0xff] }
 0x247   : > { %3653 = vmatmul.bf16.gmra.mxu1 %v3104_v46  ;;  %v9022_v40 = vpop.f32.mrf.mxu0  ;;  %v3065_v31 = vadd.f32 %v3064_v2, %v2936_v6  ;;  %v10355_v46 = vld [vmem:[#allocation23_spill] sm:$0xff]  ;;  %v10134_v6 = vshll.u32 %v9034_v1, 16  ;;  %v10360_v58 = vshll.u32 %v10359_v34, 16 }
 0x248   : > { %v2939_v32 = vadd.f32 %v2938_v10, %v10355_v46 }
 0x249   : > { %v3471_v0 = vpop.f32.mrf.mxu3  ;;  %v4230_v7 = vrot.slane %v10134_v6, 1  ;;  %v1417_v50 = vrot.slane %v10360_v58, 1 }
 0x24a   : > { %v3472_v56 = vadd.f32 %v3471_v0, %v3063_v18  ;;  %v10356_v18 = vshrl.u32 %v10352_v41, 16 }
 0x24b   : > { %4800 = vmatmul.bf16.gmra.mxu2 %v4507_v51  ;;  %v10357_v51 = vld [vmem:[#allocation30_spill] sm:$0xff] }
 0x24c   : > { %v2940_v9 = vpop.f32.mrf.mxu1  ;;  %v9037_v28 = vadd.f32 %v8982_v38, %v3472_v56  ;;  %v1413_v2 = vor.u32 %v1412_v5, %v10356_v18  ;;  %v10358_v0 = vshll.u32 %v10357_v51, 16  ;;  %v3979_v38 = vshrl.u32 %v9016_v15, 16 }
 0x24d   : > { %v3987_v56 = vshrl.u32 %v7012_v25, 16 }
 0x24e   : > { %10354 = vst [vmem:[#allocation20_spill] sm:$0xff] %v9037_v28  ;;  %v3067_v17 = vpop.f32.mrf.mxu2  ;;  %v1414_v24 = vrot.slane %v10358_v0, 1  ;;  %v4227_v46 = vor.u32 %v4225_v63, %v3979_v38  ;;  %v3977_v0 = vor.u32 %v3975_v3, %v3974_v21  ;;  %v10364_v3 = vshrl.u32 %v10359_v34, 16 }
 0x24f   : > { %v9040_v37 = vpop.f32.mrf.mxu0  ;;  %v3068_v62 = vadd.f32 %v3067_v17, %v2939_v32  ;;  %v4229_v28 = vor.u32 %v4228_v44, %v3987_v56  ;;  %v10362_v32 = vld [vmem:[#allocation26_spill] sm:$0xff] }
 0x250   : > { %v1415_v18 = vsel %vm1401_vm5, %v1413_v2, %v1414_v24  ;;  %v2941_v25 = vadd.f32 %v2940_v9, %v10362_v32  ;;  %v4311_v44 = vsel %vm8047_vm8, %v4227_v46, 0  ;;  %v10365_v2 = vld [vmem:[#allocation33_spill] sm:$0xff]  ;;  %v3989_v32 = vrot.slane %v3987_v56, 7 }
 0x251   : > { %v3473_v10 = vpop.f32.mrf.mxu3  ;;  %v4231_v63 = vsel %vm1401_vm5, %v4229_v28, %v4230_v7  ;;  %v3981_v28 = vrot.slane %v3979_v38, 7  ;;  %v4374_v6 = vunpack.c.l.b16 %v4311_v44  ;;  %v10369_v38 = vld [vmem:[#allocation28_spill] sm:$0xff] }
 0x252   : > { %5063 = vmatmul.bf16.gmra.mxu0 %v4226_v27  ;;  %v3474_v41 = vadd.f32 %v3473_v10, %v3065_v31  ;;  %v10363_v31 = vshrl.u32 %v10357_v51, 16  ;;  %v10366_v10 = vshll.u32 %v10365_v2, 16  ;;  %v4376_v46 = vunpack.c.l.b16 %v4231_v63 }
 0x254   : > { %v2943_v5 = vpop.f32.mrf.mxu1  ;;  %v9055_v16 = vadd.f32 %v8992_v48, %v3474_v41  ;;  %v1416_v17 = vor.u32 %v1414_v24, %v10363_v31  ;;  %v1418_v48 = vor.u32 %v1417_v50, %v10364_v3  ;;  %v1419_v9 = vrot.slane %v10366_v10, 1 }
 0x255   : > { %v10367_v50 = vshll.u32 %v9016_v15, 16  ;;  %v2944_v56 = vadd.f32 %v2943_v5, %v10369_v38 }
 0x256   : > { %10361 = vst [vmem:[#allocation19_spill] sm:$0xff] %v9055_v16  ;;  %4929 = vmatmul.bf16.gmra.mxu3 %v8929_v53  ;;  %v3069_v58 = vpop.f32.mrf.mxu2  ;;  %v1420_v51 = vsel %vm1401_vm5, %v1418_v48, %v1419_v9  ;;  %v1503_v34 = vsel %vm8047_vm8, %v1416_v17, 0  ;;  %v3994_v48 = vshrl.u32 %v9034_v1, 16 }
 0x257   : > { %3658 = vmatmul.bf16.gmra.mxu1 %v1415_v18  ;;  %v9058_v27 = vpop.f32.mrf.mxu0  ;;  %v3070_v41 = vadd.f32 %v3069_v58, %v2941_v25  ;;  %v4199_v18 = vsel %vm7325_vm4, 0, %v3977_v0  ;;  %v3984_v24 = vor.u32 %v10367_v50, %v3981_v28  ;;  %v3992_v25 = vor.u32 %v3990_v52, %v3989_v32 }
 0x258   : > { %v4514_v58 = vpack.c.b16 %v4376_v46, %v4374_v6  ;;  %v3996_v38 = vrot.slane %v3994_v48, 7 }
 0x259   : > { %v3476_v16 = vpop.f32.mrf.mxu3  ;;  %v3985_v17 = vsel %vm1126_vm3, %v3974_v21, %v3984_v24  ;;  %v4200_v15 = vsel %vm7325_vm4, 0, %v3992_v25 }
 0x25a   : > { %v3477_v53 = vadd.f32 %v3476_v16, %v3068_v62  ;;  %v1566_v62 = vunpack.c.l.b16 %v1503_v34  ;;  %v1568_v16 = vunpack.c.l.b16 %v1420_v51  ;;  %v4373_v5 = vunpack.c.l.b16 %v3985_v17 }
 0x25b   : > { %4805 = vmatmul.bf16.gmra.mxu2 %v4199_v18  ;;  %v4375_v28 = vunpack.c.l.b16 %v4200_v15  ;;  %v10373_v17 = vshll.u32 %v9034_v1, 16 }
 0x25c   : > { %v2945_v57 = vpop.f32.mrf.mxu1  ;;  %v9078_v0 = vadd.f32 %v9009_v43, %v3477_v53  ;;  %v3109_v6 = vpack.c.b16 %v1568_v16, %v1566_v62  ;;  %v4232_v43 = vor.u32 %v4230_v7, %v3994_v48  ;;  %v10371_v53 = vld [vmem:[#allocation32_spill] sm:$0xff]  ;;  %v10372_v7 = vshrl.u32 %v10365_v2, 16 }
 0x25d   : > { %v2946_v34 = vadd.f32 %v2945_v57, %v10371_v53 }
 0x25e   : > { %10368 = vst [vmem:[#allocation18_spill] sm:$0xff] %v9078_v0  ;;  %v3072_v31 = vpop.f32.mrf.mxu2  ;;  %v4312_v21 = vsel %vm8047_vm8, %v4232_v43, 0  ;;  %v1570_v43 = vunpack.c.h.b16 %v1420_v51 }
 0x25f   : > { %v9081_v44 = vpop.f32.mrf.mxu0  ;;  %v3073_v3 = vadd.f32 %v3072_v31, %v2944_v56  ;;  %v4378_v56 = vunpack.c.h.b16 %v4231_v63 }
 0x261   : > { %v3478_v52 = vpop.f32.mrf.mxu3 }
 0x262   : > { %5068 = vmatmul.bf16.gmra.mxu0 %v4514_v58  ;;  %v3479_v10 = vadd.f32 %v3478_v52, %v3070_v41  ;;  %v1421_v41 = vor.u32 %v1419_v9, %v10372_v7  ;;  %v4512_v58 = vpack.c.b16 %v4375_v28, %v4373_v5  ;;  %v3999_v52 = vor.u32 %v10373_v17, %v3996_v38  ;;  %v10375_v9 = vld [vmem:[#allocation35_spill] sm:$0xff]  ;;  %v10377_v38 = vld [vmem:[#allocation38_spill] sm:$0xff] }
 0x264   : > { %v2948_v18 = vpop.f32.mrf.mxu1  ;;  %v9088_v46 = vadd.f32 %v9022_v40, %v3479_v10  ;;  %v4380_v40 = vunpack.c.l.b16 %v4312_v21  ;;  %v1504_v31 = vsel %vm8047_vm8, %v1421_v41, 0  ;;  %v9110_v10 = vld [vmem:[#allocation2 + $0x48] sm:$0xff]  ;;  %v4000_v1 = vsel %vm1126_vm3, %v3989_v32, %v3999_v52 }
 0x265   : > { %v2949_v48 = vadd.f32 %v2948_v18, %v10375_v9  ;;  %v4377_v41 = vunpack.c.h.b16 %v4200_v15  ;;  %v4379_v51 = vunpack.c.l.b16 %v4000_v1  ;;  %v9126_v15 = vld [vmem:[#allocation2 + $0x58] sm:$0xff]  }
 0x266   : > { %10370 = vst [vmem:[#allocation44_spill] sm:$0xff] %v9088_v46  ;;  %4934 = vmatmul.bf16.gmra.mxu3 %v9011_v54  ;;  %v3074_v24 = vpop.f32.mrf.mxu2  ;;  %v4517_v54 = vpack.c.b16 %v4380_v40, %v4378_v56  ;;  %v6619_v9 = vunpack.c.h.b16 %v9126_v15 }
 0x267   : > { %3663 = vmatmul.bf16.gmra.mxu1 %v3109_v6  ;;  %v9091_v50 = vpop.f32.mrf.mxu0  ;;  %v3075_v25 = vadd.f32 %v3074_v24, %v2946_v34  ;;  %v9102_v6 = vld [vmem:[#allocation2 + $0x50] sm:$0xff]   ;;  %v4515_v17 = vpack.c.b16 %v4379_v51, %v4377_v41 }
 0x268   : > { %v6614_v5 = vunpack.c.l.b16 %v9102_v6  ;;  %v9133_v1 = vpack.c.b16 %v6619_v9, %v6619_v9 }
 0x269   : > { %v3481_v62 = vpop.f32.mrf.mxu3 }
 0x26a   : > { %v3482_v16 = vadd.f32 %v3481_v62, %v3073_v3  ;;  %v1572_v3 = vunpack.c.l.b16 %v1504_v31  ;;  %v9115_v24 = vpack.c.b16 %v6614_v5, %v6614_v5 }
 0x26b   : > { %4810 = vmatmul.bf16.gmra.mxu2 %v4512_v58 }
 0x26c   : > { %v2950_v57 = vpop.f32.mrf.mxu1  ;;  %v9105_v2 = vadd.f32 %v9040_v37, %v3482_v16  ;;  %v3112_v21 = vpack.c.b16 %v1572_v3, %v1570_v43  ;;  %v4005_v37 = vshll.u32 %v9110_v10, 16  ;;  %v10135_v62 = vshll.u32 %v9115_v24, 16 }
 0x26d   : > { %v2951_v56 = vadd.f32 %v2950_v57, %v10377_v38 }
 0x26e   : > { %10374 = vst [vmem:[#allocation21_spill] sm:$0xff] %v9105_v2  ;;  %v3077_v28 = vpop.f32.mrf.mxu2  ;;  %v4233_v32 = vrot.slane %v4005_v37, 1  ;;  %v4235_v57 = vrot.slane %v10135_v62, 1 }
 0x26f   : > { %v9108_v63 = vpop.f32.mrf.mxu0  ;;  %v3078_v53 = vadd.f32 %v3077_v28, %v2949_v48  ;;  %v10378_v48 = vld [vmem:[#allocation41_spill] sm:$0xff] }
 0x270   : > { %v10379_v43 = vshll.u32 %v10378_v48, 16 }
 0x271   : > { %v3483_v34 = vpop.f32.mrf.mxu3 }
 0x272   : > { %5073 = vmatmul.bf16.gmra.mxu0 %v4517_v54  ;;  %v3484_v18 = vadd.f32 %v3483_v34, %v3075_v25  ;;  %v4002_v25 = vshrl.u32 %v9110_v10, 16  ;;  %v7014_v54 = vld [vmem:[#allocation2 + $0x54] sm:$0xff]   ;;  %v1422_v3 = vrot.slane %v10379_v43, 1 }
 0x273   : > { %v4020_v28 = vshll.u32 %v7014_v54, 16 }
 0x274   : > { %v2953_v7 = vpop.f32.mrf.mxu1  ;;  %v9118_v58 = vadd.f32 %v9058_v27, %v3484_v18  ;;  %v4234_v27 = vor.u32 %v4233_v32, %v4002_v25  ;;  %v4004_v62 = vrot.slane %v4002_v25, 7 }
 0x275   : > { %v4238_v38 = vrot.slane %v4020_v28, 1 }
 0x276   : > { %10376 = vst [vmem:[#allocation49_spill] sm:$0xff] %v9118_v58  ;;  %4939 = vmatmul.bf16.gmra.mxu3 %v9003_v47  ;;  %v3079_v16 = vpop.f32.mrf.mxu2  ;;  %v4236_v51 = vsel %vm1401_vm5, %v4234_v27, %v4235_v57  ;;  %v10385_v58 = vld [vmem:[#allocation47_spill] sm:$0xff] }
 0x277   : > { %3668 = vmatmul.bf16.gmra.mxu1 %v3112_v21  ;;  %v9121_v40 = vpop.f32.mrf.mxu0  ;;  %v3080_v31 = vadd.f32 %v3079_v16, %v2951_v56  ;;  %v10381_v21 = vld [vmem:[#allocation42_spill] sm:$0xff]  ;;  %v10136_v56 = vshll.u32 %v9133_v1, 16  ;;  %v10386_v2 = vshll.u32 %v10385_v58, 16 }
 0x278   : > { %v2954_v18 = vadd.f32 %v2953_v7, %v10381_v21 }
 0x279   : > { %v3486_v52 = vpop.f32.mrf.mxu3  ;;  %v4240_v27 = vrot.slane %v10136_v56, 1  ;;  %v1427_v46 = vrot.slane %v10386_v2, 1 }
 0x27a   : > { %v3487_v5 = vadd.f32 %v3486_v52, %v3078_v53  ;;  %v10382_v53 = vshrl.u32 %v10378_v48, 16 }
 0x27b   : > { %4815 = vmatmul.bf16.gmra.mxu2 %v4515_v17  ;;  %v10383_v17 = vld [vmem:[#allocation48_spill] sm:$0xff] }
 0x27c   : > { %v2955_v47 = vpop.f32.mrf.mxu1  ;;  %v9136_v34 = vadd.f32 %v9081_v44, %v3487_v5  ;;  %v1423_v16 = vor.u32 %v1422_v3, %v10382_v53  ;;  %v10384_v52 = vshll.u32 %v10383_v17, 16  ;;  %v4009_v44 = vshrl.u32 %v9115_v24, 16 }
 0x27d   : > { %v4017_v5 = vshrl.u32 %v7014_v54, 16 }
 0x27e   : > { %10380 = vst [vmem:[#allocation52_spill] sm:$0xff] %v9136_v34  ;;  %v3082_v32 = vpop.f32.mrf.mxu2  ;;  %v1424_v9 = vrot.slane %v10384_v52, 1  ;;  %v4237_v21 = vor.u32 %v4235_v57, %v4009_v44  ;;  %v4007_v52 = vor.u32 %v4005_v37, %v4004_v62  ;;  %v10390_v37 = vshrl.u32 %v10385_v58, 16 }
 0x27f   : > { %v9139_v41 = vpop.f32.mrf.mxu0  ;;  %v3083_v43 = vadd.f32 %v3082_v32, %v2954_v18  ;;  %v4239_v34 = vor.u32 %v4238_v38, %v4017_v5  ;;  %v10388_v18 = vld [vmem:[#allocation46_spill] sm:$0xff] }
 0x280   : > { %v1425_v53 = vsel %vm1401_vm5, %v1423_v16, %v1424_v9  ;;  %v2956_v54 = vadd.f32 %v2955_v47, %v10388_v18  ;;  %v4313_v38 = vsel %vm8047_vm8, %v4237_v21, 0  ;;  %v10391_v16 = vld [vmem:[#allocation54_spill] sm:$0xff]  ;;  %v4019_v18 = vrot.slane %v4017_v5, 7 }
 0x281   : > { %v3488_v7 = vpop.f32.mrf.mxu3  ;;  %v4241_v57 = vsel %vm1401_vm5, %v4239_v34, %v4240_v27  ;;  %v4011_v34 = vrot.slane %v4009_v44, 7  ;;  %v4386_v56 = vunpack.c.l.b16 %v4313_v38  ;;  %v10394_v44 = vld [vmem:[#allocation51_spill] sm:$0xff] }
 0x282   : > { %5078 = vmatmul.bf16.gmra.mxu0 %v4236_v51  ;;  %v3489_v48 = vadd.f32 %v3488_v7, %v3080_v31  ;;  %v10389_v31 = vshrl.u32 %v10383_v17, 16  ;;  %v10392_v7 = vshll.u32 %v10391_v16, 16  ;;  %v4388_v21 = vunpack.c.l.b16 %v4241_v57 }
 0x284   : > { %v2958_v3 = vpop.f32.mrf.mxu1  ;;  %v9154_v25 = vadd.f32 %v9091_v50, %v3489_v48  ;;  %v1426_v32 = vor.u32 %v1424_v9, %v10389_v31  ;;  %v1428_v50 = vor.u32 %v1427_v46, %v10390_v37  ;;  %v1429_v47 = vrot.slane %v10392_v7, 1 }
 0x285   : > { %v10393_v46 = vshll.u32 %v9115_v24, 16  ;;  %v2959_v5 = vadd.f32 %v2958_v3, %v10394_v44 }
 0x286   : > { %10387 = vst [vmem:[#allocation55_spill] sm:$0xff] %v9154_v25  ;;  %4944 = vmatmul.bf16.gmra.mxu3 %v9027_v42  ;;  %v3084_v2 = vpop.f32.mrf.mxu2  ;;  %v1430_v17 = vsel %vm1401_vm5, %v1428_v50, %v1429_v47  ;;  %v1505_v58 = vsel %vm8047_vm8, %v1426_v32, 0  ;;  %v4024_v50 = vshrl.u32 %v9133_v1, 16 }
 0x287   : > { %3673 = vmatmul.bf16.gmra.mxu1 %v1425_v53  ;;  %v9157_v51 = vpop.f32.mrf.mxu0  ;;  %v3085_v48 = vadd.f32 %v3084_v2, %v2956_v54  ;;  %v4201_v53 = vsel %vm7325_vm4, 0, %v4007_v52  ;;  %v4014_v9 = vor.u32 %v10393_v46, %v4011_v34  ;;  %v4022_v54 = vor.u32 %v4020_v28, %v4019_v18 }
 0x288   : > { %v4522_v2 = vpack.c.b16 %v4388_v21, %v4386_v56  ;;  %v4026_v44 = vrot.slane %v4024_v50, 7 }
 0x289   : > { %v3491_v25 = vpop.f32.mrf.mxu3  ;;  %v4015_v32 = vsel %vm1126_vm3, %v4004_v62, %v4014_v9  ;;  %v4202_v24 = vsel %vm7325_vm4, 0, %v4022_v54 }
 0x28a   : > { %v3492_v42 = vadd.f32 %v3491_v25, %v3083_v43  ;;  %v1578_v43 = vunpack.c.l.b16 %v1505_v58  ;;  %v1580_v25 = vunpack.c.l.b16 %v1430_v17  ;;  %v4385_v3 = vunpack.c.l.b16 %v4015_v32 }
 0x28b   : > { %4820 = vmatmul.bf16.gmra.mxu2 %v4201_v53  ;;  %v4387_v34 = vunpack.c.l.b16 %v4202_v24  ;;  %v10397_v32 = vshll.u32 %v9133_v1, 16 }
 0x28c   : > { %v2960_v0 = vpop.f32.mrf.mxu1  ;;  %v9177_v52 = vadd.f32 %v9108_v63, %v3492_v42  ;;  %v3117_v56 = vpack.c.b16 %v1580_v25, %v1578_v43  ;;  %v4242_v63 = vor.u32 %v4240_v27, %v4024_v50  ;;  %v10395_v42 = vld [vmem:[#allocation56_spill] sm:$0xff]  ;;  %v10396_v27 = vshrl.u32 %v10391_v16, 16 }
 0x28d   : > { %v2961_v58 = vadd.f32 %v2960_v0, %v10395_v42 }
 0x28e   : > { %v3087_v31 = vpop.f32.mrf.mxu2  ;;  %v4314_v62 = vsel %vm8047_vm8, %v4242_v63, 0  ;;  %v1582_v63 = vunpack.c.h.b16 %v1430_v17  ;;  %v4389_v17 = vunpack.c.h.b16 %v4202_v24  ;;  %v9227_v24 = vld [vmem:[#allocation2 + $0x70] sm:$0xff]  }
 0x28f   : > { %v9180_v38 = vpop.f32.mrf.mxu0  ;;  %v3088_v37 = vadd.f32 %v3087_v31, %v2959_v5  ;;  %v4390_v5 = vunpack.c.h.b16 %v4241_v57 }
 0x291   : > { %v3493_v28 = vpop.f32.mrf.mxu3 }
 0x292   : > { %5083 = vmatmul.bf16.gmra.mxu0 %v4522_v2  ;;  %v3494_v7 = vadd.f32 %v3493_v28, %v3085_v48  ;;  %v1431_v48 = vor.u32 %v1429_v47, %v10396_v27  ;;  %v4520_v2 = vpack.c.b16 %v4387_v34, %v4385_v3  ;;  %v4029_v28 = vor.u32 %v10397_v32, %v4026_v44  ;;  %v10399_v47 = vld [vmem:[#allocation58_spill] sm:$0xff]  ;;  %v10401_v44 = vld [vmem:[#allocation60_spill] sm:$0xff] }
 0x294   : > { %v2963_v53 = vpop.f32.mrf.mxu1  ;;  %v9187_v21 = vadd.f32 %v9121_v40, %v3494_v7  ;;  %v4392_v40 = vunpack.c.l.b16 %v4314_v62  ;;  %v1506_v31 = vsel %vm8047_vm8, %v1431_v48, 0  ;;  %v9209_v7 = vld [vmem:[#allocation2 + $0x60] sm:$0xff]  ;;  %v4030_v1 = vsel %vm1126_vm3, %v4019_v18, %v4029_v28 }
 0x295   : > { %v2964_v50 = vadd.f32 %v2963_v53, %v10399_v47  ;;  %v4391_v48 = vunpack.c.l.b16 %v4030_v1  ;;  %v4032_v32 = vshrl.u32 %v9209_v7, 16  ;;  %v7016_v47 = vld [vmem:[#allocation2 + $0x6c] sm:$0xff]  }
 0x296   : > { %4949 = vmatmul.bf16.gmra.mxu3 %v9110_v10  ;;  %v3089_v9 = vpop.f32.mrf.mxu2  ;;  %v4525_v10 = vpack.c.b16 %v4392_v40, %v4390_v5 }
 0x297   : > { %3678 = vmatmul.bf16.gmra.mxu1 %v3117_v56  ;;  %v9190_v46 = vpop.f32.mrf.mxu0  ;;  %v3090_v54 = vadd.f32 %v3089_v9, %v2961_v58  ;;  %v9201_v56 = vld [vmem:[#allocation2 + $0x68] sm:$0xff]  }
 0x298   : > { %v6622_v3 = vunpack.c.l.b16 %v9201_v56 }
 0x299   : > { %v3496_v43 = vpop.f32.mrf.mxu3 }
 0x29a   : > { %v3497_v25 = vadd.f32 %v3496_v43, %v3088_v37  ;;  %v1584_v37 = vunpack.c.l.b16 %v1506_v31  ;;  %v9214_v9 = vpack.c.b16 %v6622_v3, %v6622_v3 }
 0x29b   : > { %4825 = vmatmul.bf16.gmra.mxu2 %v4520_v2 }
 0x29c   : > { %v2965_v0 = vpop.f32.mrf.mxu1  ;;  %v9204_v16 = vadd.f32 %v9139_v41, %v3497_v25  ;;  %v3120_v62 = vpack.c.b16 %v1584_v37, %v1582_v63  ;;  %v4035_v41 = vshll.u32 %v9209_v7, 16  ;;  %v4042_v43 = vshll.u32 %v9214_v9, 16 }
 0x29d   : > { %v2966_v5 = vadd.f32 %v2965_v0, %v10401_v44  ;;  %v6627_v0 = vunpack.c.h.b16 %v9227_v24 }
 0x29e   : > { %10398 = vst [vmem:[#allocation57_spill] sm:$0xff] %v9204_v16  ;;  %v3092_v34 = vpop.f32.mrf.mxu2  ;;  %v4243_v18 = vrot.slane %v4035_v41, 1 }
 0x29f   : > { %v9207_v57 = vpop.f32.mrf.mxu0  ;;  %v3093_v42 = vadd.f32 %v3092_v34, %v2964_v50  ;;  %v10402_v50 = vld [vmem:[#allocation59_spill] sm:$0xff]  ;;  %v9234_v1 = vpack.c.b16 %v6627_v0, %v6627_v0  ;;  %v4047_v0 = vshrl.u32 %v7016_v47, 16 }
 0x2a0   : > { %v10403_v63 = vshll.u32 %v10402_v50, 16 }
 0x2a1   : > { %v3498_v58 = vpop.f32.mrf.mxu3 }
 0x2a2   : > { %5088 = vmatmul.bf16.gmra.mxu0 %v4525_v10  ;;  %v3499_v53 = vadd.f32 %v3498_v58, %v3090_v54  ;;  %v4523_v54 = vpack.c.b16 %v4391_v48, %v4389_v17  ;;  %v4245_v10 = vrot.slane %v4042_v43, 1  ;;  %v1432_v37 = vrot.slane %v10403_v63, 1 }
 0x2a3   : > { %v10137_v48 = vshll.u32 %v9234_v1, 16 }
 0x2a4   : > { %v9216_v27 = vpop.f32.mrf.mxu1  ;;  %v9219_v2 = vadd.f32 %v9157_v51, %v3499_v53  ;;  %v4244_v51 = vor.u32 %v4243_v18, %v4032_v32  ;;  %v10406_v18 = vshll.u32 %v8377_v29, 16 }
 0x2a6   : > { %10400 = vst [vmem:[#allocation24_spill] sm:$0xff] %v9219_v2  ;;  %4954 = vmatmul.bf16.gmra.mxu3 %v9102_v6  ;;  %v3094_v25 = vpop.f32.mrf.mxu2  ;;  %v4050_v6 = vshll.u32 %v7016_v47, 16  ;;  %v4246_v53 = vsel %vm1401_vm5, %v4244_v51, %v4245_v10  ;;  %v4250_v51 = vrot.slane %v10137_v48, 1 }
 0x2a7   : > { %3683 = vmatmul.bf16.gmra.mxu1 %v3120_v62  ;;  %v9222_v40 = vpop.f32.mrf.mxu0  ;;  %v3095_v31 = vadd.f32 %v3094_v25, %v2966_v5  ;;  %v10405_v5 = vshrl.u32 %v10402_v50, 16  ;;  %v1434_v25 = vrot.slane %v10406_v18, 1 }
 0x2a8   : > { %v4248_v17 = vrot.slane %v4050_v6, 1 }
 0x2a9   : > { %v3501_v28 = vpop.f32.mrf.mxu3 }
 0x2aa   : > { %v3502_v3 = vadd.f32 %v3501_v28, %v3093_v42  ;;  %v1433_v42 = vor.u32 %v1432_v37, %v10405_v5  ;;  %v4039_v28 = vshrl.u32 %v9214_v9, 16 }
 0x2ab   : > { %4830 = vmatmul.bf16.gmra.mxu2 %v4523_v54  ;;  %v4034_v54 = vrot.slane %v4032_v32, 7 }
 0x2ac   : > { %v9232_v34 = vpop.f32.mrf.mxu1  ;;  %v9237_v58 = vadd.f32 %v9180_v38, %v3502_v3  ;;  %v4247_v63 = vor.u32 %v4245_v10, %v4039_v28  ;;  %v4249_v3 = vor.u32 %v4248_v17, %v4047_v0  ;;  %v1435_v37 = vsel %vm1401_vm5, %v1433_v42, %v1434_v25 }
 0x2ad   : > { %v4037_v5 = vor.u32 %v4035_v41, %v4034_v54  ;;  %v10409_v41 = vshrl.u32 %v8379_v11, 16  ;;  %v4041_v18 = vrot.slane %v4039_v28, 7 }
 0x2ae   : > { %10404 = vst [vmem:[#allocation23_spill] sm:$0xff] %v9237_v58  ;;  %v4791_v44 = vpop.f32.mrf.mxu2  ;;  %v10407_v58 = vshll.u32 %v8379_v11, 16  ;;  %v9261_v10 = vsel %vm1401_vm5, %v4249_v3, %v4250_v51  ;;  %v4315_v47 = vsel %vm8047_vm8, %v4247_v63, 0 }
 0x2af   : > { %v9239_v62 = vpop.f32.mrf.mxu0  ;;  %v4203_v42 = vsel %vm7325_vm4, 0, %v4037_v5  ;;  %v4398_v3 = vunpack.c.l.b16 %v4315_v47  ;;  %v4400_v63 = vunpack.c.l.b16 %v9261_v10  ;;  %v10411_v5 = vld [vmem:[#allocation61_spill] sm:$0xff] }
 0x2b0   : > { %v1437_v2 = vrot.slane %v10407_v58, 1  ;;  %v10408_v58 = vshrl.u32 %v8377_v29, 16  ;;  %v3645_v47 = vadd.f32 %v9216_v27, %v10411_v5 }
 0x2b1   : > { %v3503_v38 = vpop.f32.mrf.mxu3 }
 0x2b2   : > { %5093 = vmatmul.bf16.gmra.mxu0 %v4246_v53  ;;  %v3504_v16 = vadd.f32 %v3503_v38, %v3095_v31  ;;  %v1436_v53 = vor.u32 %v1434_v25, %v10408_v58  ;;  %v1438_v17 = vor.u32 %v1437_v2, %v10409_v41  ;;  %v9274_v38 = vrot.slane %v4047_v0, 7 }
 0x2b3   : > { %v4044_v25 = vor.u32 %v4042_v43, %v4041_v18  ;;  %v4530_v0 = vpack.c.b16 %v4400_v63, %v4398_v3  ;;  %v10412_v3 = vld [vmem:[#allocation3_spill] sm:$0xff] }
 0x2b4   : > { %v9252_v50 = vpop.f32.mrf.mxu1  ;;  %v9256_v32 = vadd.f32 %v9190_v46, %v3504_v16  ;;  %v10410_v46 = vshll.u32 %v8426_v39, 16  ;;  %v1507_v11 = vsel %vm8047_vm8, %v1436_v53, 0  ;;  %v4052_v28 = vor.u32 %v4050_v6, %v9274_v38 }
 0x2b5   : > { %v4045_v53 = vsel %vm1126_vm3, %v4034_v54, %v4044_v25  ;;  %v3647_v54 = vadd.f32 %v9232_v34, %v8414_v61  ;;  %v4402_v34 = vunpack.c.h.b16 %v9261_v10  ;;  %v10414_v10 = vshll.u32 %v9234_v1, 16 }
 0x2b6   : > { %4959 = vmatmul.bf16.gmra.mxu3 %v9126_v15  ;;  %v4793_v31 = vpop.f32.mrf.mxu2  ;;  %v1439_v16 = vrot.slane %v10410_v46, 1 }
 0x2b7   : > { %3688 = vmatmul.bf16.gmra.mxu1 %v1435_v37  ;;  %v9258_v9 = vpop.f32.mrf.mxu0 }
 0x2b8   : > { %v9280_v29 = vsel %vm1401_vm5, %v1438_v17, %v1439_v16 }
 0x2b9   : > { %v4920_v15 = vpop.f32.mrf.mxu3  ;;  %v1592_v41 = vunpack.c.l.b16 %v9280_v29 }
 0x2ba   : > { %v4921_v37 = vadd.f32 %v4920_v15, %v4791_v44  ;;  %v1590_v44 = vunpack.c.l.b16 %v1507_v11  ;;  %v4054_v15 = vshrl.u32 %v9234_v1, 16 }
 0x2bb   : > { %4835 = vmatmul.bf16.gmra.mxu2 %v4203_v42 }
 0x2bc   : > { %v9277_v48 = vpop.f32.mrf.mxu1  ;;  %v5050_v2 = vadd.f32 %v9207_v57, %v4921_v37  ;;  %v9295_v57 = vsel %vm7325_vm4, 0, %v4052_v28  ;;  %v3125_v6 = vpack.c.b16 %v1592_v41, %v1590_v44  ;;  %v4252_v42 = vor.u32 %v4250_v51, %v4054_v15 }
 0x2bd   : > { %v4397_v37 = vunpack.c.l.b16 %v4045_v53  ;;  %v4399_v11 = vunpack.c.l.b16 %v9295_v57 }
 0x2be   : > { %v4796_v17 = vpop.f32.mrf.mxu2  ;;  %v5169_v46 = vadd.f32 %v5050_v2, %v3645_v47  ;;  %v4316_v51 = vsel %vm8047_vm8, %v4252_v42, 0  ;;  %v3650_v42 = vadd.f32 %v9252_v50, %v8431_v35  ;;  %v10415_v35 = vld [vmem:[#allocation4_spill] sm:$0xff] }
 0x2bf   : > { %v9288_v58 = vpop.f32.mrf.mxu0  ;;  %v4528_v61 = vpack.c.b16 %v4399_v11, %v4397_v37  ;;  %v9329_v37 = vld [vmem:[#allocation2 + $0x80] sm:$0xff]  }
 0x2c0   : > { %v5217_v63 = vmul.f32 %v10412_v3, %v5169_v46 }
 0x2c1   : > { %v4922_v43 = vpop.f32.mrf.mxu3 }
 0x2c2   : > { %5098 = vmatmul.bf16.gmra.mxu0 %v4530_v0  ;;  %v4923_v27 = vadd.f32 %v4922_v43, %v4793_v31  ;;  %v10413_v0 = vshrl.u32 %v8426_v39, 16  ;;  %v5414_v47 = vmul.f32 %v5217_v63, %v5217_v63 }
 0x2c4   : > { %v9297_v18 = vpop.f32.mrf.mxu1  ;;  %v5052_v2 = vadd.f32 %v9222_v40, %v4923_v27  ;;  %v1441_v5 = vor.u32 %v1439_v16, %v10413_v0  ;;  %v4056_v40 = vrot.slane %v4054_v15, 7 }
 0x2c6   : > { %v5170_v28 = vadd.f32 %v5052_v2, %v3647_v54  ;;  %4964 = vmatmul.bf16.gmra.mxu3 %v9209_v7  ;;  %v4798_v31 = vpop.f32.mrf.mxu2  ;;  %v4404_v7 = vunpack.c.l.b16 %v4316_v51  ;;  %v4059_v27 = vor.u32 %v10414_v10, %v4056_v40  ;;  %v9334_v2 = vld [vmem:[#allocation2 + $0x78] sm:$0xff]  ;;  %v6630_v51 = vunpack.c.l.b16 %v9329_v37 }
 0x2c7   : > { %3693 = vmatmul.bf16.gmra.mxu1 %v3125_v6  ;;  %v9304_v25 = vpop.f32.mrf.mxu0  ;;  %v1508_v6 = vsel %vm8047_vm8, %v1441_v5, 0 }
 0x2c8   : > { %v6663_v44 = vpack.c.bf16 %v5170_v28, %v5217_v63  ;;  %v5361_v41 = vadd.f32 %v5217_v63, %v5170_v28  ;;  %v5415_v46 = vmul.f32 %v5170_v28, %v5170_v28  ;;  %v4533_v63 = vpack.c.b16 %v4404_v7, %v4402_v34 }
 0x2c9   : > { %v4925_v53 = vpop.f32.mrf.mxu3  ;;  %v1596_v54 = vunpack.c.l.b16 %v1508_v6  ;;  %v4060_v1 = vsel %vm1126_vm3, %v9274_v38, %v4059_v27 }
 0x2ca   : > { %6664 = vst [vmem:[%s9316_s26] sm:$0xff] %v6663_v44   ;;  %v5462_v39 = vadd.f32 %v5415_v46, %v5414_v47  ;;  %v4926_v16 = vadd.f32 %v4925_v53, %v4796_v17  ;;  %v1594_v17 = vunpack.c.h.b16 %v9280_v29  ;;  %v4065_v47 = vshll.u32 %v9334_v2, 16 }
 0x2cb   : > { %4840 = vmatmul.bf16.gmra.mxu2 %v4528_v61  ;;  %v9341_v61 = vpack.c.b16 %v6630_v51, %v6630_v51  ;;  %v4401_v46 = vunpack.c.h.b16 %v9295_v57  ;;  %v4403_v7 = vunpack.c.l.b16 %v4060_v1 }
 0x2cc   : > { %v9320_v43 = vpop.f32.mrf.mxu1  ;;  %v5055_v15 = vadd.f32 %v9239_v62, %v4926_v16  ;;  %v3128_v5 = vpack.c.b16 %v1596_v54, %v1594_v17  ;;  %v3652_v16 = vadd.f32 %v9277_v48, %v8446_v22  ;;  %v9357_v48 = vld [vmem:[#allocation2 + $0x88] sm:$0xff]  }
 0x2cd   : > { %v4531_v57 = vpack.c.b16 %v4403_v7, %v4401_v46  ;;  %v9363_v54 = vld [vmem:[#allocation2 + $0x84] sm:$0xff]  }
 0x2ce   : > { %v5171_v28 = vadd.f32 %v5055_v15, %v3650_v42  ;;  %v4801_v0 = vpop.f32.mrf.mxu2  ;;  %v4253_v42 = vrot.slane %v4065_v47, 1 }
 0x2cf   : > { %v9331_v11 = vpop.f32.mrf.mxu0 }
 0x2d0   : > { %v5219_v50 = vmul.f32 %v10415_v35, %v5171_v28 }
 0x2d1   : > { %v4927_v62 = vpop.f32.mrf.mxu3 }
 0x2d2   : > { %5103 = vmatmul.bf16.gmra.mxu0 %v4533_v63  ;;  %v5362_v29 = vadd.f32 %v5361_v41, %v5219_v50  ;;  %v5416_v40 = vmul.f32 %v5219_v50, %v5219_v50  ;;  %v4928_v34 = vadd.f32 %v4927_v62, %v4798_v31  ;;  %v4072_v41 = vshll.u32 %v9341_v61, 16 }
 0x2d4   : > { %v9343_v44 = vpop.f32.mrf.mxu1  ;;  %v5463_v53 = vadd.f32 %v5462_v39, %v5416_v40  ;;  %v5057_v38 = vadd.f32 %v9258_v9, %v4928_v34  ;;  %v4062_v39 = vshrl.u32 %v9334_v2, 16  ;;  %v10416_v9 = vshll.u32 %v8472_v60, 16 }
 0x2d5   : > { %v4255_v17 = vrot.slane %v4072_v41, 1  ;;  %v4080_v40 = vshll.u32 %v9363_v54, 16  ;;  %v3655_v34 = vadd.f32 %v9297_v18, %v8467_v19  ;;  %v4069_v19 = vshrl.u32 %v9341_v61, 16 }
 0x2d6   : > { %v5172_v31 = vadd.f32 %v5057_v38, %v3652_v16  ;;  %4969 = vmatmul.bf16.gmra.mxu3 %v9201_v56  ;;  %v4803_v15 = vpop.f32.mrf.mxu2  ;;  %v1442_v10 = vrot.slane %v10416_v9, 1  ;;  %v4254_v63 = vor.u32 %v4253_v42, %v4062_v39  ;;  %v6635_v56 = vunpack.c.h.b16 %v9357_v48 }
 0x2d7   : > { %3698 = vmatmul.bf16.gmra.mxu1 %v3128_v5  ;;  %v9349_v6 = vpop.f32.mrf.mxu0 }
 0x2d8   : > { %v5220_v22 = vmul.f32 %v10412_v3, %v5172_v31  ;;  %v9373_v16 = vpack.c.b16 %v6635_v56, %v6635_v56  ;;  %v10417_v31 = vshrl.u32 %v8472_v60, 16 }
 0x2d9   : > { %v4930_v27 = vpop.f32.mrf.mxu3 }
 0x2da   : > { %v6668_v51 = vpack.c.bf16 %v5220_v22, %v5219_v50  ;;  %v5417_v28 = vmul.f32 %v5220_v22, %v5220_v22  ;;  %v4931_v1 = vadd.f32 %v4930_v27, %v4801_v0  ;;  %v5363_v62 = vadd.f32 %v5362_v29, %v5220_v22 }
 0x2db   : > { %4845 = vmatmul.bf16.gmra.mxu2 %v4531_v57  ;;  %v4256_v50 = vsel %vm1401_vm5, %v4254_v63, %v4255_v17  ;;  %v4258_v0 = vrot.slane %v4080_v40, 1  ;;  %v1443_v57 = vor.u32 %v1442_v10, %v10417_v31  ;;  %v10418_v22 = vshll.u32 %v8494_v13, 16 }
 0x2dc   : > { %v9366_v5 = vpop.f32.mrf.mxu1  ;;  %6866 = vst [vmem:[%s9316_s26 + $0x8] sm:$0xff] %v6668_v51   ;;  %v5060_v46 = vadd.f32 %v9288_v58, %v4931_v1  ;;  %v5464_v7 = vadd.f32 %v5463_v53, %v5417_v28  ;;  %v4064_v27 = vrot.slane %v4062_v39, 7  ;;  %v4077_v58 = vshrl.u32 %v9363_v54, 16 }
 0x2dd   : > { %v1444_v9 = vrot.slane %v10418_v22, 1  ;;  %v4087_v18 = vshll.u32 %v9373_v16, 16  ;;  %v10419_v63 = vshll.u32 %v8496_v59, 16  ;;  %v4257_v1 = vor.u32 %v4255_v17, %v4069_v19 }
 0x2de   : > { %v5173_v29 = vadd.f32 %v5060_v46, %v3655_v34  ;;  %v4806_v42 = vpop.f32.mrf.mxu2  ;;  %v4259_v60 = vor.u32 %v4258_v0, %v4077_v58  ;;  %v4067_v54 = vor.u32 %v4065_v47, %v4064_v27  ;;  %v10420_v17 = vshrl.u32 %v8494_v13, 16 }
 0x2df   : > { %v9375_v38 = vpop.f32.mrf.mxu0  ;;  %v1447_v51 = vrot.slane %v10419_v63, 1  ;;  %v1445_v39 = vsel %vm1401_vm5, %v1443_v57, %v1444_v9  ;;  %v10422_v22 = vshll.u32 %v8542_v12, 16  ;;  %v9414_v63 = vrot.slane %v4077_v58, 7 }
 0x2e0   : > { %v5364_v53 = vadd.f32 %v5363_v62, %v5173_v29  ;;  %v5418_v56 = vmul.f32 %v5173_v29, %v5173_v29  ;;  %v4260_v62 = vrot.slane %v4087_v18, 1  ;;  %v1446_v0 = vor.u32 %v1444_v9, %v10420_v17 }
 0x2e1   : > { %v4932_v28 = vpop.f32.mrf.mxu3  ;;  %v1449_v47 = vrot.slane %v10422_v22, 1  ;;  %v4071_v9 = vrot.slane %v4069_v19, 7  ;;  %v3660_v58 = vadd.f32 %v9343_v44, %v8505_v20  ;;  %v4084_v20 = vshrl.u32 %v9373_v16, 16 }
 0x2e2   : > { %5108 = vmatmul.bf16.gmra.mxu0 %v4256_v50  ;;  %v5465_v10 = vadd.f32 %v5464_v7, %v5418_v56  ;;  %v4933_v34 = vadd.f32 %v4932_v28, %v4803_v15  ;;  %v3657_v50 = vadd.f32 %v9320_v43, %v8485_v14  ;;  %v10421_v7 = vshrl.u32 %v8496_v59, 16 }
 0x2e3   : > { %v9406_v56 = vsel %vm1401_vm5, %v4259_v60, %v4260_v62  ;;  %v4317_v14 = vsel %vm8047_vm8, %v4257_v1, 0 }
 0x2e4   : > { %v9387_v46 = vpop.f32.mrf.mxu1  ;;  %v5062_v31 = vadd.f32 %v9304_v25, %v4933_v34  ;;  %v1448_v57 = vor.u32 %v1447_v51, %v10421_v7  ;;  %v4205_v25 = vsel %vm7325_vm4, 0, %v4067_v54  ;;  %v4410_v51 = vunpack.c.l.b16 %v4317_v14 }
 0x2e5   : > { %v4412_v28 = vunpack.c.l.b16 %v9406_v56 }
 0x2e6   : > { %v5174_v43 = vadd.f32 %v5062_v31, %v3657_v50  ;;  %4974 = vmatmul.bf16.gmra.mxu3 %v9227_v24  ;;  %v4808_v13 = vpop.f32.mrf.mxu2  ;;  %v9418_v34 = vsel %vm1401_vm5, %v1448_v57, %v1449_v47  ;;  %v1509_v24 = vsel %vm8047_vm8, %v1446_v0, 0  ;;  %v4074_v31 = vor.u32 %v4072_v41, %v4071_v9 }
 0x2e7   : > { %3703 = vmatmul.bf16.gmra.mxu1 %v1445_v39  ;;  %v9399_v15 = vpop.f32.mrf.mxu0  ;;  %v4082_v57 = vor.u32 %v4080_v40, %v9414_v63  ;;  %v4538_v0 = vpack.c.b16 %v4412_v28, %v4410_v51 }
 0x2e8   : > { %v5222_v59 = vmul.f32 %v10415_v35, %v5174_v43  ;;  %v4075_v61 = vsel %vm1126_vm3, %v4064_v27, %v4074_v31  ;;  %v3662_v27 = vadd.f32 %v9366_v5, %v8530_v30  ;;  %v4086_v31 = vrot.slane %v4084_v20, 7 }
 0x2e9   : > { %v4935_v60 = vpop.f32.mrf.mxu3  ;;  %v9439_v41 = vsel %vm7325_vm4, 0, %v4082_v57  ;;  %v4409_v51 = vunpack.c.l.b16 %v4075_v61  ;;  %v4414_v30 = vunpack.c.h.b16 %v9406_v56 }
 0x2ea   : > { %v6673_v1 = vpack.c.bf16 %v5222_v59, %v5173_v29  ;;  %v5365_v39 = vadd.f32 %v5364_v53, %v5222_v59  ;;  %v5419_v50 = vmul.f32 %v5222_v59, %v5222_v59  ;;  %v4936_v54 = vadd.f32 %v4935_v60, %v4806_v42 }
 0x2eb   : > { %4850 = vmatmul.bf16.gmra.mxu2 %v4205_v25  ;;  %v1602_v53 = vunpack.c.l.b16 %v1509_v24  ;;  %v1604_v42 = vunpack.c.l.b16 %v9418_v34  ;;  %v4411_v28 = vunpack.c.l.b16 %v9439_v41  ;;  %v4089_v56 = vor.u32 %v4087_v18, %v4086_v31 }
 0x2ec   : > { %v9422_v19 = vpop.f32.mrf.mxu1  ;;  %6867 = vst [vmem:[%s9316_s26 + $0x10] sm:$0xff] %v6673_v1   ;;  %v5466_v17 = vadd.f32 %v5465_v10, %v5419_v50  ;;  %v5065_v7 = vadd.f32 %v9331_v11, %v4936_v54  ;;  %v4262_v10 = vor.u32 %v4260_v62, %v4084_v20  ;;  %v10423_v50 = vshrl.u32 %v8542_v12, 16  ;;  %v9465_v20 = vld [vmem:[#allocation2 + $0x98] sm:$0xff]  }
 0x2ed   : > { %v3133_v40 = vpack.c.b16 %v1604_v42, %v1602_v53  ;;  %v3665_v12 = vadd.f32 %v9387_v46, %v8547_v36  ;;  %v4090_v16 = vsel %vm1126_vm3, %v9414_v63, %v4089_v56 }
 0x2ee   : > { %v5175_v22 = vadd.f32 %v5065_v7, %v3660_v58  ;;  %v4811_v14 = vpop.f32.mrf.mxu2  ;;  %v4318_v62 = vsel %vm8047_vm8, %v4262_v10, 0  ;;  %v1451_v54 = vor.u32 %v1449_v47, %v10423_v50  ;;  %v4536_v58 = vpack.c.b16 %v4411_v28, %v4409_v51 }
 0x2ef   : > { %v9431_v29 = vpop.f32.mrf.mxu0  ;;  %v4416_v7 = vunpack.c.l.b16 %v4318_v62  ;;  %v3667_v62 = vadd.f32 %v9422_v19, %v8561_v33  ;;  %v9493_v19 = vld [vmem:[#allocation2 + $0xa0] sm:$0xff]  }
 0x2f0   : > { %v5223_v44 = vmul.f32 %v10412_v3, %v5175_v22 }
 0x2f1   : > { %v4937_v11 = vpop.f32.mrf.mxu3  ;;  %v4541_v22 = vpack.c.b16 %v4416_v7, %v4414_v30  ;;  %v9499_v7 = vld [vmem:[#allocation2 + $0x9c] sm:$0xff]  }
 0x2f2   : > { %5113 = vmatmul.bf16.gmra.mxu0 %v4538_v0  ;;  %v5366_v43 = vadd.f32 %v5365_v39, %v5223_v44  ;;  %v5420_v25 = vmul.f32 %v5223_v44, %v5223_v44  ;;  %v4938_v9 = vadd.f32 %v4937_v11, %v4808_v13  ;;  %v9470_v11 = vld [vmem:[#allocation2 + $0x90] sm:$0xff] }
 0x2f3   : > { %v4095_v46 = vshll.u32 %v9470_v11, 16  ;;  %v4092_v31 = vshrl.u32 %v9470_v11, 16 }
 0x2f4   : > { %v9441_v59 = vpop.f32.mrf.mxu1  ;;  %v5467_v60 = vadd.f32 %v5466_v17, %v5420_v25  ;;  %v5067_v24 = vadd.f32 %v9349_v6, %v4938_v9 }
 0x2f5   : > { %v4263_v50 = vrot.slane %v4095_v46, 1  ;;  %v3670_v56 = vadd.f32 %v9441_v59, %v8582_v4 }
 0x2f6   : > { %v5176_v39 = vadd.f32 %v5067_v24, %v3662_v27  ;;  %4979 = vmatmul.bf16.gmra.mxu3 %v9334_v2  ;;  %v4813_v13 = vpop.f32.mrf.mxu2  ;;  %v1510_v2 = vsel %vm8047_vm8, %v1451_v54, 0  ;;  %v4415_v27 = vunpack.c.l.b16 %v4090_v16 }
 0x2f7   : > { %3708 = vmatmul.bf16.gmra.mxu1 %v3133_v40  ;;  %v9447_v1 = vpop.f32.mrf.mxu0  ;;  %v1608_v61 = vunpack.c.l.b16 %v1510_v2  ;;  %v6638_v40 = vunpack.c.l.b16 %v9465_v20 }
 0x2f8   : > { %v6678_v5 = vpack.c.bf16 %v5176_v39, %v5223_v44  ;;  %v5367_v6 = vadd.f32 %v5366_v43, %v5176_v39  ;;  %v5421_v17 = vmul.f32 %v5176_v39, %v5176_v39 }
 0x2f9   : > { %v4940_v57 = vpop.f32.mrf.mxu3  ;;  %v9477_v25 = vpack.c.b16 %v6638_v40, %v6638_v40 }
 0x2fa   : > { %6868 = vst [vmem:[%s9316_s26 + $0x18] sm:$0xff] %v6678_v5   ;;  %v5468_v0 = vadd.f32 %v5467_v60, %v5421_v17  ;;  %v4941_v53 = vadd.f32 %v4940_v57, %v4811_v14  ;;  %v1606_v14 = vunpack.c.h.b16 %v9418_v34  ;;  %v4413_v60 = vunpack.c.h.b16 %v9439_v41 }
 0x2fb   : > { %4855 = vmatmul.bf16.gmra.mxu2 %v4536_v58  ;;  %v4102_v54 = vshll.u32 %v9477_v25, 16  ;;  %v4099_v4 = vshrl.u32 %v9477_v25, 16 }
 0x2fc   : > { %v9456_v42 = vpop.f32.mrf.mxu1  ;;  %v5070_v47 = vadd.f32 %v9375_v38, %v4941_v53  ;;  %v3136_v18 = vpack.c.b16 %v1608_v61, %v1606_v14  ;;  %v4539_v41 = vpack.c.b16 %v4415_v27, %v4413_v60 }
 0x2fd   : > { %v4265_v17 = vrot.slane %v4102_v54, 1 }
 0x2fe   : > { %v5177_v10 = vadd.f32 %v5070_v47, %v3665_v12  ;;  %v4816_v43 = vpop.f32.mrf.mxu2  ;;  %v4110_v47 = vshll.u32 %v9499_v7, 16 }
 0x2ff   : > { %v9467_v44 = vpop.f32.mrf.mxu0 }
 0x300   : > { %v5225_v36 = vmul.f32 %v10415_v35, %v5177_v10 }
 0x301   : > { %v4942_v38 = vpop.f32.mrf.mxu3 }
 0x302   : > { %5118 = vmatmul.bf16.gmra.mxu0 %v4541_v22  ;;  %v5368_v34 = vadd.f32 %v5367_v6, %v5225_v36  ;;  %v5422_v9 = vmul.f32 %v5225_v36, %v5225_v36  ;;  %v4943_v51 = vadd.f32 %v4942_v38, %v4813_v13  ;;  %v4264_v6 = vor.u32 %v4263_v50, %v4092_v31 }
 0x303   : > { %v10425_v38 = vshrl.u32 %v8587_v26, 16  ;;  %v4267_v50 = vor.u32 %v4265_v17, %v4099_v4 }
 0x304   : > { %v9479_v28 = vpop.f32.mrf.mxu1  ;;  %v5469_v24 = vadd.f32 %v5468_v0, %v5422_v9  ;;  %v5072_v63 = vadd.f32 %v9399_v15, %v4943_v51  ;;  %v10424_v15 = vshll.u32 %v8587_v26, 16  ;;  %v4266_v10 = vsel %vm1401_vm5, %v4264_v6, %v4265_v17 }
 0x305   : > { %v4094_v51 = vrot.slane %v4092_v31, 7  ;;  %v10428_v17 = vshrl.u32 %v8609_v55, 16 }
 0x306   : > { %v5178_v13 = vadd.f32 %v5072_v63, %v3667_v62  ;;  %4984 = vmatmul.bf16.gmra.mxu3 %v9329_v37  ;;  %v4818_v58 = vpop.f32.mrf.mxu2  ;;  %v1452_v30 = vrot.slane %v10424_v15, 1  ;;  %v6643_v37 = vunpack.c.h.b16 %v9493_v19 }
 0x307   : > { %3713 = vmatmul.bf16.gmra.mxu1 %v3136_v18  ;;  %v9485_v39 = vpop.f32.mrf.mxu0  ;;  %v4097_v15 = vor.u32 %v4095_v46, %v4094_v51 }
 0x308   : > { %v5226_v33 = vmul.f32 %v10412_v3, %v5178_v13  ;;  %v9509_v61 = vpack.c.b16 %v6643_v37, %v6643_v37  ;;  %v1453_v18 = vor.u32 %v1452_v30, %v10425_v38  ;;  %v10429_v37 = vshrl.u32 %v8611_v49, 16 }
 0x309   : > { %v4945_v5 = vpop.f32.mrf.mxu3 }
 0x30a   : > { %v6683_v57 = vpack.c.bf16 %v5226_v33, %v5225_v36  ;;  %v5423_v0 = vmul.f32 %v5226_v33, %v5226_v33  ;;  %v4946_v53 = vadd.f32 %v4945_v5, %v4816_v43  ;;  %v5369_v2 = vadd.f32 %v5368_v34, %v5226_v33 }
 0x30b   : > { %4860 = vmatmul.bf16.gmra.mxu2 %v4539_v41  ;;  %v4268_v43 = vrot.slane %v4110_v47, 1  ;;  %v10426_v34 = vshll.u32 %v8609_v55, 16  ;;  %v4117_v59 = vshll.u32 %v9509_v61, 16  ;;  %v3672_v5 = vadd.f32 %v9456_v42, %v8600_v45 }
 0x30c   : > { %v9502_v12 = vpop.f32.mrf.mxu1  ;;  %6869 = vst [vmem:[%s9316_s26 + $0x20] sm:$0xff] %v6683_v57   ;;  %v5075_v22 = vadd.f32 %v9431_v29, %v4946_v53  ;;  %v5470_v14 = vadd.f32 %v5469_v24, %v5423_v0  ;;  %v4107_v29 = vshrl.u32 %v9499_v7, 16  ;;  %v10427_v24 = vshll.u32 %v8611_v49, 16  ;;  %v10430_v0 = vld [vmem:[#allocation64_spill] sm:$0xff] }
 0x30d   : > { %v1454_v9 = vrot.slane %v10426_v34, 1  ;;  %v4270_v30 = vrot.slane %v4117_v59, 1  ;;  %v10431_v53 = vshll.u32 %v10430_v0, 16  ;;  %v4319_v45 = vsel %vm8047_vm8, %v4267_v50, 0 }
 0x30e   : > { %v5179_v36 = vadd.f32 %v5075_v22, %v3670_v56  ;;  %v4821_v16 = vpop.f32.mrf.mxu2  ;;  %v1457_v62 = vrot.slane %v10427_v24, 1  ;;  %v4269_v26 = vor.u32 %v4268_v43, %v4107_v29  ;;  %v4101_v56 = vrot.slane %v4099_v4, 7  ;;  %v10432_v24 = vld [vmem:[#allocation62_spill] sm:$0xff] }
 0x30f   : > { %v9511_v40 = vpop.f32.mrf.mxu0  ;;  %v1455_v31 = vsel %vm1401_vm5, %v1453_v18, %v1454_v9  ;;  %v1456_v7 = vor.u32 %v1454_v9, %v10428_v17  ;;  %v1459_v46 = vrot.slane %v10431_v53, 1  ;;  %v9550_v22 = vrot.slane %v4107_v29, 7 }
 0x310   : > { %v5370_v60 = vadd.f32 %v5369_v2, %v5179_v36  ;;  %v5424_v27 = vmul.f32 %v5179_v36, %v5179_v36  ;;  %v1458_v57 = vor.u32 %v1457_v62, %v10429_v37  ;;  %v9542_v2 = vsel %vm1401_vm5, %v4269_v26, %v4270_v30 }
 0x311   : > { %v4947_v63 = vpop.f32.mrf.mxu3  ;;  %v3675_v29 = vadd.f32 %v9479_v28, %v10432_v24  ;;  %v4104_v62 = vor.u32 %v4102_v54, %v4101_v56  ;;  %v4112_v26 = vor.u32 %v4110_v47, %v9550_v22  ;;  %v4114_v28 = vshrl.u32 %v9509_v61, 16 }
 0x312   : > { %5123 = vmatmul.bf16.gmra.mxu0 %v4266_v10  ;;  %v5471_v13 = vadd.f32 %v5470_v14, %v5424_v27  ;;  %v4948_v41 = vadd.f32 %v4947_v63, %v4818_v58  ;;  %v4422_v14 = vunpack.c.l.b16 %v4319_v45  ;;  %v4424_v10 = vunpack.c.l.b16 %v9542_v2 }
 0x313   : > { %v9554_v38 = vsel %vm1401_vm5, %v1458_v57, %v1459_v46  ;;  %v4105_v25 = vsel %vm1126_vm3, %v4094_v51, %v4104_v62  ;;  %v9575_v54 = vsel %vm7325_vm4, 0, %v4112_v26  ;;  %v9601_v26 = vld [vmem:[#allocation2 + $0xb0] sm:$0xff]  }
 0x314   : > { %v9523_v33 = vpop.f32.mrf.mxu1  ;;  %v5077_v6 = vadd.f32 %v9447_v1, %v4948_v41  ;;  %v4207_v1 = vsel %vm7325_vm4, 0, %v4097_v15  ;;  %v4546_v41 = vpack.c.b16 %v4424_v10, %v4422_v14  ;;  %v4421_v57 = vunpack.c.l.b16 %v4105_v25 }
 0x315   : > { %v4423_v53 = vunpack.c.l.b16 %v9575_v54  ;;  %v10434_v14 = vshrl.u32 %v10430_v0, 16  ;;  %v10435_v0 = vld [vmem:[#allocation65_spill] sm:$0xff] }
 0x316   : > { %v5180_v42 = vadd.f32 %v5077_v6, %v3672_v5  ;;  %4989 = vmatmul.bf16.gmra.mxu3 %v9357_v48  ;;  %v4823_v55 = vpop.f32.mrf.mxu2  ;;  %v1511_v48 = vsel %vm8047_vm8, %v1456_v7, 0 }
 0x317   : > { %3718 = vmatmul.bf16.gmra.mxu1 %v1455_v31  ;;  %v9535_v58 = vpop.f32.mrf.mxu0  ;;  %v1461_v10 = vor.u32 %v1459_v46, %v10434_v14  ;;  %v3680_v46 = vadd.f32 %v9523_v33, %v10435_v0  ;;  %v9629_v14 = vld [vmem:[#allocation2 + $0xb8] sm:$0xff]   ;;  %v10439_v0 = vld [vmem:[#allocation66_spill] sm:$0xff] }
 0x318   : > { %v5228_v49 = vmul.f32 %v10415_v35, %v5180_v42  ;;  %v10433_v42 = vld [vmem:[#allocation63_spill] sm:$0xff] }
 0x319   : > { %v4950_v43 = vpop.f32.mrf.mxu3  ;;  %v3677_v51 = vadd.f32 %v9502_v12, %v10433_v42  ;;  %v4426_v12 = vunpack.c.h.b16 %v9542_v2 }
 0x31a   : > { %v6688_v18 = vpack.c.bf16 %v5228_v49, %v5179_v36  ;;  %v5371_v34 = vadd.f32 %v5370_v60, %v5228_v49  ;;  %v5425_v9 = vmul.f32 %v5228_v49, %v5228_v49  ;;  %v4951_v27 = vadd.f32 %v4950_v43, %v4821_v16 }
 0x31b   : > { %4865 = vmatmul.bf16.gmra.mxu2 %v4207_v1  ;;  %v1614_v60 = vunpack.c.l.b16 %v1511_v48  ;;  %v1616_v16 = vunpack.c.l.b16 %v9554_v38  ;;  %v4544_v43 = vpack.c.b16 %v4423_v53, %v4421_v57  ;;  %v4116_v48 = vrot.slane %v4114_v28, 7  ;;  %v10436_v53 = vld [vmem:[#allocation15_spill] sm:$0xff] }
 0x31c   : > { %v9558_v4 = vpop.f32.mrf.mxu1  ;;  %6870 = vst [vmem:[%s9316_s26 + $0x28] sm:$0xff] %v6688_v18   ;;  %v5472_v63 = vadd.f32 %v5471_v13, %v5425_v9  ;;  %v5080_v50 = vadd.f32 %v9467_v44, %v4951_v27  ;;  %v4272_v13 = vor.u32 %v4270_v30, %v4114_v28 }
 0x31d   : > { %v3141_v47 = vpack.c.b16 %v1616_v16, %v1614_v60  ;;  %v4119_v2 = vor.u32 %v4117_v59, %v4116_v48  ;;  %v1618_v60 = vunpack.c.h.b16 %v9554_v38 }
 0x31e   : > { %v5181_v31 = vadd.f32 %v5080_v50, %v3675_v29  ;;  %v4826_v15 = vpop.f32.mrf.mxu2  ;;  %v4320_v30 = vsel %vm8047_vm8, %v4272_v13, 0 }
 0x31f   : > { %v9567_v36 = vpop.f32.mrf.mxu0  ;;  %v4428_v9 = vunpack.c.l.b16 %v4320_v30  ;;  %v4120_v61 = vsel %vm1126_vm3, %v9550_v22, %v4119_v2 }
 0x320   : > { %v5229_v5 = vmul.f32 %v10412_v3, %v5181_v31  ;;  %v9606_v31 = vld [vmem:[#allocation2 + $0xa8] sm:$0xff] }
 0x321   : > { %v4952_v44 = vpop.f32.mrf.mxu3  ;;  %v4549_v50 = vpack.c.b16 %v4428_v9, %v4426_v12  ;;  %v4125_v25 = vshll.u32 %v9606_v31, 16 }
 0x322   : > { %5128 = vmatmul.bf16.gmra.mxu0 %v4546_v41  ;;  %v5372_v6 = vadd.f32 %v5371_v34, %v5229_v5  ;;  %v5426_v17 = vmul.f32 %v5229_v5, %v5229_v5  ;;  %v4953_v7 = vadd.f32 %v4952_v44, %v4823_v55 }
 0x324   : > { %v9577_v37 = vpop.f32.mrf.mxu1  ;;  %v5473_v45 = vadd.f32 %v5472_v63, %v5426_v17  ;;  %v5082_v1 = vadd.f32 %v9485_v39, %v4953_v7  ;;  %v4425_v17 = vunpack.c.h.b16 %v9575_v54  ;;  %v4427_v7 = vunpack.c.l.b16 %v4120_v61 }
 0x326   : > { %v5182_v49 = vadd.f32 %v5082_v1, %v3677_v51  ;;  %4994 = vmatmul.bf16.gmra.mxu3 %v9470_v11  ;;  %v4828_v55 = vpop.f32.mrf.mxu2  ;;  %v1512_v11 = vsel %vm8047_vm8, %v1461_v10, 0  ;;  %v4273_v51 = vrot.slane %v4125_v25, 1  ;;  %v4547_v54 = vpack.c.b16 %v4427_v7, %v4425_v17 }
 0x327   : > { %3723 = vmatmul.bf16.gmra.mxu1 %v3141_v47  ;;  %v9583_v56 = vpop.f32.mrf.mxu0  ;;  %v1620_v16 = vunpack.c.l.b16 %v1512_v11 }
 0x328   : > { %v6693_v18 = vpack.c.bf16 %v5182_v49, %v5229_v5  ;;  %v5373_v39 = vadd.f32 %v5372_v6, %v5182_v49  ;;  %v5427_v34 = vmul.f32 %v5182_v49, %v5182_v49 }
 0x329   : > { %v4955_v27 = vpop.f32.mrf.mxu3  ;;  %v3144_v59 = vpack.c.b16 %v1620_v16, %v1618_v60 }
 0x32a   : > { %6871 = vst [vmem:[%s9316_s26 + $0x30] sm:$0xff] %v6693_v18   ;;  %v5474_v24 = vadd.f32 %v5473_v45, %v5427_v34  ;;  %v4956_v29 = vadd.f32 %v4955_v27, %v4826_v15  ;;  %v6646_v15 = vunpack.c.l.b16 %v9601_v26  ;;  %v3682_v45 = vadd.f32 %v9558_v4, %v10436_v53 }
 0x32b   : > { %4870 = vmatmul.bf16.gmra.mxu2 %v4544_v43 }
 0x32c   : > { %v9592_v62 = vpop.f32.mrf.mxu1  ;;  %v5085_v63 = vadd.f32 %v9511_v40, %v4956_v29  ;;  %v9613_v44 = vpack.c.b16 %v6646_v15, %v6646_v15 }
 0x32e   : > { %v5183_v28 = vadd.f32 %v5085_v63, %v3680_v46  ;;  %v4831_v5 = vpop.f32.mrf.mxu2  ;;  %v4132_v1 = vshll.u32 %v9613_v44, 16  ;;  %v3685_v46 = vadd.f32 %v9577_v37, %v10439_v0  ;;  %v4129_v37 = vshrl.u32 %v9613_v44, 16 }
 0x32f   : > { %v9603_v41 = vpop.f32.mrf.mxu0 }
 0x330   : > { %v5231_v33 = vmul.f32 %v10415_v35, %v5183_v28  ;;  %v4275_v18 = vrot.slane %v4132_v1, 1 }
 0x331   : > { %v4957_v40 = vpop.f32.mrf.mxu3 }
 0x332   : > { %5133 = vmatmul.bf16.gmra.mxu0 %v4549_v50  ;;  %v5374_v38 = vadd.f32 %v5373_v39, %v5231_v33  ;;  %v5428_v47 = vmul.f32 %v5231_v33, %v5231_v33  ;;  %v4958_v13 = vadd.f32 %v4957_v40, %v4828_v55  ;;  %v4122_v55 = vshrl.u32 %v9606_v31, 16  ;;  %v9635_v39 = vld [vmem:[#allocation2 + $0xb4] sm:$0xff]  }
 0x333   : > { %v4140_v11 = vshll.u32 %v9635_v39, 16  ;;  %v10441_v40 = vld [vmem:[#allocation7_spill] sm:$0xff] }
 0x334   : > { %v9615_v6 = vpop.f32.mrf.mxu1  ;;  %v5475_v57 = vadd.f32 %v5474_v24, %v5428_v47  ;;  %v5087_v22 = vadd.f32 %v9535_v58, %v4958_v13  ;;  %v10437_v58 = vld [vmem:[#allocation36_spill] sm:$0xff]  ;;  %v4274_v12 = vor.u32 %v4273_v51, %v4122_v55  ;;  %v4124_v47 = vrot.slane %v4122_v55, 7 }
 0x335   : > { %v10438_v10 = vshll.u32 %v10437_v58, 16  ;;  %v4278_v15 = vrot.slane %v4140_v11, 1  ;;  %v4277_v51 = vor.u32 %v4275_v18, %v4129_v37 }
 0x336   : > { %v5184_v30 = vadd.f32 %v5087_v22, %v3682_v45  ;;  %4999 = vmatmul.bf16.gmra.mxu3 %v9465_v20  ;;  %v4833_v49 = vpop.f32.mrf.mxu2  ;;  %v6651_v20 = vunpack.c.h.b16 %v9629_v14  ;;  %v4276_v16 = vsel %vm1401_vm5, %v4274_v12, %v4275_v18  ;;  %v10446_v18 = vshrl.u32 %v10441_v40, 16 }
 0x337   : > { %3728 = vmatmul.bf16.gmra.mxu1 %v3144_v59  ;;  %v9621_v42 = vpop.f32.mrf.mxu0  ;;  %v1462_v43 = vrot.slane %v10438_v10, 1  ;;  %v10442_v59 = vshll.u32 %v10441_v40, 16  ;;  %v4127_v10 = vor.u32 %v4125_v25, %v4124_v47 }
 0x338   : > { %v5232_v4 = vmul.f32 %v10412_v3, %v5184_v30  ;;  %v9645_v50 = vpack.c.b16 %v6651_v20, %v6651_v20 }
 0x339   : > { %v4960_v48 = vpop.f32.mrf.mxu3 }
 0x33a   : > { %v6698_v34 = vpack.c.bf16 %v5232_v4, %v5231_v33  ;;  %v5429_v9 = vmul.f32 %v5232_v4, %v5232_v4  ;;  %v4961_v27 = vadd.f32 %v4960_v48, %v4831_v5  ;;  %v5375_v24 = vadd.f32 %v5374_v38, %v5232_v4  ;;  %v10445_v48 = vld [vmem:[#allocation5_spill] sm:$0xff] }
 0x33b   : > { %4875 = vmatmul.bf16.gmra.mxu2 %v4547_v54  ;;  %v10440_v33 = vshrl.u32 %v10437_v58, 16  ;;  %v1464_v38 = vrot.slane %v10442_v59, 1  ;;  %v4147_v13 = vshll.u32 %v9645_v50, 16  ;;  %v3687_v12 = vadd.f32 %v9592_v62, %v10445_v48 }
 0x33c   : > { %v9638_v29 = vpop.f32.mrf.mxu1  ;;  %6872 = vst [vmem:[%s9316_s26 + $0x38] sm:$0xff] %v6698_v34   ;;  %v5090_v63 = vadd.f32 %v9567_v36, %v4961_v27  ;;  %v5476_v2 = vadd.f32 %v5475_v57, %v5429_v9  ;;  %v4137_v36 = vshrl.u32 %v9635_v39, 16  ;;  %v10443_v57 = vld [vmem:[#allocation39_spill] sm:$0xff]  ;;  %v4321_v62 = vsel %vm8047_vm8, %v4277_v51, 0 }
 0x33d   : > { %v1463_v61 = vor.u32 %v1462_v43, %v10440_v33  ;;  %v10444_v53 = vshll.u32 %v10443_v57, 16  ;;  %v4280_v43 = vrot.slane %v4147_v13, 1  ;;  %v1466_v20 = vor.u32 %v1464_v38, %v10446_v18  ;;  %v10448_v27 = vld [vmem:[#allocation43_spill] sm:$0xff] }
 0x33e   : > { %v5185_v28 = vadd.f32 %v5090_v63, %v3685_v46  ;;  %v4836_v5 = vpop.f32.mrf.mxu2  ;;  %v4279_v30 = vor.u32 %v4278_v15, %v4137_v36  ;;  %v10447_v34 = vshrl.u32 %v10443_v57, 16  ;;  %v4209_v63 = vsel %vm7325_vm4, 0, %v4127_v10 }
 0x33f   : > { %v9647_v60 = vpop.f32.mrf.mxu0  ;;  %v1467_v45 = vrot.slane %v10444_v53, 1  ;;  %v1465_v55 = vsel %vm1401_vm5, %v1463_v61, %v1464_v38  ;;  %v9686_v15 = vrot.slane %v4137_v36, 7  ;;  %v4434_v33 = vunpack.c.l.b16 %v4321_v62 }
 0x340   : > { %v5376_v17 = vadd.f32 %v5375_v24, %v5185_v28  ;;  %v5430_v7 = vmul.f32 %v5185_v28, %v5185_v28  ;;  %v10449_v24 = vshll.u32 %v10448_v27, 16  ;;  %v9678_v0 = vsel %vm1401_vm5, %v4279_v30, %v4280_v43 }
 0x341   : > { %v4962_v22 = vpop.f32.mrf.mxu3  ;;  %v1468_v9 = vor.u32 %v1467_v45, %v10447_v34  ;;  %v4436_v61 = vunpack.c.l.b16 %v9678_v0  ;;  %v10450_v45 = vld [vmem:[#allocation8_spill] sm:$0xff] }
 0x342   : > { %5138 = vmatmul.bf16.gmra.mxu0 %v4276_v16  ;;  %v5477_v54 = vadd.f32 %v5476_v2, %v5430_v7  ;;  %v4963_v4 = vadd.f32 %v4962_v22, %v4833_v49  ;;  %v1469_v25 = vrot.slane %v10449_v24, 1  ;;  %v4131_v2 = vrot.slane %v4129_v37, 7 }
 0x343   : > { %v3690_v36 = vadd.f32 %v9615_v6, %v10450_v45  ;;  %v4144_v6 = vshrl.u32 %v9645_v50, 16 }
 0x344   : > { %v9659_v58 = vpop.f32.mrf.mxu1  ;;  %v5092_v39 = vadd.f32 %v9583_v56, %v4963_v4  ;;  %v9690_v59 = vsel %vm1401_vm5, %v1468_v9, %v1469_v25  ;;  %v4134_v22 = vor.u32 %v4132_v1, %v4131_v2  ;;  %v4142_v4 = vor.u32 %v4140_v11, %v9686_v15 }
 0x346   : > { %v5186_v46 = vadd.f32 %v5092_v39, %v3687_v12  ;;  %5004 = vmatmul.bf16.gmra.mxu3 %v9493_v19  ;;  %v4838_v56 = vpop.f32.mrf.mxu2  ;;  %v1513_v19 = vsel %vm8047_vm8, %v1466_v20, 0  ;;  %v4135_v44 = vsel %vm1126_vm3, %v4124_v47, %v4134_v22  ;;  %v9711_v1 = vsel %vm7325_vm4, 0, %v4142_v4  ;;  %v9737_v4 = vld [vmem:[#allocation2 + $0xc8] sm:$0xff]  }
 0x347   : > { %3733 = vmatmul.bf16.gmra.mxu1 %v1465_v55  ;;  %v9671_v49 = vpop.f32.mrf.mxu0  ;;  %v4554_v55 = vpack.c.b16 %v4436_v61, %v4434_v33  ;;  %v4433_v9 = vunpack.c.l.b16 %v4135_v44  ;;  %v4435_v24 = vunpack.c.l.b16 %v9711_v1  ;;  %v10452_v33 = vshrl.u32 %v10448_v27, 16  ;;  %v10453_v27 = vld [vmem:[#allocation6_spill] sm:$0xff] }
 0x348   : > { %v5234_v16 = vmul.f32 %v10415_v35, %v5186_v46  ;;  %v10451_v46 = vld [vmem:[#allocation10_spill] sm:$0xff] }
 0x349   : > { %v4965_v40 = vpop.f32.mrf.mxu3  ;;  %v3692_v47 = vadd.f32 %v9638_v29, %v10451_v46  ;;  %v1471_v61 = vor.u32 %v1469_v25, %v10452_v33  ;;  %v4438_v29 = vunpack.c.h.b16 %v9678_v0  ;;  %v3695_v25 = vadd.f32 %v9659_v58, %v10453_v27  ;;  %v9765_v33 = vld [vmem:[#allocation2 + $0xd0] sm:$0xff]  }
 0x34a   : > { %v6703_v38 = vpack.c.bf16 %v5234_v16, %v5185_v28  ;;  %v5377_v7 = vadd.f32 %v5376_v17, %v5234_v16  ;;  %v5431_v57 = vmul.f32 %v5234_v16, %v5234_v16  ;;  %v4966_v53 = vadd.f32 %v4965_v40, %v4836_v5  ;;  %v10457_v27 = vld [vmem:[#allocation50_spill] sm:$0xff] }
 0x34b   : > { %4880 = vmatmul.bf16.gmra.mxu2 %v4209_v63  ;;  %v1626_v17 = vunpack.c.l.b16 %v1513_v19  ;;  %v1628_v5 = vunpack.c.l.b16 %v9690_v59  ;;  %v4552_v40 = vpack.c.b16 %v4435_v24, %v4433_v9  ;;  %v4146_v19 = vrot.slane %v4144_v6, 7  ;;  %v10454_v24 = vld [vmem:[#allocation45_spill] sm:$0xff] }
 0x34c   : > { %v9694_v37 = vpop.f32.mrf.mxu1  ;;  %6873 = vst [vmem:[%s9316_s26 + $0x40] sm:$0xff] %v6703_v38   ;;  %v5478_v51 = vadd.f32 %v5477_v54, %v5431_v57  ;;  %v5095_v30 = vadd.f32 %v9603_v41, %v4966_v53  ;;  %v4282_v54 = vor.u32 %v4280_v43, %v4144_v6 }
 0x34d   : > { %v3149_v11 = vpack.c.b16 %v1628_v5, %v1626_v17  ;;  %v4149_v0 = vor.u32 %v4147_v13, %v4146_v19  ;;  %v1630_v17 = vunpack.c.h.b16 %v9690_v59 }
 0x34e   : > { %v5187_v10 = vadd.f32 %v5095_v30, %v3690_v36  ;;  %v4841_v48 = vpop.f32.mrf.mxu2  ;;  %v4322_v43 = vsel %vm8047_vm8, %v4282_v54, 0 }
 0x34f   : > { %v9703_v28 = vpop.f32.mrf.mxu0  ;;  %v4440_v57 = vunpack.c.l.b16 %v4322_v43  ;;  %v4150_v50 = vsel %vm1126_vm3, %v9686_v15, %v4149_v0 }
 0x350   : > { %v5235_v12 = vmul.f32 %v10412_v3, %v5187_v10  ;;  %v9742_v10 = vld [vmem:[#allocation2 + $0xc0] sm:$0xff] }
 0x351   : > { %v4967_v41 = vpop.f32.mrf.mxu3  ;;  %v4557_v30 = vpack.c.b16 %v4440_v57, %v4438_v29  ;;  %v4155_v44 = vshll.u32 %v9742_v10, 16 }
 0x352   : > { %5143 = vmatmul.bf16.gmra.mxu0 %v4554_v55  ;;  %v5378_v39 = vadd.f32 %v5377_v7, %v5235_v12  ;;  %v5432_v18 = vmul.f32 %v5235_v12, %v5235_v12  ;;  %v4968_v20 = vadd.f32 %v4967_v41, %v4838_v56 }
 0x354   : > { %v9713_v34 = vpop.f32.mrf.mxu1  ;;  %v5479_v62 = vadd.f32 %v5478_v51, %v5432_v18  ;;  %v5097_v63 = vadd.f32 %v9621_v42, %v4968_v20  ;;  %v4437_v18 = vunpack.c.h.b16 %v9711_v1  ;;  %v4439_v20 = vunpack.c.l.b16 %v4150_v50 }
 0x356   : > { %v5188_v16 = vadd.f32 %v5097_v63, %v3692_v47  ;;  %5009 = vmatmul.bf16.gmra.mxu3 %v9606_v31  ;;  %v4843_v56 = vpop.f32.mrf.mxu2  ;;  %v1514_v31 = vsel %vm8047_vm8, %v1471_v61, 0  ;;  %v4283_v47 = vrot.slane %v4155_v44, 1  ;;  %v4555_v1 = vpack.c.b16 %v4439_v20, %v4437_v18 }
 0x357   : > { %3738 = vmatmul.bf16.gmra.mxu1 %v3149_v11  ;;  %v9719_v2 = vpop.f32.mrf.mxu0  ;;  %v1632_v5 = vunpack.c.l.b16 %v1514_v31 }
 0x358   : > { %v6708_v38 = vpack.c.bf16 %v5188_v16, %v5235_v12  ;;  %v5379_v42 = vadd.f32 %v5378_v39, %v5188_v16  ;;  %v5433_v7 = vmul.f32 %v5188_v16, %v5188_v16 }
 0x359   : > { %v4970_v53 = vpop.f32.mrf.mxu3  ;;  %v3152_v13 = vpack.c.b16 %v1632_v5, %v1630_v17 }
 0x35a   : > { %6874 = vst [vmem:[%s9316_s26 + $0x48] sm:$0xff] %v6708_v38   ;;  %v5480_v45 = vadd.f32 %v5479_v62, %v5433_v7  ;;  %v4971_v36 = vadd.f32 %v4970_v53, %v4841_v48  ;;  %v6654_v48 = vunpack.c.l.b16 %v9737_v4  ;;  %v3697_v62 = vadd.f32 %v9694_v37, %v10454_v24 }
 0x35b   : > { %4885 = vmatmul.bf16.gmra.mxu2 %v4552_v40 }
 0x35c   : > { %v9728_v22 = vpop.f32.mrf.mxu1  ;;  %v5100_v51 = vadd.f32 %v9647_v60, %v4971_v36  ;;  %v9749_v41 = vpack.c.b16 %v6654_v48, %v6654_v48 }
 0x35e   : > { %v5189_v6 = vadd.f32 %v5100_v51, %v3695_v25  ;;  %v4846_v12 = vpop.f32.mrf.mxu2  ;;  %v4162_v63 = vshll.u32 %v9749_v41, 16  ;;  %v3700_v25 = vadd.f32 %v9713_v34, %v10457_v27  ;;  %v4159_v34 = vshrl.u32 %v9749_v41, 16 }
 0x35f   : > { %v9739_v55 = vpop.f32.mrf.mxu0 }
 0x360   : > { %v5237_v58 = vmul.f32 %v10415_v35, %v5189_v6  ;;  %v4285_v38 = vrot.slane %v4162_v63, 1 }
 0x361   : > { %v4972_v60 = vpop.f32.mrf.mxu3 }
 0x362   : > { %5148 = vmatmul.bf16.gmra.mxu0 %v4557_v30  ;;  %v5380_v59 = vadd.f32 %v5379_v42, %v5237_v58  ;;  %v5434_v11 = vmul.f32 %v5237_v58, %v5237_v58  ;;  %v4973_v54 = vadd.f32 %v4972_v60, %v4843_v56  ;;  %v4152_v56 = vshrl.u32 %v9742_v10, 16  ;;  %v9771_v42 = vld [vmem:[#allocation2 + $0xcc] sm:$0xff]  }
 0x363   : > { %v4170_v31 = vshll.u32 %v9771_v42, 16  ;;  %v10459_v60 = vld [vmem:[#allocation22_spill] sm:$0xff] }
 0x364   : > { %v9751_v39 = vpop.f32.mrf.mxu1  ;;  %v5481_v9 = vadd.f32 %v5480_v45, %v5434_v11  ;;  %v5102_v15 = vadd.f32 %v9671_v49, %v4973_v54  ;;  %v10455_v49 = vld [vmem:[#allocation9_spill] sm:$0xff]  ;;  %v4284_v29 = vor.u32 %v4283_v47, %v4152_v56  ;;  %v4154_v11 = vrot.slane %v4152_v56, 7 }
 0x365   : > { %v10456_v61 = vshll.u32 %v10455_v49, 16  ;;  %v4288_v48 = vrot.slane %v4170_v31, 1  ;;  %v4287_v47 = vor.u32 %v4285_v38, %v4159_v34 }
 0x366   : > { %v5190_v43 = vadd.f32 %v5102_v15, %v3697_v62  ;;  %5014 = vmatmul.bf16.gmra.mxu3 %v9601_v26  ;;  %v4848_v16 = vpop.f32.mrf.mxu2  ;;  %v6659_v26 = vunpack.c.h.b16 %v9765_v33  ;;  %v4286_v5 = vsel %vm1401_vm5, %v4284_v29, %v4285_v38  ;;  %v10464_v38 = vshrl.u32 %v10459_v60, 16 }
 0x367   : > { %3743 = vmatmul.bf16.gmra.mxu1 %v3152_v13  ;;  %v9757_v46 = vpop.f32.mrf.mxu0  ;;  %v1472_v40 = vrot.slane %v10456_v61, 1  ;;  %v10460_v13 = vshll.u32 %v10459_v60, 16  ;;  %v4157_v61 = vor.u32 %v4155_v44, %v4154_v11 }
 0x368   : > { %v5238_v37 = vmul.f32 %v10412_v3, %v5190_v43  ;;  %v9781_v30 = vpack.c.b16 %v6659_v26, %v6659_v26 }
 0x369   : > { %v4975_v19 = vpop.f32.mrf.mxu3 }
 0x36a   : > { %v6713_v7 = vpack.c.bf16 %v5238_v37, %v5237_v58  ;;  %v5435_v57 = vmul.f32 %v5238_v37, %v5238_v37  ;;  %v4976_v53 = vadd.f32 %v4975_v19, %v4846_v12  ;;  %v5381_v45 = vadd.f32 %v5380_v59, %v5238_v37  ;;  %v10463_v19 = vld [vmem:[#allocation53_spill] sm:$0xff] }
 0x36b   : > { %4890 = vmatmul.bf16.gmra.mxu2 %v4555_v1  ;;  %v10458_v58 = vshrl.u32 %v10455_v49, 16  ;;  %v1474_v59 = vrot.slane %v10460_v13, 1  ;;  %v4177_v54 = vshll.u32 %v9781_v30, 16  ;;  %v3702_v29 = vadd.f32 %v9728_v22, %v10463_v19 }
 0x36c   : > { %v9774_v36 = vpop.f32.mrf.mxu1  ;;  %6875 = vst [vmem:[%s9316_s26 + $0x50] sm:$0xff] %v6713_v7   ;;  %v5105_v51 = vadd.f32 %v9703_v28, %v4976_v53  ;;  %v5482_v0 = vadd.f32 %v5481_v9, %v5435_v57  ;;  %v4167_v28 = vshrl.u32 %v9771_v42, 16  ;;  %v10461_v9 = vld [vmem:[#allocation11_spill] sm:$0xff]  ;;  %v10466_v53 = vld [vmem:[#allocation14_spill] sm:$0xff]  ;;  %v4323_v22 = vsel %vm8047_vm8, %v4287_v47, 0 }
 0x36d   : > { %v1473_v50 = vor.u32 %v1472_v40, %v10458_v58  ;;  %v10462_v24 = vshll.u32 %v10461_v9, 16  ;;  %v4290_v40 = vrot.slane %v4177_v54, 1  ;;  %v1476_v26 = vor.u32 %v1474_v59, %v10464_v38 }
 0x36e   : > { %v5191_v6 = vadd.f32 %v5105_v51, %v3700_v25  ;;  %v4851_v12 = vpop.f32.mrf.mxu2  ;;  %v4289_v43 = vor.u32 %v4288_v48, %v4167_v28  ;;  %v10465_v7 = vshrl.u32 %v10461_v9, 16  ;;  %v4211_v51 = vsel %vm7325_vm4, 0, %v4157_v61 }
 0x36f   : > { %v9783_v17 = vpop.f32.mrf.mxu0  ;;  %v1477_v62 = vrot.slane %v10462_v24, 1  ;;  %v1475_v56 = vsel %vm1401_vm5, %v1473_v50, %v1474_v59  ;;  %v9822_v48 = vrot.slane %v4167_v28, 7  ;;  %v4446_v58 = vunpack.c.l.b16 %v4323_v22  ;;  %v10469_v22 = vld [vmem:[#allocation25_spill] sm:$0xff] }
 0x370   : > { %v5382_v18 = vadd.f32 %v5381_v45, %v5191_v6  ;;  %v5436_v20 = vmul.f32 %v5191_v6, %v5191_v6  ;;  %v10467_v45 = vshll.u32 %v10466_v53, 16  ;;  %v9814_v27 = vsel %vm1401_vm5, %v4289_v43, %v4290_v40 }
 0x371   : > { %v4977_v15 = vpop.f32.mrf.mxu3  ;;  %v1478_v57 = vor.u32 %v1477_v62, %v10465_v7  ;;  %v4448_v50 = vunpack.c.l.b16 %v9814_v27  ;;  %v10468_v62 = vld [vmem:[#allocation13_spill] sm:$0xff] }
 0x372   : > { %5153 = vmatmul.bf16.gmra.mxu0 %v4286_v5  ;;  %v5483_v1 = vadd.f32 %v5482_v0, %v5436_v20  ;;  %v4978_v37 = vadd.f32 %v4977_v15, %v4848_v16  ;;  %v1479_v44 = vrot.slane %v10467_v45, 1  ;;  %v4161_v0 = vrot.slane %v4159_v34, 7 }
 0x373   : > { %v3705_v28 = vadd.f32 %v9751_v39, %v10468_v62  ;;  %v4174_v39 = vshrl.u32 %v9781_v30, 16 }
 0x374   : > { %v9795_v49 = vpop.f32.mrf.mxu1  ;;  %v5107_v42 = vadd.f32 %v9719_v2, %v4978_v37  ;;  %v9826_v13 = vsel %vm1401_vm5, %v1478_v57, %v1479_v44  ;;  %v4164_v15 = vor.u32 %v4162_v63, %v4161_v0  ;;  %v4172_v37 = vor.u32 %v4170_v31, %v9822_v48 }
 0x376   : > { %v5192_v25 = vadd.f32 %v5107_v42, %v3702_v29  ;;  %5019 = vmatmul.bf16.gmra.mxu3 %v9629_v14  ;;  %v4853_v2 = vpop.f32.mrf.mxu2  ;;  %v1515_v14 = vsel %vm8047_vm8, %v1476_v26, 0  ;;  %v4165_v41 = vsel %vm1126_vm3, %v4154_v11, %v4164_v15  ;;  %v9847_v63 = vsel %vm7325_vm4, 0, %v4172_v37  ;;  %v10471_v15 = vld [vmem:[#allocation17_spill] sm:$0xff] }
 0x377   : > { %3748 = vmatmul.bf16.gmra.mxu1 %v1475_v56  ;;  %v9807_v16 = vpop.f32.mrf.mxu0  ;;  %v4562_v56 = vpack.c.b16 %v4448_v50, %v4446_v58  ;;  %v4445_v57 = vunpack.c.l.b16 %v4165_v41  ;;  %v4447_v45 = vunpack.c.l.b16 %v9847_v63  ;;  %v1642_v37 = vunpack.c.h.b16 %v9826_v13 }
 0x378   : > { %v5240_v5 = vmul.f32 %v10415_v35, %v5192_v25  ;;  %v3707_v25 = vadd.f32 %v9774_v36, %v10469_v22  ;;  %v4450_v36 = vunpack.c.h.b16 %v9814_v27 }
 0x379   : > { %v4980_v60 = vpop.f32.mrf.mxu3  ;;  %v4560_v50 = vpack.c.b16 %v4447_v45, %v4445_v57 }
 0x37a   : > { %v6718_v59 = vpack.c.bf16 %v5240_v5, %v5191_v6  ;;  %v5383_v20 = vadd.f32 %v5382_v18, %v5240_v5  ;;  %v5437_v9 = vmul.f32 %v5240_v5, %v5240_v5  ;;  %v4981_v24 = vadd.f32 %v4980_v60, %v4851_v12 }
 0x37b   : > { %4895 = vmatmul.bf16.gmra.mxu2 %v4211_v51  ;;  %v1638_v18 = vunpack.c.l.b16 %v1515_v14  ;;  %v1640_v12 = vunpack.c.l.b16 %v9826_v13  ;;  %v10470_v5 = vshrl.u32 %v10466_v53, 16  ;;  %v4176_v60 = vrot.slane %v4174_v39, 7  ;;  %v10472_v13 = vld [vmem:[#allocation27_spill] sm:$0xff] }
 0x37c   : > { %v9830_v34 = vpop.f32.mrf.mxu1  ;;  %6876 = vst [vmem:[%s9316_s26 + $0x58] sm:$0xff] %v6718_v59   ;;  %v5484_v47 = vadd.f32 %v5483_v1, %v5437_v9  ;;  %v5110_v43 = vadd.f32 %v9739_v55, %v4981_v24  ;;  %v4292_v1 = vor.u32 %v4290_v40, %v4174_v39  ;;  %v3710_v53 = vadd.f32 %v9795_v49, %v10471_v15 }
 0x37d   : > { %v3157_v31 = vpack.c.b16 %v1640_v12, %v1638_v18  ;;  %v1481_v58 = vor.u32 %v1479_v44, %v10470_v5  ;;  %v4179_v27 = vor.u32 %v4177_v54, %v4176_v60  ;;  %v4449_v54 = vunpack.c.h.b16 %v9847_v63 }
 0x37e   : > { %v5193_v61 = vadd.f32 %v5110_v43, %v3705_v28  ;;  %v4856_v19 = vpop.f32.mrf.mxu2  ;;  %v4324_v40 = vsel %vm8047_vm8, %v4292_v1, 0 }
 0x37f   : > { %v9839_v6 = vpop.f32.mrf.mxu0  ;;  %v4180_v8 = vsel %vm1126_vm3, %v9822_v48, %v4179_v27 }
 0x380   : > { %v5241_v29 = vmul.f32 %v10412_v3, %v5193_v61  ;;  %v4451_v41 = vunpack.c.l.b16 %v4180_v8 }
 0x381   : > { %v4982_v55 = vpop.f32.mrf.mxu3 }
 0x382   : > { %5158 = vmatmul.bf16.gmra.mxu0 %v4562_v56  ;;  %v5438_v42 = vmul.f32 %v5241_v29, %v5241_v29  ;;  %v4983_v38 = vadd.f32 %v4982_v55, %v4853_v2  ;;  %v5384_v26 = vadd.f32 %v5383_v20, %v5241_v29  ;;  %v4452_v20 = vunpack.c.l.b16 %v4324_v40 }
 0x384   : > { %v9849_v7 = vpop.f32.mrf.mxu1  ;;  %v5112_v11 = vadd.f32 %v9757_v46, %v4983_v38  ;;  %v5485_v23 = vadd.f32 %v5484_v47, %v5438_v42  ;;  %v4565_v47 = vpack.c.b16 %v4452_v20, %v4450_v36 }
 0x386   : > { %v5194_v2 = vadd.f32 %v5112_v11, %v3707_v25  ;;  %5024 = vmatmul.bf16.gmra.mxu3 %v9742_v10  ;;  %v4858_v0 = vpop.f32.mrf.mxu2  ;;  %v1516_v10 = vsel %vm8047_vm8, %v1481_v58, 0 }
 0x387   : > { %3753 = vmatmul.bf16.gmra.mxu1 %v3157_v31  ;;  %v9855_v51 = vpop.f32.mrf.mxu0  ;;  %v1644_v56 = vunpack.c.l.b16 %v1516_v10  ;;  %v3712_v31 = vadd.f32 %v9830_v34, %v10472_v13  ;;  %v10473_v34 = vld [vmem:[#allocation12_spill] sm:$0xff] }
 0x388   : > { %v6723_v46 = vpack.c.bf16 %v5194_v2, %v5241_v29  ;;  %v5385_v14 = vadd.f32 %v5384_v26, %v5194_v2  ;;  %v5439_v59 = vmul.f32 %v5194_v2, %v5194_v2  ;;  %v4563_v26 = vpack.c.b16 %v4451_v41, %v4449_v54 }
 0x389   : > { %v4985_v9 = vpop.f32.mrf.mxu3  ;;  %v3160_v49 = vpack.c.b16 %v1644_v56, %v1642_v37  ;;  %v10475_v56 = vld [vmem:[#allocation34_spill] sm:$0xff] }
 0x38a   : > { %6877 = vst [vmem:[%s9316_s26 + $0x60] sm:$0xff] %v6723_v46   ;;  %v5486_v24 = vadd.f32 %v5485_v23, %v5439_v59  ;;  %v4986_v62 = vadd.f32 %v4985_v9, %v4856_v19  ;;  %v10474_v59 = vld [vmem:[#allocation31_spill] sm:$0xff] }
 0x38b   : > { %4900 = vmatmul.bf16.gmra.mxu2 %v4560_v50 }
 0x38c   : > { %v3716_v28 = vpop.f32.mrf.mxu1  ;;  %v5115_v44 = vadd.f32 %v9783_v17, %v4986_v62 }
 0x38d   : > { %v3717_v20 = vadd.f32 %v3716_v28, %v10474_v59 }
 0x38e   : > { %v5195_v18 = vadd.f32 %v5115_v44, %v3710_v53  ;;  %v4861_v12 = vpop.f32.mrf.mxu2 }
 0x38f   : > { %v5124_v43 = vpop.f32.mrf.mxu0 }
 0x390   : > { %v5243_v61 = vmul.f32 %v10415_v35, %v5195_v18 }
 0x391   : > { %v4987_v19 = vpop.f32.mrf.mxu3 }
 0x392   : > { %5163 = vmatmul.bf16.gmra.mxu0 %v4565_v47  ;;  %v5386_v39 = vadd.f32 %v5385_v14, %v5243_v61  ;;  %v5440_v17 = vmul.f32 %v5243_v61, %v5243_v61  ;;  %v4988_v29 = vadd.f32 %v4987_v19, %v4858_v0 }
 0x394   : > { %v3719_v30 = vpop.f32.mrf.mxu1  ;;  %v5487_v55 = vadd.f32 %v5486_v24, %v5440_v17  ;;  %v5117_v1 = vadd.f32 %v9807_v16, %v4988_v29  ;;  %v3715_v16 = vadd.f32 %v9849_v7, %v10473_v34  ;;  %v10476_v29 = vld [vmem:[#allocation16_spill] sm:$0xff] }
 0x395   : > { %v3720_v18 = vadd.f32 %v3719_v30, %v10475_v56 }
 0x396   : > { %v5196_v48 = vadd.f32 %v5117_v1, %v3712_v31  ;;  %5029 = vmatmul.bf16.gmra.mxu3 %v9737_v4  ;;  %v4863_v38 = vpop.f32.mrf.mxu2 }
 0x397   : > { %3758 = vmatmul.bf16.gmra.mxu1 %v3160_v49  ;;  %v5126_v42 = vpop.f32.mrf.mxu0 }
 0x398   : > { %v5244_v57 = vmul.f32 %v10412_v3, %v5196_v48 }
 0x399   : > { %v4990_v45 = vpop.f32.mrf.mxu3 }
 0x39a   : > { %v6728_v22 = vpack.c.bf16 %v5244_v57, %v5243_v61  ;;  %v5441_v63 = vmul.f32 %v5244_v57, %v5244_v57  ;;  %v4991_v25 = vadd.f32 %v4990_v45, %v4861_v12  ;;  %v5387_v11 = vadd.f32 %v5386_v39, %v5244_v57 }
 0x39b   : > { %4905 = vmatmul.bf16.gmra.mxu2 %v4563_v26 }
 0x39c   : > { %v3721_v23 = vpop.f32.mrf.mxu1  ;;  %6878 = vst [vmem:[%s9316_s26 + $0x68] sm:$0xff] %v6728_v22   ;;  %v5120_v40 = vadd.f32 %v9839_v6, %v4991_v25  ;;  %v5488_v2 = vadd.f32 %v5487_v55, %v5441_v63  ;;  %v10477_v22 = vld [vmem:[#allocation37_spill] sm:$0xff] }
 0x39d   : > { %v3722_v54 = vadd.f32 %v3721_v23, %v10476_v29 }
 0x39e   : > { %v5197_v4 = vadd.f32 %v5120_v40, %v3715_v16  ;;  %v4866_v5 = vpop.f32.mrf.mxu2 }
 0x39f   : > { %v5129_v0 = vpop.f32.mrf.mxu0 }
 0x3a0   : > { %v5388_v58 = vadd.f32 %v5387_v11, %v5197_v4  ;;  %v5442_v50 = vmul.f32 %v5197_v4, %v5197_v4 }
 0x3a1   : > { %v4992_v60 = vpop.f32.mrf.mxu3 }
 0x3a2   : > { %v5489_v36 = vadd.f32 %v5488_v2, %v5442_v50  ;;  %v4993_v46 = vadd.f32 %v4992_v60, %v4863_v38 }
 0x3a4   : > { %v3724_v14 = vpop.f32.mrf.mxu1  ;;  %v5122_v9 = vadd.f32 %v9855_v51, %v4993_v46 }
 0x3a5   : > { %v3725_v63 = vadd.f32 %v3724_v14, %v10477_v22 }
 0x3a6   : > { %v5198_v24 = vadd.f32 %v5122_v9, %v3717_v20  ;;  %5034 = vmatmul.bf16.gmra.mxu3 %v9765_v33  ;;  %v4868_v7 = vpop.f32.mrf.mxu2 }
 0x3a7   : > { %v5131_v6 = vpop.f32.mrf.mxu0 }
 0x3a8   : > { %v5246_v62 = vmul.f32 %v10415_v35, %v5198_v24 }
 0x3a9   : > { %v4995_v10 = vpop.f32.mrf.mxu3 }
 0x3aa   : > { %v6733_v15 = vpack.c.bf16 %v5246_v62, %v5197_v4  ;;  %v5389_v53 = vadd.f32 %v5388_v58, %v5246_v62  ;;  %v5443_v44 = vmul.f32 %v5246_v62, %v5246_v62  ;;  %v4996_v27 = vadd.f32 %v4995_v10, %v4866_v5  ;;  %v10478_v58 = vld [vmem:[#allocation40_spill] sm:$0xff] }
 0x3ab   : > { %v10479_v62 = vld [vmem:[#allocation20_spill] sm:$0xff] }
 0x3ac   : > { %v3726_v47 = vpop.f32.mrf.mxu1  ;;  %6879 = vst [vmem:[%s9316_s26 + $0x70] sm:$0xff] %v6733_v15   ;;  %v5490_v37 = vadd.f32 %v5489_v36, %v5443_v44  ;;  %v5125_v28 = vadd.f32 %v5124_v43, %v4996_v27 }
 0x3ad   : > { %v3727_v50 = vadd.f32 %v3726_v47, %v10478_v58 }
 0x3ae   : > { %v5199_v12 = vadd.f32 %v5125_v28, %v3720_v18  ;;  %v4871_v51 = vpop.f32.mrf.mxu2 }
 0x3af   : > { %v5134_v8 = vpop.f32.mrf.mxu0 }
 0x3b0   : > { %v5247_v61 = vmul.f32 %v10412_v3, %v5199_v12 }
 0x3b1   : > { %v4997_v33 = vpop.f32.mrf.mxu3 }
 0x3b2   : > { %v5444_v19 = vmul.f32 %v5247_v61, %v5247_v61  ;;  %v4998_v49 = vadd.f32 %v4997_v33, %v4868_v7  ;;  %v5390_v39 = vadd.f32 %v5389_v53, %v5247_v61 }
 0x3b4   : > { %v3729_v17 = vpop.f32.mrf.mxu1  ;;  %v5127_v41 = vadd.f32 %v5126_v42, %v4998_v49  ;;  %v5491_v55 = vadd.f32 %v5490_v37, %v5444_v19 }
 0x3b5   : > { %v3730_v10 = vadd.f32 %v3729_v17, %v10479_v62 }
 0x3b6   : > { %v5200_v13 = vadd.f32 %v5127_v41, %v3722_v54  ;;  %v4873_v31 = vpop.f32.mrf.mxu2 }
 0x3b7   : > { %v5136_v45 = vpop.f32.mrf.mxu0 }
 0x3b8   : > { %v6738_v1 = vpack.c.bf16 %v5200_v13, %v5247_v61  ;;  %v5391_v30 = vadd.f32 %v5390_v39, %v5200_v13  ;;  %v5445_v43 = vmul.f32 %v5200_v13, %v5200_v13 }
 0x3b9   : > { %v5000_v48 = vpop.f32.mrf.mxu3 }
 0x3ba   : > { %6880 = vst [vmem:[%s9316_s26 + $0x78] sm:$0xff] %v6738_v1   ;;  %v5492_v38 = vadd.f32 %v5491_v55, %v5445_v43  ;;  %v5001_v26 = vadd.f32 %v5000_v48, %v4871_v51  ;;  %v10480_v51 = vld [vmem:[#allocation19_spill] sm:$0xff]  ;;  %v10481_v1 = vld [vmem:[#allocation18_spill] sm:$0xff] }
 0x3bc   : > { %v3731_v57 = vpop.f32.mrf.mxu1  ;;  %v5130_v25 = vadd.f32 %v5129_v0, %v5001_v26 }
 0x3bd   : > { %v3732_v61 = vadd.f32 %v3731_v57, %v10480_v51 }
 0x3be   : > { %v5201_v11 = vadd.f32 %v5130_v25, %v3725_v63  ;;  %v4876_v34 = vpop.f32.mrf.mxu2 }
 0x3bf   : > { %v5139_v36 = vpop.f32.mrf.mxu0 }
 0x3c0   : > { %v5249_v23 = vmul.f32 %v10415_v35, %v5201_v11 }
 0x3c1   : > { %v5002_v42 = vpop.f32.mrf.mxu3 }
 0x3c2   : > { %v5392_v16 = vadd.f32 %v5391_v30, %v5249_v23  ;;  %v5446_v40 = vmul.f32 %v5249_v23, %v5249_v23  ;;  %v5003_v2 = vadd.f32 %v5002_v42, %v4873_v31 }
 0x3c4   : > { %v3734_v4 = vpop.f32.mrf.mxu1  ;;  %v5493_v5 = vadd.f32 %v5492_v38, %v5446_v40  ;;  %v5132_v60 = vadd.f32 %v5131_v6, %v5003_v2 }
 0x3c5   : > { %v3735_v30 = vadd.f32 %v3734_v4, %v10481_v1 }
 0x3c6   : > { %v5202_v46 = vadd.f32 %v5132_v60, %v3727_v50  ;;  %v4878_v59 = vpop.f32.mrf.mxu2 }
 0x3c7   : > { %v5141_v47 = vpop.f32.mrf.mxu0 }
 0x3c8   : > { %v5250_v14 = vmul.f32 %v10412_v3, %v5202_v46 }
 0x3c9   : > { %v5005_v0 = vpop.f32.mrf.mxu3 }
 0x3ca   : > { %v6743_v20 = vpack.c.bf16 %v5250_v14, %v5249_v23  ;;  %v5447_v9 = vmul.f32 %v5250_v14, %v5250_v14  ;;  %v5006_v24 = vadd.f32 %v5005_v0, %v4876_v34  ;;  %v5393_v7 = vadd.f32 %v5392_v16, %v5250_v14  ;;  %v10482_v34 = vld [vmem:[#allocation44_spill] sm:$0xff] }
 0x3cc   : > { %6881 = vst [vmem:[%s9316_s26 + $0x80] sm:$0xff] %v6743_v20   ;;  %v5135_v15 = vadd.f32 %v5134_v8, %v5006_v24  ;;  %v5494_v53 = vadd.f32 %v5493_v5, %v5447_v9  ;;  %v3736_v44 = vpop.f32.mrf.mxu1 }
 0x3cd   : > { %v3737_v23 = vadd.f32 %v3736_v44, %v10482_v34 }
 0x3ce   : > { %v5203_v27 = vadd.f32 %v5135_v15, %v3730_v10  ;;  %v4881_v37 = vpop.f32.mrf.mxu2 }
 0x3cf   : > { %v5144_v29 = vpop.f32.mrf.mxu0 }
 0x3d0   : > { %v5394_v6 = vadd.f32 %v5393_v7, %v5203_v27  ;;  %v5448_v56 = vmul.f32 %v5203_v27, %v5203_v27 }
 0x3d1   : > { %v5007_v18 = vpop.f32.mrf.mxu3 }
 0x3d2   : > { %v5495_v28 = vadd.f32 %v5494_v53, %v5448_v56  ;;  %v5008_v12 = vadd.f32 %v5007_v18, %v4878_v59  ;;  %v10483_v59 = vld [vmem:[#allocation21_spill] sm:$0xff] }
 0x3d4   : > { %v5137_v33 = vadd.f32 %v5136_v45, %v5008_v12  ;;  %v3739_v39 = vpop.f32.mrf.mxu1 }
 0x3d5   : > { %v3740_v14 = vadd.f32 %v3739_v39, %v10483_v59  ;;  %v10485_v39 = vld [vmem:[#allocation52_spill] sm:$0xff] }
 0x3d6   : > { %v5204_v19 = vadd.f32 %v5137_v33, %v3732_v61  ;;  %v4883_v49 = vpop.f32.mrf.mxu2 }
 0x3d7   : > { %v5146_v11 = vpop.f32.mrf.mxu0 }
 0x3d8   : > { %v5252_v17 = vmul.f32 %v10415_v35, %v5204_v19 }
 0x3d9   : > { %v5010_v8 = vpop.f32.mrf.mxu3 }
 0x3da   : > { %v6748_v54 = vpack.c.bf16 %v5252_v17, %v5203_v27  ;;  %v5395_v41 = vadd.f32 %v5394_v6, %v5252_v17  ;;  %v5449_v55 = vmul.f32 %v5252_v17, %v5252_v17  ;;  %v5011_v13 = vadd.f32 %v5010_v8, %v4881_v37  ;;  %v10484_v27 = vld [vmem:[#allocation49_spill] sm:$0xff] }
 0x3dc   : > { %6882 = vst [vmem:[%s9316_s26 + $0x88] sm:$0xff] %v6748_v54   ;;  %v5496_v31 = vadd.f32 %v5495_v28, %v5449_v55  ;;  %v5140_v43 = vadd.f32 %v5139_v36, %v5011_v13  ;;  %v3741_v45 = vpop.f32.mrf.mxu1 }
 0x3dd   : > { %v3742_v37 = vadd.f32 %v3741_v45, %v10484_v27 }
 0x3de   : > { %v5205_v48 = vadd.f32 %v5140_v43, %v3735_v30  ;;  %v4886_v38 = vpop.f32.mrf.mxu2 }
 0x3df   : > { %v5149_v20 = vpop.f32.mrf.mxu0 }
 0x3e0   : > { %v5253_v26 = vmul.f32 %v10412_v3, %v5205_v48 }
 0x3e1   : > { %v5012_v57 = vpop.f32.mrf.mxu3 }
 0x3e2   : > { %v5450_v22 = vmul.f32 %v5253_v26, %v5253_v26  ;;  %v5013_v63 = vadd.f32 %v5012_v57, %v4883_v49  ;;  %v5396_v25 = vadd.f32 %v5395_v41, %v5253_v26 }
 0x3e4   : > { %v5142_v42 = vadd.f32 %v5141_v47, %v5013_v63  ;;  %v5497_v16 = vadd.f32 %v5496_v31, %v5450_v22  ;;  %v3744_v46 = vpop.f32.mrf.mxu1 }
 0x3e5   : > { %v3745_v17 = vadd.f32 %v3744_v46, %v10485_v39  ;;  %v10488_v39 = vld [vmem:[#allocation24_spill] sm:$0xff] }
 0x3e6   : > { %v5206_v40 = vadd.f32 %v5142_v42, %v3737_v23  ;;  %v4888_v2 = vpop.f32.mrf.mxu2 }
 0x3e7   : > { %v5151_v28 = vpop.f32.mrf.mxu0 }
 0x3e8   : > { %v6753_v5 = vpack.c.bf16 %v5206_v40, %v5253_v26  ;;  %v5397_v4 = vadd.f32 %v5396_v25, %v5206_v40  ;;  %v5451_v58 = vmul.f32 %v5206_v40, %v5206_v40 }
 0x3e9   : > { %v5015_v50 = vpop.f32.mrf.mxu3 }
 0x3ea   : > { %6883 = vst [vmem:[%s9316_s26 + $0x90] sm:$0xff] %v6753_v5   ;;  %v5498_v60 = vadd.f32 %v5497_v16, %v5451_v58  ;;  %v5016_v36 = vadd.f32 %v5015_v50, %v4886_v38  ;;  %v10486_v38 = vld [vmem:[#allocation55_spill] sm:$0xff] }
 0x3ec   : > { %v5145_v0 = vadd.f32 %v5144_v29, %v5016_v36  ;;  %v3746_v6 = vpop.f32.mrf.mxu1 }
 0x3ed   : > { %v3747_v26 = vadd.f32 %v3746_v6, %v10486_v38  ;;  %v10489_v38 = vld [vmem:[#allocation23_spill] sm:$0xff] }
 0x3ee   : > { %v5207_v9 = vadd.f32 %v5145_v0, %v3740_v14  ;;  %v4891_v24 = vpop.f32.mrf.mxu2 }
 0x3ef   : > { %v5154_v30 = vpop.f32.mrf.mxu0 }
 0x3f0   : > { %v5255_v7 = vmul.f32 %v10415_v35, %v5207_v9 }
 0x3f1   : > { %v5017_v62 = vpop.f32.mrf.mxu3 }
 0x3f2   : > { %v5398_v10 = vadd.f32 %v5397_v4, %v5255_v7  ;;  %v5452_v15 = vmul.f32 %v5255_v7, %v5255_v7  ;;  %v5018_v53 = vadd.f32 %v5017_v62, %v4888_v2 }
 0x3f4   : > { %v5499_v44 = vadd.f32 %v5498_v60, %v5452_v15  ;;  %v5147_v47 = vadd.f32 %v5146_v11, %v5018_v53  ;;  %v3749_v55 = vpop.f32.mrf.mxu1 }
 0x3f5   : > { %v3750_v5 = vadd.f32 %v3749_v55, %v9177_v52 }
 0x3f6   : > { %v5208_v56 = vadd.f32 %v5147_v47, %v3742_v37  ;;  %v4893_v18 = vpop.f32.mrf.mxu2  ;;  %v10487_v47 = vld [vmem:[#allocation57_spill] sm:$0xff] }
 0x3f7   : > { %v5156_v40 = vpop.f32.mrf.mxu0 }
 0x3f8   : > { %v5256_v12 = vmul.f32 %v10412_v3, %v5208_v56 }
 0x3f9   : > { %v5020_v51 = vpop.f32.mrf.mxu3 }
 0x3fa   : > { %v6758_v61 = vpack.c.bf16 %v5256_v12, %v5255_v7  ;;  %v5453_v33 = vmul.f32 %v5256_v12, %v5256_v12  ;;  %v5021_v19 = vadd.f32 %v5020_v51, %v4891_v24  ;;  %v5399_v49 = vadd.f32 %v5398_v10, %v5256_v12 }
 0x3fc   : > { %6884 = vst [vmem:[%s9316_s26 + $0x98] sm:$0xff] %v6758_v61   ;;  %v5150_v8 = vadd.f32 %v5149_v20, %v5021_v19  ;;  %v5500_v29 = vadd.f32 %v5499_v44, %v5453_v33  ;;  %v3751_v11 = vpop.f32.mrf.mxu1 }
 0x3fd   : > { %v3752_v20 = vadd.f32 %v3751_v11, %v9187_v21 }
 0x3fe   : > { %v5209_v54 = vadd.f32 %v5150_v8, %v3745_v17  ;;  %v4896_v41 = vpop.f32.mrf.mxu2 }
 0x3ff   : > { %v5159_v7 = vpop.f32.mrf.mxu0 }
 0x400   : > { %v5400_v13 = vadd.f32 %v5399_v49, %v5209_v54  ;;  %v5454_v31 = vmul.f32 %v5209_v54, %v5209_v54 }
 0x401   : > { %v5022_v1 = vpop.f32.mrf.mxu3 }
 0x402   : > { %v5501_v43 = vadd.f32 %v5500_v29, %v5454_v31  ;;  %v5023_v48 = vadd.f32 %v5022_v1, %v4893_v18 }
 0x404   : > { %v5152_v57 = vadd.f32 %v5151_v28, %v5023_v48  ;;  %v3754_v0 = vpop.f32.mrf.mxu1 }
 0x405   : > { %v3755_v6 = vadd.f32 %v3754_v0, %v10487_v47 }
 0x406   : > { %v5210_v45 = vadd.f32 %v5152_v57, %v3747_v26  ;;  %v4898_v22 = vpop.f32.mrf.mxu2 }
 0x407   : > { %v5161_v12 = vpop.f32.mrf.mxu0 }
 0x408   : > { %v5258_v63 = vmul.f32 %v10415_v35, %v5210_v45 }
 0x409   : > { %v5025_v25 = vpop.f32.mrf.mxu3 }
 0x40a   : > { %v6763_v34 = vpack.c.bf16 %v5258_v63, %v5209_v54  ;;  %v5401_v23 = vadd.f32 %v5400_v13, %v5258_v63  ;;  %v5455_v42 = vmul.f32 %v5258_v63, %v5258_v63  ;;  %v5026_v16 = vadd.f32 %v5025_v25, %v4896_v41 }
 0x40c   : > { %6885 = vst [vmem:[%s9316_s26 + $0xa0] sm:$0xff] %v6763_v34   ;;  %v5502_v2 = vadd.f32 %v5501_v43, %v5455_v42  ;;  %v5155_v4 = vadd.f32 %v5154_v30, %v5026_v16  ;;  %v3756_v18 = vpop.f32.mrf.mxu1 }
 0x40d   : > { %v3757_v17 = vadd.f32 %v3756_v18, %v10488_v39 }
 0x40e   : > { %v5211_v58 = vadd.f32 %v5155_v4, %v3750_v5  ;;  %v4901_v36 = vpop.f32.mrf.mxu2 }
 0x40f   : > { %v5164_v13 = vpop.f32.mrf.mxu0 }
 0x410   : > { %v5259_v50 = vmul.f32 %v10412_v3, %v5211_v58 }
 0x411   : > { %v5027_v60 = vpop.f32.mrf.mxu3 }
 0x412   : > { %v5456_v46 = vmul.f32 %v5259_v50, %v5259_v50  ;;  %v5028_v59 = vadd.f32 %v5027_v60, %v4898_v22  ;;  %v5402_v14 = vadd.f32 %v5401_v23, %v5259_v50 }
 0x414   : > { %v5157_v9 = vadd.f32 %v5156_v40, %v5028_v59  ;;  %v5503_v24 = vadd.f32 %v5502_v2, %v5456_v46  ;;  %v3759_v41 = vpop.f32.mrf.mxu1 }
 0x415   : > { %v3760_v26 = vadd.f32 %v3759_v41, %v10489_v38 }
 0x416   : > { %v5212_v62 = vadd.f32 %v5157_v9, %v3752_v20  ;;  %v4903_v37 = vpop.f32.mrf.mxu2 }
 0x417   : > { %v5166_v16 = vpop.f32.mrf.mxu0 }
 0x418   : > { %v6768_v10 = vpack.c.bf16 %v5212_v62, %v5259_v50  ;;  %v5403_v15 = vadd.f32 %v5402_v14, %v5212_v62  ;;  %v5457_v52 = vmul.f32 %v5212_v62, %v5212_v62 }
 0x419   : > { %v5030_v53 = vpop.f32.mrf.mxu3 }
 0x41a   : > { %6886 = vst [vmem:[%s9316_s26 + $0xa8] sm:$0xff] %v6768_v10   ;;  %v5504_v44 = vadd.f32 %v5503_v24, %v5457_v52  ;;  %v5031_v27 = vadd.f32 %v5030_v53, %v4901_v36 }
 0x41c   : > { %v5160_v56 = vadd.f32 %v5159_v7, %v5031_v27  ;;  %v3761_v34 = vpop.f32.mrf.mxu1 }
 0x41d   : > { %v3762_v40 = vadd.f32 %v3761_v34, %v9256_v32 }
 0x41e   : > { %v5213_v28 = vadd.f32 %v5160_v56, %v3755_v6  ;;  %v4906_v29 = vpop.f32.mrf.mxu2 }
 0x420   : > { %v5261_v21 = vmul.f32 %v10415_v35, %v5213_v28 }
 0x421   : > { %v5032_v51 = vpop.f32.mrf.mxu3 }
 0x422   : > { %v5404_v61 = vadd.f32 %v5403_v15, %v5261_v21  ;;  %v5458_v33 = vmul.f32 %v5261_v21, %v5261_v21  ;;  %v5033_v19 = vadd.f32 %v5032_v51, %v4903_v37 }
 0x424   : > { %v5505_v49 = vadd.f32 %v5504_v44, %v5458_v33  ;;  %v5162_v8 = vadd.f32 %v5161_v12, %v5033_v19 }
 0x426   : > { %v5214_v54 = vadd.f32 %v5162_v8, %v3757_v17  ;;  %v4908_v63 = vpop.f32.mrf.mxu2 }
 0x428   : > { %v5262_v55 = vmul.f32 %v10412_v3, %v5214_v54 }
 0x429   : > { %v5035_v31 = vpop.f32.mrf.mxu3 }
 0x42a   : > { %v6773_v1 = vpack.c.bf16 %v5262_v55, %v5261_v21  ;;  %v5459_v30 = vmul.f32 %v5262_v55, %v5262_v55  ;;  %v5036_v43 = vadd.f32 %v5035_v31, %v4906_v29  ;;  %v5405_v48 = vadd.f32 %v5404_v61, %v5262_v55 }
 0x42c   : > { %6887 = vst [vmem:[%s9316_s26 + $0xb0] sm:$0xff] %v6773_v1   ;;  %v5165_v57 = vadd.f32 %v5164_v13, %v5036_v43  ;;  %v5506_v45 = vadd.f32 %v5505_v49, %v5459_v30 }
 0x42e   : > { %v5215_v22 = vadd.f32 %v5165_v57, %v3760_v26 }
 0x430   : > { %v5406_v25 = vadd.f32 %v5405_v48, %v5215_v22  ;;  %v5460_v11 = vmul.f32 %v5215_v22, %v5215_v22 }
 0x431   : > { %v5037_v23 = vpop.f32.mrf.mxu3 }
 0x432   : > { %v5507_v42 = vadd.f32 %v5506_v45, %v5460_v11  ;;  %v5038_v3 = vadd.f32 %v5037_v23, %v4908_v63 }
 0x434   : > { %v5167_v2 = vadd.f32 %v5166_v16, %v5038_v3 }
 0x436   : > { %v5216_v5 = vadd.f32 %v5167_v2, %v3762_v40 }
 0x438   : > { %v5264_v4 = vmul.f32 %v10415_v35, %v5216_v5 }
 0x43a   : > { %v6778_v58 = vpack.c.bf16 %v5264_v4, %v5215_v22  ;;  %v5407_v50 = vadd.f32 %v5406_v25, %v5264_v4  ;;  %v5461_v60 = vmul.f32 %v5264_v4, %v5264_v4 }
 0x43c   : > { %6888 = vst [vmem:[%s9316_s26 + $0xb8] sm:$0xff] %v6778_v58   ;;  %v5408_v36 = vrot.slane %v5407_v50, 4  ;;  %v5508_v46 = vadd.f32 %v5507_v42, %v5461_v60 }
 0x43e   : > { %v5409_v59 = vadd.f32 %v5408_v36, %v5407_v50  ;;  %v5509_v14 = vrot.slane %v5508_v46, 4 }
 0x440   : > { %v5410_v0 = vrot.slane %v5409_v59, 2  ;;  %v5510_v20 = vadd.f32 %v5509_v14, %v5508_v46 }
 0x442   : > { %v5411_v9 = vadd.f32 %v5410_v0, %v5409_v59  ;;  %v5511_v24 = vrot.slane %v5510_v20, 2 }
 0x444   : > { %v5412_v7 = vrot.slane %v5411_v9, 1  ;;  %v5512_v62 = vadd.f32 %v5511_v24, %v5510_v20 }
 0x446   : > { %v5513_v32 = vrot.slane %v5512_v62, 1  ;;  %v5413_v35 = vadd.f32 %v5412_v7, %v5411_v9 }
 0x448   : > { %v5514_v10 = vadd.f32 %v5513_v32, %v5512_v62 }
 0x44a   : > { %v5516_v15 = vsel %vm1383_vm2, %v5413_v35, %v5514_v10 }
 0x44b   : > { %5517 = vst [vmem:[%s465_s28] sm:$0x3] %v5516_v15 }
 0x44c PF: > { %s18_s2 = sadd.s32 1, %s7091_s2   ;;  %s10490_s24 = smov %s7087_s1 }
 0x44d   : > { %p15_p5 = scmp.ge.s32.totalorder %s18_s2, 4   ;;  %s10491_s1 = smov %s10493_s25 }
 0x44f   :  { %17 = sbr.rel (!%p15_p5) target bundleno = 2 (0x2), region = 114 }

</bundles_post_ra>
